<compile_context>
chip_gen: v7x
topology: tpu7x:2x2x1
jax: 0.10.0
libtpu: 0.0.40
codegen_flags: <defaults>
</compile_context>

<pallas_src>
import math

import jax
import jax.numpy as jnp
from jax.experimental import pallas as pl
from jax.experimental.pallas import tpu as pltpu


_GROUP_LANES = 256                 # im2col group width = MXU contraction target
_VMEM_LIMIT = 64 * 1024 * 1024     # <= v7x physical VMEM, > default scoped limit
_ACT_DTYPE = jnp.bfloat16          # inter-module activations / MXU operands


def _tap_group(c_b):
    """Taps per im2col group so one group spans ~_GROUP_LANES contraction lanes."""
    return max(1, _GROUP_LANES // c_b)


def _pick_batch_tile(B, T, target_rows=256, max_rows=4096):
    """Largest divisor of B with B_tile*T near the MXU M target, keeping >=2
    parallel grid steps when possible (v7x has 2 TensorCores)."""
    divs = [d for d in range(1, B + 1) if B % d == 0]
    cand = [d for d in divs if d * T <= max_rows] or [1]
    target = max(1, -(-target_rows // T))
    best = max([d for d in cand if d <= target] or [1])
    if best > 1 and B // best < 2:
        smaller = [d for d in cand if d < best and B // d >= 2]
        if smaller:
            best = max(smaller)
    return best


# ----------------------------------------------------------------------------
# Fused Inception-module kernel (optionally + shortcut/add/relu, + GAP/FC head)
# ----------------------------------------------------------------------------
def _make_module_kernel(*, has_bneck, has_res, fuse_head, B_tile, T, C_in,
                        C_b, C_res, C4, c_out, K_pad, GT, out_dtype):
    GW = GT * C_b                  # contraction lanes per tap group
    n_groups = K_pad // GT
    P = K_pad // 2                 # left halo rows in the scratch
    Tpf = T + K_pad - 1            # per-batch padded length in the scratch
    M = B_tile * T                 # matmul M dimension

    def kernel(*refs):
        i = 0
        x_ref = refs[i]; i += 1                     # (B_tile, T, C_in)  bf16
        if has_bneck:
            wb_ref = refs[i]; i += 1                # (C_in, C_b)        bf16
            bb_ref = refs[i]; i += 1                # (1, C_b)           f32
        wbr_ref = refs[i]; i += 1                   # (K_pad*C_b, C4)    bf16 (BN folded)
        wmp_ref = refs[i]; i += 1                   # (C_in, C4)         bf16 (BN folded)
        bias_ref = refs[i]; i += 1                  # (1, C4)            f32  (BN folded)
        if has_res:
            r_ref = refs[i]; i += 1                 # (B_tile, T, C_res) bf16
            wsc_ref = refs[i]; i += 1               # (C_res, C4)        bf16 (BN folded)
            bsc_ref = refs[i]; i += 1               # (1, C4)            f32
        if fuse_head:
            wfc_ref = refs[i]; i += 1               # (C4, c_out)        f32
            bfc_ref = refs[i]; i += 1               # (1, c_out)         f32
        if fuse_head:
            logit_ref = refs[i]; i += 1             # out: (B_tile, 1, c_out) f32
        else:
            if has_res:
                sum_ref = refs[i]; i += 1           # out: pre-activation sum
            act_ref = refs[i]; i += 1               # out: (B_tile, T, C4)
        bx_s = refs[i]; i += 1                      # scratch (B_tile*Tpf, C_b)

        x = x_ref[...]                              # (B_tile, T, C_in)
        x_flat = x.reshape(M, C_in)

        # ---- bottleneck 1x1 conv (valid rows only; halo rows stay zero) ----
        if has_bneck:
            bxv = jnp.dot(x_flat, wb_ref[...], preferred_element_type=jnp.float32)
            bxv = (bxv + bb_ref[...]).astype(x.dtype)        # (M, C_b)
        else:
            bxv = x_flat                                     # (M, C_in == C_b)

        # ---- write zero-haloed bottleneck output into VMEM scratch ----------
        # Halos are re-zeroed every step (cheap), so the kernel is safe under
        # "parallel" megacore scheduling (no cross-step scratch dependence).
        ztop = jnp.zeros((P, C_b), x.dtype)
        zbot = jnp.zeros((Tpf - P - T, C_b), x.dtype)
        for b in range(B_tile):
            base = b * Tpf
            bx_s[base:base + P, :] = ztop
            bx_s[base + P:base + P + T, :] = bxv[b * T:(b + 1) * T, :]
            bx_s[base + P + T:base + Tpf, :] = zbot

        # ---- three branch convs: tap-grouped im2col matmuls, f32 accumulate -
        acc = jnp.zeros((M, C4), jnp.float32)
        for g in range(n_groups):
            parts = []
            for b in range(B_tile):
                base = b * Tpf + g * GT
                taps = [bx_s[base + j:base + j + T, :] for j in range(GT)]
                parts.append(taps[0] if GT == 1 else jnp.concatenate(taps, axis=1))
            colsg = parts[0] if B_tile == 1 else jnp.concatenate(parts, axis=0)
            acc = acc + jnp.dot(colsg, wbr_ref[g * GW:(g + 1) * GW, :],
                                preferred_element_type=jnp.float32)

        # ---- maxpool(3,1,1) branch folded into the same 128-lane accumulator
        neg = jnp.full((B_tile, 1, C_in), -jnp.inf, x.dtype)
        left = jnp.concatenate([neg, x[:, :T - 1, :]], axis=1)
        right = jnp.concatenate([x[:, 1:, :], neg], axis=1)
        mp = jnp.maximum(jnp.maximum(left, x), right).reshape(M, C_in)
        acc = acc + jnp.dot(mp, wmp_ref[...], preferred_element_type=jnp.float32)

        # ---- conv biases + BN (folded) + ReLU --------------------------------
        y = jnp.maximum(acc + bias_ref[...], 0.0)            # (M, C4) f32

        if has_res:
            r = r_ref[...].reshape(M, C_res)
            s = (y + jnp.dot(r, wsc_ref[...], preferred_element_type=jnp.float32)
                 + bsc_ref[...])                              # x += shortcut(res)
            if not fuse_head:
                sum_ref[...] = s.reshape(B_tile, T, C4).astype(out_dtype)  # res = x
            act = jnp.maximum(s, 0.0)                         # x = act(x)
        else:
            act = y

        if fuse_head:
            # AdaptiveAvgPool1d(1) + Linear fused into the last module.
            gap = jnp.mean(act.reshape(B_tile, T, C4), axis=1)  # (B_tile, C4) f32
            logits = jnp.dot(gap, wfc_ref[...],
                             preferred_element_type=jnp.float32) + bfc_ref[...]
            logit_ref[...] = logits.reshape(B_tile, 1, c_out)
        else:
            act_ref[...] = act.reshape(B_tile, T, C4).astype(out_dtype)

    return kernel


def _full_spec(a):
    return pl.BlockSpec(a.shape, lambda b, n=a.ndim: (0,) * n)


def inception_module(x, p, res=None, rp=None, head=None, out_dtype=_ACT_DTYPE):
    """x: (B, T, C_in) channels-last (bf16).  Returns:
       - (B, T, 4F) activation, or
       - (sum, act) both (B, T, 4F) when a residual shortcut is fused, or
       - (B, c_out) logits when the GAP+FC head is fused (last module)."""
    B, T, C_in = x.shape
    has_bneck = p["wb"] is not None
    has_res = res is not None
    fuse_head = head is not None

    C_b = p["wb"].shape[1] if has_bneck else C_in
    KC, C4 = p["wbr"].shape
    K_pad = KC // C_b
    GT = _tap_group(C_b)
    assert K_pad % GT == 0, (K_pad, GT)
    Tpf = T + K_pad - 1
    C_res = res.shape[2] if has_res else 0
    c_out = head["w"].shape[1] if fuse_head else 0

    B_tile = _pick_batch_tile(B, T)
    grid = (B // B_tile,)

    in_arrays = [x]
    in_specs = [pl.BlockSpec((B_tile, T, C_in), lambda b: (b, 0, 0))]
    if has_bneck:
        in_arrays += [p["wb"], p["bb"]]
        in_specs += [_full_spec(p["wb"]), _full_spec(p["bb"])]
    in_arrays += [p["wbr"], p["wmp"], p["bias"]]
    in_specs += [_full_spec(p["wbr"]), _full_spec(p["wmp"]), _full_spec(p["bias"])]
    if has_res:
        in_arrays += [res, rp["wsc"], rp["bsc"]]
        in_specs += [pl.BlockSpec((B_tile, T, C_res), lambda b: (b, 0, 0)),
                     _full_spec(rp["wsc"]), _full_spec(rp["bsc"])]
    if fuse_head:
        in_arrays += [head["w"], head["b"]]
        in_specs += [_full_spec(head["w"]), _full_spec(head["b"])]

    if fuse_head:
        out_shape = jax.ShapeDtypeStruct((B, 1, c_out), jnp.float32)
        out_specs = pl.BlockSpec((B_tile, 1, c_out), lambda b: (b, 0, 0))
    elif has_res:
        out_shape = (jax.ShapeDtypeStruct((B, T, C4), out_dtype),
                     jax.ShapeDtypeStruct((B, T, C4), out_dtype))
        blk = pl.BlockSpec((B_tile, T, C4), lambda b: (b, 0, 0))
        out_specs = (blk, blk)
    else:
        out_shape = jax.ShapeDtypeStruct((B, T, C4), out_dtype)
        out_specs = pl.BlockSpec((B_tile, T, C4), lambda b: (b, 0, 0))

    kernel = _make_module_kernel(
        has_bneck=has_bneck, has_res=has_res, fuse_head=fuse_head,
        B_tile=B_tile, T=T, C_in=C_in, C_b=C_b, C_res=C_res, C4=C4,
        c_out=c_out, K_pad=K_pad, GT=GT, out_dtype=out_dtype)

    out = pl.pallas_call(
        kernel,
        out_shape=out_shape,
        grid=grid,
        in_specs=in_specs,
        out_specs=out_specs,
        scratch_shapes=[pltpu.VMEM((B_tile * Tpf, C_b), x.dtype)],
        compiler_params=pltpu.CompilerParams(
            dimension_semantics=("parallel",),
            vmem_limit_bytes=_VMEM_LIMIT),
    )(*in_arrays)

    if fuse_head:
        return out.reshape(B, c_out)
    return out


# ----------------------------------------------------------------------------
# Parameter construction (kernel-ready, BN folded, channels-last bf16 weights)
# ----------------------------------------------------------------------------
def _conv_init(key, c_out, c_in, k):
    """PyTorch Conv1d after the init loop: xavier_normal_ weight, default bias."""
    kw, kb = jax.random.split(key)
    fan_in, fan_out = c_in * k, c_out * k
    std = math.sqrt(2.0 / (fan_in + fan_out))
    w = std * jax.random.normal(kw, (c_out, c_in, k), jnp.float32)
    bound = 1.0 / math.sqrt(fan_in)
    b = jax.random.uniform(kb, (c_out,), jnp.float32, -bound, bound)
    return w, b


def _bn_fold(c, eps=1e-5):
    # BatchNorm1d after the init loop (gamma=1, beta=0) in inference mode with
    # fresh running stats (mean=0, var=1): y = x*scale + shift.
    gamma = jnp.ones((c,), jnp.float32)
    beta = jnp.zeros((c,), jnp.float32)
    mean = jnp.zeros((c,), jnp.float32)
    var = jnp.ones((c,), jnp.float32)
    scale = gamma / jnp.sqrt(var + eps)
    shift = beta - mean * scale
    return scale, shift


def init_inception(key, c_in, bottleneck, ks, nb_filters):
    keys = jax.random.split(key, 5)
    F = nb_filters
    kss = [ks // (2 ** i) for i in range(3)]
    kss = [k if k % 2 != 0 else k - 1 for k in kss]          # [39, 19, 9]
    K = kss[0]

    has_bneck = bool(bottleneck) and c_in > 1
    if has_bneck:
        wb, bb = _conv_init(keys[0], bottleneck, c_in, 1)
        wb = jnp.transpose(wb[:, :, 0], (1, 0)).astype(jnp.bfloat16)   # (c_in, C_b)
        bb = bb.reshape(1, -1)                                          # f32
        C_b = bottleneck
    else:
        wb, bb = None, None
        C_b = c_in

    GT = _tap_group(C_b)
    K_pad = -(-K // GT) * GT        # taps padded to a multiple of the group size
    P = K_pad // 2                  # tap-centering offset (matches kernel halo)

    scale, shift = _bn_fold(4 * F)

    # Branch conv weights -> (K_pad, C_b, 4F); maxpool columns (3F:4F) stay 0.
    w_tap = jnp.zeros((K_pad, C_b, 4 * F), jnp.float32)
    bias = jnp.zeros((4 * F,), jnp.float32)
    for i, k in enumerate(kss):
        w, b = _conv_init(keys[1 + i], F, C_b, k)
        w = jnp.transpose(w, (2, 1, 0))                      # (k, C_b, F)
        off = P - k // 2
        assert 0 <= off and off + k <= K_pad
        w_tap = w_tap.at[off:off + k, :, i * F:(i + 1) * F].set(w)
        bias = bias.at[i * F:(i + 1) * F].set(b)

    # Maxpool-branch 1x1 conv on the raw input channels -> output cols 3F:4F.
    wm, bm = _conv_init(keys[4], F, c_in, 1)
    wmp = jnp.zeros((c_in, 4 * F), jnp.float32)
    wmp = wmp.at[:, 3 * F:].set(jnp.transpose(wm[:, :, 0], (1, 0)))
    bias = bias.at[3 * F:].set(bm)

    wbr = (w_tap * scale[None, None, :]).reshape(K_pad * C_b, 4 * F)
    wmp = wmp * scale[None, :]
    bias = (bias * scale + shift).reshape(1, 4 * F)

    return {"wb": wb, "bb": bb,
            "wbr": wbr.astype(jnp.bfloat16),
            "wmp": wmp.astype(jnp.bfloat16),
            "bias": bias}


def init_shortcut(key, c_in, c_out):
    w, b = _conv_init(key, c_out, c_in, 1)
    scale, shift = _bn_fold(c_out)
    wsc = jnp.transpose(w[:, :, 0], (1, 0)) * scale[None, :]     # (c_in, c_out)
    bsc = (b * scale + shift).reshape(1, c_out)
    return {"wsc": wsc.astype(jnp.bfloat16), "bsc": bsc}


def init_block(key, c_in, bottleneck, ks, nb_filters, residual, depth):
    keys = jax.random.split(key, 2 * depth)
    inc, res_layers = [], []
    res = 0
    for d in range(depth):
        inc.append(init_inception(keys[d],
                                  c_in if d == 0 else nb_filters * 4,
                                  bottleneck if d > 0 else 0,
                                  ks, nb_filters))
        if residual and d % 3 == 2:
            sc_in = c_in if res == 0 else nb_filters * 4
            res_layers.append(init_shortcut(keys[depth + res], sc_in,
                                            nb_filters * 4))
            res += 1
        else:
            res_layers.append(None)
    # NOTE: only arrays / None in the pytree -> structure is static under jit.
    return {"inc": inc, "res": res_layers}


# ----------------------------------------------------------------------------
# Forward pass
# ----------------------------------------------------------------------------
def inception_time_fwd(x, params):
    # x arrives in PyTorch NCL layout (B, C_in, T); go channels-last + bf16 once.
    x = jnp.transpose(x, (0, 2, 1)).astype(_ACT_DTYPE)       # (B, T, C_in)
    blk = params["block"]
    head = {"w": params["fc_w"], "b": params["fc_b"]}
    depth = len(blk["inc"])

    res = x
    logits = None
    for d in range(depth):                                   # static loop
        rp = blk["res"][d]                                   # static: None vs dict
        h = head if d == depth - 1 else None                 # fuse GAP+FC in last module
        if rp is None:
            y = inception_module(x, blk["inc"][d], head=h)
        else:
            y = inception_module(x, blk["inc"][d], res=res, rp=rp, head=h)
        if h is not None:
            logits = y                                       # (B, c_out) f32
        elif rp is None:
            x = y
        else:
            s, x = y
            res = s                                          # carry PRE-activation sum
    return logits


# ----------------------------------------------------------------------------
if __name__ == "__main__":
    B, C_in, T, C_out = 2, 4, 16, 5
    nb_filters, bottleneck, ks, depth = 32, 32, 40, 6

    key = jax.random.PRNGKey(0)
    kx, kp = jax.random.split(key)
    x = jax.random.normal(kx, (B, C_in, T), jnp.float32)

    params = {
        "block": init_block(kp, C_in, bottleneck, ks, nb_filters,
                            residual=True, depth=depth),
        # nn.Linear after the init loop: weight = 1, bias = 0
        "fc_w": jnp.ones((nb_filters * 4, C_out), jnp.float32),
        "fc_b": jnp.zeros((1, C_out), jnp.float32),
    }

    fwd = jax.jit(inception_time_fwd)
    out = fwd(x, params)
    jax.block_until_ready(out)
    assert out.shape == (B, C_out), out.shape
    assert out.dtype == jnp.float32
    assert bool(jnp.all(jnp.isfinite(out)))
    print("KERNEL_OK")
</pallas_src>

<mosaic_0001>
module attributes {stable_mosaic.version = 11 : i64} {
  func.func @kernel(%arg0: i32, %arg1: memref<1x16x4xbf16, #tpu.memory_space<vmem>>, %arg2: memref<256x128xbf16, #tpu.memory_space<vmem>>, %arg3: memref<4x128xbf16, #tpu.memory_space<vmem>>, %arg4: memref<1x128xf32, #tpu.memory_space<vmem>>, %arg5: memref<1x16x128xbf16, #tpu.memory_space<vmem>>, %arg6: memref<79x4xbf16, #tpu.memory_space<vmem>>) attributes {dimension_semantics = [#tpu.dimension_semantics<parallel>], iteration_bounds = array<i64: 2>, scalar_prefetch = 0 : i64, scratch_operands = 1 : i64, tpu.core_type = #tpu.core_type<tc>, window_params = [{transform_indices = @transform_0, window_bounds = array<i64: 1, 16, 4>}, {pipeline_mode = #tpu.pipeline_mode<synchronous>, transform_indices = @transform_1, window_bounds = array<i64: 256, 128>}, {pipeline_mode = #tpu.pipeline_mode<synchronous>, transform_indices = @transform_2, window_bounds = array<i64: 4, 128>}, {pipeline_mode = #tpu.pipeline_mode<synchronous>, transform_indices = @transform_3, window_bounds = array<i64: 1, 128>}, {transform_indices = @transform_4, window_bounds = array<i64: 1, 16, 128>}]} {
    %c0 = arith.constant 0 : index
    %c0_0 = arith.constant 0 : index
    %c0_1 = arith.constant 0 : index
    %0 = vector.load %arg1[%c0, %c0_0, %c0_1] : memref<1x16x4xbf16, #tpu.memory_space<vmem>>, vector<1x16x4xbf16>
    %1 = vector.shape_cast %0 : vector<1x16x4xbf16> to vector<16x4xbf16>
    %cst = arith.constant 0.000000e+00 : bf16
    %2 = vector.broadcast %cst : bf16 to vector<32x4xbf16>
    %cst_2 = arith.constant 0.000000e+00 : bf16
    %3 = vector.broadcast %cst_2 : bf16 to vector<31x4xbf16>
    %c0_3 = arith.constant 0 : index
    %c0_4 = arith.constant 0 : index
    %4 = vector.load %arg6[%c0_3, %c0_4] : memref<79x4xbf16, #tpu.memory_space<vmem>>, vector<32x4xbf16>
    tpu.vector_store %arg6[%c0_3, %c0_4], %2 {strides = array<i32>} : memref<79x4xbf16, #tpu.memory_space<vmem>>, vector<32x4xbf16>,
    %c32 = arith.constant 32 : index
    %c0_5 = arith.constant 0 : index
    %5 = vector.load %arg6[%c32, %c0_5] : memref<79x4xbf16, #tpu.memory_space<vmem>>, vector<16x4xbf16>
    tpu.vector_store %arg6[%c32, %c0_5], %1 {strides = array<i32>} : memref<79x4xbf16, #tpu.memory_space<vmem>>, vector<16x4xbf16>,
    %c48 = arith.constant 48 : index
    %c0_6 = arith.constant 0 : index
    %6 = vector.load %arg6[%c48, %c0_6] : memref<79x4xbf16, #tpu.memory_space<vmem>>, vector<31x4xbf16>
    tpu.vector_store %arg6[%c48, %c0_6], %3 {strides = array<i32>} : memref<79x4xbf16, #tpu.memory_space<vmem>>, vector<31x4xbf16>,
    %cst_7 = arith.constant 0.000000e+00 : f32
    %7 = vector.broadcast %cst_7 : f32 to vector<16x128xf32>
    %c0_8 = arith.constant 0 : index
    %c0_9 = arith.constant 0 : index
    %8 = vector.load %arg6[%c0_8, %c0_9] : memref<79x4xbf16, #tpu.memory_space<vmem>>, vector<16x4xbf16>
    %c1 = arith.constant 1 : index
    %c0_10 = arith.constant 0 : index
    %9 = vector.load %arg6[%c1, %c0_10] : memref<79x4xbf16, #tpu.memory_space<vmem>>, vector<16x4xbf16>
    %c2 = arith.constant 2 : index
    %c0_11 = arith.constant 0 : index
    %10 = vector.load %arg6[%c2, %c0_11] : memref<79x4xbf16, #tpu.memory_space<vmem>>, vector<16x4xbf16>
    %c3 = arith.constant 3 : index
    %c0_12 = arith.constant 0 : index
    %11 = vector.load %arg6[%c3, %c0_12] : memref<79x4xbf16, #tpu.memory_space<vmem>>, vector<16x4xbf16>
    %c4 = arith.constant 4 : index
    %c0_13 = arith.constant 0 : index
    %12 = vector.load %arg6[%c4, %c0_13] : memref<79x4xbf16, #tpu.memory_space<vmem>>, vector<16x4xbf16>
    %c5 = arith.constant 5 : index
    %c0_14 = arith.constant 0 : index
    %13 = vector.load %arg6[%c5, %c0_14] : memref<79x4xbf16, #tpu.memory_space<vmem>>, vector<16x4xbf16>
    %c6 = arith.constant 6 : index
    %c0_15 = arith.constant 0 : index
    %14 = vector.load %arg6[%c6, %c0_15] : memref<79x4xbf16, #tpu.memory_space<vmem>>, vector<16x4xbf16>
    %c7 = arith.constant 7 : index
    %c0_16 = arith.constant 0 : index
    %15 = vector.load %arg6[%c7, %c0_16] : memref<79x4xbf16, #tpu.memory_space<vmem>>, vector<16x4xbf16>
    %c8 = arith.constant 8 : index
    %c0_17 = arith.constant 0 : index
    %16 = vector.load %arg6[%c8, %c0_17] : memref<79x4xbf16, #tpu.memory_space<vmem>>, vector<16x4xbf16>
    %c9 = arith.constant 9 : index
    %c0_18 = arith.constant 0 : index
    %17 = vector.load %arg6[%c9, %c0_18] : memref<79x4xbf16, #tpu.memory_space<vmem>>, vector<16x4xbf16>
    %c10 = arith.constant 10 : index
    %c0_19 = arith.constant 0 : index
    %18 = vector.load %arg6[%c10, %c0_19] : memref<79x4xbf16, #tpu.memory_space<vmem>>, vector<16x4xbf16>
    %c11 = arith.constant 11 : index
    %c0_20 = arith.constant 0 : index
    %19 = vector.load %arg6[%c11, %c0_20] : memref<79x4xbf16, #tpu.memory_space<vmem>>, vector<16x4xbf16>
    %c12 = arith.constant 12 : index
    %c0_21 = arith.constant 0 : index
    %20 = vector.load %arg6[%c12, %c0_21] : memref<79x4xbf16, #tpu.memory_space<vmem>>, vector<16x4xbf16>
    %c13 = arith.constant 13 : index
    %c0_22 = arith.constant 0 : index
    %21 = vector.load %arg6[%c13, %c0_22] : memref<79x4xbf16, #tpu.memory_space<vmem>>, vector<16x4xbf16>
    %c14 = arith.constant 14 : index
    %c0_23 = arith.constant 0 : index
    %22 = vector.load %arg6[%c14, %c0_23] : memref<79x4xbf16, #tpu.memory_space<vmem>>, vector<16x4xbf16>
    %c15 = arith.constant 15 : index
    %c0_24 = arith.constant 0 : index
    %23 = vector.load %arg6[%c15, %c0_24] : memref<79x4xbf16, #tpu.memory_space<vmem>>, vector<16x4xbf16>
    %c16 = arith.constant 16 : index
    %c0_25 = arith.constant 0 : index
    %24 = vector.load %arg6[%c16, %c0_25] : memref<79x4xbf16, #tpu.memory_space<vmem>>, vector<16x4xbf16>
    %c17 = arith.constant 17 : index
    %c0_26 = arith.constant 0 : index
    %25 = vector.load %arg6[%c17, %c0_26] : memref<79x4xbf16, #tpu.memory_space<vmem>>, vector<16x4xbf16>
    %c18 = arith.constant 18 : index
    %c0_27 = arith.constant 0 : index
    %26 = vector.load %arg6[%c18, %c0_27] : memref<79x4xbf16, #tpu.memory_space<vmem>>, vector<16x4xbf16>
    %c19 = arith.constant 19 : index
    %c0_28 = arith.constant 0 : index
    %27 = vector.load %arg6[%c19, %c0_28] : memref<79x4xbf16, #tpu.memory_space<vmem>>, vector<16x4xbf16>
    %c20 = arith.constant 20 : index
    %c0_29 = arith.constant 0 : index
    %28 = vector.load %arg6[%c20, %c0_29] : memref<79x4xbf16, #tpu.memory_space<vmem>>, vector<16x4xbf16>
    %c21 = arith.constant 21 : index
    %c0_30 = arith.constant 0 : index
    %29 = vector.load %arg6[%c21, %c0_30] : memref<79x4xbf16, #tpu.memory_space<vmem>>, vector<16x4xbf16>
    %c22 = arith.constant 22 : index
    %c0_31 = arith.constant 0 : index
    %30 = vector.load %arg6[%c22, %c0_31] : memref<79x4xbf16, #tpu.memory_space<vmem>>, vector<16x4xbf16>
    %c23 = arith.constant 23 : index
    %c0_32 = arith.constant 0 : index
    %31 = vector.load %arg6[%c23, %c0_32] : memref<79x4xbf16, #tpu.memory_space<vmem>>, vector<16x4xbf16>
    %c24 = arith.constant 24 : index
    %c0_33 = arith.constant 0 : index
    %32 = vector.load %arg6[%c24, %c0_33] : memref<79x4xbf16, #tpu.memory_space<vmem>>, vector<16x4xbf16>
    %c25 = arith.constant 25 : index
    %c0_34 = arith.constant 0 : index
    %33 = vector.load %arg6[%c25, %c0_34] : memref<79x4xbf16, #tpu.memory_space<vmem>>, vector<16x4xbf16>
    %c26 = arith.constant 26 : index
    %c0_35 = arith.constant 0 : index
    %34 = vector.load %arg6[%c26, %c0_35] : memref<79x4xbf16, #tpu.memory_space<vmem>>, vector<16x4xbf16>
    %c27 = arith.constant 27 : index
    %c0_36 = arith.constant 0 : index
    %35 = vector.load %arg6[%c27, %c0_36] : memref<79x4xbf16, #tpu.memory_space<vmem>>, vector<16x4xbf16>
    %c28 = arith.constant 28 : index
    %c0_37 = arith.constant 0 : index
    %36 = vector.load %arg6[%c28, %c0_37] : memref<79x4xbf16, #tpu.memory_space<vmem>>, vector<16x4xbf16>
    %c29 = arith.constant 29 : index
    %c0_38 = arith.constant 0 : index
    %37 = vector.load %arg6[%c29, %c0_38] : memref<79x4xbf16, #tpu.memory_space<vmem>>, vector<16x4xbf16>
    %c30 = arith.constant 30 : index
    %c0_39 = arith.constant 0 : index
    %38 = vector.load %arg6[%c30, %c0_39] : memref<79x4xbf16, #tpu.memory_space<vmem>>, vector<16x4xbf16>
    %c31 = arith.constant 31 : index
    %c0_40 = arith.constant 0 : index
    %39 = vector.load %arg6[%c31, %c0_40] : memref<79x4xbf16, #tpu.memory_space<vmem>>, vector<16x4xbf16>
    %c32_41 = arith.constant 32 : index
    %c0_42 = arith.constant 0 : index
    %40 = vector.load %arg6[%c32_41, %c0_42] : memref<79x4xbf16, #tpu.memory_space<vmem>>, vector<16x4xbf16>
    %c33 = arith.constant 33 : index
    %c0_43 = arith.constant 0 : index
    %41 = vector.load %arg6[%c33, %c0_43] : memref<79x4xbf16, #tpu.memory_space<vmem>>, vector<16x4xbf16>
    %c34 = arith.constant 34 : index
    %c0_44 = arith.constant 0 : index
    %42 = vector.load %arg6[%c34, %c0_44] : memref<79x4xbf16, #tpu.memory_space<vmem>>, vector<16x4xbf16>
    %c35 = arith.constant 35 : index
    %c0_45 = arith.constant 0 : index
    %43 = vector.load %arg6[%c35, %c0_45] : memref<79x4xbf16, #tpu.memory_space<vmem>>, vector<16x4xbf16>
    %c36 = arith.constant 36 : index
    %c0_46 = arith.constant 0 : index
    %44 = vector.load %arg6[%c36, %c0_46] : memref<79x4xbf16, #tpu.memory_space<vmem>>, vector<16x4xbf16>
    %c37 = arith.constant 37 : index
    %c0_47 = arith.constant 0 : index
    %45 = vector.load %arg6[%c37, %c0_47] : memref<79x4xbf16, #tpu.memory_space<vmem>>, vector<16x4xbf16>
    %c38 = arith.constant 38 : index
    %c0_48 = arith.constant 0 : index
    %46 = vector.load %arg6[%c38, %c0_48] : memref<79x4xbf16, #tpu.memory_space<vmem>>, vector<16x4xbf16>
    %c39 = arith.constant 39 : index
    %c0_49 = arith.constant 0 : index
    %47 = vector.load %arg6[%c39, %c0_49] : memref<79x4xbf16, #tpu.memory_space<vmem>>, vector<16x4xbf16>
    %c40 = arith.constant 40 : index
    %c0_50 = arith.constant 0 : index
    %48 = vector.load %arg6[%c40, %c0_50] : memref<79x4xbf16, #tpu.memory_space<vmem>>, vector<16x4xbf16>
    %c41 = arith.constant 41 : index
    %c0_51 = arith.constant 0 : index
    %49 = vector.load %arg6[%c41, %c0_51] : memref<79x4xbf16, #tpu.memory_space<vmem>>, vector<16x4xbf16>
    %c42 = arith.constant 42 : index
    %c0_52 = arith.constant 0 : index
    %50 = vector.load %arg6[%c42, %c0_52] : memref<79x4xbf16, #tpu.memory_space<vmem>>, vector<16x4xbf16>
    %c43 = arith.constant 43 : index
    %c0_53 = arith.constant 0 : index
    %51 = vector.load %arg6[%c43, %c0_53] : memref<79x4xbf16, #tpu.memory_space<vmem>>, vector<16x4xbf16>
    %c44 = arith.constant 44 : index
    %c0_54 = arith.constant 0 : index
    %52 = vector.load %arg6[%c44, %c0_54] : memref<79x4xbf16, #tpu.memory_space<vmem>>, vector<16x4xbf16>
    %c45 = arith.constant 45 : index
    %c0_55 = arith.constant 0 : index
    %53 = vector.load %arg6[%c45, %c0_55] : memref<79x4xbf16, #tpu.memory_space<vmem>>, vector<16x4xbf16>
    %c46 = arith.constant 46 : index
    %c0_56 = arith.constant 0 : index
    %54 = vector.load %arg6[%c46, %c0_56] : memref<79x4xbf16, #tpu.memory_space<vmem>>, vector<16x4xbf16>
    %c47 = arith.constant 47 : index
    %c0_57 = arith.constant 0 : index
    %55 = vector.load %arg6[%c47, %c0_57] : memref<79x4xbf16, #tpu.memory_space<vmem>>, vector<16x4xbf16>
    %c48_58 = arith.constant 48 : index
    %c0_59 = arith.constant 0 : index
    %56 = vector.load %arg6[%c48_58, %c0_59] : memref<79x4xbf16, #tpu.memory_space<vmem>>, vector<16x4xbf16>
    %c49 = arith.constant 49 : index
    %c0_60 = arith.constant 0 : index
    %57 = vector.load %arg6[%c49, %c0_60] : memref<79x4xbf16, #tpu.memory_space<vmem>>, vector<16x4xbf16>
    %c50 = arith.constant 50 : index
    %c0_61 = arith.constant 0 : index
    %58 = vector.load %arg6[%c50, %c0_61] : memref<79x4xbf16, #tpu.memory_space<vmem>>, vector<16x4xbf16>
    %c51 = arith.constant 51 : index
    %c0_62 = arith.constant 0 : index
    %59 = vector.load %arg6[%c51, %c0_62] : memref<79x4xbf16, #tpu.memory_space<vmem>>, vector<16x4xbf16>
    %c52 = arith.constant 52 : index
    %c0_63 = arith.constant 0 : index
    %60 = vector.load %arg6[%c52, %c0_63] : memref<79x4xbf16, #tpu.memory_space<vmem>>, vector<16x4xbf16>
    %c53 = arith.constant 53 : index
    %c0_64 = arith.constant 0 : index
    %61 = vector.load %arg6[%c53, %c0_64] : memref<79x4xbf16, #tpu.memory_space<vmem>>, vector<16x4xbf16>
    %c54 = arith.constant 54 : index
    %c0_65 = arith.constant 0 : index
    %62 = vector.load %arg6[%c54, %c0_65] : memref<79x4xbf16, #tpu.memory_space<vmem>>, vector<16x4xbf16>
    %c55 = arith.constant 55 : index
    %c0_66 = arith.constant 0 : index
    %63 = vector.load %arg6[%c55, %c0_66] : memref<79x4xbf16, #tpu.memory_space<vmem>>, vector<16x4xbf16>
    %c56 = arith.constant 56 : index
    %c0_67 = arith.constant 0 : index
    %64 = vector.load %arg6[%c56, %c0_67] : memref<79x4xbf16, #tpu.memory_space<vmem>>, vector<16x4xbf16>
    %c57 = arith.constant 57 : index
    %c0_68 = arith.constant 0 : index
    %65 = vector.load %arg6[%c57, %c0_68] : memref<79x4xbf16, #tpu.memory_space<vmem>>, vector<16x4xbf16>
    %c58 = arith.constant 58 : index
    %c0_69 = arith.constant 0 : index
    %66 = vector.load %arg6[%c58, %c0_69] : memref<79x4xbf16, #tpu.memory_space<vmem>>, vector<16x4xbf16>
    %c59 = arith.constant 59 : index
    %c0_70 = arith.constant 0 : index
    %67 = vector.load %arg6[%c59, %c0_70] : memref<79x4xbf16, #tpu.memory_space<vmem>>, vector<16x4xbf16>
    %c60 = arith.constant 60 : index
    %c0_71 = arith.constant 0 : index
    %68 = vector.load %arg6[%c60, %c0_71] : memref<79x4xbf16, #tpu.memory_space<vmem>>, vector<16x4xbf16>
    %c61 = arith.constant 61 : index
    %c0_72 = arith.constant 0 : index
    %69 = vector.load %arg6[%c61, %c0_72] : memref<79x4xbf16, #tpu.memory_space<vmem>>, vector<16x4xbf16>
    %c62 = arith.constant 62 : index
    %c0_73 = arith.constant 0 : index
    %70 = vector.load %arg6[%c62, %c0_73] : memref<79x4xbf16, #tpu.memory_space<vmem>>, vector<16x4xbf16>
    %c63 = arith.constant 63 : index
    %c0_74 = arith.constant 0 : index
    %71 = vector.load %arg6[%c63, %c0_74] : memref<79x4xbf16, #tpu.memory_space<vmem>>, vector<16x4xbf16>
    %72 = tpu.concatenate %8, %9, %10, %11, %12, %13, %14, %15, %16, %17, %18, %19, %20, %21, %22, %23 in 1 : vector<16x4xbf16>, vector<16x4xbf16>, vector<16x4xbf16>, vector<16x4xbf16>, vector<16x4xbf16>, vector<16x4xbf16>, vector<16x4xbf16>, vector<16x4xbf16>, vector<16x4xbf16>, vector<16x4xbf16>, vector<16x4xbf16>, vector<16x4xbf16>, vector<16x4xbf16>, vector<16x4xbf16>, vector<16x4xbf16>, vector<16x4xbf16> -> vector<16x64xbf16>
    %73 = tpu.concatenate %24, %25, %26, %27, %28, %29, %30, %31, %32, %33, %34, %35, %36, %37, %38, %39 in 1 : vector<16x4xbf16>, vector<16x4xbf16>, vector<16x4xbf16>, vector<16x4xbf16>, vector<16x4xbf16>, vector<16x4xbf16>, vector<16x4xbf16>, vector<16x4xbf16>, vector<16x4xbf16>, vector<16x4xbf16>, vector<16x4xbf16>, vector<16x4xbf16>, vector<16x4xbf16>, vector<16x4xbf16>, vector<16x4xbf16>, vector<16x4xbf16> -> vector<16x64xbf16>
    %74 = tpu.concatenate %40, %41, %42, %43, %44, %45, %46, %47, %48, %49, %50, %51, %52, %53, %54, %55 in 1 : vector<16x4xbf16>, vector<16x4xbf16>, vector<16x4xbf16>, vector<16x4xbf16>, vector<16x4xbf16>, vector<16x4xbf16>, vector<16x4xbf16>, vector<16x4xbf16>, vector<16x4xbf16>, vector<16x4xbf16>, vector<16x4xbf16>, vector<16x4xbf16>, vector<16x4xbf16>, vector<16x4xbf16>, vector<16x4xbf16>, vector<16x4xbf16> -> vector<16x64xbf16>
    %75 = tpu.concatenate %56, %57, %58, %59, %60, %61, %62, %63, %64, %65, %66, %67, %68, %69, %70, %71 in 1 : vector<16x4xbf16>, vector<16x4xbf16>, vector<16x4xbf16>, vector<16x4xbf16>, vector<16x4xbf16>, vector<16x4xbf16>, vector<16x4xbf16>, vector<16x4xbf16>, vector<16x4xbf16>, vector<16x4xbf16>, vector<16x4xbf16>, vector<16x4xbf16>, vector<16x4xbf16>, vector<16x4xbf16>, vector<16x4xbf16>, vector<16x4xbf16> -> vector<16x64xbf16>
    %76 = tpu.concatenate %72, %73, %74, %75 in 1 : vector<16x64xbf16>, vector<16x64xbf16>, vector<16x64xbf16>, vector<16x64xbf16> -> vector<16x256xbf16>
    %c0_75 = arith.constant 0 : index
    %c0_76 = arith.constant 0 : index
    %77 = vector.load %arg2[%c0_75, %c0_76] : memref<256x128xbf16, #tpu.memory_space<vmem>>, vector<256x128xbf16>
    %cst_77 = arith.constant dense<0.000000e+00> : vector<16x128xf32>
    %78 = tpu.matmul %76, %77, %cst_77 {dimension_numbers = #tpu.dot_dimension_numbers<[1], [0], [0], [1], [0, 0, 1, 1], [], []>} : vector<16x256xbf16>, vector<256x128xbf16>, vector<16x128xf32> -> vector<16x128xf32>
    %79 = arith.addf %7, %78 : vector<16x128xf32>
    %cst_78 = arith.constant 0xFF80 : bf16
    %80 = vector.broadcast %cst_78 : bf16 to vector<1x1x4xbf16>
    %81 = vector.extract_strided_slice %0 {offsets = [0, 0, 0], sizes = [1, 15, 4], strides = [1, 1, 1]} : vector<1x16x4xbf16> to vector<1x15x4xbf16>
    %82 = tpu.concatenate %80, %81 in 1 : vector<1x1x4xbf16>, vector<1x15x4xbf16> -> vector<1x16x4xbf16>
    %83 = vector.extract_strided_slice %0 {offsets = [0, 1, 0], sizes = [1, 15, 4], strides = [1, 1, 1]} : vector<1x16x4xbf16> to vector<1x15x4xbf16>
    %84 = tpu.concatenate %83, %80 in 1 : vector<1x15x4xbf16>, vector<1x1x4xbf16> -> vector<1x16x4xbf16>
    %85 = arith.maximumf %82, %0 : vector<1x16x4xbf16>
    %86 = arith.maximumf %85, %84 : vector<1x16x4xbf16>
    %87 = vector.shape_cast %86 : vector<1x16x4xbf16> to vector<16x4xbf16>
    %c0_79 = arith.constant 0 : index
    %c0_80 = arith.constant 0 : index
    %88 = vector.load %arg3[%c0_79, %c0_80] : memref<4x128xbf16, #tpu.memory_space<vmem>>, vector<4x128xbf16>
    %cst_81 = arith.constant dense<0.000000e+00> : vector<16x128xf32>
    %89 = tpu.matmul %87, %88, %cst_81 {dimension_numbers = #tpu.dot_dimension_numbers<[1], [0], [0], [1], [0, 0, 1, 1], [], []>} : vector<16x4xbf16>, vector<4x128xbf16>, vector<16x128xf32> -> vector<16x128xf32>
    %90 = arith.addf %79, %89 : vector<16x128xf32>
    %c0_82 = arith.constant 0 : index
    %c0_83 = arith.constant 0 : index
    %91 = vector.load %arg4[%c0_82, %c0_83] : memref<1x128xf32, #tpu.memory_space<vmem>>, vector<1x128xf32>
    %92 = vector.broadcast %91 : vector<1x128xf32> to vector<16x128xf32>
    %93 = arith.addf %90, %92 : vector<16x128xf32>
    %cst_84 = arith.constant 0.000000e+00 : f32
    %94 = vector.broadcast %cst_84 : f32 to vector<16x128xf32>
    %95 = arith.maximumf %93, %94 : vector<16x128xf32>
    %96 = vector.shape_cast %95 : vector<16x128xf32> to vector<1x16x128xf32>
    %97 = arith.truncf %96 : vector<1x16x128xf32> to vector<1x16x128xbf16>
    %c0_85 = arith.constant 0 : index
    %c0_86 = arith.constant 0 : index
    %c0_87 = arith.constant 0 : index
    %98 = vector.load %arg5[%c0_85, %c0_86, %c0_87] : memref<1x16x128xbf16, #tpu.memory_space<vmem>>, vector<1x16x128xbf16>
    tpu.vector_store %arg5[%c0_85, %c0_86, %c0_87], %97 {strides = array<i32>} : memref<1x16x128xbf16, #tpu.memory_space<vmem>>, vector<1x16x128xbf16>,
    return
  }
  func.func @transform_0(%arg0: i32) -> (i32, i32, i32) {
    %c0_i32 = arith.constant 0 : i32
    %c0_i32_0 = arith.constant 0 : i32
    %c0_i32_1 = arith.constant 0 : i32
    return %arg0, %c0_i32, %c0_i32_0 : i32, i32, i32
  }
  func.func @transform_1(%arg0: i32) -> (i32, i32) {
    %c0_i32 = arith.constant 0 : i32
    %c0_i32_0 = arith.constant 0 : i32
    %c0_i32_1 = arith.constant 0 : i32
    return %c0_i32, %c0_i32_0 : i32, i32
  }
  func.func @transform_2(%arg0: i32) -> (i32, i32) {
    %c0_i32 = arith.constant 0 : i32
    %c0_i32_0 = arith.constant 0 : i32
    %c0_i32_1 = arith.constant 0 : i32
    return %c0_i32, %c0_i32_0 : i32, i32
  }
  func.func @transform_3(%arg0: i32) -> (i32, i32) {
    %c0_i32 = arith.constant 0 : i32
    %c0_i32_0 = arith.constant 0 : i32
    %c0_i32_1 = arith.constant 0 : i32
    return %c0_i32, %c0_i32_0 : i32, i32
  }
  func.func @transform_4(%arg0: i32) -> (i32, i32, i32) {
    %c0_i32 = arith.constant 0 : i32
    %c0_i32_0 = arith.constant 0 : i32
    %c0_i32_1 = arith.constant 0 : i32
    return %arg0, %c0_i32, %c0_i32_0 : i32, i32, i32
  }
}

module attributes {stable_mosaic.version = 11 : i64} {
  func.func @kernel(%arg0: i32, %arg1: memref<1x16x128xbf16, #tpu.memory_space<vmem>>, %arg2: memref<128x32xbf16, #tpu.memory_space<vmem>>, %arg3: memref<1x32xf32, #tpu.memory_space<vmem>>, %arg4: memref<1280x128xbf16, #tpu.memory_space<vmem>>, %arg5: memref<128x128xbf16, #tpu.memory_space<vmem>>, %arg6: memref<1x128xf32, #tpu.memory_space<vmem>>, %arg7: memref<1x16x128xbf16, #tpu.memory_space<vmem>>, %arg8: memref<55x32xbf16, #tpu.memory_space<vmem>>) attributes {dimension_semantics = [#tpu.dimension_semantics<parallel>], iteration_bounds = array<i64: 2>, scalar_prefetch = 0 : i64, scratch_operands = 1 : i64, tpu.core_type = #tpu.core_type<tc>, window_params = [{transform_indices = @transform_0, window_bounds = array<i64: 1, 16, 128>}, {pipeline_mode = #tpu.pipeline_mode<synchronous>, transform_indices = @transform_1, window_bounds = array<i64: 128, 32>}, {pipeline_mode = #tpu.pipeline_mode<synchronous>, transform_indices = @transform_2, window_bounds = array<i64: 1, 32>}, {pipeline_mode = #tpu.pipeline_mode<synchronous>, transform_indices = @transform_3, window_bounds = array<i64: 1280, 128>}, {pipeline_mode = #tpu.pipeline_mode<synchronous>, transform_indices = @transform_4, window_bounds = array<i64: 128, 128>}, {pipeline_mode = #tpu.pipeline_mode<synchronous>, transform_indices = @transform_5, window_bounds = array<i64: 1, 128>}, {transform_indices = @transform_6, window_bounds = array<i64: 1, 16, 128>}]} {
    %c0 = arith.constant 0 : index
    %c0_0 = arith.constant 0 : index
    %c0_1 = arith.constant 0 : index
    %0 = vector.load %arg1[%c0, %c0_0, %c0_1] : memref<1x16x128xbf16, #tpu.memory_space<vmem>>, vector<1x16x128xbf16>
    %1 = vector.shape_cast %0 : vector<1x16x128xbf16> to vector<16x128xbf16>
    %c0_2 = arith.constant 0 : index
    %c0_3 = arith.constant 0 : index
    %2 = vector.load %arg2[%c0_2, %c0_3] : memref<128x32xbf16, #tpu.memory_space<vmem>>, vector<128x32xbf16>
    %cst = arith.constant dense<0.000000e+00> : vector<16x32xf32>
    %3 = tpu.matmul %1, %2, %cst {dimension_numbers = #tpu.dot_dimension_numbers<[1], [0], [0], [1], [0, 0, 1, 1], [], []>} : vector<16x128xbf16>, vector<128x32xbf16>, vector<16x32xf32> -> vector<16x32xf32>
    %c0_4 = arith.constant 0 : index
    %c0_5 = arith.constant 0 : index
    %4 = vector.load %arg3[%c0_4, %c0_5] : memref<1x32xf32, #tpu.memory_space<vmem>>, vector<1x32xf32>
    %5 = vector.broadcast %4 : vector<1x32xf32> to vector<16x32xf32>
    %6 = arith.addf %3, %5 : vector<16x32xf32>
    %7 = arith.truncf %6 : vector<16x32xf32> to vector<16x32xbf16>
    %cst_6 = arith.constant 0.000000e+00 : bf16
    %8 = vector.broadcast %cst_6 : bf16 to vector<20x32xbf16>
    %cst_7 = arith.constant 0.000000e+00 : bf16
    %9 = vector.broadcast %cst_7 : bf16 to vector<19x32xbf16>
    %c0_8 = arith.constant 0 : index
    %c0_9 = arith.constant 0 : index
    %10 = vector.load %arg8[%c0_8, %c0_9] : memref<55x32xbf16, #tpu.memory_space<vmem>>, vector<20x32xbf16>
    tpu.vector_store %arg8[%c0_8, %c0_9], %8 {strides = array<i32>} : memref<55x32xbf16, #tpu.memory_space<vmem>>, vector<20x32xbf16>,
    %c20 = arith.constant 20 : index
    %c0_10 = arith.constant 0 : index
    %11 = vector.load %arg8[%c20, %c0_10] : memref<55x32xbf16, #tpu.memory_space<vmem>>, vector<16x32xbf16>
    tpu.vector_store %arg8[%c20, %c0_10], %7 {strides = array<i32>} : memref<55x32xbf16, #tpu.memory_space<vmem>>, vector<16x32xbf16>,
    %c36 = arith.constant 36 : index
    %c0_11 = arith.constant 0 : index
    %12 = vector.load %arg8[%c36, %c0_11] : memref<55x32xbf16, #tpu.memory_space<vmem>>, vector<19x32xbf16>
    tpu.vector_store %arg8[%c36, %c0_11], %9 {strides = array<i32>} : memref<55x32xbf16, #tpu.memory_space<vmem>>, vector<19x32xbf16>,
    %cst_12 = arith.constant 0.000000e+00 : f32
    %13 = vector.broadcast %cst_12 : f32 to vector<16x128xf32>
    %c0_13 = arith.constant 0 : index
    %c0_14 = arith.constant 0 : index
    %14 = vector.load %arg8[%c0_13, %c0_14] : memref<55x32xbf16, #tpu.memory_space<vmem>>, vector<16x32xbf16>
    %c1 = arith.constant 1 : index
    %c0_15 = arith.constant 0 : index
    %15 = vector.load %arg8[%c1, %c0_15] : memref<55x32xbf16, #tpu.memory_space<vmem>>, vector<16x32xbf16>
    %c2 = arith.constant 2 : index
    %c0_16 = arith.constant 0 : index
    %16 = vector.load %arg8[%c2, %c0_16] : memref<55x32xbf16, #tpu.memory_space<vmem>>, vector<16x32xbf16>
    %c3 = arith.constant 3 : index
    %c0_17 = arith.constant 0 : index
    %17 = vector.load %arg8[%c3, %c0_17] : memref<55x32xbf16, #tpu.memory_space<vmem>>, vector<16x32xbf16>
    %c4 = arith.constant 4 : index
    %c0_18 = arith.constant 0 : index
    %18 = vector.load %arg8[%c4, %c0_18] : memref<55x32xbf16, #tpu.memory_space<vmem>>, vector<16x32xbf16>
    %c5 = arith.constant 5 : index
    %c0_19 = arith.constant 0 : index
    %19 = vector.load %arg8[%c5, %c0_19] : memref<55x32xbf16, #tpu.memory_space<vmem>>, vector<16x32xbf16>
    %c6 = arith.constant 6 : index
    %c0_20 = arith.constant 0 : index
    %20 = vector.load %arg8[%c6, %c0_20] : memref<55x32xbf16, #tpu.memory_space<vmem>>, vector<16x32xbf16>
    %c7 = arith.constant 7 : index
    %c0_21 = arith.constant 0 : index
    %21 = vector.load %arg8[%c7, %c0_21] : memref<55x32xbf16, #tpu.memory_space<vmem>>, vector<16x32xbf16>
    %22 = tpu.concatenate %14, %15, %16, %17, %18, %19, %20, %21 in 1 : vector<16x32xbf16>, vector<16x32xbf16>, vector<16x32xbf16>, vector<16x32xbf16>, vector<16x32xbf16>, vector<16x32xbf16>, vector<16x32xbf16>, vector<16x32xbf16> -> vector<16x256xbf16>
    %c0_22 = arith.constant 0 : index
    %c0_23 = arith.constant 0 : index
    %23 = vector.load %arg4[%c0_22, %c0_23] : memref<1280x128xbf16, #tpu.memory_space<vmem>>, vector<256x128xbf16>
    %cst_24 = arith.constant dense<0.000000e+00> : vector<16x128xf32>
    %24 = tpu.matmul %22, %23, %cst_24 {dimension_numbers = #tpu.dot_dimension_numbers<[1], [0], [0], [1], [0, 0, 1, 1], [], []>} : vector<16x256xbf16>, vector<256x128xbf16>, vector<16x128xf32> -> vector<16x128xf32>
    %25 = arith.addf %13, %24 : vector<16x128xf32>
    %c8 = arith.constant 8 : index
    %c0_25 = arith.constant 0 : index
    %26 = vector.load %arg8[%c8, %c0_25] : memref<55x32xbf16, #tpu.memory_space<vmem>>, vector<16x32xbf16>
    %c9 = arith.constant 9 : index
    %c0_26 = arith.constant 0 : index
    %27 = vector.load %arg8[%c9, %c0_26] : memref<55x32xbf16, #tpu.memory_space<vmem>>, vector<16x32xbf16>
    %c10 = arith.constant 10 : index
    %c0_27 = arith.constant 0 : index
    %28 = vector.load %arg8[%c10, %c0_27] : memref<55x32xbf16, #tpu.memory_space<vmem>>, vector<16x32xbf16>
    %c11 = arith.constant 11 : index
    %c0_28 = arith.constant 0 : index
    %29 = vector.load %arg8[%c11, %c0_28] : memref<55x32xbf16, #tpu.memory_space<vmem>>, vector<16x32xbf16>
    %c12 = arith.constant 12 : index
    %c0_29 = arith.constant 0 : index
    %30 = vector.load %arg8[%c12, %c0_29] : memref<55x32xbf16, #tpu.memory_space<vmem>>, vector<16x32xbf16>
    %c13 = arith.constant 13 : index
    %c0_30 = arith.constant 0 : index
    %31 = vector.load %arg8[%c13, %c0_30] : memref<55x32xbf16, #tpu.memory_space<vmem>>, vector<16x32xbf16>
    %c14 = arith.constant 14 : index
    %c0_31 = arith.constant 0 : index
    %32 = vector.load %arg8[%c14, %c0_31] : memref<55x32xbf16, #tpu.memory_space<vmem>>, vector<16x32xbf16>
    %c15 = arith.constant 15 : index
    %c0_32 = arith.constant 0 : index
    %33 = vector.load %arg8[%c15, %c0_32] : memref<55x32xbf16, #tpu.memory_space<vmem>>, vector<16x32xbf16>
    %34 = tpu.concatenate %26, %27, %28, %29, %30, %31, %32, %33 in 1 : vector<16x32xbf16>, vector<16x32xbf16>, vector<16x32xbf16>, vector<16x32xbf16>, vector<16x32xbf16>, vector<16x32xbf16>, vector<16x32xbf16>, vector<16x32xbf16> -> vector<16x256xbf16>
    %c256 = arith.constant 256 : index
    %c0_33 = arith.constant 0 : index
    %35 = vector.load %arg4[%c256, %c0_33] : memref<1280x128xbf16, #tpu.memory_space<vmem>>, vector<256x128xbf16>
    %cst_34 = arith.constant dense<0.000000e+00> : vector<16x128xf32>
    %36 = tpu.matmul %34, %35, %cst_34 {dimension_numbers = #tpu.dot_dimension_numbers<[1], [0], [0], [1], [0, 0, 1, 1], [], []>} : vector<16x256xbf16>, vector<256x128xbf16>, vector<16x128xf32> -> vector<16x128xf32>
    %37 = arith.addf %25, %36 : vector<16x128xf32>
    %c16 = arith.constant 16 : index
    %c0_35 = arith.constant 0 : index
    %38 = vector.load %arg8[%c16, %c0_35] : memref<55x32xbf16, #tpu.memory_space<vmem>>, vector<16x32xbf16>
    %c17 = arith.constant 17 : index
    %c0_36 = arith.constant 0 : index
    %39 = vector.load %arg8[%c17, %c0_36] : memref<55x32xbf16, #tpu.memory_space<vmem>>, vector<16x32xbf16>
    %c18 = arith.constant 18 : index
    %c0_37 = arith.constant 0 : index
    %40 = vector.load %arg8[%c18, %c0_37] : memref<55x32xbf16, #tpu.memory_space<vmem>>, vector<16x32xbf16>
    %c19 = arith.constant 19 : index
    %c0_38 = arith.constant 0 : index
    %41 = vector.load %arg8[%c19, %c0_38] : memref<55x32xbf16, #tpu.memory_space<vmem>>, vector<16x32xbf16>
    %c20_39 = arith.constant 20 : index
    %c0_40 = arith.constant 0 : index
    %42 = vector.load %arg8[%c20_39, %c0_40] : memref<55x32xbf16, #tpu.memory_space<vmem>>, vector<16x32xbf16>
    %c21 = arith.constant 21 : index
    %c0_41 = arith.constant 0 : index
    %43 = vector.load %arg8[%c21, %c0_41] : memref<55x32xbf16, #tpu.memory_space<vmem>>, vector<16x32xbf16>
    %c22 = arith.constant 22 : index
    %c0_42 = arith.constant 0 : index
    %44 = vector.load %arg8[%c22, %c0_42] : memref<55x32xbf16, #tpu.memory_space<vmem>>, vector<16x32xbf16>
    %c23 = arith.constant 23 : index
    %c0_43 = arith.constant 0 : index
    %45 = vector.load %arg8[%c23, %c0_43] : memref<55x32xbf16, #tpu.memory_space<vmem>>, vector<16x32xbf16>
    %46 = tpu.concatenate %38, %39, %40, %41, %42, %43, %44, %45 in 1 : vector<16x32xbf16>, vector<16x32xbf16>, vector<16x32xbf16>, vector<16x32xbf16>, vector<16x32xbf16>, vector<16x32xbf16>, vector<16x32xbf16>, vector<16x32xbf16> -> vector<16x256xbf16>
    %c512 = arith.constant 512 : index
    %c0_44 = arith.constant 0 : index
    %47 = vector.load %arg4[%c512, %c0_44] : memref<1280x128xbf16, #tpu.memory_space<vmem>>, vector<256x128xbf16>
    %cst_45 = arith.constant dense<0.000000e+00> : vector<16x128xf32>
    %48 = tpu.matmul %46, %47, %cst_45 {dimension_numbers = #tpu.dot_dimension_numbers<[1], [0], [0], [1], [0, 0, 1, 1], [], []>} : vector<16x256xbf16>, vector<256x128xbf16>, vector<16x128xf32> -> vector<16x128xf32>
    %49 = arith.addf %37, %48 : vector<16x128xf32>
    %c24 = arith.constant 24 : index
    %c0_46 = arith.constant 0 : index
    %50 = vector.load %arg8[%c24, %c0_46] : memref<55x32xbf16, #tpu.memory_space<vmem>>, vector<16x32xbf16>
    %c25 = arith.constant 25 : index
    %c0_47 = arith.constant 0 : index
    %51 = vector.load %arg8[%c25, %c0_47] : memref<55x32xbf16, #tpu.memory_space<vmem>>, vector<16x32xbf16>
    %c26 = arith.constant 26 : index
    %c0_48 = arith.constant 0 : index
    %52 = vector.load %arg8[%c26, %c0_48] : memref<55x32xbf16, #tpu.memory_space<vmem>>, vector<16x32xbf16>
    %c27 = arith.constant 27 : index
    %c0_49 = arith.constant 0 : index
    %53 = vector.load %arg8[%c27, %c0_49] : memref<55x32xbf16, #tpu.memory_space<vmem>>, vector<16x32xbf16>
    %c28 = arith.constant 28 : index
    %c0_50 = arith.constant 0 : index
    %54 = vector.load %arg8[%c28, %c0_50] : memref<55x32xbf16, #tpu.memory_space<vmem>>, vector<16x32xbf16>
    %c29 = arith.constant 29 : index
    %c0_51 = arith.constant 0 : index
    %55 = vector.load %arg8[%c29, %c0_51] : memref<55x32xbf16, #tpu.memory_space<vmem>>, vector<16x32xbf16>
    %c30 = arith.constant 30 : index
    %c0_52 = arith.constant 0 : index
    %56 = vector.load %arg8[%c30, %c0_52] : memref<55x32xbf16, #tpu.memory_space<vmem>>, vector<16x32xbf16>
    %c31 = arith.constant 31 : index
    %c0_53 = arith.constant 0 : index
    %57 = vector.load %arg8[%c31, %c0_53] : memref<55x32xbf16, #tpu.memory_space<vmem>>, vector<16x32xbf16>
    %58 = tpu.concatenate %50, %51, %52, %53, %54, %55, %56, %57 in 1 : vector<16x32xbf16>, vector<16x32xbf16>, vector<16x32xbf16>, vector<16x32xbf16>, vector<16x32xbf16>, vector<16x32xbf16>, vector<16x32xbf16>, vector<16x32xbf16> -> vector<16x256xbf16>
    %c768 = arith.constant 768 : index
    %c0_54 = arith.constant 0 : index
    %59 = vector.load %arg4[%c768, %c0_54] : memref<1280x128xbf16, #tpu.memory_space<vmem>>, vector<256x128xbf16>
    %cst_55 = arith.constant dense<0.000000e+00> : vector<16x128xf32>
    %60 = tpu.matmul %58, %59, %cst_55 {dimension_numbers = #tpu.dot_dimension_numbers<[1], [0], [0], [1], [0, 0, 1, 1], [], []>} : vector<16x256xbf16>, vector<256x128xbf16>, vector<16x128xf32> -> vector<16x128xf32>
    %61 = arith.addf %49, %60 : vector<16x128xf32>
    %c32 = arith.constant 32 : index
    %c0_56 = arith.constant 0 : index
    %62 = vector.load %arg8[%c32, %c0_56] : memref<55x32xbf16, #tpu.memory_space<vmem>>, vector<16x32xbf16>
    %c33 = arith.constant 33 : index
    %c0_57 = arith.constant 0 : index
    %63 = vector.load %arg8[%c33, %c0_57] : memref<55x32xbf16, #tpu.memory_space<vmem>>, vector<16x32xbf16>
    %c34 = arith.constant 34 : index
    %c0_58 = arith.constant 0 : index
    %64 = vector.load %arg8[%c34, %c0_58] : memref<55x32xbf16, #tpu.memory_space<vmem>>, vector<16x32xbf16>
    %c35 = arith.constant 35 : index
    %c0_59 = arith.constant 0 : index
    %65 = vector.load %arg8[%c35, %c0_59] : memref<55x32xbf16, #tpu.memory_space<vmem>>, vector<16x32xbf16>
    %c36_60 = arith.constant 36 : index
    %c0_61 = arith.constant 0 : index
    %66 = vector.load %arg8[%c36_60, %c0_61] : memref<55x32xbf16, #tpu.memory_space<vmem>>, vector<16x32xbf16>
    %c37 = arith.constant 37 : index
    %c0_62 = arith.constant 0 : index
    %67 = vector.load %arg8[%c37, %c0_62] : memref<55x32xbf16, #tpu.memory_space<vmem>>, vector<16x32xbf16>
    %c38 = arith.constant 38 : index
    %c0_63 = arith.constant 0 : index
    %68 = vector.load %arg8[%c38, %c0_63] : memref<55x32xbf16, #tpu.memory_space<vmem>>, vector<16x32xbf16>
    %c39 = arith.constant 39 : index
    %c0_64 = arith.constant 0 : index
    %69 = vector.load %arg8[%c39, %c0_64] : memref<55x32xbf16, #tpu.memory_space<vmem>>, vector<16x32xbf16>
    %70 = tpu.concatenate %62, %63, %64, %65, %66, %67, %68, %69 in 1 : vector<16x32xbf16>, vector<16x32xbf16>, vector<16x32xbf16>, vector<16x32xbf16>, vector<16x32xbf16>, vector<16x32xbf16>, vector<16x32xbf16>, vector<16x32xbf16> -> vector<16x256xbf16>
    %c1024 = arith.constant 1024 : index
    %c0_65 = arith.constant 0 : index
    %71 = vector.load %arg4[%c1024, %c0_65] : memref<1280x128xbf16, #tpu.memory_space<vmem>>, vector<256x128xbf16>
    %cst_66 = arith.constant dense<0.000000e+00> : vector<16x128xf32>
    %72 = tpu.matmul %70, %71, %cst_66 {dimension_numbers = #tpu.dot_dimension_numbers<[1], [0], [0], [1], [0, 0, 1, 1], [], []>} : vector<16x256xbf16>, vector<256x128xbf16>, vector<16x128xf32> -> vector<16x128xf32>
    %73 = arith.addf %61, %72 : vector<16x128xf32>
    %cst_67 = arith.constant 0xFF80 : bf16
    %74 = vector.broadcast %cst_67 : bf16 to vector<1x1x128xbf16>
    %75 = vector.extract_strided_slice %0 {offsets = [0, 0, 0], sizes = [1, 15, 128], strides = [1, 1, 1]} : vector<1x16x128xbf16> to vector<1x15x128xbf16>
    %76 = tpu.concatenate %74, %75 in 1 : vector<1x1x128xbf16>, vector<1x15x128xbf16> -> vector<1x16x128xbf16>
    %77 = vector.extract_strided_slice %0 {offsets = [0, 1, 0], sizes = [1, 15, 128], strides = [1, 1, 1]} : vector<1x16x128xbf16> to vector<1x15x128xbf16>
    %78 = tpu.concatenate %77, %74 in 1 : vector<1x15x128xbf16>, vector<1x1x128xbf16> -> vector<1x16x128xbf16>
    %79 = arith.maximumf %76, %0 : vector<1x16x128xbf16>
    %80 = arith.maximumf %79, %78 : vector<1x16x128xbf16>
    %81 = vector.shape_cast %80 : vector<1x16x128xbf16> to vector<16x128xbf16>
    %c0_68 = arith.constant 0 : index
    %c0_69 = arith.constant 0 : index
    %82 = vector.load %arg5[%c0_68, %c0_69] : memref<128x128xbf16, #tpu.memory_space<vmem>>, vector<128x128xbf16>
    %cst_70 = arith.constant dense<0.000000e+00> : vector<16x128xf32>
    %83 = tpu.matmul %81, %82, %cst_70 {dimension_numbers = #tpu.dot_dimension_numbers<[1], [0], [0], [1], [0, 0, 1, 1], [], []>} : vector<16x128xbf16>, vector<128x128xbf16>, vector<16x128xf32> -> vector<16x128xf32>
    %84 = arith.addf %73, %83 : vector<16x128xf32>
    %c0_71 = arith.constant 0 : index
    %c0_72 = arith.constant 0 : index
    %85 = vector.load %arg6[%c0_71, %c0_72] : memref<1x128xf32, #tpu.memory_space<vmem>>, vector<1x128xf32>
    %86 = vector.broadcast %85 : vector<1x128xf32> to vector<16x128xf32>
    %87 = arith.addf %84, %86 : vector<16x128xf32>
    %cst_73 = arith.constant 0.000000e+00 : f32
    %88 = vector.broadcast %cst_73 : f32 to vector<16x128xf32>
    %89 = arith.maximumf %87, %88 : vector<16x128xf32>
    %90 = vector.shape_cast %89 : vector<16x128xf32> to vector<1x16x128xf32>
    %91 = arith.truncf %90 : vector<1x16x128xf32> to vector<1x16x128xbf16>
    %c0_74 = arith.constant 0 : index
    %c0_75 = arith.constant 0 : index
    %c0_76 = arith.constant 0 : index
    %92 = vector.load %arg7[%c0_74, %c0_75, %c0_76] : memref<1x16x128xbf16, #tpu.memory_space<vmem>>, vector<1x16x128xbf16>
    tpu.vector_store %arg7[%c0_74, %c0_75, %c0_76], %91 {strides = array<i32>} : memref<1x16x128xbf16, #tpu.memory_space<vmem>>, vector<1x16x128xbf16>,
    return
  }
  func.func @transform_0(%arg0: i32) -> (i32, i32, i32) {
    %c0_i32 = arith.constant 0 : i32
    %c0_i32_0 = arith.constant 0 : i32
    %c0_i32_1 = arith.constant 0 : i32
    return %arg0, %c0_i32, %c0_i32_0 : i32, i32, i32
  }
  func.func @transform_1(%arg0: i32) -> (i32, i32) {
    %c0_i32 = arith.constant 0 : i32
    %c0_i32_0 = arith.constant 0 : i32
    %c0_i32_1 = arith.constant 0 : i32
    return %c0_i32, %c0_i32_0 : i32, i32
  }
  func.func @transform_2(%arg0: i32) -> (i32, i32) {
    %c0_i32 = arith.constant 0 : i32
    %c0_i32_0 = arith.constant 0 : i32
    %c0_i32_1 = arith.constant 0 : i32
    return %c0_i32, %c0_i32_0 : i32, i32
  }
  func.func @transform_3(%arg0: i32) -> (i32, i32) {
    %c0_i32 = arith.constant 0 : i32
    %c0_i32_0 = arith.constant 0 : i32
    %c0_i32_1 = arith.constant 0 : i32
    return %c0_i32, %c0_i32_0 : i32, i32
  }
  func.func @transform_4(%arg0: i32) -> (i32, i32) {
    %c0_i32 = arith.constant 0 : i32
    %c0_i32_0 = arith.constant 0 : i32
    %c0_i32_1 = arith.constant 0 : i32
    return %c0_i32, %c0_i32_0 : i32, i32
  }
  func.func @transform_5(%arg0: i32) -> (i32, i32) {
    %c0_i32 = arith.constant 0 : i32
    %c0_i32_0 = arith.constant 0 : i32
    %c0_i32_1 = arith.constant 0 : i32
    return %c0_i32, %c0_i32_0 : i32, i32
  }
  func.func @transform_6(%arg0: i32) -> (i32, i32, i32) {
    %c0_i32 = arith.constant 0 : i32
    %c0_i32_0 = arith.constant 0 : i32
    %c0_i32_1 = arith.constant 0 : i32
    return %arg0, %c0_i32, %c0_i32_0 : i32, i32, i32
  }
}

module attributes {stable_mosaic.version = 11 : i64} {
  func.func @kernel(%arg0: i32, %arg1: memref<1x16x128xbf16, #tpu.memory_space<vmem>>, %arg2: memref<128x32xbf16, #tpu.memory_space<vmem>>, %arg3: memref<1x32xf32, #tpu.memory_space<vmem>>, %arg4: memref<1280x128xbf16, #tpu.memory_space<vmem>>, %arg5: memref<128x128xbf16, #tpu.memory_space<vmem>>, %arg6: memref<1x128xf32, #tpu.memory_space<vmem>>, %arg7: memref<1x16x128xbf16, #tpu.memory_space<vmem>>, %arg8: memref<128x128xbf16, #tpu.memory_space<vmem>>, %arg9: memref<1x128xf32, #tpu.memory_space<vmem>>, %arg10: memref<128x5xf32, #tpu.memory_space<vmem>>, %arg11: memref<1x5xf32, #tpu.memory_space<vmem>>, %arg12: memref<1x1x5xf32, #tpu.memory_space<vmem>>, %arg13: memref<55x32xbf16, #tpu.memory_space<vmem>>) attributes {dimension_semantics = [#tpu.dimension_semantics<parallel>], iteration_bounds = array<i64: 2>, scalar_prefetch = 0 : i64, scratch_operands = 1 : i64, tpu.core_type = #tpu.core_type<tc>, window_params = [{transform_indices = @transform_0, window_bounds = array<i64: 1, 16, 128>}, {pipeline_mode = #tpu.pipeline_mode<synchronous>, transform_indices = @transform_1, window_bounds = array<i64: 128, 32>}, {pipeline_mode = #tpu.pipeline_mode<synchronous>, transform_indices = @transform_2, window_bounds = array<i64: 1, 32>}, {pipeline_mode = #tpu.pipeline_mode<synchronous>, transform_indices = @transform_3, window_bounds = array<i64: 1280, 128>}, {pipeline_mode = #tpu.pipeline_mode<synchronous>, transform_indices = @transform_4, window_bounds = array<i64: 128, 128>}, {pipeline_mode = #tpu.pipeline_mode<synchronous>, transform_indices = @transform_5, window_bounds = array<i64: 1, 128>}, {transform_indices = @transform_6, window_bounds = array<i64: 1, 16, 128>}, {pipeline_mode = #tpu.pipeline_mode<synchronous>, transform_indices = @transform_7, window_bounds = array<i64: 128, 128>}, {pipeline_mode = #tpu.pipeline_mode<synchronous>, transform_indices = @transform_8, window_bounds = array<i64: 1, 128>}, {pipeline_mode = #tpu.pipeline_mode<synchronous>, transform_indices = @transform_9, window_bounds = array<i64: 128, 5>}, {pipeline_mode = #tpu.pipeline_mode<synchronous>, transform_indices = @transform_10, window_bounds = array<i64: 1, 5>}, {transform_indices = @transform_11, window_bounds = array<i64: 1, 1, 5>}]} {
    %c0 = arith.constant 0 : index
    %c0_0 = arith.constant 0 : index
    %c0_1 = arith.constant 0 : index
    %0 = vector.load %arg1[%c0, %c0_0, %c0_1] : memref<1x16x128xbf16, #tpu.memory_space<vmem>>, vector<1x16x128xbf16>
    %1 = vector.shape_cast %0 : vector<1x16x128xbf16> to vector<16x128xbf16>
    %c0_2 = arith.constant 0 : index
    %c0_3 = arith.constant 0 : index
    %2 = vector.load %arg2[%c0_2, %c0_3] : memref<128x32xbf16, #tpu.memory_space<vmem>>, vector<128x32xbf16>
    %cst = arith.constant dense<0.000000e+00> : vector<16x32xf32>
    %3 = tpu.matmul %1, %2, %cst {dimension_numbers = #tpu.dot_dimension_numbers<[1], [0], [0], [1], [0, 0, 1, 1], [], []>} : vector<16x128xbf16>, vector<128x32xbf16>, vector<16x32xf32> -> vector<16x32xf32>
    %c0_4 = arith.constant 0 : index
    %c0_5 = arith.constant 0 : index
    %4 = vector.load %arg3[%c0_4, %c0_5] : memref<1x32xf32, #tpu.memory_space<vmem>>, vector<1x32xf32>
    %5 = vector.broadcast %4 : vector<1x32xf32> to vector<16x32xf32>
    %6 = arith.addf %3, %5 : vector<16x32xf32>
    %7 = arith.truncf %6 : vector<16x32xf32> to vector<16x32xbf16>
    %cst_6 = arith.constant 0.000000e+00 : bf16
    %8 = vector.broadcast %cst_6 : bf16 to vector<20x32xbf16>
    %cst_7 = arith.constant 0.000000e+00 : bf16
    %9 = vector.broadcast %cst_7 : bf16 to vector<19x32xbf16>
    %c0_8 = arith.constant 0 : index
    %c0_9 = arith.constant 0 : index
    %10 = vector.load %arg13[%c0_8, %c0_9] : memref<55x32xbf16, #tpu.memory_space<vmem>>, vector<20x32xbf16>
    tpu.vector_store %arg13[%c0_8, %c0_9], %8 {strides = array<i32>} : memref<55x32xbf16, #tpu.memory_space<vmem>>, vector<20x32xbf16>,
    %c20 = arith.constant 20 : index
    %c0_10 = arith.constant 0 : index
    %11 = vector.load %arg13[%c20, %c0_10] : memref<55x32xbf16, #tpu.memory_space<vmem>>, vector<16x32xbf16>
    tpu.vector_store %arg13[%c20, %c0_10], %7 {strides = array<i32>} : memref<55x32xbf16, #tpu.memory_space<vmem>>, vector<16x32xbf16>,
    %c36 = arith.constant 36 : index
    %c0_11 = arith.constant 0 : index
    %12 = vector.load %arg13[%c36, %c0_11] : memref<55x32xbf16, #tpu.memory_space<vmem>>, vector<19x32xbf16>
    tpu.vector_store %arg13[%c36, %c0_11], %9 {strides = array<i32>} : memref<55x32xbf16, #tpu.memory_space<vmem>>, vector<19x32xbf16>,
    %cst_12 = arith.constant 0.000000e+00 : f32
    %13 = vector.broadcast %cst_12 : f32 to vector<16x128xf32>
    %c0_13 = arith.constant 0 : index
    %c0_14 = arith.constant 0 : index
    %14 = vector.load %arg13[%c0_13, %c0_14] : memref<55x32xbf16, #tpu.memory_space<vmem>>, vector<16x32xbf16>
    %c1 = arith.constant 1 : index
    %c0_15 = arith.constant 0 : index
    %15 = vector.load %arg13[%c1, %c0_15] : memref<55x32xbf16, #tpu.memory_space<vmem>>, vector<16x32xbf16>
    %c2 = arith.constant 2 : index
    %c0_16 = arith.constant 0 : index
    %16 = vector.load %arg13[%c2, %c0_16] : memref<55x32xbf16, #tpu.memory_space<vmem>>, vector<16x32xbf16>
    %c3 = arith.constant 3 : index
    %c0_17 = arith.constant 0 : index
    %17 = vector.load %arg13[%c3, %c0_17] : memref<55x32xbf16, #tpu.memory_space<vmem>>, vector<16x32xbf16>
    %c4 = arith.constant 4 : index
    %c0_18 = arith.constant 0 : index
    %18 = vector.load %arg13[%c4, %c0_18] : memref<55x32xbf16, #tpu.memory_space<vmem>>, vector<16x32xbf16>
    %c5 = arith.constant 5 : index
    %c0_19 = arith.constant 0 : index
    %19 = vector.load %arg13[%c5, %c0_19] : memref<55x32xbf16, #tpu.memory_space<vmem>>, vector<16x32xbf16>
    %c6 = arith.constant 6 : index
    %c0_20 = arith.constant 0 : index
    %20 = vector.load %arg13[%c6, %c0_20] : memref<55x32xbf16, #tpu.memory_space<vmem>>, vector<16x32xbf16>
    %c7 = arith.constant 7 : index
    %c0_21 = arith.constant 0 : index
    %21 = vector.load %arg13[%c7, %c0_21] : memref<55x32xbf16, #tpu.memory_space<vmem>>, vector<16x32xbf16>
    %22 = tpu.concatenate %14, %15, %16, %17, %18, %19, %20, %21 in 1 : vector<16x32xbf16>, vector<16x32xbf16>, vector<16x32xbf16>, vector<16x32xbf16>, vector<16x32xbf16>, vector<16x32xbf16>, vector<16x32xbf16>, vector<16x32xbf16> -> vector<16x256xbf16>
    %c0_22 = arith.constant 0 : index
    %c0_23 = arith.constant 0 : index
    %23 = vector.load %arg4[%c0_22, %c0_23] : memref<1280x128xbf16, #tpu.memory_space<vmem>>, vector<256x128xbf16>
    %cst_24 = arith.constant dense<0.000000e+00> : vector<16x128xf32>
    %24 = tpu.matmul %22, %23, %cst_24 {dimension_numbers = #tpu.dot_dimension_numbers<[1], [0], [0], [1], [0, 0, 1, 1], [], []>} : vector<16x256xbf16>, vector<256x128xbf16>, vector<16x128xf32> -> vector<16x128xf32>
    %25 = arith.addf %13, %24 : vector<16x128xf32>
    %c8 = arith.constant 8 : index
    %c0_25 = arith.constant 0 : index
    %26 = vector.load %arg13[%c8, %c0_25] : memref<55x32xbf16, #tpu.memory_space<vmem>>, vector<16x32xbf16>
    %c9 = arith.constant 9 : index
    %c0_26 = arith.constant 0 : index
    %27 = vector.load %arg13[%c9, %c0_26] : memref<55x32xbf16, #tpu.memory_space<vmem>>, vector<16x32xbf16>
    %c10 = arith.constant 10 : index
    %c0_27 = arith.constant 0 : index
    %28 = vector.load %arg13[%c10, %c0_27] : memref<55x32xbf16, #tpu.memory_space<vmem>>, vector<16x32xbf16>
    %c11 = arith.constant 11 : index
    %c0_28 = arith.constant 0 : index
    %29 = vector.load %arg13[%c11, %c0_28] : memref<55x32xbf16, #tpu.memory_space<vmem>>, vector<16x32xbf16>
    %c12 = arith.constant 12 : index
    %c0_29 = arith.constant 0 : index
    %30 = vector.load %arg13[%c12, %c0_29] : memref<55x32xbf16, #tpu.memory_space<vmem>>, vector<16x32xbf16>
    %c13 = arith.constant 13 : index
    %c0_30 = arith.constant 0 : index
    %31 = vector.load %arg13[%c13, %c0_30] : memref<55x32xbf16, #tpu.memory_space<vmem>>, vector<16x32xbf16>
    %c14 = arith.constant 14 : index
    %c0_31 = arith.constant 0 : index
    %32 = vector.load %arg13[%c14, %c0_31] : memref<55x32xbf16, #tpu.memory_space<vmem>>, vector<16x32xbf16>
    %c15 = arith.constant 15 : index
    %c0_32 = arith.constant 0 : index
    %33 = vector.load %arg13[%c15, %c0_32] : memref<55x32xbf16, #tpu.memory_space<vmem>>, vector<16x32xbf16>
    %34 = tpu.concatenate %26, %27, %28, %29, %30, %31, %32, %33 in 1 : vector<16x32xbf16>, vector<16x32xbf16>, vector<16x32xbf16>, vector<16x32xbf16>, vector<16x32xbf16>, vector<16x32xbf16>, vector<16x32xbf16>, vector<16x32xbf16> -> vector<16x256xbf16>
    %c256 = arith.constant 256 : index
    %c0_33 = arith.constant 0 : index
    %35 = vector.load %arg4[%c256, %c0_33] : memref<1280x128xbf16, #tpu.memory_space<vmem>>, vector<256x128xbf16>
    %cst_34 = arith.constant dense<0.000000e+00> : vector<16x128xf32>
    %36 = tpu.matmul %34, %35, %cst_34 {dimension_numbers = #tpu.dot_dimension_numbers<[1], [0], [0], [1], [0, 0, 1, 1], [], []>} : vector<16x256xbf16>, vector<256x128xbf16>, vector<16x128xf32> -> vector<16x128xf32>
    %37 = arith.addf %25, %36 : vector<16x128xf32>
    %c16 = arith.constant 16 : index
    %c0_35 = arith.constant 0 : index
    %38 = vector.load %arg13[%c16, %c0_35] : memref<55x32xbf16, #tpu.memory_space<vmem>>, vector<16x32xbf16>
    %c17 = arith.constant 17 : index
    %c0_36 = arith.constant 0 : index
    %39 = vector.load %arg13[%c17, %c0_36] : memref<55x32xbf16, #tpu.memory_space<vmem>>, vector<16x32xbf16>
    %c18 = arith.constant 18 : index
    %c0_37 = arith.constant 0 : index
    %40 = vector.load %arg13[%c18, %c0_37] : memref<55x32xbf16, #tpu.memory_space<vmem>>, vector<16x32xbf16>
    %c19 = arith.constant 19 : index
    %c0_38 = arith.constant 0 : index
    %41 = vector.load %arg13[%c19, %c0_38] : memref<55x32xbf16, #tpu.memory_space<vmem>>, vector<16x32xbf16>
    %c20_39 = arith.constant 20 : index
    %c0_40 = arith.constant 0 : index
    %42 = vector.load %arg13[%c20_39, %c0_40] : memref<55x32xbf16, #tpu.memory_space<vmem>>, vector<16x32xbf16>
    %c21 = arith.constant 21 : index
    %c0_41 = arith.constant 0 : index
    %43 = vector.load %arg13[%c21, %c0_41] : memref<55x32xbf16, #tpu.memory_space<vmem>>, vector<16x32xbf16>
    %c22 = arith.constant 22 : index
    %c0_42 = arith.constant 0 : index
    %44 = vector.load %arg13[%c22, %c0_42] : memref<55x32xbf16, #tpu.memory_space<vmem>>, vector<16x32xbf16>
    %c23 = arith.constant 23 : index
    %c0_43 = arith.constant 0 : index
    %45 = vector.load %arg13[%c23, %c0_43] : memref<55x32xbf16, #tpu.memory_space<vmem>>, vector<16x32xbf16>
    %46 = tpu.concatenate %38, %39, %40, %41, %42, %43, %44, %45 in 1 : vector<16x32xbf16>, vector<16x32xbf16>, vector<16x32xbf16>, vector<16x32xbf16>, vector<16x32xbf16>, vector<16x32xbf16>, vector<16x32xbf16>, vector<16x32xbf16> -> vector<16x256xbf16>
    %c512 = arith.constant 512 : index
    %c0_44 = arith.constant 0 : index
    %47 = vector.load %arg4[%c512, %c0_44] : memref<1280x128xbf16, #tpu.memory_space<vmem>>, vector<256x128xbf16>
    %cst_45 = arith.constant dense<0.000000e+00> : vector<16x128xf32>
    %48 = tpu.matmul %46, %47, %cst_45 {dimension_numbers = #tpu.dot_dimension_numbers<[1], [0], [0], [1], [0, 0, 1, 1], [], []>} : vector<16x256xbf16>, vector<256x128xbf16>, vector<16x128xf32> -> vector<16x128xf32>
    %49 = arith.addf %37, %48 : vector<16x128xf32>
    %c24 = arith.constant 24 : index
    %c0_46 = arith.constant 0 : index
    %50 = vector.load %arg13[%c24, %c0_46] : memref<55x32xbf16, #tpu.memory_space<vmem>>, vector<16x32xbf16>
    %c25 = arith.constant 25 : index
    %c0_47 = arith.constant 0 : index
    %51 = vector.load %arg13[%c25, %c0_47] : memref<55x32xbf16, #tpu.memory_space<vmem>>, vector<16x32xbf16>
    %c26 = arith.constant 26 : index
    %c0_48 = arith.constant 0 : index
    %52 = vector.load %arg13[%c26, %c0_48] : memref<55x32xbf16, #tpu.memory_space<vmem>>, vector<16x32xbf16>
    %c27 = arith.constant 27 : index
    %c0_49 = arith.constant 0 : index
    %53 = vector.load %arg13[%c27, %c0_49] : memref<55x32xbf16, #tpu.memory_space<vmem>>, vector<16x32xbf16>
    %c28 = arith.constant 28 : index
    %c0_50 = arith.constant 0 : index
    %54 = vector.load %arg13[%c28, %c0_50] : memref<55x32xbf16, #tpu.memory_space<vmem>>, vector<16x32xbf16>
    %c29 = arith.constant 29 : index
    %c0_51 = arith.constant 0 : index
    %55 = vector.load %arg13[%c29, %c0_51] : memref<55x32xbf16, #tpu.memory_space<vmem>>, vector<16x32xbf16>
    %c30 = arith.constant 30 : index
    %c0_52 = arith.constant 0 : index
    %56 = vector.load %arg13[%c30, %c0_52] : memref<55x32xbf16, #tpu.memory_space<vmem>>, vector<16x32xbf16>
    %c31 = arith.constant 31 : index
    %c0_53 = arith.constant 0 : index
    %57 = vector.load %arg13[%c31, %c0_53] : memref<55x32xbf16, #tpu.memory_space<vmem>>, vector<16x32xbf16>
    %58 = tpu.concatenate %50, %51, %52, %53, %54, %55, %56, %57 in 1 : vector<16x32xbf16>, vector<16x32xbf16>, vector<16x32xbf16>, vector<16x32xbf16>, vector<16x32xbf16>, vector<16x32xbf16>, vector<16x32xbf16>, vector<16x32xbf16> -> vector<16x256xbf16>
    %c768 = arith.constant 768 : index
    %c0_54 = arith.constant 0 : index
    %59 = vector.load %arg4[%c768, %c0_54] : memref<1280x128xbf16, #tpu.memory_space<vmem>>, vector<256x128xbf16>
    %cst_55 = arith.constant dense<0.000000e+00> : vector<16x128xf32>
    %60 = tpu.matmul %58, %59, %cst_55 {dimension_numbers = #tpu.dot_dimension_numbers<[1], [0], [0], [1], [0, 0, 1, 1], [], []>} : vector<16x256xbf16>, vector<256x128xbf16>, vector<16x128xf32> -> vector<16x128xf32>
    %61 = arith.addf %49, %60 : vector<16x128xf32>
    %c32 = arith.constant 32 : index
    %c0_56 = arith.constant 0 : index
    %62 = vector.load %arg13[%c32, %c0_56] : memref<55x32xbf16, #tpu.memory_space<vmem>>, vector<16x32xbf16>
    %c33 = arith.constant 33 : index
    %c0_57 = arith.constant 0 : index
    %63 = vector.load %arg13[%c33, %c0_57] : memref<55x32xbf16, #tpu.memory_space<vmem>>, vector<16x32xbf16>
    %c34 = arith.constant 34 : index
    %c0_58 = arith.constant 0 : index
    %64 = vector.load %arg13[%c34, %c0_58] : memref<55x32xbf16, #tpu.memory_space<vmem>>, vector<16x32xbf16>
    %c35 = arith.constant 35 : index
    %c0_59 = arith.constant 0 : index
    %65 = vector.load %arg13[%c35, %c0_59] : memref<55x32xbf16, #tpu.memory_space<vmem>>, vector<16x32xbf16>
    %c36_60 = arith.constant 36 : index
    %c0_61 = arith.constant 0 : index
    %66 = vector.load %arg13[%c36_60, %c0_61] : memref<55x32xbf16, #tpu.memory_space<vmem>>, vector<16x32xbf16>
    %c37 = arith.constant 37 : index
    %c0_62 = arith.constant 0 : index
    %67 = vector.load %arg13[%c37, %c0_62] : memref<55x32xbf16, #tpu.memory_space<vmem>>, vector<16x32xbf16>
    %c38 = arith.constant 38 : index
    %c0_63 = arith.constant 0 : index
    %68 = vector.load %arg13[%c38, %c0_63] : memref<55x32xbf16, #tpu.memory_space<vmem>>, vector<16x32xbf16>
    %c39 = arith.constant 39 : index
    %c0_64 = arith.constant 0 : index
    %69 = vector.load %arg13[%c39, %c0_64] : memref<55x32xbf16, #tpu.memory_space<vmem>>, vector<16x32xbf16>
    %70 = tpu.concatenate %62, %63, %64, %65, %66, %67, %68, %69 in 1 : vector<16x32xbf16>, vector<16x32xbf16>, vector<16x32xbf16>, vector<16x32xbf16>, vector<16x32xbf16>, vector<16x32xbf16>, vector<16x32xbf16>, vector<16x32xbf16> -> vector<16x256xbf16>
    %c1024 = arith.constant 1024 : index
    %c0_65 = arith.constant 0 : index
    %71 = vector.load %arg4[%c1024, %c0_65] : memref<1280x128xbf16, #tpu.memory_space<vmem>>, vector<256x128xbf16>
    %cst_66 = arith.constant dense<0.000000e+00> : vector<16x128xf32>
    %72 = tpu.matmul %70, %71, %cst_66 {dimension_numbers = #tpu.dot_dimension_numbers<[1], [0], [0], [1], [0, 0, 1, 1], [], []>} : vector<16x256xbf16>, vector<256x128xbf16>, vector<16x128xf32> -> vector<16x128xf32>
    %73 = arith.addf %61, %72 : vector<16x128xf32>
    %cst_67 = arith.constant 0xFF80 : bf16
    %74 = vector.broadcast %cst_67 : bf16 to vector<1x1x128xbf16>
    %75 = vector.extract_strided_slice %0 {offsets = [0, 0, 0], sizes = [1, 15, 128], strides = [1, 1, 1]} : vector<1x16x128xbf16> to vector<1x15x128xbf16>
    %76 = tpu.concatenate %74, %75 in 1 : vector<1x1x128xbf16>, vector<1x15x128xbf16> -> vector<1x16x128xbf16>
    %77 = vector.extract_strided_slice %0 {offsets = [0, 1, 0], sizes = [1, 15, 128], strides = [1, 1, 1]} : vector<1x16x128xbf16> to vector<1x15x128xbf16>
    %78 = tpu.concatenate %77, %74 in 1 : vector<1x15x128xbf16>, vector<1x1x128xbf16> -> vector<1x16x128xbf16>
    %79 = arith.maximumf %76, %0 : vector<1x16x128xbf16>
    %80 = arith.maximumf %79, %78 : vector<1x16x128xbf16>
    %81 = vector.shape_cast %80 : vector<1x16x128xbf16> to vector<16x128xbf16>
    %c0_68 = arith.constant 0 : index
    %c0_69 = arith.constant 0 : index
    %82 = vector.load %arg5[%c0_68, %c0_69] : memref<128x128xbf16, #tpu.memory_space<vmem>>, vector<128x128xbf16>
    %cst_70 = arith.constant dense<0.000000e+00> : vector<16x128xf32>
    %83 = tpu.matmul %81, %82, %cst_70 {dimension_numbers = #tpu.dot_dimension_numbers<[1], [0], [0], [1], [0, 0, 1, 1], [], []>} : vector<16x128xbf16>, vector<128x128xbf16>, vector<16x128xf32> -> vector<16x128xf32>
    %84 = arith.addf %73, %83 : vector<16x128xf32>
    %c0_71 = arith.constant 0 : index
    %c0_72 = arith.constant 0 : index
    %85 = vector.load %arg6[%c0_71, %c0_72] : memref<1x128xf32, #tpu.memory_space<vmem>>, vector<1x128xf32>
    %86 = vector.broadcast %85 : vector<1x128xf32> to vector<16x128xf32>
    %87 = arith.addf %84, %86 : vector<16x128xf32>
    %cst_73 = arith.constant 0.000000e+00 : f32
    %88 = vector.broadcast %cst_73 : f32 to vector<16x128xf32>
    %89 = arith.maximumf %87, %88 : vector<16x128xf32>
    %c0_74 = arith.constant 0 : index
    %c0_75 = arith.constant 0 : index
    %c0_76 = arith.constant 0 : index
    %90 = vector.load %arg7[%c0_74, %c0_75, %c0_76] : memref<1x16x128xbf16, #tpu.memory_space<vmem>>, vector<1x16x128xbf16>
    %91 = vector.shape_cast %90 : vector<1x16x128xbf16> to vector<16x128xbf16>
    %c0_77 = arith.constant 0 : index
    %c0_78 = arith.constant 0 : index
    %92 = vector.load %arg8[%c0_77, %c0_78] : memref<128x128xbf16, #tpu.memory_space<vmem>>, vector<128x128xbf16>
    %cst_79 = arith.constant dense<0.000000e+00> : vector<16x128xf32>
    %93 = tpu.matmul %91, %92, %cst_79 {dimension_numbers = #tpu.dot_dimension_numbers<[1], [0], [0], [1], [0, 0, 1, 1], [], []>} : vector<16x128xbf16>, vector<128x128xbf16>, vector<16x128xf32> -> vector<16x128xf32>
    %94 = arith.addf %89, %93 : vector<16x128xf32>
    %c0_80 = arith.constant 0 : index
    %c0_81 = arith.constant 0 : index
    %95 = vector.load %arg9[%c0_80, %c0_81] : memref<1x128xf32, #tpu.memory_space<vmem>>, vector<1x128xf32>
    %96 = vector.broadcast %95 : vector<1x128xf32> to vector<16x128xf32>
    %97 = arith.addf %94, %96 : vector<16x128xf32>
    %cst_82 = arith.constant 0.000000e+00 : f32
    %98 = vector.broadcast %cst_82 : f32 to vector<16x128xf32>
    %99 = arith.maximumf %97, %98 : vector<16x128xf32>
    %100 = vector.shape_cast %99 : vector<16x128xf32> to vector<1x16x128xf32>
    %cst_83 = arith.constant dense<0.000000e+00> : vector<1x128xf32>
    %101 = vector.multi_reduction <add>, %100, %cst_83 [1] : vector<1x16x128xf32> to vector<1x128xf32>
    %cst_84 = arith.constant 1.600000e+01 : f32
    %102 = vector.broadcast %cst_84 : f32 to vector<1x128xf32>
    %103 = arith.divf %101, %102 : vector<1x128xf32>
    %c0_85 = arith.constant 0 : index
    %c0_86 = arith.constant 0 : index
    %104 = vector.load %arg10[%c0_85, %c0_86] : memref<128x5xf32, #tpu.memory_space<vmem>>, vector<128x5xf32>
    %cst_87 = arith.constant dense<0.000000e+00> : vector<1x5xf32>
    %105 = tpu.matmul %103, %104, %cst_87 {dimension_numbers = #tpu.dot_dimension_numbers<[1], [0], [0], [1], [0, 0, 1, 1], [], []>} : vector<1x128xf32>, vector<128x5xf32>, vector<1x5xf32> -> vector<1x5xf32>
    %c0_88 = arith.constant 0 : index
    %c0_89 = arith.constant 0 : index
    %106 = vector.load %arg11[%c0_88, %c0_89] : memref<1x5xf32, #tpu.memory_space<vmem>>, vector<1x5xf32>
    %107 = arith.addf %105, %106 : vector<1x5xf32>
    %108 = vector.shape_cast %107 : vector<1x5xf32> to vector<1x1x5xf32>
    %c0_90 = arith.constant 0 : index
    %c0_91 = arith.constant 0 : index
    %c0_92 = arith.constant 0 : index
    %109 = vector.load %arg12[%c0_90, %c0_91, %c0_92] : memref<1x1x5xf32, #tpu.memory_space<vmem>>, vector<1x1x5xf32>
    tpu.vector_store %arg12[%c0_90, %c0_91, %c0_92], %108 {strides = array<i32>} : memref<1x1x5xf32, #tpu.memory_space<vmem>>, vector<1x1x5xf32>,
    return
  }
  func.func @transform_0(%arg0: i32) -> (i32, i32, i32) {
    %c0_i32 = arith.constant 0 : i32
    %c0_i32_0 = arith.constant 0 : i32
    %c0_i32_1 = arith.constant 0 : i32
    return %arg0, %c0_i32, %c0_i32_0 : i32, i32, i32
  }
  func.func @transform_1(%arg0: i32) -> (i32, i32) {
    %c0_i32 = arith.constant 0 : i32
    %c0_i32_0 = arith.constant 0 : i32
    %c0_i32_1 = arith.constant 0 : i32
    return %c0_i32, %c0_i32_0 : i32, i32
  }
  func.func @transform_2(%arg0: i32) -> (i32, i32) {
    %c0_i32 = arith.constant 0 : i32
    %c0_i32_0 = arith.constant 0 : i32
    %c0_i32_1 = arith.constant 0 : i32
    return %c0_i32, %c0_i32_0 : i32, i32
  }
  func.func @transform_3(%arg0: i32) -> (i32, i32) {
    %c0_i32 = arith.constant 0 : i32
    %c0_i32_0 = arith.constant 0 : i32
    %c0_i32_1 = arith.constant 0 : i32
    return %c0_i32, %c0_i32_0 : i32, i32
  }
  func.func @transform_4(%arg0: i32) -> (i32, i32) {
    %c0_i32 = arith.constant 0 : i32
    %c0_i32_0 = arith.constant 0 : i32
    %c0_i32_1 = arith.constant 0 : i32
    return %c0_i32, %c0_i32_0 : i32, i32
  }
  func.func @transform_5(%arg0: i32) -> (i32, i32) {
    %c0_i32 = arith.constant 0 : i32
    %c0_i32_0 = arith.constant 0 : i32
    %c0_i32_1 = arith.constant 0 : i32
    return %c0_i32, %c0_i32_0 : i32, i32
  }
  func.func @transform_6(%arg0: i32) -> (i32, i32, i32) {
    %c0_i32 = arith.constant 0 : i32
    %c0_i32_0 = arith.constant 0 : i32
    %c0_i32_1 = arith.constant 0 : i32
    return %arg0, %c0_i32, %c0_i32_0 : i32, i32, i32
  }
  func.func @transform_7(%arg0: i32) -> (i32, i32) {
    %c0_i32 = arith.constant 0 : i32
    %c0_i32_0 = arith.constant 0 : i32
    %c0_i32_1 = arith.constant 0 : i32
    return %c0_i32, %c0_i32_0 : i32, i32
  }
  func.func @transform_8(%arg0: i32) -> (i32, i32) {
    %c0_i32 = arith.constant 0 : i32
    %c0_i32_0 = arith.constant 0 : i32
    %c0_i32_1 = arith.constant 0 : i32
    return %c0_i32, %c0_i32_0 : i32, i32
  }
  func.func @transform_9(%arg0: i32) -> (i32, i32) {
    %c0_i32 = arith.constant 0 : i32
    %c0_i32_0 = arith.constant 0 : i32
    %c0_i32_1 = arith.constant 0 : i32
    return %c0_i32, %c0_i32_0 : i32, i32
  }
  func.func @transform_10(%arg0: i32) -> (i32, i32) {
    %c0_i32 = arith.constant 0 : i32
    %c0_i32_0 = arith.constant 0 : i32
    %c0_i32_1 = arith.constant 0 : i32
    return %c0_i32, %c0_i32_0 : i32, i32
  }
  func.func @transform_11(%arg0: i32) -> (i32, i32, i32) {
    %c0_i32 = arith.constant 0 : i32
    %c0_i32_0 = arith.constant 0 : i32
    %c0_i32_1 = arith.constant 0 : i32
    return %arg0, %c0_i32, %c0_i32_0 : i32, i32, i32
  }
}

module attributes {stable_mosaic.version = 11 : i64} {
  func.func @kernel(%arg0: i32, %arg1: memref<1x16x128xbf16, #tpu.memory_space<vmem>>, %arg2: memref<128x32xbf16, #tpu.memory_space<vmem>>, %arg3: memref<1x32xf32, #tpu.memory_space<vmem>>, %arg4: memref<1280x128xbf16, #tpu.memory_space<vmem>>, %arg5: memref<128x128xbf16, #tpu.memory_space<vmem>>, %arg6: memref<1x128xf32, #tpu.memory_space<vmem>>, %arg7: memref<1x16x4xbf16, #tpu.memory_space<vmem>>, %arg8: memref<4x128xbf16, #tpu.memory_space<vmem>>, %arg9: memref<1x128xf32, #tpu.memory_space<vmem>>, %arg10: memref<1x16x128xbf16, #tpu.memory_space<vmem>>, %arg11: memref<1x16x128xbf16, #tpu.memory_space<vmem>>, %arg12: memref<55x32xbf16, #tpu.memory_space<vmem>>) attributes {dimension_semantics = [#tpu.dimension_semantics<parallel>], iteration_bounds = array<i64: 2>, scalar_prefetch = 0 : i64, scratch_operands = 1 : i64, tpu.core_type = #tpu.core_type<tc>, window_params = [{transform_indices = @transform_0, window_bounds = array<i64: 1, 16, 128>}, {pipeline_mode = #tpu.pipeline_mode<synchronous>, transform_indices = @transform_1, window_bounds = array<i64: 128, 32>}, {pipeline_mode = #tpu.pipeline_mode<synchronous>, transform_indices = @transform_2, window_bounds = array<i64: 1, 32>}, {pipeline_mode = #tpu.pipeline_mode<synchronous>, transform_indices = @transform_3, window_bounds = array<i64: 1280, 128>}, {pipeline_mode = #tpu.pipeline_mode<synchronous>, transform_indices = @transform_4, window_bounds = array<i64: 128, 128>}, {pipeline_mode = #tpu.pipeline_mode<synchronous>, transform_indices = @transform_5, window_bounds = array<i64: 1, 128>}, {transform_indices = @transform_6, window_bounds = array<i64: 1, 16, 4>}, {pipeline_mode = #tpu.pipeline_mode<synchronous>, transform_indices = @transform_7, window_bounds = array<i64: 4, 128>}, {pipeline_mode = #tpu.pipeline_mode<synchronous>, transform_indices = @transform_8, window_bounds = array<i64: 1, 128>}, {transform_indices = @transform_9, window_bounds = array<i64: 1, 16, 128>}, {transform_indices = @transform_10, window_bounds = array<i64: 1, 16, 128>}]} {
    %c0 = arith.constant 0 : index
    %c0_0 = arith.constant 0 : index
    %c0_1 = arith.constant 0 : index
    %0 = vector.load %arg1[%c0, %c0_0, %c0_1] : memref<1x16x128xbf16, #tpu.memory_space<vmem>>, vector<1x16x128xbf16>
    %1 = vector.shape_cast %0 : vector<1x16x128xbf16> to vector<16x128xbf16>
    %c0_2 = arith.constant 0 : index
    %c0_3 = arith.constant 0 : index
    %2 = vector.load %arg2[%c0_2, %c0_3] : memref<128x32xbf16, #tpu.memory_space<vmem>>, vector<128x32xbf16>
    %cst = arith.constant dense<0.000000e+00> : vector<16x32xf32>
    %3 = tpu.matmul %1, %2, %cst {dimension_numbers = #tpu.dot_dimension_numbers<[1], [0], [0], [1], [0, 0, 1, 1], [], []>} : vector<16x128xbf16>, vector<128x32xbf16>, vector<16x32xf32> -> vector<16x32xf32>
    %c0_4 = arith.constant 0 : index
    %c0_5 = arith.constant 0 : index
    %4 = vector.load %arg3[%c0_4, %c0_5] : memref<1x32xf32, #tpu.memory_space<vmem>>, vector<1x32xf32>
    %5 = vector.broadcast %4 : vector<1x32xf32> to vector<16x32xf32>
    %6 = arith.addf %3, %5 : vector<16x32xf32>
    %7 = arith.truncf %6 : vector<16x32xf32> to vector<16x32xbf16>
    %cst_6 = arith.constant 0.000000e+00 : bf16
    %8 = vector.broadcast %cst_6 : bf16 to vector<20x32xbf16>
    %cst_7 = arith.constant 0.000000e+00 : bf16
    %9 = vector.broadcast %cst_7 : bf16 to vector<19x32xbf16>
    %c0_8 = arith.constant 0 : index
    %c0_9 = arith.constant 0 : index
    %10 = vector.load %arg12[%c0_8, %c0_9] : memref<55x32xbf16, #tpu.memory_space<vmem>>, vector<20x32xbf16>
    tpu.vector_store %arg12[%c0_8, %c0_9], %8 {strides = array<i32>} : memref<55x32xbf16, #tpu.memory_space<vmem>>, vector<20x32xbf16>,
    %c20 = arith.constant 20 : index
    %c0_10 = arith.constant 0 : index
    %11 = vector.load %arg12[%c20, %c0_10] : memref<55x32xbf16, #tpu.memory_space<vmem>>, vector<16x32xbf16>
    tpu.vector_store %arg12[%c20, %c0_10], %7 {strides = array<i32>} : memref<55x32xbf16, #tpu.memory_space<vmem>>, vector<16x32xbf16>,
    %c36 = arith.constant 36 : index
    %c0_11 = arith.constant 0 : index
    %12 = vector.load %arg12[%c36, %c0_11] : memref<55x32xbf16, #tpu.memory_space<vmem>>, vector<19x32xbf16>
    tpu.vector_store %arg12[%c36, %c0_11], %9 {strides = array<i32>} : memref<55x32xbf16, #tpu.memory_space<vmem>>, vector<19x32xbf16>,
    %cst_12 = arith.constant 0.000000e+00 : f32
    %13 = vector.broadcast %cst_12 : f32 to vector<16x128xf32>
    %c0_13 = arith.constant 0 : index
    %c0_14 = arith.constant 0 : index
    %14 = vector.load %arg12[%c0_13, %c0_14] : memref<55x32xbf16, #tpu.memory_space<vmem>>, vector<16x32xbf16>
    %c1 = arith.constant 1 : index
    %c0_15 = arith.constant 0 : index
    %15 = vector.load %arg12[%c1, %c0_15] : memref<55x32xbf16, #tpu.memory_space<vmem>>, vector<16x32xbf16>
    %c2 = arith.constant 2 : index
    %c0_16 = arith.constant 0 : index
    %16 = vector.load %arg12[%c2, %c0_16] : memref<55x32xbf16, #tpu.memory_space<vmem>>, vector<16x32xbf16>
    %c3 = arith.constant 3 : index
    %c0_17 = arith.constant 0 : index
    %17 = vector.load %arg12[%c3, %c0_17] : memref<55x32xbf16, #tpu.memory_space<vmem>>, vector<16x32xbf16>
    %c4 = arith.constant 4 : index
    %c0_18 = arith.constant 0 : index
    %18 = vector.load %arg12[%c4, %c0_18] : memref<55x32xbf16, #tpu.memory_space<vmem>>, vector<16x32xbf16>
    %c5 = arith.constant 5 : index
    %c0_19 = arith.constant 0 : index
    %19 = vector.load %arg12[%c5, %c0_19] : memref<55x32xbf16, #tpu.memory_space<vmem>>, vector<16x32xbf16>
    %c6 = arith.constant 6 : index
    %c0_20 = arith.constant 0 : index
    %20 = vector.load %arg12[%c6, %c0_20] : memref<55x32xbf16, #tpu.memory_space<vmem>>, vector<16x32xbf16>
    %c7 = arith.constant 7 : index
    %c0_21 = arith.constant 0 : index
    %21 = vector.load %arg12[%c7, %c0_21] : memref<55x32xbf16, #tpu.memory_space<vmem>>, vector<16x32xbf16>
    %22 = tpu.concatenate %14, %15, %16, %17, %18, %19, %20, %21 in 1 : vector<16x32xbf16>, vector<16x32xbf16>, vector<16x32xbf16>, vector<16x32xbf16>, vector<16x32xbf16>, vector<16x32xbf16>, vector<16x32xbf16>, vector<16x32xbf16> -> vector<16x256xbf16>
    %c0_22 = arith.constant 0 : index
    %c0_23 = arith.constant 0 : index
    %23 = vector.load %arg4[%c0_22, %c0_23] : memref<1280x128xbf16, #tpu.memory_space<vmem>>, vector<256x128xbf16>
    %cst_24 = arith.constant dense<0.000000e+00> : vector<16x128xf32>
    %24 = tpu.matmul %22, %23, %cst_24 {dimension_numbers = #tpu.dot_dimension_numbers<[1], [0], [0], [1], [0, 0, 1, 1], [], []>} : vector<16x256xbf16>, vector<256x128xbf16>, vector<16x128xf32> -> vector<16x128xf32>
    %25 = arith.addf %13, %24 : vector<16x128xf32>
    %c8 = arith.constant 8 : index
    %c0_25 = arith.constant 0 : index
    %26 = vector.load %arg12[%c8, %c0_25] : memref<55x32xbf16, #tpu.memory_space<vmem>>, vector<16x32xbf16>
    %c9 = arith.constant 9 : index
    %c0_26 = arith.constant 0 : index
    %27 = vector.load %arg12[%c9, %c0_26] : memref<55x32xbf16, #tpu.memory_space<vmem>>, vector<16x32xbf16>
    %c10 = arith.constant 10 : index
    %c0_27 = arith.constant 0 : index
    %28 = vector.load %arg12[%c10, %c0_27] : memref<55x32xbf16, #tpu.memory_space<vmem>>, vector<16x32xbf16>
    %c11 = arith.constant 11 : index
    %c0_28 = arith.constant 0 : index
    %29 = vector.load %arg12[%c11, %c0_28] : memref<55x32xbf16, #tpu.memory_space<vmem>>, vector<16x32xbf16>
    %c12 = arith.constant 12 : index
    %c0_29 = arith.constant 0 : index
    %30 = vector.load %arg12[%c12, %c0_29] : memref<55x32xbf16, #tpu.memory_space<vmem>>, vector<16x32xbf16>
    %c13 = arith.constant 13 : index
    %c0_30 = arith.constant 0 : index
    %31 = vector.load %arg12[%c13, %c0_30] : memref<55x32xbf16, #tpu.memory_space<vmem>>, vector<16x32xbf16>
    %c14 = arith.constant 14 : index
    %c0_31 = arith.constant 0 : index
    %32 = vector.load %arg12[%c14, %c0_31] : memref<55x32xbf16, #tpu.memory_space<vmem>>, vector<16x32xbf16>
    %c15 = arith.constant 15 : index
    %c0_32 = arith.constant 0 : index
    %33 = vector.load %arg12[%c15, %c0_32] : memref<55x32xbf16, #tpu.memory_space<vmem>>, vector<16x32xbf16>
    %34 = tpu.concatenate %26, %27, %28, %29, %30, %31, %32, %33 in 1 : vector<16x32xbf16>, vector<16x32xbf16>, vector<16x32xbf16>, vector<16x32xbf16>, vector<16x32xbf16>, vector<16x32xbf16>, vector<16x32xbf16>, vector<16x32xbf16> -> vector<16x256xbf16>
    %c256 = arith.constant 256 : index
    %c0_33 = arith.constant 0 : index
    %35 = vector.load %arg4[%c256, %c0_33] : memref<1280x128xbf16, #tpu.memory_space<vmem>>, vector<256x128xbf16>
    %cst_34 = arith.constant dense<0.000000e+00> : vector<16x128xf32>
    %36 = tpu.matmul %34, %35, %cst_34 {dimension_numbers = #tpu.dot_dimension_numbers<[1], [0], [0], [1], [0, 0, 1, 1], [], []>} : vector<16x256xbf16>, vector<256x128xbf16>, vector<16x128xf32> -> vector<16x128xf32>
    %37 = arith.addf %25, %36 : vector<16x128xf32>
    %c16 = arith.constant 16 : index
    %c0_35 = arith.constant 0 : index
    %38 = vector.load %arg12[%c16, %c0_35] : memref<55x32xbf16, #tpu.memory_space<vmem>>, vector<16x32xbf16>
    %c17 = arith.constant 17 : index
    %c0_36 = arith.constant 0 : index
    %39 = vector.load %arg12[%c17, %c0_36] : memref<55x32xbf16, #tpu.memory_space<vmem>>, vector<16x32xbf16>
    %c18 = arith.constant 18 : index
    %c0_37 = arith.constant 0 : index
    %40 = vector.load %arg12[%c18, %c0_37] : memref<55x32xbf16, #tpu.memory_space<vmem>>, vector<16x32xbf16>
    %c19 = arith.constant 19 : index
    %c0_38 = arith.constant 0 : index
    %41 = vector.load %arg12[%c19, %c0_38] : memref<55x32xbf16, #tpu.memory_space<vmem>>, vector<16x32xbf16>
    %c20_39 = arith.constant 20 : index
    %c0_40 = arith.constant 0 : index
    %42 = vector.load %arg12[%c20_39, %c0_40] : memref<55x32xbf16, #tpu.memory_space<vmem>>, vector<16x32xbf16>
    %c21 = arith.constant 21 : index
    %c0_41 = arith.constant 0 : index
    %43 = vector.load %arg12[%c21, %c0_41] : memref<55x32xbf16, #tpu.memory_space<vmem>>, vector<16x32xbf16>
    %c22 = arith.constant 22 : index
    %c0_42 = arith.constant 0 : index
    %44 = vector.load %arg12[%c22, %c0_42] : memref<55x32xbf16, #tpu.memory_space<vmem>>, vector<16x32xbf16>
    %c23 = arith.constant 23 : index
    %c0_43 = arith.constant 0 : index
    %45 = vector.load %arg12[%c23, %c0_43] : memref<55x32xbf16, #tpu.memory_space<vmem>>, vector<16x32xbf16>
    %46 = tpu.concatenate %38, %39, %40, %41, %42, %43, %44, %45 in 1 : vector<16x32xbf16>, vector<16x32xbf16>, vector<16x32xbf16>, vector<16x32xbf16>, vector<16x32xbf16>, vector<16x32xbf16>, vector<16x32xbf16>, vector<16x32xbf16> -> vector<16x256xbf16>
    %c512 = arith.constant 512 : index
    %c0_44 = arith.constant 0 : index
    %47 = vector.load %arg4[%c512, %c0_44] : memref<1280x128xbf16, #tpu.memory_space<vmem>>, vector<256x128xbf16>
    %cst_45 = arith.constant dense<0.000000e+00> : vector<16x128xf32>
    %48 = tpu.matmul %46, %47, %cst_45 {dimension_numbers = #tpu.dot_dimension_numbers<[1], [0], [0], [1], [0, 0, 1, 1], [], []>} : vector<16x256xbf16>, vector<256x128xbf16>, vector<16x128xf32> -> vector<16x128xf32>
    %49 = arith.addf %37, %48 : vector<16x128xf32>
    %c24 = arith.constant 24 : index
    %c0_46 = arith.constant 0 : index
    %50 = vector.load %arg12[%c24, %c0_46] : memref<55x32xbf16, #tpu.memory_space<vmem>>, vector<16x32xbf16>
    %c25 = arith.constant 25 : index
    %c0_47 = arith.constant 0 : index
    %51 = vector.load %arg12[%c25, %c0_47] : memref<55x32xbf16, #tpu.memory_space<vmem>>, vector<16x32xbf16>
    %c26 = arith.constant 26 : index
    %c0_48 = arith.constant 0 : index
    %52 = vector.load %arg12[%c26, %c0_48] : memref<55x32xbf16, #tpu.memory_space<vmem>>, vector<16x32xbf16>
    %c27 = arith.constant 27 : index
    %c0_49 = arith.constant 0 : index
    %53 = vector.load %arg12[%c27, %c0_49] : memref<55x32xbf16, #tpu.memory_space<vmem>>, vector<16x32xbf16>
    %c28 = arith.constant 28 : index
    %c0_50 = arith.constant 0 : index
    %54 = vector.load %arg12[%c28, %c0_50] : memref<55x32xbf16, #tpu.memory_space<vmem>>, vector<16x32xbf16>
    %c29 = arith.constant 29 : index
    %c0_51 = arith.constant 0 : index
    %55 = vector.load %arg12[%c29, %c0_51] : memref<55x32xbf16, #tpu.memory_space<vmem>>, vector<16x32xbf16>
    %c30 = arith.constant 30 : index
    %c0_52 = arith.constant 0 : index
    %56 = vector.load %arg12[%c30, %c0_52] : memref<55x32xbf16, #tpu.memory_space<vmem>>, vector<16x32xbf16>
    %c31 = arith.constant 31 : index
    %c0_53 = arith.constant 0 : index
    %57 = vector.load %arg12[%c31, %c0_53] : memref<55x32xbf16, #tpu.memory_space<vmem>>, vector<16x32xbf16>
    %58 = tpu.concatenate %50, %51, %52, %53, %54, %55, %56, %57 in 1 : vector<16x32xbf16>, vector<16x32xbf16>, vector<16x32xbf16>, vector<16x32xbf16>, vector<16x32xbf16>, vector<16x32xbf16>, vector<16x32xbf16>, vector<16x32xbf16> -> vector<16x256xbf16>
    %c768 = arith.constant 768 : index
    %c0_54 = arith.constant 0 : index
    %59 = vector.load %arg4[%c768, %c0_54] : memref<1280x128xbf16, #tpu.memory_space<vmem>>, vector<256x128xbf16>
    %cst_55 = arith.constant dense<0.000000e+00> : vector<16x128xf32>
    %60 = tpu.matmul %58, %59, %cst_55 {dimension_numbers = #tpu.dot_dimension_numbers<[1], [0], [0], [1], [0, 0, 1, 1], [], []>} : vector<16x256xbf16>, vector<256x128xbf16>, vector<16x128xf32> -> vector<16x128xf32>
    %61 = arith.addf %49, %60 : vector<16x128xf32>
    %c32 = arith.constant 32 : index
    %c0_56 = arith.constant 0 : index
    %62 = vector.load %arg12[%c32, %c0_56] : memref<55x32xbf16, #tpu.memory_space<vmem>>, vector<16x32xbf16>
    %c33 = arith.constant 33 : index
    %c0_57 = arith.constant 0 : index
    %63 = vector.load %arg12[%c33, %c0_57] : memref<55x32xbf16, #tpu.memory_space<vmem>>, vector<16x32xbf16>
    %c34 = arith.constant 34 : index
    %c0_58 = arith.constant 0 : index
    %64 = vector.load %arg12[%c34, %c0_58] : memref<55x32xbf16, #tpu.memory_space<vmem>>, vector<16x32xbf16>
    %c35 = arith.constant 35 : index
    %c0_59 = arith.constant 0 : index
    %65 = vector.load %arg12[%c35, %c0_59] : memref<55x32xbf16, #tpu.memory_space<vmem>>, vector<16x32xbf16>
    %c36_60 = arith.constant 36 : index
    %c0_61 = arith.constant 0 : index
    %66 = vector.load %arg12[%c36_60, %c0_61] : memref<55x32xbf16, #tpu.memory_space<vmem>>, vector<16x32xbf16>
    %c37 = arith.constant 37 : index
    %c0_62 = arith.constant 0 : index
    %67 = vector.load %arg12[%c37, %c0_62] : memref<55x32xbf16, #tpu.memory_space<vmem>>, vector<16x32xbf16>
    %c38 = arith.constant 38 : index
    %c0_63 = arith.constant 0 : index
    %68 = vector.load %arg12[%c38, %c0_63] : memref<55x32xbf16, #tpu.memory_space<vmem>>, vector<16x32xbf16>
    %c39 = arith.constant 39 : index
    %c0_64 = arith.constant 0 : index
    %69 = vector.load %arg12[%c39, %c0_64] : memref<55x32xbf16, #tpu.memory_space<vmem>>, vector<16x32xbf16>
    %70 = tpu.concatenate %62, %63, %64, %65, %66, %67, %68, %69 in 1 : vector<16x32xbf16>, vector<16x32xbf16>, vector<16x32xbf16>, vector<16x32xbf16>, vector<16x32xbf16>, vector<16x32xbf16>, vector<16x32xbf16>, vector<16x32xbf16> -> vector<16x256xbf16>
    %c1024 = arith.constant 1024 : index
    %c0_65 = arith.constant 0 : index
    %71 = vector.load %arg4[%c1024, %c0_65] : memref<1280x128xbf16, #tpu.memory_space<vmem>>, vector<256x128xbf16>
    %cst_66 = arith.constant dense<0.000000e+00> : vector<16x128xf32>
    %72 = tpu.matmul %70, %71, %cst_66 {dimension_numbers = #tpu.dot_dimension_numbers<[1], [0], [0], [1], [0, 0, 1, 1], [], []>} : vector<16x256xbf16>, vector<256x128xbf16>, vector<16x128xf32> -> vector<16x128xf32>
    %73 = arith.addf %61, %72 : vector<16x128xf32>
    %cst_67 = arith.constant 0xFF80 : bf16
    %74 = vector.broadcast %cst_67 : bf16 to vector<1x1x128xbf16>
    %75 = vector.extract_strided_slice %0 {offsets = [0, 0, 0], sizes = [1, 15, 128], strides = [1, 1, 1]} : vector<1x16x128xbf16> to vector<1x15x128xbf16>
    %76 = tpu.concatenate %74, %75 in 1 : vector<1x1x128xbf16>, vector<1x15x128xbf16> -> vector<1x16x128xbf16>
    %77 = vector.extract_strided_slice %0 {offsets = [0, 1, 0], sizes = [1, 15, 128], strides = [1, 1, 1]} : vector<1x16x128xbf16> to vector<1x15x128xbf16>
    %78 = tpu.concatenate %77, %74 in 1 : vector<1x15x128xbf16>, vector<1x1x128xbf16> -> vector<1x16x128xbf16>
    %79 = arith.maximumf %76, %0 : vector<1x16x128xbf16>
    %80 = arith.maximumf %79, %78 : vector<1x16x128xbf16>
    %81 = vector.shape_cast %80 : vector<1x16x128xbf16> to vector<16x128xbf16>
    %c0_68 = arith.constant 0 : index
    %c0_69 = arith.constant 0 : index
    %82 = vector.load %arg5[%c0_68, %c0_69] : memref<128x128xbf16, #tpu.memory_space<vmem>>, vector<128x128xbf16>
    %cst_70 = arith.constant dense<0.000000e+00> : vector<16x128xf32>
    %83 = tpu.matmul %81, %82, %cst_70 {dimension_numbers = #tpu.dot_dimension_numbers<[1], [0], [0], [1], [0, 0, 1, 1], [], []>} : vector<16x128xbf16>, vector<128x128xbf16>, vector<16x128xf32> -> vector<16x128xf32>
    %84 = arith.addf %73, %83 : vector<16x128xf32>
    %c0_71 = arith.constant 0 : index
    %c0_72 = arith.constant 0 : index
    %85 = vector.load %arg6[%c0_71, %c0_72] : memref<1x128xf32, #tpu.memory_space<vmem>>, vector<1x128xf32>
    %86 = vector.broadcast %85 : vector<1x128xf32> to vector<16x128xf32>
    %87 = arith.addf %84, %86 : vector<16x128xf32>
    %cst_73 = arith.constant 0.000000e+00 : f32
    %88 = vector.broadcast %cst_73 : f32 to vector<16x128xf32>
    %89 = arith.maximumf %87, %88 : vector<16x128xf32>
    %c0_74 = arith.constant 0 : index
    %c0_75 = arith.constant 0 : index
    %c0_76 = arith.constant 0 : index
    %90 = vector.load %arg7[%c0_74, %c0_75, %c0_76] : memref<1x16x4xbf16, #tpu.memory_space<vmem>>, vector<1x16x4xbf16>
    %91 = vector.shape_cast %90 : vector<1x16x4xbf16> to vector<16x4xbf16>
    %c0_77 = arith.constant 0 : index
    %c0_78 = arith.constant 0 : index
    %92 = vector.load %arg8[%c0_77, %c0_78] : memref<4x128xbf16, #tpu.memory_space<vmem>>, vector<4x128xbf16>
    %cst_79 = arith.constant dense<0.000000e+00> : vector<16x128xf32>
    %93 = tpu.matmul %91, %92, %cst_79 {dimension_numbers = #tpu.dot_dimension_numbers<[1], [0], [0], [1], [0, 0, 1, 1], [], []>} : vector<16x4xbf16>, vector<4x128xbf16>, vector<16x128xf32> -> vector<16x128xf32>
    %94 = arith.addf %89, %93 : vector<16x128xf32>
    %c0_80 = arith.constant 0 : index
    %c0_81 = arith.constant 0 : index
    %95 = vector.load %arg9[%c0_80, %c0_81] : memref<1x128xf32, #tpu.memory_space<vmem>>, vector<1x128xf32>
    %96 = vector.broadcast %95 : vector<1x128xf32> to vector<16x128xf32>
    %97 = arith.addf %94, %96 : vector<16x128xf32>
    %98 = vector.shape_cast %97 : vector<16x128xf32> to vector<1x16x128xf32>
    %99 = arith.truncf %98 : vector<1x16x128xf32> to vector<1x16x128xbf16>
    %c0_82 = arith.constant 0 : index
    %c0_83 = arith.constant 0 : index
    %c0_84 = arith.constant 0 : index
    %100 = vector.load %arg10[%c0_82, %c0_83, %c0_84] : memref<1x16x128xbf16, #tpu.memory_space<vmem>>, vector<1x16x128xbf16>
    tpu.vector_store %arg10[%c0_82, %c0_83, %c0_84], %99 {strides = array<i32>} : memref<1x16x128xbf16, #tpu.memory_space<vmem>>, vector<1x16x128xbf16>,
    %cst_85 = arith.constant 0.000000e+00 : f32
    %101 = vector.broadcast %cst_85 : f32 to vector<16x128xf32>
    %102 = arith.maximumf %97, %101 : vector<16x128xf32>
    %103 = vector.shape_cast %102 : vector<16x128xf32> to vector<1x16x128xf32>
    %104 = arith.truncf %103 : vector<1x16x128xf32> to vector<1x16x128xbf16>
    %c0_86 = arith.constant 0 : index
    %c0_87 = arith.constant 0 : index
    %c0_88 = arith.constant 0 : index
    %105 = vector.load %arg11[%c0_86, %c0_87, %c0_88] : memref<1x16x128xbf16, #tpu.memory_space<vmem>>, vector<1x16x128xbf16>
    tpu.vector_store %arg11[%c0_86, %c0_87, %c0_88], %104 {strides = array<i32>} : memref<1x16x128xbf16, #tpu.memory_space<vmem>>, vector<1x16x128xbf16>,
    return
  }
  func.func @transform_0(%arg0: i32) -> (i32, i32, i32) {
    %c0_i32 = arith.constant 0 : i32
    %c0_i32_0 = arith.constant 0 : i32
    %c0_i32_1 = arith.constant 0 : i32
    return %arg0, %c0_i32, %c0_i32_0 : i32, i32, i32
  }
  func.func @transform_1(%arg0: i32) -> (i32, i32) {
    %c0_i32 = arith.constant 0 : i32
    %c0_i32_0 = arith.constant 0 : i32
    %c0_i32_1 = arith.constant 0 : i32
    return %c0_i32, %c0_i32_0 : i32, i32
  }
  func.func @transform_2(%arg0: i32) -> (i32, i32) {
    %c0_i32 = arith.constant 0 : i32
    %c0_i32_0 = arith.constant 0 : i32
    %c0_i32_1 = arith.constant 0 : i32
    return %c0_i32, %c0_i32_0 : i32, i32
  }
  func.func @transform_3(%arg0: i32) -> (i32, i32) {
    %c0_i32 = arith.constant 0 : i32
    %c0_i32_0 = arith.constant 0 : i32
    %c0_i32_1 = arith.constant 0 : i32
    return %c0_i32, %c0_i32_0 : i32, i32
  }
  func.func @transform_4(%arg0: i32) -> (i32, i32) {
    %c0_i32 = arith.constant 0 : i32
    %c0_i32_0 = arith.constant 0 : i32
    %c0_i32_1 = arith.constant 0 : i32
    return %c0_i32, %c0_i32_0 : i32, i32
  }
  func.func @transform_5(%arg0: i32) -> (i32, i32) {
    %c0_i32 = arith.constant 0 : i32
    %c0_i32_0 = arith.constant 0 : i32
    %c0_i32_1 = arith.constant 0 : i32
    return %c0_i32, %c0_i32_0 : i32, i32
  }
  func.func @transform_6(%arg0: i32) -> (i32, i32, i32) {
    %c0_i32 = arith.constant 0 : i32
    %c0_i32_0 = arith.constant 0 : i32
    %c0_i32_1 = arith.constant 0 : i32
    return %arg0, %c0_i32, %c0_i32_0 : i32, i32, i32
  }
  func.func @transform_7(%arg0: i32) -> (i32, i32) {
    %c0_i32 = arith.constant 0 : i32
    %c0_i32_0 = arith.constant 0 : i32
    %c0_i32_1 = arith.constant 0 : i32
    return %c0_i32, %c0_i32_0 : i32, i32
  }
  func.func @transform_8(%arg0: i32) -> (i32, i32) {
    %c0_i32 = arith.constant 0 : i32
    %c0_i32_0 = arith.constant 0 : i32
    %c0_i32_1 = arith.constant 0 : i32
    return %c0_i32, %c0_i32_0 : i32, i32
  }
  func.func @transform_9(%arg0: i32) -> (i32, i32, i32) {
    %c0_i32 = arith.constant 0 : i32
    %c0_i32_0 = arith.constant 0 : i32
    %c0_i32_1 = arith.constant 0 : i32
    return %arg0, %c0_i32, %c0_i32_0 : i32, i32, i32
  }
  func.func @transform_10(%arg0: i32) -> (i32, i32, i32) {
    %c0_i32 = arith.constant 0 : i32
    %c0_i32_0 = arith.constant 0 : i32
    %c0_i32_1 = arith.constant 0 : i32
    return %arg0, %c0_i32, %c0_i32_0 : i32, i32, i32
  }
}

</mosaic_0001>

<bundles_post_ra>
// kernel: inception_time_fwd.6
= control target key start
LH: loop header
LB: loop body
LE: loop exit
PB: predicated region body
PF: predicated region fallthrough
CT: control target
= control target key end

     0   :  { %9 = vsyncpa [#allocation4], 0  ;;  %s2999_s0 = inlined_call_operand.hbm [shape: bf16[2,16,4], index: 0, kind: input, shape index: {}]   ;;  %s3000_s1 = inlined_call_operand.hbm [shape: bf16[256,128], index: 1, kind: input, shape index: {}]   ;;  %s3001_s2 = inlined_call_operand.hbm [shape: bf16[4,128], index: 2, kind: input, shape index: {}]   ;;  %s3002_s3 = inlined_call_operand.hbm [shape: f32[1,128], index: 3, kind: input, shape index: {}]   ;;  %s3003_s4 = inlined_call_operand.hbm [shape: bf16[2,16,128], index: 4, kind: output, shape index: {}]  }
   0x1   :  { %11 = vsyncpa [#allocation4 + $0x1], 0 }
   0x2   :  { %12 = vsyncpa [#allocation7], 0 }
   0x3   :  { %13 = vsyncpa [#allocation10], 0 }
   0x4   :  { %14 = vsyncpa [#allocation5], 0 }
   0x5   :  { %16 = vsyncpa [#allocation5 + $0x1], 0  ;;  %s2289_s15 = smov 0   ;;  %s2291_s16 = smov 0  }
   0x6   :  { %s2293_s17 = smov 0   ;;  %s2295_s18 = smov 0  }
   0x7 LB: > { %s2310_s19 = sadd.s32 4294967295, %s2236_s18   ;;  %s1746_s20 = sadd.s32 4294967294, %s2236_s18   ;;  %s2236_s18 = sphi %s2295_s18, %s3028_s18   ;;  %s2232_s17 = sphi %s2293_s17, %s3027_s17   ;;  %s2228_s16 = sphi %s2291_s16, %s3026_s16   ;;  %s2224_s15 = sphi %s2289_s15, %s3025_s15  }
   0x8   : > { %p42_p0 = scmp.ne.s32.totalorder %s2228_s16, %s2224_s15  ;;  %p3004_p1 = scmp.eq.s32.totalorder %s2310_s19, 0 }
   0x9   : > { %p135_p3 = scmp.eq.s32.totalorder %s1746_s20, 1  ;;  %p1747_p5 = scmp.ge.s32.totalorder %s2236_s18, 1 }
   0xa   : > { %p2319_p4 = por %p3004_p1, %p42_p0  ;;  %p142_p7 = scmp.lt.s32.totalorder %s2236_s18, 3 }
   0xb   : > { %p2324_p6 = por %p135_p3, %p42_p0  ;;  %s2238_s24 = smov [#allocation6]  }
   0xc   : > { %s3007_s21 = scalar_select %p2319_p4, 1, 0 }
   0xd   : > { %s3008_s22 = scalar_select %p2324_p6, 1, 0 }
   0xe   : > { %p2329_p8 = pnand %p1747_p5, %p142_p7  ;;  %s154_s25 = sshll.u32 %s2238_s24, 4  ;;  %s2333_s25 = int_to_ptr.vmem [resolvable:$true] %s154_s25 }
   0xf   : > { %s2239_s27 = smov [#allocation8]   ;;  %s2240_s29 = smov [#allocation9]  }
  0x10   : > { %s3009_s23 = scalar_select %p2329_p8, 1, 0 }
  0x11   : > { %p1906_p9 = pneg %p2329_p8  ;;  %s168_s28 = sshll.u32 %s2239_s27, 4  ;;  %s2344_s28 = int_to_ptr.vmem [resolvable:$true] %s168_s28 }
  0x12   : > { %s2346_s30 = sshll.u32 %s2240_s29, 4  ;;  %s2048_s7 = scalar_lea.hbm %s3000_s1, 2048  ;;  %s180_s30 = int_to_ptr.vmem [resolvable:$true] %s2346_s30 }
  0x13   : > { %p2340_p11 = pnand %p1906_p9, %p3004_p1  ;;  %p2049_p12 = scmp.ne.s32.totalorder %s3000_s1, %s2048_s7 }
  0x14   : > { %p2055_p5 = scmp.lt.u32.totalorder %s2048_s7, %s3000_s1 }
  0x15   : > { %p2356_p13 = pneg %p2340_p11 }
  0x17   : > { %p2051_p0 = pnand %p2356_p13, %p2049_p12 }
  0x19   : > { %p2052_p3 = pneg %p2051_p0 }
  0x1b   : > { %p2057_p7 = pnand %p2055_p5, %p2052_p3 }
  0x1d   : > { %2060 = shalt.err (!%p2057_p7)
}
  0x1e   : > { %s2061_s13 = scalar_lea.vmem %s2333_s25, 2048  ;;  %p2069_p2 = scmp.lt.s32.totalorder %s2333_s25, %s2333_s25 }
  0x1f   : > { %p2062_p9 = scmp.ne.s32.totalorder %s2333_s25, %s2061_s13  ;;  %p2070_p6 = scmp.lt.s32.totalorder %s2061_s13, %s2061_s13 }
  0x21   : > { %p2064_p10 = pnand %p2062_p9, %p2356_p13  ;;  %p2071_p12 = por %p2070_p6, %p2069_p2 }
  0x23   : > { %p2065_p1 = pneg %p2064_p10 }
  0x25   : > { %p2072_p0 = pnand %p2071_p12, %p2065_p1 }
  0x27   : > { %2075 = shalt.err (!%p2072_p0)
}
  0x28   : > { %s2241_s14 = smov 64   ;;  %s2242_s20 = smov 4  }
  0x29   : > { %1909 = dma.hbm_to_vmem [thread:$0]  (!%p2340_p11), %s3000_s1, 2048, %s2333_s25, [#allocation7], %s2241_s14, %s2241_s14, %s2242_s20  }
  0x2a   : > { %s2076_s6 = scalar_lea.hbm %s3001_s2, 32 }
  0x2b   : > { %p2077_p1 = scmp.ne.s32.totalorder %s3001_s2, %s2076_s6  ;;  %p2083_p10 = scmp.lt.u32.totalorder %s2076_s6, %s3001_s2 }
  0x2d   : > { %p2079_p2 = pnand %p2077_p1, %p2356_p13 }
  0x2f   : > { %p2080_p6 = pneg %p2079_p2 }
  0x31   : > { %p2085_p3 = pnand %p2083_p10, %p2080_p6 }
  0x33   : > { %2088 = shalt.err (!%p2085_p3)
}
  0x34   : > { %s2089_s25 = scalar_lea.vmem %s2344_s28, 32  ;;  %p2097_p12 = scmp.lt.s32.totalorder %s2344_s28, %s2344_s28 }
  0x35   : > { %p2090_p5 = scmp.ne.s32.totalorder %s2344_s28, %s2089_s25  ;;  %p2098_p0 = scmp.lt.s32.totalorder %s2089_s25, %s2089_s25 }
  0x37   : > { %p2092_p7 = pnand %p2090_p5, %p2356_p13  ;;  %p2099_p1 = por %p2098_p0, %p2097_p12 }
  0x39   : > { %p2093_p9 = pneg %p2092_p7 }
  0x3b   : > { %p2100_p2 = pnand %p2099_p1, %p2093_p9 }
  0x3d   : > { %2103 = shalt.err (!%p2100_p2)
}
  0x3e   : > { %1912 = dma.hbm_to_vmem [thread:$0]  (!%p2340_p11), %s3001_s2, 32, %s2344_s28, [#allocation7]  }
  0x3f   : > { %s2104_s29 = scalar_lea.hbm %s3002_s3, 16 }
  0x40   : > { %p2105_p6 = scmp.ne.s32.totalorder %s3002_s3, %s2104_s29  ;;  %p2111_p5 = scmp.lt.u32.totalorder %s2104_s29, %s3002_s3 }
  0x42   : > { %p2107_p10 = pnand %p2105_p6, %p2356_p13 }
  0x44   : > { %p2108_p3 = pneg %p2107_p10 }
  0x46   : > { %p2113_p7 = pnand %p2111_p5, %p2108_p3 }
  0x48   : > { %2116 = shalt.err (!%p2113_p7)
}
  0x49   : > { %s2117_s9 = scalar_lea.vmem %s180_s30, 16  ;;  %s2124_s28 = scalar_lea.vmem %s180_s30, 32 }
  0x4a   : > { %p2118_p9 = scmp.ne.s32.totalorder %s180_s30, %s2117_s9  ;;  %p2125_p1 = scmp.lt.s32.totalorder %s180_s30, %s180_s30 }
  0x4b   : > { %p2126_p2 = scmp.lt.s32.totalorder %s2124_s28, %s2117_s9 }
  0x4c   : > { %p2120_p12 = pnand %p2118_p9, %p2356_p13 }
  0x4d   : > { %p2127_p4 = por %p2126_p2, %p2125_p1 }
  0x4e   : > { %p2121_p0 = pneg %p2120_p12 }
  0x50   : > { %p2128_p8 = pnand %p2127_p4, %p2121_p0 }
  0x52   : > { %2131 = shalt.err (!%p2128_p8)
}
  0x53   : > { %1915 = dma.hbm_to_vmem [thread:$0]  (!%p2340_p11), %s3002_s3, 16, %s180_s30, [#allocation10]  }
  0x54   : > { %s2423_s10 = sadd.s32 1, %s2236_s18   ;;  %s29_s26 = sadd.s32 1, %s2232_s17 }
  0x55   : > { %s26_s12 = ssub.s32 %s2236_s18, %s2423_s10  ;;  %p36_p8 = scmp.ne.s32.totalorder %s2232_s17, %s2228_s16 }
  0x56   : > { %p27_p4 = scmp.eq.s32.totalorder %s26_s12, 0  ;;  %p37_p13 = scmp.eq.s32.totalorder %s2236_s18, 0 }
  0x57   : > { %p1927_p6 = scmp.lt.s32.totalorder %s2236_s18, 2  ;;  %p3012_p3 = scmp.eq.s32.totalorder %s2310_s19, 1 }
  0x58   : > { %s2433_s13 = scalar_select %p27_p4, %s2232_s17, %s29_s26  }
  0x59   : > { %p38_p10 = por %p37_p13, %p36_p8  ;;  %p2437_p5 = por %p3012_p3, %p36_p8 }
  0x5a   : > { %s190_s27 = sand.u32 1, %s2232_s17   ;;  %s1851_s29 = sshll.u32 %s2236_s18, 7 }
  0x5b   : > { %s1752_s30 = sshll.u32 %s190_s27, 3  ;;  %s2446_s7 = scalar_lea.hbm %s2999_s0, %s1851_s29 }
  0x5c   : > { %s194_s8 = scalar_lea.vmem [#allocation3], %s1752_s30  ;;  %p2448_p11 = pnand %p1927_p6, %p38_p10 }
  0x5d   : > { %s201_s9 = sshll.u32 %s194_s8, 4  ;;  %s2454_s11 = scalar_lea.sflag [#allocation4], %s190_s27  ;;  %s2452_s9 = int_to_ptr.vmem [resolvable:$true] %s201_s9 }
  0x5e   : > { %s2132_s25 = scalar_lea.hbm %s2446_s7, 128  ;;  %p2134_p9 = pneg %p2448_p11 }
  0x5f   : > { %p2133_p7 = scmp.ne.s32.totalorder %s2446_s7, %s2132_s25  ;;  %s2137_s29 = scalar_lea.hbm %s2999_s0, 256 }
  0x60   : > { %p2138_p1 = scmp.lt.u32.totalorder %s2446_s7, %s2999_s0  ;;  %p2139_p2 = scmp.lt.u32.totalorder %s2137_s29, %s2132_s25 }
  0x61   : > { %p2135_p12 = pnand %p2134_p9, %p2133_p7  ;;  %p2141_p8 = scmp.lt.u32.totalorder %s2132_s25, %s2446_s7 }
  0x62   : > { %p2140_p4 = por %p2139_p2, %p2138_p1 }
  0x63   : > { %p2136_p0 = pneg %p2135_p12 }
  0x64   : > { %p2142_p13 = por %p2141_p8, %p2140_p4 }
  0x66   : > { %p2143_p6 = pnand %p2142_p13, %p2136_p0 }
  0x68   : > { %2146 = shalt.err (!%p2143_p6)
}
  0x69   : > { %s2147_s27 = scalar_lea.vmem %s2452_s9, 128  ;;  %s2243_s6 = smov [#allocation3]  }
  0x6a   : > { %p2148_p10 = scmp.ne.s32.totalorder %s2452_s9, %s2147_s27  ;;  %s2152_s8 = sshll.u32 %s2243_s6, 4  ;;  %s2153_s8 = int_to_ptr.vmem [resolvable:$false] %s2152_s8 }
  0x6b   : > { %s2154_s12 = scalar_lea.vmem %s2153_s8, 256  ;;  %p2155_p12 = scmp.lt.s32.totalorder %s2452_s9, %s2153_s8 }
  0x6c   : > { %p2150_p3 = pnand %p2148_p10, %p2134_p9  ;;  %p2156_p1 = scmp.lt.s32.totalorder %s2154_s12, %s2147_s27 }
  0x6e   : > { %p2151_p7 = pneg %p2150_p3  ;;  %p2157_p2 = por %p2156_p1, %p2155_p12 }
  0x70   : > { %p2158_p4 = pnand %p2157_p2, %p2151_p7 }
  0x72   : > { %2161 = shalt.err (!%p2158_p4)
}
  0x73   : > { %1919 = dma.hbm_to_vmem [thread:$0]  (!%p2448_p11), %s2446_s7, 128, %s2452_s9, %s2454_s11, %s2241_s14, %s2241_s14, %s2242_s20  }
  0x74   : > { %p3015_p9 = scmp.ne.s32.totalorder %s3009_s23, 0 }
  0x75   : > { %s2488_s25 = sand.u32 (!%p3015_p9), 1, %s2228_s16   ;;  %p3016_p0 = scmp.ne.s32.totalorder (!%p3015_p9), %s3007_s21, 0 }
  0x76   : > { %213 = sbr.rel (%p3015_p9) target bundleno = 678 (0x2a6), region = 36  ;;  %s1756_s26 = sshll.u32 (!%p3015_p9), %s2488_s25, 3 }
  0x77   : > { %s216_s29 = scalar_lea.sflag (!%p3015_p9), [#allocation4], %s2488_s25  ;;  %s219_s28 = scalar_lea.vmem (!%p3015_p9), [#allocation3], %s1756_s26 }
  0x7d   : > { %2207 = dma.done.wait (%p3016_p0), %s216_s29, 128  }
  0x7e   : > { %2209 = vsyncadd (%p3016_p0), %s216_s29, 4294967168  ;;  %p3017_p11 = scmp.eq.s32.totalorder %s2310_s19, 0 }
  0x80   : > { %2211 = dma.done.wait (%p3017_p11), [#allocation7], 2080   ;;  %p3018_p8 = pmov %p3017_p11 }
  0x82   : > { %2213 = vsyncadd (%p3018_p8), [#allocation7], 4294965216  ;;  %p3019_p13 = pmov %p3018_p8 }
  0x83   : > { %p3020_p6 = pmov %p3018_p8 }
  0x84   : > { %2215 = dma.done.wait (%p3019_p13), [#allocation10], 16  }
  0x85   : > { %2217 = vsyncadd (%p3020_p6), [#allocation10], 4294967280  ;;  %vm260_vm0 = vcmask 27648   ;;  %v2244_v0 = vmov 0   ;;  %vm271_vm1 = vsmask.f32 3328 }
  0x86   : > { %267 = vst.msk [vmem:[#allocation2 + $0x18] sm:$0xf] %vm260_vm0, %v2244_v0  ;;  %268 = vst.msk [vmem:[#allocation2 + $0x1c] sm:$0xf] %vm260_vm0, %v2244_v0  ;;  %vm392_vm2 = vcmask 1045504   ;;  %vm360_vm3 = vcmask 1046528  }
  0x87   : > { %269 = vst.msk [vmem:[#allocation2 + $0x20] sm:$0xf] %vm260_vm0, %v2244_v0  ;;  %261 = vst.msk [vmem:[#allocation2] sm:$0xf] %vm260_vm0, %v2244_v0  ;;  %vm424_vm4 = vcmask 1044480   ;;  %s2245_s21 = smov 16  }
  0x88   : > { %262 = vst.msk [vmem:[#allocation2 + $0x4] sm:$0xf] %vm260_vm0, %v2244_v0  ;;  %263 = vst.msk [vmem:[#allocation2 + $0x8] sm:$0xf] %vm260_vm0, %v2244_v0  ;;  %v2514_v1 = vld [vmem:[%s219_s28] sm:$0xf] }
  0x89   : > { %264 = vst.msk [vmem:[#allocation2 + $0xc] sm:$0xf] %vm260_vm0, %v2244_v0  ;;  %vm272_vm5 = vmand %vm260_vm0, %vm271_vm1  ;;  %v273_v2 = vld [vmem:[#allocation2 + $0x24] sm:$0xf]  ;;  %v2516_v3 = vld [vmem:[%s219_s28 + $0x4] sm:$0xf] }
  0x8a   : > { %265 = vst.msk [vmem:[#allocation2 + $0x10] sm:$0xf] %vm260_vm0, %v2514_v1  ;;  %266 = vst.msk [vmem:[#allocation2 + $0x14] sm:$0xf] %vm260_vm0, %v2516_v3  ;;  %v274_v8 = vsel %vm272_vm5, 0, %v273_v2  ;;  %s2246_s23 = smov 8  }
  0x8b   : > { %275 = vst [vmem:[#allocation2 + $0x24] sm:$0xf] %v274_v8  ;;  %vm342_vm6 = vsmask.f32 7424  ;;  %vm369_vm7 = vsmask.f32 6400 }
  0x8c   : > { %s2247_s14 = smov 24   ;;  %vm401_vm8 = vsmask.f32 5376  ;;  %s2248_s20 = smov 4   ;;  %vm433_vm9 = vsmask.f32 4352 }
  0x8d   : > { %v2518_v4 = vld [vmem:[#allocation2 + $0x1c] sm:$0xf]  ;;  %v323_v5 = vld [vmem:[#allocation2 + $0x18] sm:$0xc]  ;;  %s2249_s7 = smov 12   ;;  %s2250_s9 = smov 20  }
  0x8e   : > { %v1988_v6 = vld [vmem:[#allocation2 + $0x20] ss:$0 sps:$4 sm:$0x33]   ;;  %v2525_v7 = vcombine.low %v323_v5, %v2518_v4  ;;  %v321_v9 = vld [vmem:[#allocation2 + $0x18] sm:$0xe]  ;;  %s2251_s11 = smov 28  }
  0x8f   : > { %v1990_v10 = vld [vmem:[#allocation2 + $0x20] ss:$0 sps:$4 sm:$0x11]   ;;  %v1156_v12 = vrot.slane %v1988_v6, 2  ;;  %v1811_v13 = vcombine.low %v321_v9, %v2518_v4  ;;  %v325_v14 = vld [vmem:[#allocation2 + $0x18] sm:$0x8] }
  0x90   : > { %v1155_v11 = vrot.slane %v2525_v7, 2  ;;  %v1126_v15 = vrot.slane %v1990_v10, 1  ;;  %v2529_v16 = vld [vmem:[#allocation2 + $0x20] ss:$0 sps:$4 sm:$0x77]   ;;  %v2532_v17 = vcombine.low %v325_v14, %v2518_v4  ;;  %v1116_v23 = vshll.u32 %v1990_v10, 16 }
  0x91   : > { %v2534_v18 = vld [vmem:[#allocation2 + $0xc] sm:$0xf]  ;;  %v1125_v20 = vrot.slane %v1811_v13, 1  ;;  %v293_v21 = vld [vmem:[#allocation2 + $0x8] sm:$0xe]  ;;  %v1186_v25 = vrot.slane %v2529_v16, 3 }
  0x92   : > { %v1157_v19 = vsel %vm392_vm2, %v1155_v11, %v1156_v12  ;;  %v2537_v22 = vld [vmem:[#allocation2 + $0x18] sm:$0xf]  ;;  %v1185_v24 = vrot.slane %v2532_v17, 3  ;;  %v1779_v26 = vcombine.low %v293_v21, %v2534_v18  ;;  %v295_v28 = vld [vmem:[#allocation2 + $0x8] sm:$0xc]  ;;  %v1118_v32 = vrot.slane %v1116_v23, 1 }
  0x93   : > { %1158 = vrot.lane.b32.xlu0 %v1157_v19, %s2245_s21  ;;  %v2545_v27 = vcombine.low %v2537_v22, %v2518_v4  ;;  %v297_v29 = vld [vmem:[#allocation2 + $0x8] sm:$0x8]  ;;  %v1127_v30 = vsel %vm360_vm3, %v1125_v20, %v1126_v15  ;;  %v2548_v31 = vld [vmem:[#allocation2 + $0x10] ss:$0 sps:$4 sm:$0x11]   ;;  %v2551_v33 = vcombine.low %v295_v28, %v2534_v18  ;;  %v1134_v42 = vshrl.u32 %v1811_v13, 16 }
  0x94   : > { %v2554_v34 = vcombine.low %v297_v29, %v2534_v18  ;;  %1128 = vrot.lane.b32.xlu1 %v1127_v30, %s2246_s23  ;;  %v1187_v35 = vsel %vm424_vm4, %v1185_v24, %v1186_v25  ;;  %v629_v36 = vrot.slane %v1779_v26, 1  ;;  %v630_v39 = vrot.slane %v2548_v31, 1  ;;  %v1994_v40 = vld [vmem:[#allocation2 + $0x10] ss:$0 sps:$4 sm:$0x33]   ;;  %s2252_s30 = smov 32  }
  0x95   : > { %v1109_v37 = vshrl.u32 %v2545_v27, 16  ;;  %v1111_v38 = vshll.u32 %v2545_v27, 16  ;;  %v659_v41 = vrot.slane %v2551_v33, 2  ;;  %v1137_v44 = vshll.u32 %v1811_v13, 16  ;;  %v2577_v8 = vld [vmem:[#allocation2 + $0x8] sm:$0xf] }
  0x96   : > { %v1142_v45 = vshrl.u32 %v1988_v6, 16  ;;  %v1145_v46 = vshll.u32 %v1988_v6, 16  ;;  %v631_v47 = vsel %vm360_vm3, %v629_v36, %v630_v39  ;;  %v660_v48 = vrot.slane %v1994_v40, 2  ;;  %v2564_v50 = vld [vmem:[#allocation2 + $0x10] ss:$0 sps:$4 sm:$0x77]  }
  0x97   : > { %1188 = vrot.lane.b32.xlu0 %v1187_v35, %s2247_s14  ;;  %v1113_v43 = vrot.slane %v1111_v38, 1  ;;  %v1136_v49 = vrot.slane %v1134_v42, 1  ;;  %v689_v51 = vrot.slane %v2554_v34, 3  ;;  %v1139_v53 = vrot.slane %v1137_v44, 2  ;;  %v2588_v28 = vld [vmem:[#allocation2 + $0x20] sm:$0xf] }
  0x98   : > { %632 = vrot.lane.b32.xlu1 %v631_v47, %s2246_s23  ;;  %v1144_v54 = vrot.slane %v1142_v45, 1  ;;  %v1147_v55 = vrot.slane %v1145_v46, 2  ;;  %v661_v56 = vsel %vm392_vm2, %v659_v41, %v660_v48  ;;  %v690_v57 = vrot.slane %v2564_v50, 3  ;;  %v2603_v47 = vld [vmem:[#allocation2 + $0x10] sm:$0xf]  ;;  %s2253_s5 = smov 36  }
  0x99   : > { %v1114_v52 = vor.u32 %v1113_v43, %v1109_v37  ;;  %v1164_v58 = vshrl.u32 %v2525_v7, 16  ;;  %v1167_v59 = vshll.u32 %v2525_v7, 16  ;;  %v1140_v61 = vor.u32 %v1139_v53, %v1136_v49  ;;  %s2254_s27 = smov 40   ;;  %s2255_s6 = smov 44  }
  0x9a   : > { %v1148_v62 = vor.u32 %v1147_v55, %v1144_v54  ;;  %v1172_v63 = vshrl.u32 %v2529_v16, 16  ;;  %v691_v0 = vsel %vm424_vm4, %v689_v51, %v690_v57  ;;  %v1175_v6 = vshll.u32 %v2529_v16, 16  ;;  %s2256_s8 = smov 48   ;;  %s2257_s12 = smov 52  }
  0x9b   : > { %v1119_v60 = vsel %vm342_vm6, %v1114_v52, %v1118_v32  ;;  %v1166_v2 = vrot.slane %v1164_v58, 2  ;;  %v1169_v5 = vrot.slane %v1167_v59, 3  ;;  %v638_v10 = vshrl.u32 %v1779_v26, 16  ;;  %s2258_s29 = smov 56   ;;  %s2259_s28 = smov 60  }
  0x9c   : > { %1120 = vrot.lane.b32.xlu0 %v1119_v60, %s2248_s20  ;;  %662 = vrot.lane.b32.xlu1 %v661_v56, %s2245_s21  ;;  %v1149_v7 = vsel %vm369_vm7, %v1140_v61, %v1148_v62  ;;  %v1174_v9 = vrot.slane %v1172_v63, 2  ;;  %v641_v11 = vshll.u32 %v1779_v26, 16  ;;  %v1177_v13 = vrot.slane %v1175_v6, 3  ;;  %v2615_v6 = vld [vmem:[#allocation2 + $0x14] ss:$0 sps:$4 sm:$0x11]  }
  0x9d   : > { %v1170_v12 = vor.u32 %v1169_v5, %v1166_v2  ;;  %v646_v14 = vshrl.u32 %v1994_v40, 16  ;;  %v649_v15 = vshll.u32 %v1994_v40, 16  ;;  %v640_v19 = vrot.slane %v638_v10, 1 }
  0x9e   : > { %v643_v20 = vrot.slane %v641_v11, 2  ;;  %v2583_v21 = vcombine.low %v2577_v8, %v2534_v18  ;;  %v620_v16 = vshll.u32 %v2548_v31, 16  ;;  %v1178_v23 = vor.u32 %v1177_v13, %v1174_v9  ;;  %v300_v13 = vld [vmem:[#allocation2 + $0xc] sm:$0xe] }
  0x9f   : > { %v648_v24 = vrot.slane %v646_v14, 1  ;;  %v651_v25 = vrot.slane %v649_v15, 2  ;;  %v668_v26 = vshrl.u32 %v2551_v33, 16  ;;  %v671_v38 = vshll.u32 %v2551_v33, 16 }
  0xa0   : > { %1150 = vrot.lane.b32.xlu0 %v1149_v7, %s2249_s7  ;;  %692 = vrot.lane.b32.xlu1 %v691_v0, %s2247_s14  ;;  %v644_v29 = vor.u32 %v643_v20, %v640_v19  ;;  %v613_v30 = vshrl.u32 %v2583_v21, 16  ;;  %v615_v32 = vshll.u32 %v2583_v21, 16  ;;  %v622_v35 = vrot.slane %v620_v16, 1 }
  0xa1   : > { %v1179_v31 = vsel %vm401_vm8, %v1170_v12, %v1178_v23  ;;  %v652_v36 = vor.u32 %v651_v25, %v648_v24  ;;  %v670_v37 = vrot.slane %v668_v26, 2  ;;  %v676_v40 = vshrl.u32 %v2564_v50, 16  ;;  %v328_v12 = vld [vmem:[#allocation2 + $0x1c] sm:$0xe] }
  0xa2   : > { %v617_v39 = vrot.slane %v615_v32, 1  ;;  %v679_v41 = vshll.u32 %v2564_v50, 16  ;;  %v1816_v42 = vcombine.low %v2588_v28, %v2588_v28  ;;  %v673_v44 = vrot.slane %v671_v38, 3  ;;  %v2621_v24 = vld [vmem:[#allocation2 + $0x24] ss:$0 sps:$4 sm:$0x33]  }
  0xa3   : > { %v653_v43 = vsel %vm369_vm7, %v644_v29, %v652_v36  ;;  %v1194_v45 = vshrl.u32 %v2532_v17, 16  ;;  %v1197_v46 = vshll.u32 %v2532_v17, 16  ;;  %v678_v48 = vrot.slane %v676_v40, 2  ;;  %v2002_v17 = vld [vmem:[#allocation2 + $0x24] ss:$0 sps:$4 sm:$0x11]  }
  0xa4   : > { %1180 = vrot.lane.b32.xlu0 %v1179_v31, %s2250_s9  ;;  %654 = vrot.lane.b32.xlu1 %v653_v43, %s2249_s7  ;;  %v618_v33 = vor.u32 %v617_v39, %v613_v30  ;;  %v681_v49 = vrot.slane %v679_v41, 3  ;;  %v1202_v50 = vshrl.u32 %v1816_v42, 16  ;;  %v674_v51 = vor.u32 %v673_v44, %v670_v37  ;;  %v2628_v40 = vld [vmem:[#allocation2 + $0x14] ss:$0 sps:$4 sm:$0x33]  }
  0xa5   : > { %v1196_v52 = vrot.slane %v1194_v45, 3  ;;  %v1199_v53 = vrot.slane %v1197_v46, 4  ;;  %v1205_v54 = vshll.u32 %v1816_v42, 16  ;;  %v1784_v58 = vcombine.low %v2603_v47, %v2603_v47 }
  0xa6   : > { %v623_v55 = vsel %vm342_vm6, %v618_v33, %v622_v35  ;;  %v682_v56 = vor.u32 %v681_v49, %v678_v48  ;;  %v1204_v57 = vrot.slane %v1202_v50, 3  ;;  %v698_v61 = vshrl.u32 %v2554_v34, 16  ;;  %v330_v48 = vld [vmem:[#allocation2 + $0x1c] sm:$0xc] }
  0xa7   : > { %v1200_v59 = vor.u32 %v1199_v53, %v1196_v52  ;;  %v1207_v60 = vrot.slane %v1205_v54, 4  ;;  %v701_v62 = vshll.u32 %v2554_v34, 16  ;;  %v706_v0 = vshrl.u32 %v1784_v58, 16  ;;  %v302_v53 = vld [vmem:[#allocation2 + $0xc] sm:$0xc] }
  0xa8   : > { %624 = vrot.lane.b32.xlu0 %v623_v55, %s2248_s20  ;;  %v683_v63 = vsel %vm401_vm8, %v674_v51, %v682_v56  ;;  %v709_v2 = vshll.u32 %v1784_v58, 16  ;;  %v1817_v5 = vcombine.low %v2518_v4, %v2588_v28  ;;  %v700_v9 = vrot.slane %v698_v61, 3 }
  0xa9   : > { %684 = vrot.lane.b32.xlu1 %v683_v63, %s2250_s9  ;;  %v1208_v7 = vor.u32 %v1207_v60, %v1204_v57  ;;  %v703_v10 = vrot.slane %v701_v62, 4  ;;  %v1785_v11 = vcombine.low %v2534_v18, %v2603_v47  ;;  %v708_v34 = vrot.slane %v706_v0, 3 }
  0xaa   : > { %v711_v14 = vrot.slane %v709_v2, 4  ;;  %v1221_v15 = vshll.u32 %v1817_v5, 16  ;;  %v1219_v19 = vshrl.u32 %v1817_v5, 16  ;;  %v1226_v23 = vshll.u32 %v2002_v17, 16 }
  0xab   : > { %v1209_v20 = vsel %vm433_vm9, %v1200_v59, %v1208_v7  ;;  %v704_v16 = vor.u32 %v703_v10, %v700_v9  ;;  %v725_v4 = vshll.u32 %v1785_v11, 16  ;;  %v723_v29 = vshrl.u32 %v1785_v11, 16  ;;  %v2644_v2 = vld [vmem:[#allocation2 + $0x24] ss:$0 sps:$4 sm:$0x77]  }
  0xac   : > { %1210 = vrot.lane.b32.xlu0 %v1209_v20, %s2251_s11  ;;  %v712_v25 = vor.u32 %v711_v14, %v708_v34  ;;  %v1223_v26 = vrot.slane %v1221_v15, 1  ;;  %v730_v18 = vshll.u32 %v2615_v6, 16  ;;  %v1228_v30 = vrot.slane %v1226_v23, 1  ;;  %v2648_v34 = vld [vmem:[#allocation2 + $0x14] ss:$0 sps:$4 sm:$0x77]  }
  0xad   : > { %v727_v32 = vrot.slane %v725_v4, 1  ;;  %v1819_v35 = vcombine.low %v328_v12, %v2588_v28  ;;  %v1236_v31 = vrot.slane %v2002_v17, 1  ;;  %v1787_v39 = vcombine.low %v300_v13, %v2603_v47 }
  0xae   : > { %v713_v36 = vsel %vm433_vm9, %v704_v16, %v712_v25  ;;  %v1224_v37 = vor.u32 %v1223_v26, %v1219_v19  ;;  %v732_v38 = vrot.slane %v730_v18, 1  ;;  %v740_v45 = vrot.slane %v2615_v6, 1  ;;  %v332_v25 = vld [vmem:[#allocation2 + $0x1c] sm:$0x8] }
  0xaf   : > { %714 = vrot.lane.b32.xlu1 %v713_v36, %s2251_s11  ;;  %v728_v41 = vor.u32 %v727_v32, %v723_v29  ;;  %v1235_v42 = vrot.slane %v1819_v35, 1  ;;  %v1244_v43 = vshrl.u32 %v1819_v35, 16  ;;  %v1247_v46 = vshll.u32 %v1819_v35, 16 }
  0xb0   : > { %1213 = vrot.lane.b32.xlu0 %v1817_v5, %s2252_s30  ;;  %v1229_v44 = vsel %vm342_vm6, %v1224_v37, %v1228_v30  ;;  %v1252_v33 = vshrl.u32 %v2621_v24, 16  ;;  %v739_v50 = vrot.slane %v1787_v39, 1  ;;  %v1255_v52 = vshll.u32 %v2621_v24, 16  ;;  %v304_v37 = vld [vmem:[#allocation2 + $0xc] sm:$0x8] }
  0xb1   : > { %v733_v49 = vsel %vm342_vm6, %v728_v41, %v732_v38  ;;  %v1246_v51 = vrot.slane %v1244_v43, 1  ;;  %v1237_v54 = vsel %vm360_vm3, %v1235_v42, %v1236_v31  ;;  %v1249_v55 = vrot.slane %v1247_v46, 2  ;;  %v2008_v42 = vld [vmem:[#allocation2 + $0x24] ss:$0 sps:$4 sm:$0xff]  }
  0xb2   : > { %v1254_v56 = vrot.slane %v1252_v33, 1  ;;  %v748_v57 = vshrl.u32 %v1787_v39, 16  ;;  %v1257_v58 = vrot.slane %v1255_v52, 2  ;;  %v751_v17 = vshll.u32 %v1787_v39, 16 }
  0xb3   : > { %717 = vrot.lane.b32.xlu1 %v1785_v11, %s2252_s30  ;;  %v756_v59 = vshrl.u32 %v2628_v40, 16  ;;  %v759_v60 = vshll.u32 %v2628_v40, 16  ;;  %v1250_v61 = vor.u32 %v1249_v55, %v1246_v51  ;;  %v1821_v63 = vcombine.low %v330_v48, %v2588_v28  ;;  %v2666_v55 = vld [vmem:[#allocation2 + $0x14] sm:$0xf] }
  0xb4   : > { %1230 = vrot.lane.b32.xlu0 %v1229_v44, %s2253_s5  ;;  %v750_v62 = vrot.slane %v748_v57, 1  ;;  %v1266_v0 = vrot.slane %v2621_v24, 2  ;;  %v1258_v5 = vor.u32 %v1257_v58, %v1254_v56  ;;  %v753_v6 = vrot.slane %v751_v17, 2  ;;  %v2671_v17 = vld [vmem:[#allocation2 + $0x18] ss:$0 sps:$4 sm:$0x11]  }
  0xb5   : > { %v758_v7 = vrot.slane %v756_v59, 1  ;;  %v761_v9 = vrot.slane %v759_v60, 2  ;;  %v741_v10 = vsel %vm360_vm3, %v739_v50, %v740_v45  ;;  %v1265_v11 = vrot.slane %v1821_v63, 2 }
  0xb6   : > { %v1789_v12 = vcombine.low %v302_v53, %v2603_v47  ;;  %v1274_v13 = vshrl.u32 %v1821_v63, 16  ;;  %v754_v14 = vor.u32 %v753_v6, %v750_v62  ;;  %v770_v19 = vrot.slane %v2628_v40, 2 }
  0xb7   : > { %734 = vrot.lane.b32.xlu1 %v733_v49, %s2253_s5  ;;  %v762_v15 = vor.u32 %v761_v9, %v758_v7  ;;  %v1277_v20 = vshll.u32 %v1821_v63, 16  ;;  %v1259_v16 = vsel %vm369_vm7, %v1250_v61, %v1258_v5  ;;  %v1282_v24 = vshrl.u32 %v2644_v2, 16  ;;  %v276_v63 = vld [vmem:[#allocation2] sm:$0xf]  ;;  %v2678_v7 = vld [vmem:[#allocation2 + $0x4] sm:$0xf] }
  0xb8   : > { %1238 = vrot.lane.b32.xlu0 %v1237_v54, %s2254_s27  ;;  %v769_v4 = vrot.slane %v1789_v12, 2  ;;  %v1276_v23 = vrot.slane %v1274_v13, 2  ;;  %v1267_v26 = vsel %vm392_vm2, %v1265_v11, %v1266_v0  ;;  %v1285_v18 = vshll.u32 %v2644_v2, 16  ;;  %v2680_v13 = vld [vmem:[#allocation2 + $0x8] ss:$0 sps:$4 sm:$0x11]  }
  0xb9   : > { %v1279_v29 = vrot.slane %v1277_v20, 3  ;;  %v778_v30 = vshrl.u32 %v1789_v12, 16  ;;  %v763_v32 = vsel %vm369_vm7, %v754_v14, %v762_v15  ;;  %v1284_v35 = vrot.slane %v1282_v24, 2  ;;  %v307_v24 = vld [vmem:[#allocation2 + $0x10] sm:$0xe] }
  0xba   : > { %v781_v31 = vshll.u32 %v1789_v12, 16  ;;  %v786_v36 = vshrl.u32 %v2648_v34, 16  ;;  %v1287_v39 = vrot.slane %v1285_v18, 3  ;;  %v789_v41 = vshll.u32 %v2648_v34, 16 }
  0xbb   : > { %742 = vrot.lane.b32.xlu1 %v741_v10, %s2254_s27  ;;  %v1280_v38 = vor.u32 %v1279_v29, %v1276_v23  ;;  %v780_v40 = vrot.slane %v778_v30, 2  ;;  %v771_v43 = vsel %vm392_vm2, %v769_v4, %v770_v19  ;;  %v1823_v46 = vcombine.low %v332_v25, %v2588_v28 }
  0xbc   : > { %1260 = vrot.lane.b32.xlu0 %v1259_v16, %s2255_s6  ;;  %v783_v44 = vrot.slane %v781_v31, 3  ;;  %v788_v45 = vrot.slane %v786_v36, 2  ;;  %v1288_v33 = vor.u32 %v1287_v39, %v1284_v35  ;;  %v791_v48 = vrot.slane %v789_v41, 3  ;;  %v2696_v36 = vld [vmem:[#allocation2 + $0x18] ss:$0 sps:$4 sm:$0x33]  }
  0xbd   : > { %v1296_v49 = vrot.slane %v2644_v2, 3  ;;  %v1791_v50 = vcombine.low %v304_v37, %v2603_v47  ;;  %v1295_v52 = vrot.slane %v1823_v46, 3  ;;  %v1304_v53 = vshrl.u32 %v1823_v46, 16 }
  0xbe   : > { %v784_v51 = vor.u32 %v783_v44, %v780_v40  ;;  %v1307_v54 = vshll.u32 %v1823_v46, 16  ;;  %v1289_v56 = vsel %vm401_vm8, %v1280_v38, %v1288_v33  ;;  %v792_v57 = vor.u32 %v791_v48, %v788_v45 }
  0xbf   : > { %764 = vrot.lane.b32.xlu1 %v763_v32, %s2255_s6  ;;  %v800_v58 = vrot.slane %v2648_v34, 3  ;;  %v1312_v28 = vshrl.u32 %v2008_v42, 16  ;;  %v799_v59 = vrot.slane %v1791_v50, 3  ;;  %v1306_v60 = vrot.slane %v1304_v53, 3 }
  0xc0   : > { %1268 = vrot.lane.b32.xlu0 %v1267_v26, %s2256_s8  ;;  %v1309_v61 = vrot.slane %v1307_v54, 4  ;;  %v1315_v62 = vshll.u32 %v2008_v42, 16  ;;  %v793_v0 = vsel %vm401_vm8, %v784_v51, %v792_v57  ;;  %v1297_v2 = vsel %vm424_vm4, %v1295_v52, %v1296_v49  ;;  %v2707_v49 = vld [vmem:[#allocation2 + $0x8] ss:$0 sps:$4 sm:$0x33]  }
  0xc1   : > { %v1314_v5 = vrot.slane %v1312_v28, 3  ;;  %v1792_v6 = vcombine.low %v2666_v55, %v2666_v55  ;;  %v808_v11 = vshrl.u32 %v1791_v50, 16  ;;  %v811_v12 = vshll.u32 %v1791_v50, 16  ;;  %v309_v54 = vld [vmem:[#allocation2 + $0x10] sm:$0xc] }
  0xc2   : > { %v1310_v9 = vor.u32 %v1309_v61, %v1306_v60  ;;  %v1317_v10 = vrot.slane %v1315_v62, 4  ;;  %v2685_v15 = vcombine.low %v2603_v47, %v2666_v55  ;;  %v868_v19 = vshll.u32 %v2671_v17, 16  ;;  %v279_v47 = vld [vmem:[#allocation2] sm:$0xe] }
  0xc3   : > { %772 = vrot.lane.b32.xlu1 %v771_v43, %s2256_s8  ;;  %v816_v34 = vshrl.u32 %v1792_v6, 16  ;;  %v819_v14 = vshll.u32 %v1792_v6, 16  ;;  %v810_v16 = vrot.slane %v808_v11, 3  ;;  %v813_v4 = vrot.slane %v811_v12, 4  ;;  %v281_v28 = vld [vmem:[#allocation2] sm:$0xc] }
  0xc4   : > { %1290 = vrot.lane.b32.xlu0 %v1289_v56, %s2257_s12  ;;  %v1318_v20 = vor.u32 %v1317_v10, %v1314_v5  ;;  %v2690_v23 = vcombine.low %v276_v63, %v2678_v7  ;;  %v861_v29 = vshrl.u32 %v2685_v15, 16  ;;  %v863_v18 = vshll.u32 %v2685_v15, 16 }
  0xc5   : > { %v818_v25 = vrot.slane %v816_v34, 3  ;;  %v821_v26 = vrot.slane %v819_v14, 4  ;;  %v801_v30 = vsel %vm424_vm4, %v799_v59, %v800_v58  ;;  %v814_v35 = vor.u32 %v813_v4, %v810_v16  ;;  %v2722_v14 = vld [vmem:[#allocation2 + $0x8] ss:$0 sps:$4 sm:$0x77]  }
  0xc6   : > { %v1319_v32 = vsel %vm433_vm9, %v1310_v9, %v1318_v20  ;;  %v870_v31 = vrot.slane %v868_v19, 1  ;;  %v865_v37 = vrot.slane %v863_v18, 1  ;;  %v344_v38 = vshrl.u32 %v2690_v23, 16  ;;  %v311_v18 = vld [vmem:[#allocation2 + $0x10] sm:$0x8] }
  0xc7   : > { %794 = vrot.lane.b32.xlu1 %v793_v0, %s2257_s12  ;;  %v346_v39 = vshll.u32 %v2690_v23, 16  ;;  %v351_v40 = vshll.u32 %v2680_v13, 16  ;;  %v822_v41 = vor.u32 %v821_v26, %v818_v25  ;;  %v1795_v42 = vcombine.low %v307_v24, %v2666_v55 }
  0xc8   : > { %1298 = vrot.lane.b32.xlu0 %v1297_v2, %s2258_s29  ;;  %v878_v43 = vrot.slane %v2671_v17, 1  ;;  %v1763_v44 = vcombine.low %v279_v47, %v2678_v7  ;;  %v866_v45 = vor.u32 %v865_v37, %v861_v29  ;;  %v362_v48 = vrot.slane %v2680_v13, 1  ;;  %v2715_v2 = vld [vmem:[#allocation2 + $0x18] ss:$0 sps:$4 sm:$0x77]  }
  0xc9   : > { %v348_v46 = vrot.slane %v346_v39, 1  ;;  %v353_v33 = vrot.slane %v351_v40, 1  ;;  %v877_v50 = vrot.slane %v1795_v42, 1  ;;  %v886_v52 = vshrl.u32 %v1795_v42, 16  ;;  %v283_v40 = vld [vmem:[#allocation2] sm:$0x8] }
  0xca   : > { %v361_v51 = vrot.slane %v1763_v44, 1  ;;  %v889_v53 = vshll.u32 %v1795_v42, 16  ;;  %v894_v57 = vshrl.u32 %v2696_v36, 16  ;;  %v897_v58 = vshll.u32 %v2696_v36, 16 }
  0xcb   : > { %802 = vrot.lane.b32.xlu1 %v801_v30, %s2258_s29  ;;  %v349_v56 = vor.u32 %v348_v46, %v344_v38  ;;  %v823_v17 = vsel %vm433_vm9, %v814_v35, %v822_v41  ;;  %v888_v59 = vrot.slane %v886_v52, 1  ;;  %v871_v61 = vsel %vm342_vm6, %v866_v45, %v870_v31 }
  0xcc   : > { %1320 = vrot.lane.b32.xlu0 %v1319_v32, %s2259_s28  ;;  %v891_v60 = vrot.slane %v889_v53, 2  ;;  %v896_v62 = vrot.slane %v894_v57, 1  ;;  %v899_v63 = vrot.slane %v897_v58, 2  ;;  %v371_v0 = vshrl.u32 %v1763_v44, 16 }
  0xcd   : > { %v354_v5 = vsel %vm342_vm6, %v349_v56, %v353_v33  ;;  %v374_v6 = vshll.u32 %v1763_v44, 16  ;;  %v379_v9 = vshrl.u32 %v2707_v49, 16  ;;  %v382_v10 = vshll.u32 %v2707_v49, 16 }
  0xce   : > { %v892_v11 = vor.u32 %v891_v60, %v888_v59  ;;  %v900_v12 = vor.u32 %v899_v63, %v896_v62  ;;  %v373_v13 = vrot.slane %v371_v0, 1  ;;  %v1797_v34 = vcombine.low %v309_v54, %v2666_v55 }
  0xcf   : > { %824 = vrot.lane.b32.xlu1 %v823_v17, %s2259_s28  ;;  %v376_v19 = vrot.slane %v374_v6, 2  ;;  %v381_v20 = vrot.slane %v379_v9, 1  ;;  %v384_v16 = vrot.slane %v382_v10, 2  ;;  %v1765_v4 = vcombine.low %v281_v28, %v2678_v7 }
  0xd0   : > { %872 = vrot.lane.b32.xlu0 %v871_v61, %s2248_s20  ;;  %v879_v24 = vsel %vm360_vm3, %v877_v50, %v878_v43  ;;  %v907_v25 = vrot.slane %v1797_v34, 2  ;;  %v908_v26 = vrot.slane %v2696_v36, 2  ;;  %v916_v29 = vshrl.u32 %v1797_v34, 16 }
  0xd1   : > { %v377_v47 = vor.u32 %v376_v19, %v373_v13  ;;  %v385_v30 = vor.u32 %v384_v16, %v381_v20  ;;  %v394_v32 = vrot.slane %v2707_v49, 2  ;;  %v919_v35 = vshll.u32 %v1797_v34, 16 }
  0xd2   : > { %v393_v31 = vrot.slane %v1765_v4, 2  ;;  %v918_v37 = vrot.slane %v916_v29, 2  ;;  %v924_v38 = vshrl.u32 %v2715_v2, 16  ;;  %v927_v39 = vshll.u32 %v2715_v2, 16 }
  0xd3   : > { %355 = vrot.lane.b32.xlu1 %v354_v5, %s2248_s20  ;;  %v363_v36 = vsel %vm360_vm3, %v361_v51, %v362_v48  ;;  %v901_v41 = vsel %vm369_vm7, %v892_v11, %v900_v12  ;;  %v921_v42 = vrot.slane %v919_v35, 3  ;;  %v403_v43 = vshrl.u32 %v1765_v4, 16 }
  0xd4   : > { %880 = vrot.lane.b32.xlu0 %v879_v24, %s2246_s23  ;;  %v926_v44 = vrot.slane %v924_v38, 2  ;;  %v929_v45 = vrot.slane %v927_v39, 3  ;;  %v406_v46 = vshll.u32 %v1765_v4, 16  ;;  %v411_v33 = vshrl.u32 %v2722_v14, 16 }
  0xd5   : > { %v405_v49 = vrot.slane %v403_v43, 2  ;;  %v414_v50 = vshll.u32 %v2722_v14, 16  ;;  %v1799_v52 = vcombine.low %v311_v18, %v2666_v55  ;;  %v1800_v53 = vcombine.low %v2537_v22, %v2537_v22  ;;  %v2752_v4 = vld [vmem:[#allocation2 + $0x1c] ss:$0 sps:$4 sm:$0x11]  }
  0xd6   : > { %v386_v48 = vsel %vm369_vm7, %v377_v47, %v385_v30  ;;  %v922_v51 = vor.u32 %v921_v42, %v918_v37  ;;  %v408_v54 = vrot.slane %v406_v46, 3  ;;  %v413_v56 = vrot.slane %v411_v33, 2  ;;  %v2024_v42 = vld [vmem:[#allocation2 + $0xc] ss:$0 sps:$4 sm:$0x11]  }
  0xd7   : > { %364 = vrot.lane.b32.xlu1 %v363_v36, %s2246_s23  ;;  %v930_v57 = vor.u32 %v929_v45, %v926_v44  ;;  %v416_v58 = vrot.slane %v414_v50, 3  ;;  %v938_v28 = vrot.slane %v2715_v2, 3  ;;  %v1767_v17 = vcombine.low %v283_v40, %v2678_v7  ;;  %v314_v40 = vld [vmem:[#allocation2 + $0x14] sm:$0xe]  ;;  %v286_v46 = vld [vmem:[#allocation2 + $0x4] sm:$0xe] }
  0xd8   : > { %902 = vrot.lane.b32.xlu0 %v901_v41, %s2249_s7  ;;  %v909_v59 = vsel %vm392_vm2, %v907_v25, %v908_v26  ;;  %v946_v60 = vshrl.u32 %v1799_v52, 16  ;;  %v949_v61 = vshll.u32 %v1799_v52, 16  ;;  %v409_v62 = vor.u32 %v408_v54, %v405_v49  ;;  %v2772_v50 = vld [vmem:[#allocation2 + $0x1c] ss:$0 sps:$4 sm:$0x33]   ;;  %s1854_s23 = sshll.u32 %s2310_s19, 7 }
  0xd9   : > { %v937_v63 = vrot.slane %v1799_v52, 3  ;;  %v954_v0 = vshrl.u32 %v1800_v53, 16  ;;  %v417_v5 = vor.u32 %v416_v58, %v413_v56  ;;  %v957_v9 = vshll.u32 %v1800_v53, 16  ;;  %s2263_s19 = smov [#allocation11]  }
  0xda   : > { %v948_v6 = vrot.slane %v946_v60, 3  ;;  %v1768_v10 = vcombine.low %v2577_v8, %v2577_v8  ;;  %v395_v2 = vsel %vm392_vm2, %v393_v31, %v394_v32  ;;  %v931_v11 = vsel %vm401_vm8, %v922_v51, %v930_v57  ;;  %v316_v57 = vld [vmem:[#allocation2 + $0x14] sm:$0xc] }
  0xdb   : > { %387 = vrot.lane.b32.xlu1 %v386_v48, %s2249_s7  ;;  %v951_v12 = vrot.slane %v949_v61, 4  ;;  %v435_v13 = vshrl.u32 %v1767_v17, 16  ;;  %v956_v34 = vrot.slane %v954_v0, 3  ;;  %v959_v19 = vrot.slane %v957_v9, 4 }
  0xdc   : > { %910 = vrot.lane.b32.xlu0 %v909_v59, %s2245_s21  ;;  %v438_v20 = vshll.u32 %v1767_v17, 16  ;;  %v443_v16 = vshrl.u32 %v1768_v10, 16  ;;  %v446_v24 = vshll.u32 %v1768_v10, 16  ;;  %v1801_v25 = vcombine.low %v2666_v55, %v2537_v22 }
  0xdd   : > { %v2758_v26 = vcombine.low %v2678_v7, %v2577_v8  ;;  %v418_v29 = vsel %vm401_vm8, %v409_v62, %v417_v5  ;;  %v425_v18 = vrot.slane %v1767_v17, 3  ;;  %v426_v47 = vrot.slane %v2722_v14, 3 }
  0xde   : > { %v437_v30 = vrot.slane %v435_v13, 3  ;;  %v440_v32 = vrot.slane %v438_v20, 4  ;;  %v445_v35 = vrot.slane %v443_v16, 3  ;;  %v448_v31 = vrot.slane %v446_v24, 4 }
  0xdf   : > { %396 = vrot.lane.b32.xlu1 %v395_v2, %s2245_s21  ;;  %v973_v37 = vshll.u32 %v1801_v25, 16  ;;  %v939_v55 = vsel %vm424_vm4, %v937_v63, %v938_v28  ;;  %v952_v38 = vor.u32 %v951_v12, %v948_v6  ;;  %v960_v39 = vor.u32 %v959_v19, %v956_v34  ;;  %v2779_v28 = vld [vmem:[#allocation2 + $0xc] ss:$0 sps:$4 sm:$0x33]   ;;  %v288_v6 = vld [vmem:[#allocation2 + $0x4] sm:$0xc] }
  0xe0   : > { %932 = vrot.lane.b32.xlu0 %v931_v11, %s2250_s9  ;;  %v462_v7 = vshll.u32 %v2758_v26, 16  ;;  %v971_v36 = vshrl.u32 %v1801_v25, 16  ;;  %v978_v14 = vshll.u32 %v2752_v4, 16  ;;  %v427_v43 = vsel %vm424_vm4, %v425_v18, %v426_v47  ;;  %v2789_v12 = vld [vmem:[#allocation2 + $0x1c] ss:$0 sps:$4 sm:$0x77]  }
  0xe1   : > { %v975_v41 = vrot.slane %v973_v37, 1  ;;  %v441_v44 = vor.u32 %v440_v32, %v437_v30  ;;  %v449_v45 = vor.u32 %v448_v31, %v445_v35  ;;  %v961_v33 = vsel %vm433_vm9, %v952_v38, %v960_v39  ;;  %v2802_v35 = vld [vmem:[#allocation2 + $0xc] ss:$0 sps:$4 sm:$0x77]   ;;  %s2262_s21 = smov 64  }
  0xe2   : > { %v1803_v49 = vcombine.low %v314_v40, %v2537_v22  ;;  %v460_v52 = vshrl.u32 %v2758_v26, 16  ;;  %v464_v53 = vrot.slane %v462_v7, 1  ;;  %v980_v51 = vrot.slane %v978_v14, 1 }
  0xe3   : > { %419 = vrot.lane.b32.xlu1 %v418_v29, %s2250_s9  ;;  %v976_v48 = vor.u32 %v975_v41, %v971_v36  ;;  %v467_v54 = vshll.u32 %v2024_v42, 16  ;;  %v1771_v56 = vcombine.low %v286_v46, %v2577_v8  ;;  %v450_v58 = vsel %vm433_vm9, %v441_v44, %v449_v45 }
  0xe4   : > { %940 = vrot.lane.b32.xlu0 %v939_v55, %s2247_s14  ;;  %v996_v17 = vshrl.u32 %v1803_v49, 16  ;;  %v999_v59 = vshll.u32 %v1803_v49, 16  ;;  %v1004_v60 = vshrl.u32 %v2772_v50, 16  ;;  %v1007_v61 = vshll.u32 %v2772_v50, 16 }
  0xe5   : > { %v465_v62 = vor.u32 %v464_v53, %v460_v52  ;;  %v988_v63 = vrot.slane %v2752_v4, 1  ;;  %v477_v0 = vrot.slane %v2024_v42, 1  ;;  %v2785_v5 = vcombine.low %v316_v57, %v2537_v22  ;;  %v290_v57 = vld [vmem:[#allocation2 + $0x4] sm:$0x8] }
  0xe6   : > { %v981_v9 = vsel %vm342_vm6, %v976_v48, %v980_v51  ;;  %v469_v10 = vrot.slane %v467_v54, 1  ;;  %v987_v2 = vrot.slane %v1803_v49, 1  ;;  %v476_v11 = vrot.slane %v1771_v56, 1  ;;  %v2045_v54 = vld [vmem:[#allocation2 + $0x18] sm:$0xf] }
  0xe7   : > { %428 = vrot.lane.b32.xlu1 %v427_v43, %s2247_s14  ;;  %v485_v13 = vshrl.u32 %v1771_v56, 16  ;;  %v488_v34 = vshll.u32 %v1771_v56, 16  ;;  %v493_v19 = vshrl.u32 %v2779_v28, 16  ;;  %v496_v20 = vshll.u32 %v2779_v28, 16  ;;  %v318_v43 = vld [vmem:[#allocation2 + $0x14] sm:$0x8] }
  0xe8   : > { %962 = vrot.lane.b32.xlu0 %v961_v33, %s2251_s11  ;;  %v998_v22 = vrot.slane %v996_v17, 1  ;;  %v1001_v16 = vrot.slane %v999_v59, 2  ;;  %v1006_v4 = vrot.slane %v1004_v60, 1  ;;  %v1009_v24 = vrot.slane %v1007_v61, 2  ;;  %s255_s14 = scalar_lea.vmem [#allocation11], %s1756_s26  ;;  %s2166_s26 = sshll.u32 %s2263_s19, 4  ;;  %s2167_s26 = int_to_ptr.vmem [resolvable:$false] %s2166_s26 }
  0xe9   : > { %v1773_v29 = vcombine.low %v288_v6, %v2577_v8  ;;  %v1026_v18 = vshrl.u32 %v2785_v5, 16  ;;  %v1029_v47 = vshll.u32 %v2785_v5, 16  ;;  %v1034_v30 = vshrl.u32 %v2789_v12, 16  ;;  %s1644_s7 = sshll.u32 %s255_s14, 4  ;;  %s2952_s7 = int_to_ptr.vmem [resolvable:$true] %s1644_s7 }
  0xea   : > { %v1037_v32 = vshll.u32 %v2789_v12, 16  ;;  %v487_v31 = vrot.slane %v485_v13, 1  ;;  %v490_v37 = vrot.slane %v488_v34, 2  ;;  %v495_v55 = vrot.slane %v493_v19, 1  ;;  %p2169_p12 = scmp.lt.s32.totalorder %s2952_s7, %s2167_s26 }
  0xeb   : > { %451 = vrot.lane.b32.xlu1 %v450_v58, %s2251_s11  ;;  %v498_v38 = vrot.slane %v496_v20, 2  ;;  %v989_v39 = vsel %vm360_vm3, %v987_v2, %v988_v63  ;;  %v478_v7 = vsel %vm360_vm3, %v476_v11, %v477_v0  ;;  %v1002_v40 = vor.u32 %v1001_v16, %v998_v22  ;;  %v2046_v58 = vld [vmem:[#allocation2 + $0x1c] sm:$0xf]  ;;  %v2047_v2 = vld [vmem:[#allocation2 + $0xc] sm:$0xf] }
  0xec   : > { %965 = vrot.lane.b32.xlu0 %v1801_v25, %s2252_s30  ;;  %v470_v25 = vsel %vm342_vm6, %v465_v62, %v469_v10  ;;  %v1028_v36 = vrot.slane %v1026_v18, 2  ;;  %v1031_v41 = vrot.slane %v1029_v47, 3  ;;  %v515_v14 = vshrl.u32 %v1773_v29, 16 }
  0xed   : > { %v518_v42 = vshll.u32 %v1773_v29, 16  ;;  %v1036_v44 = vrot.slane %v1034_v30, 2  ;;  %v1039_v45 = vrot.slane %v1037_v32, 3  ;;  %v523_v46 = vshrl.u32 %v2802_v35, 16 }
  0xee   : > { %v526_v33 = vshll.u32 %v2802_v35, 16  ;;  %v491_v49 = vor.u32 %v490_v37, %v487_v31  ;;  %v499_v52 = vor.u32 %v498_v38, %v495_v55  ;;  %v1017_v53 = vrot.slane %v2785_v5, 2  ;;  %v2029_v55 = vld [vmem:[#allocation6 + $0x40] sm:$0xff]  }
  0xef   : > { %454 = vrot.lane.b32.xlu1 %v2758_v26, %s2252_s30  ;;  %v1010_v26 = vor.u32 %v1009_v24, %v1006_v4  ;;  %v1018_v48 = vrot.slane %v2772_v50, 2  ;;  %v1807_v56 = vcombine.low %v318_v43, %v2045_v54  ;;  %v1808_v17 = vcombine.low %v2046_v58, %v2046_v58  ;;  %v2030_v38 = vld [vmem:[#allocation6] sm:$0xff]   ;;  %1862 = vmatprep.subr.bf16.mxu1 %v2029_v55  ;;  %v2035_v54 = vld [vmem:[#allocation6 + $0x58] sm:$0xff]   ;;  %s2950_s30 = scalar_lea.hbm %s3003_s4, %s1854_s23 }
  0xf0   : > { %982 = vrot.lane.b32.xlu0 %v981_v9, %s2253_s5  ;;  %v506_v59 = vrot.slane %v1773_v29, 2  ;;  %v507_v60 = vrot.slane %v2779_v28, 2  ;;  %v1032_v61 = vor.u32 %v1031_v41, %v1028_v36  ;;  %v517_v62 = vrot.slane %v515_v14, 2  ;;  %1863 = vmatpush3.bf16.msra.mxu1 %v2030_v38  ;;  %v2036_v58 = vld [vmem:[#allocation6 + $0x18] sm:$0xff]  }
  0xf1   : > { %v1011_v51 = vsel %vm369_vm7, %v1002_v40, %v1010_v26  ;;  %v1040_v63 = vor.u32 %v1039_v45, %v1036_v44  ;;  %v520_v0 = vrot.slane %v518_v42, 3  ;;  %v525_v6 = vrot.slane %v523_v46, 2  ;;  %v2032_v45 = vld [vmem:[#allocation6 + $0x8] sm:$0xff]   ;;  %v2033_v46 = vld [vmem:[#allocation6 + $0x50] sm:$0xff]  }
  0xf2   : > { %v528_v5 = vrot.slane %v526_v33, 3  ;;  %v500_v50 = vsel %vm369_vm7, %v491_v49, %v499_v52  ;;  %v1019_v9 = vsel %vm392_vm2, %v1017_v53, %v1018_v48  ;;  %v1775_v10 = vcombine.low %v290_v57, %v2577_v8  ;;  %v2034_v48 = vld [vmem:[#allocation6 + $0x10] sm:$0xff]  }
  0xf3   : > { %471 = vrot.lane.b32.xlu1 %v470_v25, %s2253_s5  ;;  %v1776_v11 = vcombine.low %v2047_v2, %v2047_v2  ;;  %v1056_v13 = vshrl.u32 %v1807_v56, 16  ;;  %v1059_v28 = vshll.u32 %v1807_v56, 16  ;;  %v1064_v34 = vshrl.u32 %v1808_v17, 16  ;;  %s1631_s5 = scalar_lea.sflag [#allocation5], %s2488_s25 }
  0xf4   : > { %990 = vrot.lane.b32.xlu0 %v989_v39, %s2254_s27  ;;  %v1067_v19 = vshll.u32 %v1808_v17, 16  ;;  %v508_v20 = vsel %vm392_vm2, %v506_v59, %v507_v60  ;;  %v1048_v22 = vrot.slane %v2789_v12, 3  ;;  %v1041_v16 = vsel %vm401_vm8, %v1032_v61, %v1040_v63  ;;  %v2031_v12 = vld [vmem:[#allocation6 + $0x48] sm:$0xff]   ;;  %v2037_v59 = vld [vmem:[#allocation6 + $0x60] sm:$0xff]  }
  0xf5   : > { %v521_v4 = vor.u32 %v520_v0, %v517_v62  ;;  %v529_v24 = vor.u32 %v528_v5, %v525_v6  ;;  %v1047_v29 = vrot.slane %v1807_v56, 3  ;;  %v545_v8 = vshrl.u32 %v1775_v10, 16  ;;  %1864 = vmatprep.subr.bf16.mxu1 %v2031_v12  ;;  %v2038_v61 = vld [vmem:[#allocation6 + $0x20] sm:$0xff]   ;;  %v2039_v63 = vld [vmem:[#allocation6 + $0x68] sm:$0xff]   ;;  %v2043_v12 = vld [vmem:[#allocation6 + $0x78] sm:$0xff]  }
  0xf6   : > { %v548_v18 = vshll.u32 %v1775_v10, 16  ;;  %v553_v47 = vshrl.u32 %v1776_v11, 16  ;;  %v556_v25 = vshll.u32 %v1776_v11, 16  ;;  %v1058_v30 = vrot.slane %v1056_v13, 3  ;;  %1865 = vmatpush3.bf16.msra.mxu1 %v2032_v45  ;;  %v2040_v6 = vld [vmem:[#allocation6 + $0x28] sm:$0xff]  }
  0xf7   : > { %479 = vrot.lane.b32.xlu1 %v478_v7, %s2254_s27  ;;  %v1061_v32 = vrot.slane %v1059_v28, 4  ;;  %v1066_v31 = vrot.slane %v1064_v34, 3  ;;  %v1069_v37 = vrot.slane %v1067_v19, 4  ;;  %v530_v39 = vsel %vm401_vm8, %v521_v4, %v529_v24  ;;  %1866 = vmatprep.subr.bf16.mxu1 %v2033_v46  ;;  %s2162_s27 = scalar_lea.vmem %s2952_s7, 128 }
  0xf8   : > { %1012 = vrot.lane.b32.xlu0 %v1011_v51, %s2255_s6  ;;  %v536_v7 = vrot.slane %v1775_v10, 3  ;;  %v537_v40 = vrot.slane %v2802_v35, 3  ;;  %v547_v26 = vrot.slane %v545_v8, 3  ;;  %v550_v36 = vrot.slane %v548_v18, 4  ;;  %v2042_v10 = vld [vmem:[#allocation6 + $0x30] sm:$0xff]   ;;  %p2163_p10 = scmp.ne.s32.totalorder %s2952_s7, %s2162_s27 }
  0xf9   : > { %v555_v41 = vrot.slane %v553_v47, 3  ;;  %v558_v14 = vrot.slane %v556_v25, 4  ;;  %v1049_v42 = vsel %vm424_vm4, %v1047_v29, %v1048_v22  ;;  %v1062_v43 = vor.u32 %v1061_v32, %v1058_v30 }
  0xfa   : > { %v1070_v44 = vor.u32 %v1069_v37, %v1066_v31  ;;  %v538_v35 = vsel %vm424_vm4, %v536_v7, %v537_v40  ;;  %v551_v49 = vor.u32 %v550_v36, %v547_v26  ;;  %1867 = vmatpush3.bf16.msra.mxu1 %v2034_v48  ;;  %vm563_vm10 = vcmask 31744   ;;  %v1423_v26 = vld [vmem:[#allocation8] sm:$0x3]  ;;  %v2044_v36 = vld [vmem:[#allocation6 + $0x38] sm:$0xff]   ;;  %p2164_p3 = pnand %p2163_p10, %p2437_p5 }
  0xfb   : > { %501 = vrot.lane.b32.xlu1 %v500_v50, %s2255_s6  ;;  %v559_v52 = vor.u32 %v558_v14, %v555_v41  ;;  %1868 = vmatprep.subr.bf16.mxu1 %v2035_v54  ;;  %v2041_v50 = vld [vmem:[#allocation6 + $0x70] sm:$0xff]   ;;  %vm566_vm11 = vcmask 64512   ;;  %v1825_v29 = vcombine.low %v2514_v1, %v2516_v3  ;;  %vm569_vm12 = vcmask 97280   ;;  %s2168_s6 = scalar_lea.vmem %s2167_s26, 256 }
  0xfc   : > { %1020 = vrot.lane.b32.xlu0 %v1019_v9, %s2256_s8  ;;  %v1071_v53 = vsel %vm433_vm9, %v1062_v43, %v1070_v44  ;;  %vm572_vm13 = vcmask 130048   ;;  %vm575_vm14 = vcmask 162816   ;;  %vm1410_vm15 = vcmask 1040384   ;;  %p2165_p7 = pneg %p2164_p3  ;;  %p2170_p1 = scmp.lt.s32.totalorder %s2168_s6, %s2162_s27 }
  0xfd   : > { %v560_v57 = vsel %vm433_vm9, %v551_v49, %v559_v52  ;;  %v1403_v47 = vshrl.u32 %v1825_v29, 16  ;;  %v1406_v37 = vshll.u32 %v1825_v29, 16  ;;  %vm1411_vm0 = vsmask.f32 256 }
  0xfe   : > { %1869 = vmatpush3.bf16.msra.mxu1 %v2036_v58  ;;  %vm2869_vm1 = vmand %vm1410_vm15, %vm1411_vm0  ;;  %vm578_vm2 = vcmask 195584   ;;  %vm1427_vm3 = vcmask 1041408   ;;  %v2260_v14 = vmov 0.0   ;;  %vm581_vm4 = vcmask 228352   ;;  %p2171_p2 = por %p2170_p1, %p2169_p12 }
  0xff   : > { %509 = vrot.lane.b32.xlu1 %v508_v20, %s2256_s8  ;;  %1870 = vmatprep.subr.bf16.mxu1 %v2037_v59  ;;  %v1405_v31 = vrot.slane %v1403_v47, 7  ;;  %v1414_v3 = vrot.slane %v1406_v37, 1  ;;  %vm1417_vm5 = vcmask 1047552   ;;  %vm584_vm7 = vcmask 261120  }
 0x100   : > { %1042 = vrot.lane.b32.xlu0 %v1041_v16, %s2257_s12  ;;  %1884 = vmatprep.subr.bf16.mxu0 %v2260_v14  ;;  %vm1418_vm8 = vmand %vm1417_vm5, %vm342_vm6  ;;  %vm587_vm9 = vcmask 293888   ;;  %vm2261_vm15 = vmmov 0   ;;  %vm590_vm0 = vcmask 326656   ;;  %vm596_vm6 = vcmask 392192   ;;  %p2172_p4 = pnand %p2171_p2, %p2165_p7 }
 0x101   : > { %v1408_v1 = vor.u32 %v1406_v37, %v1405_v31  ;;  %v1415_v44 = vor.u32 %v1414_v3, %v1403_v47  ;;  %1886 = vmatprep.mubr.msk.bf16.mxu0 %vm2261_vm15, %v2260_v14  ;;  %vm602_vm5 = vcmask 457728  }
 0x102   : > { %1871 = vmatpush3.bf16.msra.mxu1 %v2038_v61 }
 0x103   : > { %531 = vrot.lane.b32.xlu1 %v530_v39, %s2257_s12  ;;  %1872 = vmatprep.subr.bf16.mxu1 %v2039_v63  ;;  %v1413_v43 = vsel %vm2869_vm1, 4286644096, %v1408_v1  ;;  %v1419_v52 = vsel %vm1418_vm8, %v1415_v44, 4286644096  ;;  %vm593_vm1 = vcmask 359424   ;;  %vm605_vm8 = vcmask 490496  }
 0x104   : > { %1050 = vrot.lane.b32.xlu0 %v1049_v42, %s2258_s29  ;;  %v1429_v42 = vsel %vm1427_vm3, %v1423_v26, 0  ;;  %v1421_v46 = vmax.bf16 %v1825_v29, %v1413_v43  ;;  %vm599_vm3 = vcmask 424960  }
 0x105   : > { %v2831_v33 = vpop.permute.xlu0 %1158  ;;  %1885 = vmatpush3.bf16.msra.mxu0 %v1429_v42 }
 0x106   : > { %v1129_v51 = vpop.permute.xlu1 %1128  ;;  %1873 = vmatpush3.bf16.msra.mxu1 %v2040_v6 }
 0x107   : > { %539 = vrot.lane.b32.xlu1 %v538_v35, %s2258_s29  ;;  %1874 = vmatprep.subr.bf16.mxu1 %v2041_v50 }
 0x108   : > { %1072 = vrot.lane.b32.xlu0 %v1071_v53, %s2259_s28 }
 0x109   : > { %v2837_v56 = vpop.permute.xlu0 %1188 }
 0x10a   : > { %v633_v17 = vpop.permute.xlu1 %632  ;;  %1875 = vmatpush3.bf16.msra.mxu1 %v2042_v10 }
 0x10b   : > { %561 = vrot.lane.b32.xlu1 %v560_v57, %s2259_s28  ;;  %1876 = vmatprep.subr.bf16.mxu1 %v2043_v12 }
 0x10e   : > { %v1121_v60 = vpop.permute.xlu0 %1120  ;;  %v663_v62 = vpop.permute.xlu1 %662  ;;  %1877 = vmatpush3.bf16.msra.mxu1 %v2044_v36 }
 0x10f   : > { %v1323_v8 = vsel %vm563_vm10, %v2545_v27, %v1121_v60 }
 0x110   : > { %v1325_v30 = vsel %vm566_vm11, %v1323_v8, %v1129_v51  ;;  %v1422_v51 = vmax.bf16 %v1421_v46, %v1419_v52 }
 0x112   : > { %v1151_v0 = vpop.permute.xlu0 %1150  ;;  %v2842_v5 = vpop.permute.xlu1 %692  ;;  %1887 = vmatmul.mubr.msk.bf16.vlgmr.msra.gmra.mrb[0].mxu0 %vm563_vm10, %v1422_v51 }
 0x113   : > { %v1327_v55 = vsel %vm569_vm12, %v1325_v30, %v1151_v0 }
 0x114   : > { %v1329_v7 = vsel %vm572_vm13, %v1327_v55, %v2831_v33 }
 0x116   : > { %v1181_v9 = vpop.permute.xlu0 %1180  ;;  %v655_v2 = vpop.permute.xlu1 %654 }
 0x117   : > { %v1331_v41 = vsel %vm575_vm14, %v1329_v7, %v1181_v9 }
 0x118   : > { %v1333_v35 = vsel %vm578_vm2, %v1331_v41, %v2837_v56 }
 0x11a   : > { %v625_v11 = vpop.permute.xlu0 %624 }
 0x11b   : > { %v685_v13 = vpop.permute.xlu1 %684  ;;  %v827_v16 = vsel %vm563_vm10, %v2583_v21, %v625_v11 }
 0x11c   : > { %v829_v18 = vsel %vm566_vm11, %v827_v16, %v633_v17 }
 0x11d   : > { %v831_v21 = vsel %vm569_vm12, %v829_v18, %v655_v2 }
 0x11e   : > { %v1211_v28 = vpop.permute.xlu0 %1210  ;;  %v833_v27 = vsel %vm572_vm13, %v831_v21, %v663_v62 }
 0x11f   : > { %v835_v45 = vsel %vm575_vm14, %v833_v27, %v685_v13  ;;  %v1335_v53 = vsel %vm581_vm4, %v1333_v35, %v1211_v28 }
 0x120   : > { %v837_v48 = vsel %vm578_vm2, %v835_v45, %v2842_v5 }
 0x121   : > { %v2844_v34 = vpop.permute.xlu1 %714 }
 0x122   : > { %v2846_v19 = vpop.permute.xlu0 %1213  ;;  %v839_v58 = vsel %vm581_vm4, %v837_v48, %v2844_v34 }
 0x123   : > { %v1337_v54 = vsel %vm584_vm7, %v1335_v53, %v2846_v19 }
 0x125   : > { %v2848_v20 = vpop.permute.xlu1 %717 }
 0x126   : > { %v2850_v22 = vpop.permute.xlu0 %1230  ;;  %v841_v60 = vsel %vm584_vm7, %v839_v58, %v2848_v20 }
 0x127   : > { %v1339_v57 = vsel %vm587_vm9, %v1337_v54, %v2850_v22 }
 0x129   : > { %v2854_v4 = vpop.permute.xlu1 %734 }
 0x12a   : > { %v2856_v24 = vpop.permute.xlu0 %1238  ;;  %v843_v62 = vsel %vm587_vm9, %v841_v60, %v2854_v4 }
 0x12b   : > { %v1341_v17 = vsel %vm590_vm0, %v1339_v57, %v2856_v24 }
 0x12d   : > { %v2863_v25 = vpop.permute.xlu1 %742 }
 0x12e   : > { %v1261_v32 = vpop.permute.xlu0 %1260  ;;  %v845_v0 = vsel %vm590_vm0, %v843_v62, %v2863_v25 }
 0x12f   : > { %v1343_v61 = vsel %vm593_vm1, %v1341_v17, %v1261_v32 }
 0x131   : > { %v765_v38 = vpop.permute.xlu1 %764 }
 0x132   : > { %v1269_v40 = vpop.permute.xlu0 %1268  ;;  %v847_v50 = vsel %vm593_vm1, %v845_v0, %v765_v38 }
 0x133   : > { %v1345_v63 = vsel %vm596_vm6, %v1343_v61, %v1269_v40 }
 0x135   : > { %v773_v33 = vpop.permute.xlu1 %772 }
 0x136   : > { %v1291_v49 = vpop.permute.xlu0 %1290  ;;  %v849_v2 = vsel %vm596_vm6, %v847_v50, %v773_v33 }
 0x137   : > { %v1347_v6 = vsel %vm599_vm3, %v1345_v63, %v1291_v49 }
 0x139   : > { %v795_v56 = vpop.permute.xlu1 %794 }
 0x13a   : > { %v1299_v59 = vpop.permute.xlu0 %1298  ;;  %v851_v13 = vsel %vm599_vm3, %v849_v2, %v795_v56 }
 0x13b   : > { %v1349_v9 = vsel %vm602_vm5, %v1347_v6, %v1299_v59 }
 0x13d   : > { %v803_v5 = vpop.permute.xlu1 %802 }
 0x13e   : > { %v1321_v10 = vpop.permute.xlu0 %1320  ;;  %v853_v28 = vsel %vm602_vm5, %v851_v13, %v803_v5 }
 0x13f   : > { %v1351_v11 = vsel %vm605_vm8, %v1349_v9, %v1321_v10 }
 0x140   : > { %1356 = vrot.lane.b32.xlu0 %v1351_v11, %s2262_s21 }
 0x141   : > { %v825_v34 = vpop.permute.xlu1 %824 }
 0x142   : > { %v855_v19 = vsel %vm605_vm8, %v853_v28, %v825_v34  ;;  %v873_v20 = vpop.permute.xlu0 %872 }
 0x143   : > { %1353 = vrot.lane.b32.xlu1 %v855_v19, %s2262_s21  ;;  %v1075_v22 = vsel %vm563_vm10, %v2685_v15, %v873_v20 }
 0x145   : > { %v356_v16 = vpop.permute.xlu1 %355 }
 0x146   : > { %v881_v4 = vpop.permute.xlu0 %880  ;;  %v565_v24 = vsel %vm563_vm10, %v2690_v23, %v356_v16  ;;  %vm1358_vm10 = vcmask 523264  }
 0x147   : > { %v1077_v29 = vsel %vm566_vm11, %v1075_v22, %v881_v4 }
 0x149   : > { %v365_v8 = vpop.permute.xlu1 %364 }
 0x14a   : > { %v568_v18 = vsel %vm566_vm11, %v565_v24, %v365_v8  ;;  %v903_v47 = vpop.permute.xlu0 %902 }
 0x14b   : > { %v1079_v25 = vsel %vm569_vm12, %v1077_v29, %v903_v47  ;;  %v1843_v47 = vld [vmem:[#allocation9] ss:$0 sm:$0xff] }
 0x14d   : > { %v388_v30 = vpop.permute.xlu1 %387 }
 0x14e   : > { %v571_v21 = vsel %vm569_vm12, %v568_v18, %v388_v30  ;;  %v911_v32 = vpop.permute.xlu0 %910 }
 0x14f   : > { %v1081_v31 = vsel %vm572_vm13, %v1079_v25, %v911_v32 }
 0x151   : > { %v397_v15 = vpop.permute.xlu1 %396 }
 0x152   : > { %v574_v37 = vsel %vm572_vm13, %v571_v21, %v397_v15  ;;  %v933_v55 = vpop.permute.xlu0 %932 }
 0x153   : > { %v1083_v23 = vsel %vm575_vm14, %v1081_v31, %v933_v55 }
 0x155   : > { %v420_v1 = vpop.permute.xlu1 %419 }
 0x156   : > { %v577_v3 = vsel %vm575_vm14, %v574_v37, %v420_v1  ;;  %v941_v27 = vpop.permute.xlu0 %940 }
 0x157   : > { %v1085_v38 = vsel %vm578_vm2, %v1083_v23, %v941_v27 }
 0x159   : > { %v429_v12 = vpop.permute.xlu1 %428 }
 0x15a   : > { %v963_v39 = vpop.permute.xlu0 %962  ;;  %v580_v7 = vsel %vm578_vm2, %v577_v3, %v429_v12 }
 0x15b   : > { %v1087_v40 = vsel %vm581_vm4, %v1085_v38, %v963_v39 }
 0x15d   : > { %v452_v26 = vpop.permute.xlu1 %451 }
 0x15e   : > { %v583_v36 = vsel %vm581_vm4, %v580_v7, %v452_v26  ;;  %v966_v41 = vpop.permute.xlu0 %965 }
 0x15f   : > { %v1089_v14 = vsel %vm584_vm7, %v1087_v40, %v966_v41 }
 0x161   : > { %v455_v42 = vpop.permute.xlu1 %454 }
 0x162   : > { %v586_v43 = vsel %vm584_vm7, %v583_v36, %v455_v42  ;;  %v983_v44 = vpop.permute.xlu0 %982 }
 0x163   : > { %v1091_v45 = vsel %vm587_vm9, %v1089_v14, %v983_v44 }
 0x165   : > { %v472_v46 = vpop.permute.xlu1 %471 }
 0x166   : > { %v589_v33 = vsel %vm587_vm9, %v586_v43, %v472_v46  ;;  %v991_v35 = vpop.permute.xlu0 %990 }
 0x167   : > { %v1093_v49 = vsel %vm590_vm0, %v1091_v45, %v991_v35 }
 0x169   : > { %v480_v52 = vpop.permute.xlu1 %479 }
 0x16a   : > { %v592_v53 = vsel %vm590_vm0, %v589_v33, %v480_v52  ;;  %v1013_v48 = vpop.permute.xlu0 %1012 }
 0x16b   : > { %v1095_v51 = vsel %vm593_vm1, %v1093_v49, %v1013_v48 }
 0x16d   : > { %v502_v54 = vpop.permute.xlu1 %501 }
 0x16e   : > { %v595_v57 = vsel %vm593_vm1, %v592_v53, %v502_v54  ;;  %v1021_v56 = vpop.permute.xlu0 %1020 }
 0x16f   : > { %v1097_v58 = vsel %vm596_vm6, %v1095_v51, %v1021_v56 }
 0x171   : > { %v510_v17 = vpop.permute.xlu1 %509 }
 0x172   : > { %v598_v59 = vsel %vm596_vm6, %v595_v57, %v510_v17  ;;  %v1043_v60 = vpop.permute.xlu0 %1042 }
 0x173   : > { %v1099_v61 = vsel %vm599_vm3, %v1097_v58, %v1043_v60 }
 0x175   : > { %v532_v62 = vpop.permute.xlu1 %531 }
 0x176   : > { %v601_v63 = vsel %vm599_vm3, %v598_v59, %v532_v62  ;;  %v1051_v0 = vpop.permute.xlu0 %1050 }
 0x177   : > { %v1101_v6 = vsel %vm602_vm5, %v1099_v61, %v1051_v0 }
 0x179   : > { %v540_v5 = vpop.permute.xlu1 %539 }
 0x17a   : > { %v604_v50 = vsel %vm602_vm5, %v601_v63, %v540_v5  ;;  %v1073_v9 = vpop.permute.xlu0 %1072 }
 0x17b   : > { %v1103_v10 = vsel %vm605_vm8, %v1101_v6, %v1073_v9 }
 0x17d   : > { %v562_v2 = vpop.permute.xlu1 %561 }
 0x17e   : > { %v607_v11 = vsel %vm605_vm8, %v604_v50, %v562_v2 }
 0x1b2   : > { %v1357_v13 = vpop.permute.xlu0 %1356 }
 0x1b3   : > { %v1363_v28 = vsel %vm1358_vm10, %v1103_v10, %v1357_v13 }
 0x1b4   : > { %1600 = vmatprep.mubr.bf16.mxu1 %v1363_v28 }
 0x1b5   : > { %v1354_v34 = vpop.permute.xlu1 %1353 }
 0x1b6   : > { %v1360_v19 = vsel %vm1358_vm10, %v607_v11, %v1354_v34 }
 0x1b7   : > { %1601 = vmatmul.mubr.bf16.vlgmr.msra.gmra.mrb[0].mxu1 %v1360_v19 }
 0x1e5   : > { %v1465_v20 = vpop.f32.mrb[0].mxu0 }
 0x1e6   : > { %v1888_v22 = vpop.f32.mrb[1].mxu0 }
 0x1e7   : > { %v1468_v16 = vpop.f32.mrb[2].mxu0 }
 0x1e8   : > { %v1889_v4 = vpop.f32.mrb[3].mxu0 }
 0x28a   : > { %v1878_v24 = vpop.f32.mrb[0].mxu1 }
 0x28b   : > { %v1879_v29 = vpop.f32.mrb[1].mxu1 }
 0x28c   : > { %v1880_v8 = vadd.f32 %v1879_v29, %v1878_v24  ;;  %v1881_v18 = vpop.f32.mrb[2].mxu1 }
 0x28d   : > { %v1882_v25 = vpop.f32.mrb[3].mxu1 }
 0x28e   : > { %v1603_v30 = vadd.f32 %v1880_v8, %v1465_v20  ;;  %v1883_v21 = vadd.f32 %v1882_v25, %v1881_v18 }
 0x290   : > { %v1616_v32 = vadd.f32 %v1843_v47, %v1603_v30  ;;  %v1606_v31 = vadd.f32 %v1883_v21, %v1468_v16 }
 0x292   : > { %v1617_v15 = vadd.f32 %v1843_v47, %v1606_v31  ;;  %v1618_v37 = vmax.f32 %v1616_v32, 0.0 }
 0x294   : > { %v1619_v55 = vmax.f32 %v1617_v15, 0.0 }
 0x296   : > { %v1858_v23 = vpack.c.bf16 %v1619_v55, %v1618_v37 }
 0x298   : > { %1859 = vst [vmem:[%s255_s14] sm:$0xff] %v1858_v23  }
 0x299   : > { %2175 = shalt.err (!%p2172_p4)
}
 0x29a   : > { %s2176_s8 = scalar_lea.hbm %s2950_s30, 128  ;;  %s2180_s28 = scalar_lea.hbm %s3003_s4, 256 }
 0x29b   : > { %p2177_p9 = scmp.ne.s32.totalorder %s2950_s30, %s2176_s8  ;;  %p2181_p8 = scmp.lt.u32.totalorder %s2950_s30, %s3003_s4 }
 0x29c   : > { %p2182_p13 = scmp.lt.u32.totalorder %s2180_s28, %s2176_s8  ;;  %p2184_p10 = scmp.lt.u32.totalorder %s2176_s8, %s2950_s30 }
 0x29d   : > { %p2178_p0 = pnand %p2177_p9, %p2437_p5 }
 0x29e   : > { %p2183_p6 = por %p2182_p13, %p2181_p8 }
 0x29f   : > { %p2179_p11 = pneg %p2178_p0 }
 0x2a0   : > { %p2185_p3 = por %p2184_p10, %p2183_p6 }
 0x2a2   : > { %p2186_p7 = pnand %p2185_p3, %p2179_p11 }
 0x2a4   : > { %2189 = shalt.err (!%p2186_p7)
}
 0x2a5   : > { %1904 = dma.vmem_to_hbm [thread:$0]  (%p2437_p5), %s2952_s7, 128, %s2950_s30, %s1631_s5, %s2262_s21, %s2262_s21, %s2248_s20  }
 0x2a6 PF: > { %s1659_s9 = sand.u32 1, %s2224_s15   ;;  %p3023_p12 = scmp.ne.s32.totalorder %s3008_s22, 0 }
 0x2a7   : > { %p3024_p1 = scmp.ge.s32.totalorder %s2236_s18, 2  ;;  %s1660_s11 = scalar_lea.sflag [#allocation5], %s1659_s9 }
 0x2a9   : > { %p1921_p2 = pnand %p3024_p1, %p3023_p12 }
 0x2ab   : > { %2219 = dma.done.wait (!%p1921_p2), %s1660_s11, 128  }
 0x2ac   : > { %2221 = vsyncadd (!%p1921_p2), %s1660_s11, 4294967168  ;;  %p19_p4 = scmp.ge.s32.totalorder %s2423_s10, 4   ;;  %s3025_s15 = smov %s2228_s16 }
 0x2ad   : > { %s3026_s16 = smov %s2232_s17  ;;  %s3027_s17 = smov %s2433_s13 }
 0x2ae   : > { %s3028_s18 = smov %s2423_s10  ;;  %21 = sbr.rel (!%p19_p4) target bundleno = 7 (0x7), region = 93 }
 0x2b5   :  { %1665 = vsyncpa [#allocation4], 1 }
 0x2b6   :  { %1667 = vsyncpa [#allocation4 + $0x1], 1 }
 0x2b7   :  { %1668 = vsyncpa [#allocation7], 1 }
 0x2b8   :  { %1669 = vsyncpa [#allocation10], 1 }
 0x2b9   :  { %1670 = vsyncpa [#allocation5], 1 }
 0x2ba   :  { %1672 = vsyncpa [#allocation5 + $0x1], 1 }

// kernel: inception_time_fwd.11
= control target key start
LH: loop header
LB: loop body
LE: loop exit
PB: predicated region body
PF: predicated region fallthrough
CT: control target
= control target key end

     0   :  { %s4952_s0 = inlined_call_operand.hbm [shape: bf16[2,16,128], index: 0, kind: input, shape index: {}]   ;;  %s4953_s1 = inlined_call_operand.hbm [shape: bf16[128,32], index: 1, kind: input, shape index: {}]   ;;  %s4954_s2 = inlined_call_operand.hbm [shape: f32[1,32], index: 2, kind: input, shape index: {}]   ;;  %s4955_s3 = inlined_call_operand.hbm [shape: bf16[1280,128], index: 3, kind: input, shape index: {}]   ;;  %s4956_s4 = inlined_call_operand.hbm [shape: bf16[128,128], index: 4, kind: input, shape index: {}]   ;;  %s4957_s5 = inlined_call_operand.hbm [shape: f32[1,128], index: 5, kind: input, shape index: {}]   ;;  %s4958_s6 = inlined_call_operand.hbm [shape: bf16[2,16,128], index: 6, kind: input, shape index: {}]   ;;  %s4959_s7 = inlined_call_operand.hbm [shape: bf16[128,128], index: 7, kind: input, shape index: {}]   ;;  %s4960_s8 = inlined_call_operand.hbm [shape: f32[1,128], index: 8, kind: input, shape index: {}]   ;;  %s4961_s9 = inlined_call_operand.hbm [shape: f32[128,5], index: 9, kind: input, shape index: {}]   ;;  %s4962_s10 = inlined_call_operand.hbm [shape: f32[1,5], index: 10, kind: input, shape index: {}]   ;;  %s4963_s11 = inlined_call_operand.hbm [shape: f32[2,1,5], index: 11, kind: output, shape index: {}]  }
   0x1   :  { %4988 = sst [smem:[#allocation37_spill]] %s4952_s0 }
   0x2   :  { %4989 = sst [smem:[#allocation38_spill]] %s4953_s1 }
   0x3   :  { %4990 = sst [smem:[#allocation39_spill]] %s4954_s2 }
   0x4   :  { %4991 = sst [smem:[#allocation40_spill]] %s4955_s3 }
   0x5   :  { %4992 = sst [smem:[#allocation41_spill]] %s4956_s4 }
   0x6   :  { %4993 = sst [smem:[#allocation42_spill]] %s4957_s5 }
   0x7   :  { %4994 = sst [smem:[#allocation43_spill]] %s4959_s7 }
   0x8   :  { %4995 = sst [smem:[#allocation44_spill]] %s4960_s8 }
   0x9   :  { %4996 = sst [smem:[#allocation45_spill]] %s4962_s10 }
   0xa   :  { %4997 = sst [smem:[#allocation46_spill]] %s4963_s11 }
   0xb   :  { %16 = vsyncpa [#allocation4], 0 }
   0xc   :  { %18 = vsyncpa [#allocation4 + $0x1], 0 }
   0xd   :  { %19 = vsyncpa [#allocation7], 0 }
   0xe   :  { %20 = vsyncpa [#allocation10], 0 }
   0xf   :  { %21 = vsyncpa [#allocation13], 0 }
  0x10   :  { %22 = vsyncpa [#allocation19], 0 }
  0x11   :  { %23 = vsyncpa [#allocation5], 0 }
  0x12   :  { %25 = vsyncpa [#allocation5 + $0x1], 0  ;;  %s4058_s17 = smov 0   ;;  %s4060_s18 = smov 0  }
  0x13   :  { %s4062_s19 = smov 0   ;;  %s4064_s20 = smov 0  }
  0x14 LB: > { %4998 = sst [smem:[#allocation31_spill]] %s3961_s17  ;;  %s3975_s21 = smov [#allocation6]   ;;  %s3973_s20 = sphi %s4064_s20, %s5058_s20   ;;  %s3969_s19 = sphi %s4062_s19, %s5060_s19   ;;  %s3965_s18 = sphi %s4060_s18, %s5062_s18   ;;  %s3961_s17 = sphi %s4058_s17, %s5061_s17  }
  0x15   : > { %4999 = sst [smem:[#allocation32_spill]] %s3969_s19  ;;  %s315_s22 = sshll.u32 %s3975_s21, 4  ;;  %s4084_s22 = int_to_ptr.vmem [resolvable:$true] %s315_s22 }
  0x16   : > { %s4079_s23 = sadd.s32 4294967295, %s3973_s20   ;;  %p2797_p0 = scmp.ge.s32.totalorder %s3973_s20, 1 }
  0x17   : > { %p4969_p1 = scmp.eq.s32.totalorder %s4079_s23, 0  ;;  %p303_p2 = scmp.lt.s32.totalorder %s3973_s20, 3 }
  0x18   : > { %s3976_s25 = smov [#allocation9]   ;;  %s3977_s28 = smov [#allocation8]  }
  0x19   : > { %p4086_p3 = pnand %p2797_p0, %p303_p2  ;;  %s339_s26 = sshll.u32 %s3976_s25, 4  ;;  %s4099_s26 = int_to_ptr.vmem [resolvable:$true] %s339_s26 }
  0x1a   : > { %s329_s29 = sshll.u32 %s3977_s28, 4  ;;  %s5003_s1 = sld [smem:[#allocation38_spill]]  ;;  %s4101_s29 = int_to_ptr.vmem [resolvable:$true] %s329_s29 }
  0x1b   : > { %s5000_s24 = scalar_select %p4086_p3, 1, 0 }
  0x1c   : > { %p3302_p5 = pneg %p4086_p3 }
  0x1d   : > { %5001 = sst [smem:[#allocation33_spill]] %s5000_s24 }
  0x1e   : > { %p4095_p6 = pnand %p3302_p5, %p4969_p1 }
  0x20   : > { %s5002_s27 = scalar_select %p4095_p6, 1, 0 }
  0x21   : > { %s3563_s13 = scalar_lea.hbm %s5003_s1, 1024  ;;  %p4111_p8 = pneg %p4095_p6 }
  0x22   : > { %p3564_p7 = scmp.ne.s32.totalorder %s5003_s1, %s3563_s13  ;;  %p3570_p11 = scmp.lt.u32.totalorder %s3563_s13, %s5003_s1 }
  0x24   : > { %p3566_p9 = pnand %p4111_p8, %p3564_p7 }
  0x26   : > { %p3567_p10 = pneg %p3566_p9 }
  0x28   : > { %p3572_p12 = pnand %p3570_p11, %p3567_p10 }
  0x2a   : > { %3575 = shalt.err (!%p3572_p12)
}
  0x2b   : > { %s3576_s28 = scalar_lea.vmem %s4084_s22, 1024  ;;  %p3584_p5 = scmp.lt.s32.totalorder %s4084_s22, %s4084_s22 }
  0x2c   : > { %p3577_p13 = scmp.ne.s32.totalorder %s4084_s22, %s3576_s28  ;;  %p3585_p4 = scmp.lt.s32.totalorder %s3576_s28, %s3576_s28 }
  0x2e   : > { %p3579_p0 = pnand %p3577_p13, %p4111_p8  ;;  %p3586_p7 = por %p3585_p4, %p3584_p5 }
  0x30   : > { %p3580_p2 = pneg %p3579_p0 }
  0x32   : > { %p3587_p9 = pnand %p3586_p7, %p3580_p2 }
  0x34   : > { %3590 = shalt.err (!%p3587_p9)
}
  0x35   : > { %s4967_s30 = smov 64   ;;  %s4971_s12 = smov 4  }
  0x36   : > { %3305 = dma.hbm_to_vmem [thread:$0]  (!%p4095_p6), %s5003_s1, 1024, %s4084_s22, [#allocation7], %s4967_s30, %s4967_s30, %s4971_s12  }
  0x37   : > { %s5005_s3 = sld [smem:[#allocation40_spill]] }
  0x3d   : > { %s3591_s25 = scalar_lea.hbm %s5005_s3, 10240 }
  0x3e   : > { %p3592_p4 = scmp.ne.s32.totalorder %s5005_s3, %s3591_s25  ;;  %p3598_p12 = scmp.lt.u32.totalorder %s3591_s25, %s5005_s3 }
  0x40   : > { %p3594_p10 = pnand %p3592_p4, %p4111_p8 }
  0x42   : > { %p3595_p11 = pneg %p3594_p10 }
  0x44   : > { %p3600_p13 = pnand %p3598_p12, %p3595_p11 }
  0x46   : > { %3603 = shalt.err (!%p3600_p13)
}
  0x47   : > { %s3604_s22 = scalar_lea.vmem %s4099_s26, 10240  ;;  %p3612_p7 = scmp.lt.s32.totalorder %s4099_s26, %s4099_s26 }
  0x48   : > { %p3605_p0 = scmp.ne.s32.totalorder %s4099_s26, %s3604_s22  ;;  %p3613_p9 = scmp.lt.s32.totalorder %s3604_s22, %s3604_s22 }
  0x4a   : > { %p3607_p2 = pnand %p3605_p0, %p4111_p8  ;;  %p3614_p4 = por %p3613_p9, %p3612_p7 }
  0x4c   : > { %p3608_p5 = pneg %p3607_p2 }
  0x4e   : > { %p3615_p10 = pnand %p3614_p4, %p3608_p5 }
  0x50   : > { %3618 = shalt.err (!%p3615_p10)
}
  0x51   : > { %3311 = dma.hbm_to_vmem [thread:$0]  (!%p4095_p6), %s5005_s3, 10240, %s4099_s26, [#allocation10], %s4967_s30, %s4967_s30, %s4971_s12  }
  0x52   : > { %s5006_s2 = sld [smem:[#allocation39_spill]] }
  0x58   : > { %s3619_s14 = scalar_lea.hbm %s5006_s2, 16 }
  0x59   : > { %p3620_p11 = scmp.ne.s32.totalorder %s5006_s2, %s3619_s14  ;;  %p3626_p0 = scmp.lt.u32.totalorder %s3619_s14, %s5006_s2 }
  0x5b   : > { %p3622_p12 = pnand %p3620_p11, %p4111_p8 }
  0x5d   : > { %p3623_p13 = pneg %p3622_p12 }
  0x5f   : > { %p3628_p2 = pnand %p3626_p0, %p3623_p13 }
  0x61   : > { %3631 = shalt.err (!%p3628_p2)
}
  0x62   : > { %s3632_s26 = scalar_lea.vmem %s4101_s29, 16  ;;  %s3639_s22 = scalar_lea.vmem %s4101_s29, 32 }
  0x63   : > { %p3633_p5 = scmp.ne.s32.totalorder %s4101_s29, %s3632_s26  ;;  %p3640_p4 = scmp.lt.s32.totalorder %s4101_s29, %s4101_s29 }
  0x64   : > { %p3641_p10 = scmp.lt.s32.totalorder %s3639_s22, %s3632_s26 }
  0x65   : > { %p3635_p7 = pnand %p3633_p5, %p4111_p8 }
  0x66   : > { %p3642_p11 = por %p3641_p10, %p3640_p4 }
  0x67   : > { %p3636_p9 = pneg %p3635_p7 }
  0x69   : > { %p3643_p12 = pnand %p3642_p11, %p3636_p9 }
  0x6b   : > { %3646 = shalt.err (!%p3643_p12)
}
  0x6c   : > { %3308 = dma.hbm_to_vmem [thread:$0]  (!%p4095_p6), %s5006_s2, 16, %s4101_s29, [#allocation7]  }
  0x6d   : > { %s3980_s24 = smov [#allocation11]   ;;  %s3981_s14 = smov [#allocation12]  }
  0x6e   : > { %s352_s13 = sshll.u32 %s3980_s24, 4  ;;  %s366_s15 = sshll.u32 %s3981_s14, 4  ;;  %s353_s13 = int_to_ptr.vmem [resolvable:$true] %s352_s13  ;;  %s367_s15 = int_to_ptr.vmem [resolvable:$true] %s366_s15 }
  0x6f   : > { %s5007_s4 = sld [smem:[#allocation41_spill]] }
  0x75   : > { %s3647_s28 = scalar_lea.hbm %s5007_s4, 1024 }
  0x76   : > { %p3648_p13 = scmp.ne.s32.totalorder %s5007_s4, %s3647_s28  ;;  %p3654_p5 = scmp.lt.u32.totalorder %s3647_s28, %s5007_s4 }
  0x78   : > { %p3650_p0 = pnand %p3648_p13, %p4111_p8 }
  0x7a   : > { %p3651_p2 = pneg %p3650_p0 }
  0x7c   : > { %p3656_p7 = pnand %p3654_p5, %p3651_p2 }
  0x7e   : > { %3659 = shalt.err (!%p3656_p7)
}
  0x7f   : > { %s3660_s29 = scalar_lea.vmem %s353_s13, 1024  ;;  %p3668_p11 = scmp.lt.s32.totalorder %s353_s13, %s353_s13 }
  0x80   : > { %p3661_p9 = scmp.ne.s32.totalorder %s353_s13, %s3660_s29  ;;  %p3669_p12 = scmp.lt.s32.totalorder %s3660_s29, %s3660_s29 }
  0x82   : > { %p3663_p4 = pnand %p3661_p9, %p4111_p8  ;;  %p3670_p1 = por %p3669_p12, %p3668_p11 }
  0x84   : > { %p3664_p10 = pneg %p3663_p4 }
  0x86   : > { %p3671_p3 = pnand %p3670_p1, %p3664_p10 }
  0x88   : > { %3674 = shalt.err (!%p3671_p3)
}
  0x89   : > { %s5008_s11 = smov 64   ;;  %s5009_s5 = sld [smem:[#allocation42_spill]] }
  0x8a   : > { %3314 = dma.hbm_to_vmem [thread:$0]  (!%p4095_p6), %s5007_s4, 1024, %s353_s13, [#allocation10], %s5008_s11, %s5008_s11, %s4971_s12  }
  0x8f   : > { %s3675_s25 = scalar_lea.hbm %s5009_s5, 16 }
  0x90   : > { %p3676_p1 = scmp.ne.s32.totalorder %s5009_s5, %s3675_s25  ;;  %p3682_p0 = scmp.lt.u32.totalorder %s3675_s25, %s5009_s5 }
  0x92   : > { %p3678_p3 = pnand %p3676_p1, %p4111_p8 }
  0x94   : > { %p3679_p13 = pneg %p3678_p3 }
  0x96   : > { %p3684_p2 = pnand %p3682_p0, %p3679_p13 }
  0x98   : > { %3687 = shalt.err (!%p3684_p2)
}
  0x99   : > { %s3688_s29 = scalar_lea.vmem %s367_s15, 16  ;;  %s3695_s13 = scalar_lea.vmem %s367_s15, 32 }
  0x9a   : > { %p3689_p5 = scmp.ne.s32.totalorder %s367_s15, %s3688_s29  ;;  %p3696_p4 = scmp.lt.s32.totalorder %s367_s15, %s367_s15 }
  0x9b   : > { %p3697_p10 = scmp.lt.s32.totalorder %s3695_s13, %s3688_s29 }
  0x9c   : > { %p3691_p7 = pnand %p3689_p5, %p4111_p8 }
  0x9d   : > { %p3698_p11 = por %p3697_p10, %p3696_p4 }
  0x9e   : > { %p3692_p9 = pneg %p3691_p7 }
  0xa0   : > { %p3699_p12 = pnand %p3698_p11, %p3692_p9 }
  0xa2   : > { %3702 = shalt.err (!%p3699_p12)
}
  0xa3   : > { %3317 = dma.hbm_to_vmem [thread:$0]  (!%p4095_p6), %s5009_s5, 16, %s367_s15, [#allocation13]  }
  0xa4   : > { %s2796_s14 = sadd.s32 4294967294, %s3973_s20   ;;  %s4226_s21 = sadd.s32 1, %s3973_s20  }
  0xa5   : > { %5010 = sst [smem:[#allocation34_spill]] %s4226_s21  ;;  %s38_s25 = sadd.s32 1, %s3969_s19 }
  0xa6   : > { %s35_s28 = ssub.s32 %s3973_s20, %s4226_s21  ;;  %p45_p1 = scmp.ne.s32.totalorder %s3969_s19, %s3965_s18 }
  0xa7   : > { %p36_p3 = scmp.eq.s32.totalorder %s35_s28, 0  ;;  %p46_p13 = scmp.eq.s32.totalorder %s3973_s20, 0 }
  0xa8   : > { %p51_p0 = scmp.ne.s32.totalorder %s3965_s18, %s3961_s17  ;;  %p290_p2 = scmp.eq.s32.totalorder %s4079_s23, 1 }
  0xa9   : > { %s4238_s26 = scalar_select %p36_p3, %s3969_s19, %s38_s25  }
  0xaa   : > { %p47_p5 = por %p46_p13, %p45_p1  ;;  %p5012_p7 = scmp.eq.s32.totalorder %s4079_s23, 0 }
  0xab   : > { %5011 = sst [smem:[#allocation35_spill]] %s4238_s26  ;;  %p4246_p4 = por %p290_p2, %p45_p1 }
  0xac   : > { %p4242_p9 = por %p5012_p7, %p51_p0  ;;  %p296_p10 = scmp.eq.s32.totalorder %s2796_s14, 1 }
  0xad   : > { %s5014_s22 = scalar_select %p4246_p4, 1, 0 }
  0xae   : > { %s5013_s15 = scalar_select %p4242_p9, 1, 0 }
  0xaf   : > { %p3350_p11 = scmp.lt.s32.totalorder %s3973_s20, 2  ;;  %s425_s10 = sand.u32 1, %s3973_s20  }
  0xb0   : > { %p4252_p12 = por %p296_p10, %p51_p0  ;;  %s427_s13 = sand.u32 1, %s3969_s19  }
  0xb1   : > { %s4973_s30 = sshll.u32 %s3973_s20, 7  ;;  %s4258_s24 = sshll.u32 %s427_s13, 3 }
  0xb2   : > { %s5015_s29 = scalar_select %p4252_p12, 1, 0 }
  0xb3   : > { %s5017_s0 = sld [smem:[#allocation37_spill]]  ;;  %p4267_p1 = pnand %p3350_p11, %p47_p5 }
  0xb4   : > { %5016 = sst [smem:[#allocation36_spill]] %s5015_s29  ;;  %s429_s1 = scalar_lea.vmem [#allocation3], %s4258_s24 }
  0xb5   : > { %s5018_s14 = scalar_select %p4267_p1, 1, 0 }
  0xb6   : > { %s436_s13 = sshll.u32 %s429_s1, 4  ;;  %s4274_s2 = scalar_lea.sflag [#allocation4], %s425_s10  ;;  %s4272_s13 = int_to_ptr.vmem [resolvable:$true] %s436_s13 }
  0xb7   : > { %p4981_p13 = pneg %p4267_p1 }
  0xb9   : > { %s4265_s12 = scalar_lea.hbm %s5017_s0, %s4973_s30  ;;  %s3708_s3 = scalar_lea.hbm %s5017_s0, 256 }
  0xba   : > { %s3703_s25 = scalar_lea.hbm %s4265_s12, 128  ;;  %p3709_p5 = scmp.lt.u32.totalorder %s4265_s12, %s5017_s0 }
  0xbb   : > { %p3704_p3 = scmp.ne.s32.totalorder %s4265_s12, %s3703_s25  ;;  %p3710_p7 = scmp.lt.u32.totalorder %s3708_s3, %s3703_s25 }
  0xbc   : > { %p3712_p11 = scmp.lt.u32.totalorder %s3703_s25, %s4265_s12 }
  0xbd   : > { %p3706_p0 = pnand %p4981_p13, %p3704_p3  ;;  %p3711_p10 = por %p3710_p7, %p3709_p5 }
  0xbf   : > { %p3707_p2 = pneg %p3706_p0  ;;  %p3713_p12 = por %p3712_p11, %p3711_p10 }
  0xc1   : > { %p3714_p4 = pnand %p3713_p12, %p3707_p2 }
  0xc3   : > { %3717 = shalt.err (!%p3714_p4)
}
  0xc4   : > { %s3718_s1 = scalar_lea.vmem %s4272_s13, 128  ;;  %s3982_s10 = smov [#allocation3]  }
  0xc5   : > { %p3719_p3 = scmp.ne.s32.totalorder %s4272_s13, %s3718_s1  ;;  %s3723_s30 = sshll.u32 %s3982_s10, 4  ;;  %s3724_s30 = int_to_ptr.vmem [resolvable:$false] %s3723_s30 }
  0xc6   : > { %s3725_s4 = scalar_lea.vmem %s3724_s30, 256  ;;  %p3726_p6 = scmp.lt.s32.totalorder %s4272_s13, %s3724_s30 }
  0xc7   : > { %p3721_p0 = pnand %p3719_p3, %p4981_p13  ;;  %p3727_p5 = scmp.lt.s32.totalorder %s3725_s4, %s3718_s1 }
  0xc9   : > { %p3722_p9 = pneg %p3721_p0  ;;  %p3728_p7 = por %p3727_p5, %p3726_p6 }
  0xcb   : > { %p3729_p10 = pnand %p3728_p7, %p3722_p9 }
  0xcd   : > { %3732 = shalt.err (!%p3729_p10)
}
  0xce   : > { %s5019_s3 = smov 4   ;;  %s450_s5 = scalar_lea.vmem [#allocation14], %s4258_s24 }
  0xcf   : > { %3333 = dma.hbm_to_vmem [thread:$0]  (!%p4267_p1), %s4265_s12, 128, %s4272_s13, %s4274_s2, %s5008_s11, %s5008_s11, %s5019_s3  }
  0xd0   : > { %s4306_s25 = sshll.u32 %s450_s5, 4  ;;  %s3983_s28 = smov [#allocation15]   ;;  %s4373_s25 = int_to_ptr.vmem [resolvable:$true] %s4306_s25 }
  0xd1   : > { %s376_s10 = sshll.u32 %s3983_s28, 4  ;;  %s3984_s1 = smov [#allocation16]   ;;  %s377_s10 = int_to_ptr.vmem [resolvable:$true] %s376_s10 }
  0xd2   : > { %s390_s30 = sshll.u32 %s3984_s1, 4  ;;  %s5020_s7 = sld [smem:[#allocation43_spill]]  ;;  %s391_s30 = int_to_ptr.vmem [resolvable:$true] %s390_s30 }
  0xd8   : > { %s3733_s26 = scalar_lea.hbm %s5020_s7, 1024 }
  0xd9   : > { %p3734_p6 = scmp.ne.s32.totalorder %s5020_s7, %s3733_s26  ;;  %p3740_p12 = scmp.lt.u32.totalorder %s3733_s26, %s5020_s7 }
  0xdb   : > { %p3736_p9 = pnand %p3734_p6, %p4111_p8 }
  0xdd   : > { %p3737_p4 = pneg %p3736_p9 }
  0xdf   : > { %p3742_p2 = pnand %p3740_p12, %p3737_p4 }
  0xe1   : > { %3745 = shalt.err (!%p3742_p2)
}
  0xe2   : > { %s3746_s13 = scalar_lea.vmem %s377_s10, 1024  ;;  %p3754_p5 = scmp.lt.s32.totalorder %s377_s10, %s377_s10 }
  0xe3   : > { %p3747_p11 = scmp.ne.s32.totalorder %s377_s10, %s3746_s13  ;;  %p3755_p7 = scmp.lt.s32.totalorder %s3746_s13, %s3746_s13 }
  0xe5   : > { %p3749_p3 = pnand %p3747_p11, %p4111_p8  ;;  %p3756_p10 = por %p3755_p7, %p3754_p5 }
  0xe7   : > { %p3750_p0 = pneg %p3749_p3 }
  0xe9   : > { %p3757_p13 = pnand %p3756_p10, %p3750_p0 }
  0xeb   : > { %3760 = shalt.err (!%p3757_p13)
}
  0xec   : > { %p5021_p6 = scmp.ne.s32.totalorder %s5002_s27, 0  ;;  %s5022_s8 = sld [smem:[#allocation44_spill]] }
  0xee   : > { %3320 = dma.hbm_to_vmem [thread:$0]  (!%p5021_p6), %s5020_s7, 1024, %s377_s10, [#allocation7], %s5008_s11, %s5008_s11, %s5019_s3  }
  0xf2   : > { %s3761_s5 = scalar_lea.hbm %s5022_s8, 16 }
  0xf3   : > { %p3762_p9 = scmp.ne.s32.totalorder %s5022_s8, %s3761_s5  ;;  %p3768_p12 = scmp.lt.u32.totalorder %s3761_s5, %s5022_s8 }
  0xf5   : > { %p3764_p13 = pnand %p3762_p9, %p4111_p8 }
  0xf7   : > { %p3765_p4 = pneg %p3764_p13 }
  0xf9   : > { %p3770_p2 = pnand %p3768_p12, %p3765_p4 }
  0xfb   : > { %3773 = shalt.err (!%p3770_p2)
}
  0xfc   : > { %s3774_s24 = scalar_lea.vmem %s391_s30, 16  ;;  %s3781_s10 = scalar_lea.vmem %s391_s30, 32 }
  0xfd   : > { %p3775_p11 = scmp.ne.s32.totalorder %s391_s30, %s3774_s24  ;;  %p3782_p5 = scmp.lt.s32.totalorder %s391_s30, %s391_s30 }
  0xfe   : > { %p3783_p7 = scmp.lt.s32.totalorder %s3781_s10, %s3774_s24 }
  0xff   : > { %p3777_p3 = pnand %p3775_p11, %p4111_p8 }
 0x100   : > { %p3784_p10 = por %p3783_p7, %p3782_p5 }
 0x101   : > { %p3778_p0 = pneg %p3777_p3 }
 0x103   : > { %p3785_p1 = pnand %p3784_p10, %p3778_p0 }
 0x105   : > { %3788 = shalt.err (!%p3785_p1)
}
 0x106   : > { %3323 = dma.hbm_to_vmem [thread:$0]  (!%p5021_p6), %s5022_s8, 16, %s391_s30, [#allocation10]  }
 0x107   : > { %s3985_s19 = smov [#allocation17]   ;;  %s3789_s28 = scalar_lea.hbm %s4961_s9, 2048 }
 0x108   : > { %s400_s21 = sshll.u32 %s3985_s19, 4  ;;  %p3790_p9 = scmp.ne.s32.totalorder %s4961_s9, %s3789_s28  ;;  %s401_s21 = int_to_ptr.vmem [resolvable:$true] %s400_s21 }
 0x109   : > { %p3796_p4 = scmp.lt.u32.totalorder %s3789_s28, %s4961_s9 }
 0x10a   : > { %p3792_p1 = pnand %p3790_p9, %p4111_p8 }
 0x10c   : > { %p3793_p13 = pneg %p3792_p1 }
 0x10e   : > { %p3798_p12 = pnand %p3796_p4, %p3793_p13 }
 0x110   : > { %3801 = shalt.err (!%p3798_p12)
}
 0x111   : > { %s3802_s30 = scalar_lea.vmem %s401_s21, 2048  ;;  %p3810_p0 = scmp.lt.s32.totalorder %s401_s21, %s401_s21 }
 0x112   : > { %p3803_p2 = scmp.ne.s32.totalorder %s401_s21, %s3802_s30  ;;  %p3811_p5 = scmp.lt.s32.totalorder %s3802_s30, %s3802_s30 }
 0x114   : > { %p3805_p11 = pnand %p3803_p2, %p4111_p8  ;;  %p3812_p7 = por %p3811_p5, %p3810_p0 }
 0x116   : > { %p3806_p3 = pneg %p3805_p11 }
 0x118   : > { %p3813_p10 = pnand %p3812_p7, %p3806_p3 }
 0x11a   : > { %3816 = shalt.err (!%p3813_p10)
}
 0x11b   : > { %s3986_s10 = smov 128   ;;  %s3987_s13 = smov 8  }
 0x11c   : > { %3326 = dma.hbm_to_vmem [thread:$0]  (!%p5021_p6), %s4961_s9, 2048, %s401_s21, [#allocation13], %s3986_s10, %s3986_s10, %s3987_s13  }
 0x11d   : > { %s5023_s26 = sshll.u32 %s3973_s20, 7  ;;  %s3988_s4 = smov [#allocation18]  }
 0x11e   : > { %s4370_s1 = scalar_lea.hbm %s4958_s6, %s5023_s26  ;;  %s414_s12 = sshll.u32 %s3988_s4, 4  ;;  %s415_s12 = int_to_ptr.vmem [resolvable:$true] %s414_s12 }
 0x11f   : > { %s5024_s7 = sld [smem:[#allocation45_spill]] }
 0x125   : > { %s3817_s8 = scalar_lea.hbm %s5024_s7, 16 }
 0x126   : > { %p3818_p9 = scmp.ne.s32.totalorder %s5024_s7, %s3817_s8  ;;  %p3824_p4 = scmp.lt.u32.totalorder %s3817_s8, %s5024_s7 }
 0x128   : > { %p3820_p1 = pnand %p3818_p9, %p4111_p8 }
 0x12a   : > { %p3821_p13 = pneg %p3820_p1 }
 0x12c   : > { %p3826_p12 = pnand %p3824_p4, %p3821_p13 }
 0x12e   : > { %3829 = shalt.err (!%p3826_p12)
}
 0x12f   : > { %s3830_s13 = scalar_lea.vmem %s415_s12, 16  ;;  %s3837_s0 = scalar_lea.vmem %s415_s12, 32 }
 0x130   : > { %p3831_p2 = scmp.ne.s32.totalorder %s415_s12, %s3830_s13  ;;  %p3838_p0 = scmp.lt.s32.totalorder %s415_s12, %s415_s12 }
 0x131   : > { %p3839_p5 = scmp.lt.s32.totalorder %s3837_s0, %s3830_s13 }
 0x132   : > { %p3833_p11 = pnand %p3831_p2, %p4111_p8 }
 0x133   : > { %p3840_p7 = por %p3839_p5, %p3838_p0 }
 0x134   : > { %p3834_p3 = pneg %p3833_p11 }
 0x136   : > { %p3841_p10 = pnand %p3840_p7, %p3834_p3 }
 0x138   : > { %3844 = shalt.err (!%p3841_p10)
}
 0x139   : > { %3329 = dma.hbm_to_vmem [thread:$0]  (!%p5021_p6), %s5024_s7, 16, %s415_s12, [#allocation19]  }
 0x13a   : > { %s3845_s8 = scalar_lea.hbm %s4370_s1, 128  ;;  %p5025_p9 = scmp.ne.s32.totalorder %s5018_s14, 0 }
 0x13b   : > { %p3846_p8 = scmp.ne.s32.totalorder %s4370_s1, %s3845_s8  ;;  %s3850_s26 = scalar_lea.hbm %s4958_s6, 256 }
 0x13c   : > { %p5026_p1 = pneg %p5025_p9  ;;  %p3851_p12 = scmp.lt.u32.totalorder %s4370_s1, %s4958_s6 }
 0x13d   : > { %p3852_p2 = scmp.lt.u32.totalorder %s3850_s26, %s3845_s8  ;;  %p3854_p3 = scmp.lt.u32.totalorder %s3845_s8, %s4370_s1 }
 0x13e   : > { %p3848_p13 = pnand %p3846_p8, %p5026_p1 }
 0x13f   : > { %p3853_p11 = por %p3852_p2, %p3851_p12 }
 0x140   : > { %p3849_p4 = pneg %p3848_p13 }
 0x141   : > { %p3855_p0 = por %p3854_p3, %p3853_p11 }
 0x143   : > { %p3856_p5 = pnand %p3855_p0, %p3849_p4 }
 0x145   : > { %3859 = shalt.err (!%p3856_p5)
}
 0x146   : > { %s3860_s28 = scalar_lea.vmem %s4373_s25, 128  ;;  %p5027_p7 = pmov %p5026_p1 }
 0x147   : > { %p3861_p6 = scmp.ne.s32.totalorder %s4373_s25, %s3860_s28  ;;  %s3989_s4 = smov [#allocation14]  }
 0x148   : > { %s3865_s12 = sshll.u32 %s3989_s4, 4  ;;  %s3866_s12 = int_to_ptr.vmem [resolvable:$false] %s3865_s12 }
 0x149   : > { %p3863_p10 = pnand %p3861_p6, %p5027_p7  ;;  %s3867_s24 = scalar_lea.vmem %s3866_s12, 256 }
 0x14a   : > { %p3868_p1 = scmp.lt.s32.totalorder %s4373_s25, %s3866_s12  ;;  %p3869_p13 = scmp.lt.s32.totalorder %s3867_s24, %s3860_s28 }
 0x14b   : > { %p3864_p8 = pneg %p3863_p10 }
 0x14c   : > { %p3870_p12 = por %p3869_p13, %p3868_p1 }
 0x14e   : > { %p3871_p2 = pnand %p3870_p12, %p3864_p8 }
 0x150   : > { %3874 = shalt.err (!%p3871_p2)
}
 0x151   : > { %3336 = dma.hbm_to_vmem [thread:$0]  (!%p5025_p9), %s4370_s1, 128, %s4373_s25, %s4274_s2, %s5008_s11, %s5008_s11, %s5019_s3  }
 0x152   : > { %s5028_s30 = sld [smem:[#allocation33_spill]] }
 0x158   : > { %p5029_p4 = scmp.ne.s32.totalorder %s5028_s30, 0 }
 0x159   : > { %s471_s21 = sand.u32 (!%p5029_p4), 1, %s4079_s23   ;;  %s4424_s10 = sand.u32 (!%p5029_p4), 1, %s3965_s18  }
 0x15a   : > { %469 = sbr.rel (%p5029_p4) target bundleno = 1334 (0x536), region = 64  ;;  %s2815_s13 = sshll.u32 (!%p5029_p4), %s4424_s10, 3 }
 0x15b   : > { %s472_s0 = scalar_lea.sflag (!%p5029_p4), [#allocation4], %s471_s21  ;;  %s4427_s14 = scalar_lea.vmem (!%p5029_p4), [#allocation3], %s2815_s13 }
 0x15c   : > { %p5030_p11 = scmp.ne.s32.totalorder (!%p5029_p4), %s5013_s15, 0 }
 0x161   : > { %3920 = dma.done.wait (%p5030_p11), %s472_s0, 128  }
 0x162   : > { %3922 = vsyncadd (%p5030_p11), %s472_s0, 4294967168  ;;  %p5031_p9 = scmp.eq.s32.totalorder %s4079_s23, 0 }
 0x164   : > { %3924 = dma.done.wait (%p5031_p9), [#allocation7], 1040   ;;  %p5032_p3 = pmov %p5031_p9 }
 0x166   : > { %3926 = vsyncadd (%p5032_p3), [#allocation7], 4294966256  ;;  %p5033_p0 = pmov %p5032_p3 }
 0x168   : > { %3928 = dma.done.wait (%p5033_p0), [#allocation10], 11264   ;;  %p5034_p5 = pmov %p5033_p0 }
 0x169   : > { %p5035_p6 = pmov %p5033_p0 }
 0x16a   : > { %3930 = vsyncadd (%p5034_p5), [#allocation10], 4294956032 }
 0x16b   : > { %3932 = dma.done.wait (%p5035_p6), [#allocation13], 16   ;;  %p5036_p7 = pmov %p5033_p0 }
 0x16c   : > { %s4445_s2 = scalar_lea.vmem [#allocation14], %s2815_s13 }
 0x16d   : > { %3934 = vsyncadd (%p5036_p7), [#allocation13], 4294967280 }
 0x16e   : > { %3936 = dma.done.wait (%p5030_p11), %s472_s0, 128  }
 0x16f   : > { %3938 = vsyncadd (%p5030_p11), %s472_s0, 4294967168  ;;  %p5037_p10 = pmov %p5033_p0 }
 0x170   : > { %p5038_p8 = pmov %p5033_p0 }
 0x171   : > { %3940 = dma.done.wait (%p5037_p10), [#allocation7], 1024  }
 0x172   : > { %3942 = vsyncadd (%p5038_p8), [#allocation7], 4294966272  ;;  %p5039_p1 = pmov %p5033_p0 }
 0x173   : > { %p5040_p13 = pmov %p5033_p0 }
 0x174   : > { %3944 = dma.done.wait (%p5039_p1), [#allocation10], 16  }
 0x175   : > { %3946 = vsyncadd (%p5040_p13), [#allocation10], 4294967280  ;;  %p5041_p12 = pmov %p5033_p0 }
 0x176   : > { %p5042_p2 = pmov %p5033_p0 }
 0x177   : > { %3948 = dma.done.wait (%p5041_p12), [#allocation13], 2048  }
 0x178   : > { %3950 = vsyncadd (%p5042_p2), [#allocation13], 4294965248  ;;  %p5043_p4 = pmov %p5033_p0 }
 0x179   : > { %p5044_p11 = pmov %p5033_p0 }
 0x17a   : > { %3952 = dma.done.wait (%p5043_p4), [#allocation19], 16  }
 0x17b   : > { %3954 = vsyncadd (%p5044_p11), [#allocation19], 4294967280  ;;  %v4986_v0 = vmov 0.0   ;;  %vm3991_vm0 = vmmov 0   ;;  %v3413_v1 = vld [vmem:[#allocation6] sm:$0xff]   ;;  %v3414_v2 = vld [vmem:[#allocation6 + $0x8] sm:$0xff]  }
 0x17c   : > { %3141 = vmatprep.subr.bf16.mxu0 %v4986_v0  ;;  %3157 = vmatprep.mubr.msk.bf16.mxu0 %vm3991_vm0, %v4986_v0  ;;  %v3415_v3 = vld [vmem:[#allocation6 + $0x10] sm:$0xff]   ;;  %v3416_v4 = vld [vmem:[#allocation6 + $0x18] sm:$0xff]   ;;  %v3417_v5 = vld [vmem:[#allocation6 + $0x20] sm:$0xff]   ;;  %vm686_vm1 = vcmask 257024   ;;  %vm707_vm2 = vcmask 257026   ;;  %v3992_v10 = vmov 0  }
 0x17d   : > { %3142 = vmatpush3.bf16.msra.mxu0 %v3413_v1  ;;  %v3418_v6 = vld [vmem:[#allocation6 + $0x28] sm:$0xff]   ;;  %v3419_v7 = vld [vmem:[#allocation6 + $0x30] sm:$0xff]   ;;  %v3420_v8 = vld [vmem:[#allocation6 + $0x38] sm:$0xff]   ;;  %687 = vst.msk [vmem:[#allocation2] sm:$0xf] %vm686_vm1, %v3992_v10  ;;  %vm689_vm3 = vcmask 254976  }
 0x17e   : > { %3143 = vmatprep.subr.bf16.mxu0 %v4986_v0  ;;  %v3421_v9 = vld [vmem:[%s4427_s14] sm:$0xff]   ;;  %688 = vst.msk [vmem:[#allocation2 + $0x4] sm:$0xf] %vm686_vm1, %v3992_v10  ;;  %712 = vst.msk [vmem:[#allocation2 + $0x14] sm:$0xf] %vm686_vm1, %v3992_v10  ;;  %v3462_v13 = vld [vmem:[#allocation9 + $0xc0] sm:$0xff]  }
 0x17f   : > { %711 = vst.msk [vmem:[#allocation2 + $0x10] sm:$0xc] %vm707_vm2, %v3992_v10  ;;  %vm714_vm4 = vsmask.f32 3328  ;;  %v716_v11 = vld [vmem:[#allocation2 + $0x18] sm:$0xf]  ;;  %2996 = vmatprep.subr.bf16.mxu1 %v3462_v13 }
 0x180   : > { %690 = vst.msk [vmem:[#allocation2 + $0x8] sm:$0x3] %vm689_vm3, %v3992_v10  ;;  %vm715_vm5 = vmand %vm686_vm1, %vm714_vm4  ;;  %v3463_v14 = vld [vmem:[#allocation9 + $0x80] sm:$0xff]   ;;  %v3464_v15 = vld [vmem:[#allocation9 + $0xc8] sm:$0xff]   ;;  %vm696_vm6 = vcmask 1041408   ;;  %vm697_vm7 = vcmask 1045508  }
 0x181   : > { %3144 = vmatpush3.bf16.msra.mxu0 %v3414_v2  ;;  %v717_v12 = vsel %vm715_vm5, 0, %v716_v11  ;;  %v3469_v16 = vld [vmem:[#allocation9 + $0x40] sm:$0xff]   ;;  %2997 = vmatpush3.bf16.msra.mxu1 %v3463_v14  ;;  %v3465_v17 = vld [vmem:[#allocation9 + $0x88] sm:$0xff]   ;;  %v3466_v20 = vld [vmem:[#allocation9 + $0xd0] sm:$0xff]   ;;  %vm816_vm9 = vcmask 1044480   ;;  %vm754_vm10 = vcmask 1046528  }
 0x182   : > { %3145 = vmatprep.subr.bf16.mxu0 %v4986_v0  ;;  %718 = vst [vmem:[#allocation2 + $0x18] sm:$0xf] %v717_v12  ;;  %v3471_v18 = vld [vmem:[#allocation9] sm:$0xff]   ;;  %v3473_v19 = vld [vmem:[#allocation9 + $0x48] sm:$0xff]   ;;  %2998 = vmatprep.subr.bf16.mxu1 %v3464_v15  ;;  %v3477_v22 = vld [vmem:[#allocation9 + $0x50] sm:$0xff]   ;;  %s3993_s11 = smov 64  }
 0x183   : > { %v3475_v21 = vld [vmem:[#allocation9 + $0x8] sm:$0xff]   ;;  %v3467_v23 = vld [vmem:[#allocation9 + $0x90] sm:$0xff]   ;;  %v3468_v24 = vld [vmem:[#allocation9 + $0xd8] sm:$0xff]   ;;  %vm736_vm11 = vsmask.f32 7424  ;;  %s3994_s15 = smov 32  }
 0x184   : > { %v3470_v25 = vld [vmem:[#allocation9 + $0x98] sm:$0xff]   ;;  %v3472_v26 = vld [vmem:[#allocation9 + $0xe0] sm:$0xff]   ;;  %v3476_v28 = vld [vmem:[#allocation9 + $0xe8] sm:$0xff]   ;;  %vm763_vm12 = vsmask.f32 6400  ;;  %s3995_s3 = smov 96  }
 0x185   : > { %3146 = vmatpush3.bf16.msra.mxu0 %v3415_v3  ;;  %2999 = vmatpush3.bf16.msra.mxu1 %v3465_v17  ;;  %v3474_v27 = vld [vmem:[#allocation9 + $0xa0] sm:$0xff]   ;;  %v4484_v29 = vld [vmem:[#allocation2 + $0x4] sm:$0xf]  ;;  %v724_v30 = vld [vmem:[#allocation2] sm:$0xc]  ;;  %vm786_vm15 = vcmask 1045504  }
 0x186   : > { %3147 = vmatprep.subr.bf16.mxu0 %v4986_v0  ;;  %3000 = vmatprep.subr.bf16.mxu1 %v3466_v20  ;;  %v726_v31 = vld [vmem:[#allocation2] sm:$0x8]  ;;  %v2826_v32 = vld [vmem:[#allocation8] ss:$0 sm:$0xff]  ;;  %v4487_v33 = vcombine.low %v724_v30, %v4484_v29  ;;  %vm698_vm8 = vmor %vm696_vm6, %vm697_vm7  ;;  %vm793_vm13 = vsmask.f32 5376 }
 0x187   : > { %v719_v35 = vld [vmem:[#allocation2] sm:$0xf]  ;;  %v4490_v36 = vcombine.low %v726_v31, %v4484_v29  ;;  %v4497_v47 = vld [vmem:[#allocation2 + $0x8] ss:$0 sps:$4 sm:$0x11]   ;;  %v3478_v1 = vld [vmem:[#allocation9 + $0xa8] sm:$0xff]  }
 0x188   : > { %v722_v39 = vld [vmem:[#allocation2] sm:$0xe]  ;;  %v795_v41 = vshrl.u32 %v4487_v33, 16  ;;  %v798_v42 = vshll.u32 %v4487_v33, 16  ;;  %v4495_v46 = vcombine.low %v719_v35, %v4484_v29  ;;  %v745_v60 = vshll.u32 %v4497_v47, 16  ;;  %s2980_s25 = sshll.u32 %s4079_s23, 4 }
 0x189   : > { %3148 = vmatpush3.bf16.msra.mxu0 %v3416_v4  ;;  %3001 = vmatpush3.bf16.msra.mxu1 %v3467_v23  ;;  %v4500_v48 = vcombine.low %v722_v39, %v4484_v29  ;;  %v827_v49 = vshrl.u32 %v4490_v36, 16  ;;  %v4503_v52 = vld [vmem:[#allocation2 + $0x8] ss:$0 sps:$4 sm:$0x33]   ;;  %v830_v59 = vshll.u32 %v4490_v36, 16  ;;  %v3479_v2 = vld [vmem:[#allocation9 + $0x10] sm:$0xff]  }
 0x18a   : > { %3149 = vmatprep.subr.bf16.mxu0 %v4986_v0  ;;  %3002 = vmatprep.subr.bf16.mxu1 %v3468_v24  ;;  %v4505_v53 = vrot.slane %v795_v41, 2  ;;  %v4507_v54 = vrot.slane %v798_v42, 3  ;;  %v740_v58 = vshll.u32 %v4495_v46, 16  ;;  %v4523_v10 = vld [vmem:[#allocation2 + $0x14] ss:$0 sps:$4 sm:$0x77]  }
 0x18b   : > { %v765_v61 = vshrl.u32 %v4500_v48, 16  ;;  %v768_v62 = vshll.u32 %v4500_v48, 16  ;;  %v4516_v63 = vrot.slane %v827_v49, 3  ;;  %v738_v11 = vshrl.u32 %v4495_v46, 16  ;;  %v896_v15 = vld [vmem:[#allocation2 + $0x4] sm:$0xe] }
 0x18c   : > { %v742_v12 = vrot.slane %v740_v58, 1  ;;  %v4527_v13 = vrot.slane %v830_v59, 4  ;;  %v4529_v14 = vld [vmem:[#allocation2 + $0x18] ss:$0 sps:$4 sm:$0x11]   ;;  %v755_v17 = vrot.slane %v4500_v48, 1 }
 0x18d   : > { %3150 = vmatpush3.bf16.msra.mxu0 %v3417_v5  ;;  %3003 = vmatpush3.bf16.msra.mxu1 %v3470_v25  ;;  %v773_v5 = vshrl.u32 %v4503_v52, 16  ;;  %v4537_v20 = vrot.slane %v765_v61, 1  ;;  %v3480_v24 = vld [vmem:[#allocation9 + $0xf0] sm:$0xff]   ;;  %v3481_v25 = vld [vmem:[#allocation9 + $0x58] sm:$0xff]   ;;  %v4560_v35 = vld [vmem:[#allocation2 + $0x14] sm:$0xf] }
 0x18e   : > { %3151 = vmatprep.subr.bf16.mxu0 %v4986_v0  ;;  %3004 = vmatprep.subr.bf16.mxu1 %v3472_v26  ;;  %v1716_v39 = vshrl.u32 %v4523_v10, 16  ;;  %vm825_vm14 = vsmask.f32 4352  ;;  %vm2258_vm4 = vcmask 1040384   ;;  %vm2259_vm5 = vsmask.f32 256 }
 0x18f   : > { %vm2260_vm6 = vmand %vm2258_vm4, %vm2259_vm5  ;;  %vm2265_vm7 = vcmask 1047552   ;;  %s562_s1 = scalar_lea.vmem [#allocation20], %s4424_s10  ;;  %s5052_s16 = sld [smem:[#allocation46_spill]] }
 0x190   : > { %s2625_s17 = sshll.u32 %s562_s1, 4  ;;  %s2613_s26 = scalar_lea.sflag [#allocation5], %s4424_s10  ;;  %s4910_s17 = int_to_ptr.vmem [resolvable:$true] %s2625_s17 }
 0x191   : > { %3152 = vmatpush3.bf16.msra.mxu0 %v3418_v6  ;;  %3005 = vmatpush3.bf16.msra.mxu1 %v3474_v27  ;;  %v776_v6 = vshll.u32 %v4503_v52, 16  ;;  %s3875_s27 = scalar_lea.vmem %s4910_s17, 16  ;;  %p5053_p3 = scmp.ne.s32.totalorder %s5014_s22, 0 }
 0x192   : > { %3153 = vmatprep.subr.bf16.mxu0 %v4986_v0  ;;  %3006 = vmatprep.subr.bf16.mxu1 %v3476_v28  ;;  %v3485_v28 = vld [vmem:[#allocation9 + $0x60] sm:$0xff]   ;;  %p3876_p9 = scmp.ne.s32.totalorder %s4910_s17, %s3875_s27  ;;  %s3997_s23 = smov [#allocation20]  }
 0x193   : > { %v4543_v23 = vrot.slane %v776_v6, 2  ;;  %s3879_s5 = sshll.u32 %s3997_s23, 4  ;;  %s3880_s5 = int_to_ptr.vmem [resolvable:$false] %s3879_s5 }
 0x194   : > { %p3877_p0 = pnand %p3876_p9, %p5053_p3  ;;  %s3881_s28 = scalar_lea.vmem %s3880_s5, 32 }
 0x195   : > { %3154 = vmatpush3.bf16.msra.mxu0 %v3419_v7  ;;  %v900_v7 = vld [vmem:[#allocation2 + $0x4] sm:$0x8]  ;;  %3007 = vmatpush3.bf16.msra.mxu1 %v3478_v1  ;;  %s4908_s19 = scalar_lea.hbm %s5052_s16, %s2980_s25  ;;  %p3882_p6 = scmp.lt.s32.totalorder %s4910_s17, %s3880_s5 }
 0x196   : > { %3155 = vmatprep.subr.bf16.mxu0 %v4986_v0  ;;  %3008 = vmatprep.subr.bf16.mxu1 %v3480_v24  ;;  %p3878_p5 = pneg %p3877_p0  ;;  %p3883_p7 = scmp.lt.s32.totalorder %s3881_s28, %s3875_s27 }
 0x198   : > { %p3884_p10 = por %p3883_p7, %p3882_p6 }
 0x199   : > { %3156 = vmatpush3.bf16.msra.mxu0 %v3420_v8  ;;  %v898_v8 = vld [vmem:[#allocation2 + $0x4] sm:$0xc] }
 0x19a   : > { %3018 = vmatprep.subr.bf16.mxu0 %v3469_v16  ;;  %v4531_v16 = vrot.slane %v745_v60, 1  ;;  %p3885_p8 = pnand %p3884_p10, %p3878_p5 }
 0x19c   : > { %3158 = vmatmul.mubr.bf16.vlgmr.msra.gmra.mrb[0].mxu0 %v3421_v9  ;;  %v4521_v9 = vld [vmem:[#allocation2 + $0x14] ss:$0 sps:$4 sm:$0x11]  }
 0x19d   : > { %3019 = vmatpush3.bf16.msra.mxu0 %v3471_v18  ;;  %v756_v18 = vrot.slane %v4497_v47, 1 }
 0x19e   : > { %3020 = vmatprep.subr.bf16.mxu0 %v3473_v19  ;;  %v4535_v19 = vld [vmem:[#allocation2 + $0x14] ss:$0 sps:$4 sm:$0x33]  }
 0x19f   : > { %v1688_v41 = vshrl.u32 %v4535_v19, 16 }
 0x1a1   : > { %3021 = vmatpush3.bf16.msra.mxu0 %v3475_v21  ;;  %v4539_v21 = vrot.slane %v768_v62, 2 }
 0x1a2   : > { %3022 = vmatprep.subr.bf16.mxu0 %v3477_v22  ;;  %v4541_v22 = vrot.slane %v773_v5, 1 }
 0x1a5   : > { %3023 = vmatpush3.bf16.msra.mxu0 %v3479_v2 }
 0x1a6   : > { %3024 = vmatprep.subr.bf16.mxu0 %v3481_v25 }
 0x26f   : > { %v678_v34 = vpop.f32.mrb[0].mxu0 }
 0x270   : > { %v679_v37 = vadd.f32 %v2826_v32, %v678_v34  ;;  %v3159_v38 = vpop.f32.mrb[1].mxu0 }
 0x271   : > { %v681_v40 = vpop.f32.mrb[2].mxu0  ;;  %v1662_v38 = vshll.u32 %v4521_v9, 16 }
 0x272   : > { %v2985_v43 = vpack.c.bf16 %v679_v37, %v679_v37  ;;  %v682_v44 = vadd.f32 %v2826_v32, %v681_v40  ;;  %v3160_v45 = vpop.f32.mrb[3].mxu0  ;;  %v3482_v37 = vld [vmem:[#allocation9 + $0xb0] sm:$0xff]   ;;  %v1719_v40 = vshll.u32 %v4523_v10, 16 }
 0x273   : > { %v1691_v45 = vshll.u32 %v4535_v19, 16  ;;  %3009 = vmatpush3.bf16.msra.mxu1 %v3482_v37  ;;  %v3484_v37 = vld [vmem:[#allocation9 + $0xf8] sm:$0xff]  }
 0x274   : > { %v699_v50 = vrot.slane %v2985_v43, 6  ;;  %v2986_v51 = vpack.c.bf16 %v682_v44, %v682_v44  ;;  %v801_v44 = vor.u32 %v4507_v54, %v4505_v53  ;;  %3010 = vmatprep.subr.bf16.mxu1 %v3484_v37 }
 0x276   : > { %v700_v56 = vrot.slane %v699_v50, 4  ;;  %708 = vst.msk [vmem:[#allocation2 + $0x8] sm:$0xc] %vm707_vm2, %v699_v50  ;;  %v701_v57 = vrot.slane %v2986_v51, 6  ;;  %v4571_v51 = vor.u32 %v742_v12, %v738_v11  ;;  %vm848_vm2 = vcmask 523264  }
 0x278   : > { %v702_v3 = vsel %vm698_vm8, %v700_v56, %v701_v57  ;;  %v703_v4 = vrot.slane %v701_v57, 4  ;;  %v4579_v57 = vcombine.low %v4560_v35, %v4560_v35  ;;  %vm2266_vm8 = vmand %vm2265_vm7, %vm736_vm11 }
 0x279   : > { %709 = vst.msk [vmem:[#allocation2 + $0xc] sm:$0xf] %vm686_vm1, %v702_v3  ;;  %vm845_vm1 = vcmask 261120  }
 0x27a   : > { %710 = vst.msk [vmem:[#allocation2 + $0x10] sm:$0x3] %vm689_vm3, %v703_v4  ;;  %vm851_vm3 = vcmask 785408  }
 0x27d   : > { %v4545_v26 = vld [vmem:[#allocation2 + $0x8] sm:$0xf] }
 0x27e   : > { %v4550_v30 = vcombine.low %v900_v7, %v4545_v26  ;;  %v4554_v31 = vcombine.low %v4484_v29, %v4545_v26  ;;  %v4557_v32 = vcombine.low %v898_v8, %v4545_v26  ;;  %v3483_v29 = vld [vmem:[#allocation9 + $0x18] sm:$0xff]   ;;  %v2848_v43 = vcombine.low %v896_v15, %v4545_v26 }
 0x27f   : > { %v4575_v56 = vcombine.low %v4545_v26, %v4545_v26  ;;  %3025 = vmatpush3.bf16.msra.mxu0 %v3483_v29 }
 0x280   : > { %v3422_v42 = vld [vmem:[#allocation2 + $0xc] ss:$0 sps:$4 sm:$0x77]   ;;  %v981_v49 = vrot.slane %v4550_v30, 3  ;;  %v907_v59 = vshrl.u32 %v4554_v31, 16  ;;  %v909_v60 = vshll.u32 %v4554_v31, 16  ;;  %3026 = vmatprep.subr.bf16.mxu0 %v3485_v28 }
 0x281   : > { %v3425_v50 = vld [vmem:[#allocation2 + $0xc] ss:$0 sps:$4 sm:$0x11]   ;;  %v982_v58 = vrot.slane %v3422_v42, 3  ;;  %v960_v61 = vshrl.u32 %v4557_v32, 16  ;;  %v963_v2 = vshll.u32 %v4557_v32, 16 }
 0x282   : > { %v914_v62 = vshll.u32 %v3425_v50, 16  ;;  %v924_v1 = vrot.slane %v3425_v50, 1  ;;  %v968_v3 = vshrl.u32 %v3422_v42, 16  ;;  %v4585_v4 = vld [vmem:[#allocation2 + $0xc] sm:$0xf]  ;;  %v911_v6 = vrot.slane %v909_v60, 1 }
 0x283   : > { %v983_v5 = vsel %vm816_vm9, %v981_v49, %v982_v58  ;;  %v923_v7 = vrot.slane %v2848_v43, 1  ;;  %v971_v8 = vshll.u32 %v3422_v42, 16  ;;  %v4588_v11 = vld [vmem:[#allocation2 + $0xc] ss:$0 sps:$4 sm:$0x33]   ;;  %v962_v15 = vrot.slane %v960_v61, 2 }
 0x284   : > { %984 = vrot.lane.b32.xlu1 %v983_v5, %s3993_s11  ;;  %v916_v12 = vrot.slane %v914_v62, 1  ;;  %v965_v24 = vrot.slane %v963_v2, 3  ;;  %v970_v25 = vrot.slane %v968_v3, 2  ;;  %v912_v29 = vor.u32 %v911_v6, %v907_v59  ;;  %v4596_v62 = vld [vmem:[#allocation2 + $0x8] ss:$0 sps:$4 sm:$0x77]  }
 0x285   : > { %v973_v50 = vrot.slane %v971_v8, 3  ;;  %v932_v0 = vshrl.u32 %v2848_v43, 16  ;;  %v935_v34 = vshll.u32 %v2848_v43, 16  ;;  %v925_v49 = vsel %vm754_vm10, %v923_v7, %v924_v1  ;;  %v3486_v61 = vld [vmem:[#allocation9 + $0xb8] sm:$0xff]  }
 0x286   : > { %v940_v58 = vshrl.u32 %v4588_v11, 16  ;;  %v943_v42 = vshll.u32 %v4588_v11, 16  ;;  %v2853_v60 = vcombine.low %v4585_v4, %v4585_v4  ;;  %v917_v59 = vsel %vm736_vm11, %v912_v29, %v916_v12  ;;  %3011 = vmatpush3.bf16.msra.mxu1 %v3486_v61  ;;  %v3487_v12 = vld [vmem:[#allocation9 + $0x20] sm:$0xff]  }
 0x287   : > { %v974_v2 = vor.u32 %v973_v50, %v970_v25  ;;  %v934_v3 = vrot.slane %v932_v0, 1  ;;  %v937_v43 = vrot.slane %v935_v34, 2  ;;  %918 = vrot.lane.b32.xlu0 %v917_v59, %s3994_s15  ;;  %v990_v6 = vshrl.u32 %v4550_v30, 16  ;;  %3027 = vmatpush3.bf16.msra.mxu0 %v3487_v12  ;;  %v4615_v59 = vld [vmem:[#allocation2 + $0xc] sm:$0xf] }
 0x288   : > { %926 = vrot.lane.b32.xlu1 %v925_v49, %s3993_s11  ;;  %v942_v1 = vrot.slane %v940_v58, 1  ;;  %v945_v5 = vrot.slane %v943_v42, 2  ;;  %v993_v7 = vshll.u32 %v4550_v30, 16  ;;  %v966_v8 = vor.u32 %v965_v24, %v962_v15  ;;  %v4649_v47 = vld [vmem:[#allocation2 + $0x10] ss:$0 sps:$4 sm:$0x77]  }
 0x289   : > { %v938_v37 = vor.u32 %v937_v43, %v934_v3  ;;  %v998_v27 = vshrl.u32 %v2853_v60, 16  ;;  %v1001_v55 = vshll.u32 %v2853_v60, 16  ;;  %v992_v34 = vrot.slane %v990_v6, 3  ;;  %v1329_v6 = vld [vmem:[#allocation2 + $0x8] sm:$0xf] }
 0x28a   : > { %v946_v0 = vor.u32 %v945_v5, %v942_v1  ;;  %v995_v28 = vrot.slane %v993_v7, 4  ;;  %v803_v25 = vshrl.u32 %v4596_v62, 16  ;;  %v975_v29 = vsel %vm793_vm13, %v966_v8, %v974_v2  ;;  %v4617_v2 = vld [vmem:[#allocation2 + $0x18] ss:$0 sps:$4 sm:$0x77]  }
 0x28b   : > { %v1000_v50 = vrot.slane %v998_v27, 3  ;;  %v1003_v49 = vrot.slane %v1001_v55, 4  ;;  %v806_v58 = vshll.u32 %v4596_v62, 16  ;;  %976 = vrot.lane.b32.xlu0 %v975_v29, %s3994_s15  ;;  %v4610_v42 = vrot.slane %v1716_v39, 2  ;;  %v1332_v5 = vld [vmem:[#allocation2 + $0x8] sm:$0xe] }
 0x28c   : > { %v947_v30 = vsel %vm763_vm12, %v938_v37, %v946_v0  ;;  %v996_v15 = vor.u32 %v995_v28, %v992_v34  ;;  %v805_v24 = vrot.slane %v803_v25, 2  ;;  %v835_v55 = vshrl.u32 %v4575_v56, 16  ;;  %v1948_v37 = vld [vmem:[#allocation2 + $0x10] sm:$0xc]  ;;  %v3492_v28 = vld [vmem:[#allocation9 + $0x70] sm:$0xff]  }
 0x28d   : > { %948 = vrot.lane.b32.xlu1 %v947_v30, %s3995_s3  ;;  %v1004_v60 = vor.u32 %v1003_v49, %v1000_v50  ;;  %v808_v61 = vrot.slane %v806_v58, 3  ;;  %v838_v27 = vshll.u32 %v4575_v56, 16  ;;  %v748_v3 = vsel %vm736_vm11, %v4571_v51, %v4531_v16  ;;  %v1334_v56 = vld [vmem:[#allocation2 + $0x8] sm:$0xc]  ;;  %v3490_v51 = vld [vmem:[#allocation9 + $0x28] sm:$0xff]   ;;  %v3494_v30 = vld [vmem:[#allocation9 + $0x30] sm:$0xff]  }
 0x28e   : > { %v771_v39 = vor.u32 %v4539_v21, %v4537_v20  ;;  %v779_v43 = vor.u32 %v4543_v23, %v4541_v22  ;;  %v833_v1 = vor.u32 %v4527_v13, %v4516_v63  ;;  %v4631_v12 = vrot.slane %v1719_v40, 3  ;;  %v3488_v20 = vld [vmem:[#allocation9 + $0x68] sm:$0xff]   ;;  %v3489_v21 = vld [vmem:[#allocation9 + $0x140] sm:$0xff]  }
 0x28f   : > { %v1005_v7 = vsel %vm825_vm14, %v996_v15, %v1004_v60  ;;  %v809_v8 = vor.u32 %v808_v61, %v805_v24  ;;  %v1746_v16 = vshrl.u32 %v4579_v57, 16  ;;  %v757_v22 = vsel %vm754_vm10, %v755_v17, %v756_v18  ;;  %v4641_v0 = vld [vmem:[#allocation2 + $0x10] ss:$0 sps:$4 sm:$0x11]   ;;  %3028 = vmatprep.subr.bf16.mxu0 %v3488_v20  ;;  %v1336_v18 = vld [vmem:[#allocation2 + $0x8] sm:$0x8]  ;;  %3040 = vmatprep.subr.bf16.mxu1 %v3489_v21 }
 0x290   : > { %1006 = vrot.lane.b32.xlu0 %v1005_v7, %s3995_s3  ;;  %v818_v23 = vrot.slane %v4596_v62, 3  ;;  %v2887_v40 = vcombine.low %v1329_v6, %v4615_v59  ;;  %v837_v25 = vrot.slane %v835_v55, 3  ;;  %v840_v29 = vrot.slane %v838_v27, 4  ;;  %3029 = vmatpush3.bf16.msra.mxu0 %v3490_v51  ;;  %v4670_v60 = vld [vmem:[#allocation2 + $0x14] sm:$0xf] }
 0x291   : > { %749 = vrot.lane.b32.xlu1 %v748_v3, %s3994_s15  ;;  %v4647_v50 = vcombine.low %v1332_v5, %v4615_v59  ;;  %v4652_v48 = vcombine.low %v1334_v56, %v4615_v59  ;;  %v780_v17 = vsel %vm763_vm12, %v771_v39, %v779_v43  ;;  %v4657_v49 = vrot.slane %v1662_v38, 1  ;;  %3030 = vmatprep.subr.bf16.mxu0 %v3492_v28  ;;  %v4684_v27 = vld [vmem:[#allocation2 + $0x10] sm:$0xf] }
 0x292   : > { %v1350_v62 = vshll.u32 %v2887_v40, 16  ;;  %v4661_v58 = vrot.slane %v1688_v41, 1  ;;  %v810_v15 = vsel %vm793_vm13, %v801_v44, %v809_v8  ;;  %v4668_v24 = vcombine.low %v1336_v18, %v4615_v59  ;;  %v3496_v41 = vld [vmem:[#allocation9 + $0x78] sm:$0xff]   ;;  %v4682_v44 = vld [vmem:[#allocation2 + $0x10] ss:$0 sps:$4 sm:$0x33]  }
 0x293   : > { %v2023_v38 = vshrl.u32 %v4617_v2, 16  ;;  %v4675_v61 = vrot.slane %v1691_v45, 2  ;;  %v5045_v55 = vrot.slane %v4490_v36, 3  ;;  %v1365_v54 = vrot.slane %v4641_v0, 1 }
 0x294   : > { %811 = vrot.lane.b32.xlu0 %v810_v15, %s3994_s15  ;;  %v4687_v3 = vcombine.low %v1948_v37, %v4670_v60  ;;  %v841_v39 = vor.u32 %v840_v29, %v837_v25  ;;  %v1364_v43 = vrot.slane %v4647_v50, 1  ;;  %v1401_v36 = vshrl.u32 %v4652_v48, 16  ;;  %3031 = vmatpush3.bf16.msra.mxu0 %v3494_v30  ;;  %v3498_v37 = vld [vmem:[#allocation9 + $0x38] sm:$0xff]   ;;  %v4713_v15 = vld [vmem:[#allocation2 + $0x10] sm:$0xf] }
 0x295   : > { %v819_v53 = vsel %vm816_vm9, %v5045_v55, %v818_v23  ;;  %758 = vrot.lane.b32.xlu1 %v757_v22, %s3993_s11  ;;  %v1409_v5 = vshrl.u32 %v4649_v47, 16  ;;  %v1423_v6 = vrot.slane %v4649_v47, 3  ;;  %v1352_v56 = vrot.slane %v1350_v62, 1  ;;  %3032 = vmatprep.subr.bf16.mxu0 %v3496_v41  ;;  %v3500_v23 = vld [vmem:[#allocation9 + $0x1c0] sm:$0xff]  }
 0x296   : > { %v1404_v7 = vshll.u32 %v4652_v48, 16  ;;  %v1412_v8 = vshll.u32 %v4649_v47, 16  ;;  %v1422_v20 = vrot.slane %v4668_v24, 3  ;;  %v1355_v21 = vshll.u32 %v4641_v0, 16 }
 0x297   : > { %v1373_v51 = vshrl.u32 %v4647_v50, 16  ;;  %v2894_v22 = vcombine.low %v4684_v27, %v4684_v27  ;;  %v1348_v28 = vshrl.u32 %v2887_v40, 16  ;;  %v1376_v25 = vshll.u32 %v4647_v50, 16  ;;  %v1636_v40 = vld [vmem:[#allocation2 + $0xc] sm:$0xf] }
 0x298   : > { %820 = vrot.lane.b32.xlu0 %v819_v53, %s3993_s11  ;;  %v1381_v29 = vshrl.u32 %v4682_v44, 16  ;;  %v1384_v47 = vshll.u32 %v4682_v44, 16  ;;  %v842_v0 = vsel %vm825_vm14, %v833_v1, %v841_v39  ;;  %v1366_v18 = vsel %vm754_vm10, %v1364_v43, %v1365_v54  ;;  %3033 = vmatpush3.bf16.msra.mxu0 %v3498_v37  ;;  %v1639_v39 = vld [vmem:[#allocation2 + $0xc] sm:$0xe] }
 0x299   : > { %781 = vrot.lane.b32.xlu1 %v780_v17, %s3995_s3  ;;  %v1403_v62 = vrot.slane %v1401_v36, 2  ;;  %v1411_v30 = vrot.slane %v1409_v5, 2  ;;  %v1353_v41 = vor.u32 %v1352_v56, %v1348_v28  ;;  %v1406_v50 = vrot.slane %v1404_v7, 3  ;;  %3062 = vmatprep.subr.bf16.mxu0 %v3500_v23 }
 0x29a   : > { %v1414_v55 = vrot.slane %v1412_v8, 3  ;;  %v1431_v53 = vshrl.u32 %v4668_v24, 16  ;;  %v1375_v45 = vrot.slane %v1373_v51, 1  ;;  %v1434_v17 = vshll.u32 %v4668_v24, 16 }
 0x29b   : > { %v1439_v34 = vshrl.u32 %v2894_v22, 16  ;;  %v1442_v63 = vshll.u32 %v2894_v22, 16  ;;  %v1378_v13 = vrot.slane %v1376_v25, 2  ;;  %v1383_v1 = vrot.slane %v1381_v29, 1  ;;  %v1643_v22 = vld [vmem:[#allocation2 + $0xc] sm:$0x8] }
 0x29c   : > { %843 = vrot.lane.b32.xlu0 %v842_v0, %s3995_s3  ;;  %v1386_v54 = vrot.slane %v1384_v47, 2  ;;  %v2912_v43 = vcombine.low %v1636_v40, %v4713_v15  ;;  %v1424_v36 = vsel %vm816_vm9, %v1422_v20, %v1423_v6  ;;  %v2015_v5 = vshrl.u32 %v4687_v3, 16  ;;  %v1641_v47 = vld [vmem:[#allocation2 + $0xc] sm:$0xc]  ;;  %v1946_v40 = vld [vmem:[#allocation2 + $0x10] sm:$0xe] }
 0x29d   : > { %1367 = vrot.lane.b32.xlu1 %v1366_v18, %s3993_s11  ;;  %v2018_v56 = vshll.u32 %v4687_v3, 16  ;;  %v2026_v24 = vshll.u32 %v4617_v2, 16  ;;  %v1357_v7 = vrot.slane %v1355_v21, 1  ;;  %v1407_v8 = vor.u32 %v1406_v50, %v1403_v62 }
 0x29e   : > { %v1415_v37 = vor.u32 %v1414_v55, %v1411_v30  ;;  %v1433_v51 = vrot.slane %v1431_v53, 3  ;;  %v1436_v23 = vrot.slane %v1434_v17, 4  ;;  %v1441_v28 = vrot.slane %v1439_v34, 3 }
 0x29f   : > { %v1444_v25 = vrot.slane %v1442_v63, 4  ;;  %v4725_v29 = vcombine.low %v1639_v39, %v4713_v15  ;;  %v1358_v6 = vsel %vm736_vm11, %v1353_v41, %v1357_v7  ;;  %v1379_v20 = vor.u32 %v1378_v13, %v1375_v45 }
 0x2a0   : > { %1425 = vrot.lane.b32.xlu0 %v1424_v36, %s3993_s11  ;;  %v1387_v0 = vor.u32 %v1386_v54, %v1383_v1  ;;  %v1657_v18 = vshll.u32 %v2912_v43, 16  ;;  %v4731_v21 = vcombine.low %v1643_v22, %v4713_v15  ;;  %v2025_v34 = vrot.slane %v2023_v38, 2 }
 0x2a1   : > { %1359 = vrot.lane.b32.xlu1 %v1358_v6, %s3994_s15  ;;  %v2028_v62 = vrot.slane %v2026_v24, 3  ;;  %v4737_v30 = vrot.slane %v1746_v16, 3  ;;  %v2916_v50 = vcombine.low %v1641_v47, %v4713_v15  ;;  %v5046_v45 = vshll.u32 %v4579_v57, 16  ;;  %v1943_v24 = vld [vmem:[#allocation2 + $0x10] sm:$0xf] }
 0x2a2   : > { %v1702_v55 = vrot.slane %v4535_v19, 2  ;;  %v1416_v53 = vsel %vm793_vm13, %v1407_v8, %v1415_v37  ;;  %v1437_v17 = vor.u32 %v1436_v23, %v1433_v51  ;;  %v1445_v63 = vor.u32 %v1444_v25, %v1441_v28 }
 0x2a3   : > { %v4742_v41 = vrot.slane %v5046_v45, 4  ;;  %v1671_v38 = vrot.slane %v4725_v29, 1  ;;  %v1388_v16 = vsel %vm763_vm12, %v1379_v20, %v1387_v0  ;;  %v1659_v13 = vrot.slane %v1657_v18, 1  ;;  %v1950_v45 = vld [vmem:[#allocation2 + $0x10] sm:$0x8] }
 0x2a4   : > { %1417 = vrot.lane.b32.xlu0 %v1416_v53, %s3994_s15  ;;  %v2017_v1 = vrot.slane %v2015_v5, 2  ;;  %v2020_v54 = vrot.slane %v2018_v56, 3  ;;  %v1729_v57 = vrot.slane %v4731_v21, 3  ;;  %v1655_v39 = vshrl.u32 %v2912_v43, 16 }
 0x2a5   : > { %1389 = vrot.lane.b32.xlu1 %v1388_v16, %s3995_s3  ;;  %v2029_v36 = vor.u32 %v2028_v62, %v2025_v34  ;;  %v4752_v19 = vcombine.low %v1946_v40, %v4670_v60  ;;  %v1708_v7 = vshrl.u32 %v2916_v50, 16  ;;  %v1711_v8 = vshll.u32 %v2916_v50, 16 }
 0x2a6   : > { %v953_v37 = vrot.slane %v4557_v32, 2  ;;  %v954_v51 = vrot.slane %v4588_v11, 2  ;;  %v1446_v22 = vsel %vm825_vm14, %v1437_v17, %v1445_v63  ;;  %v5047_v5 = vrot.slane %v4521_v9, 1  ;;  %v4770_v11 = vld [vmem:[#allocation2 + $0x18] ss:$0 sps:$4 sm:$0x33]  }
 0x2a7   : > { %v1680_v23 = vshrl.u32 %v4725_v29, 16  ;;  %v1683_v43 = vshll.u32 %v4725_v29, 16  ;;  %v1660_v28 = vor.u32 %v1659_v13, %v1655_v39  ;;  %v2937_v25 = vcombine.low %v1943_v24, %v4670_v60 }
 0x2a8   : > { %v1673_v56 = vsel %vm754_vm10, %v1671_v38, %v5047_v5  ;;  %1447 = vrot.lane.b32.xlu0 %v1446_v22, %s3995_s3  ;;  %v4765_v47 = vsel %vm786_vm15, %v953_v37, %v954_v51  ;;  %v2886_v32 = vcombine.low %v4545_v26, %v4585_v4  ;;  %v2021_v9 = vor.u32 %v2020_v54, %v2017_v1  ;;  %v3461_v54 = vld [vmem:[#allocation2 + $0x18] ss:$0 sps:$4 sm:$0xff]  }
 0x2a9   : > { %1674 = vrot.lane.b32.xlu1 %v1673_v56, %s3993_s11  ;;  %v1394_v6 = vrot.slane %v4652_v48, 2  ;;  %v1395_v29 = vrot.slane %v4682_v44, 2  ;;  %v2911_v20 = vcombine.low %v4615_v59, %v4684_v27  ;;  %v5048_v0 = vrot.slane %v4523_v10, 3  ;;  %v3538_v27 = vld [vmem:[#allocation9 + $0x260] sm:$0xff]  }
 0x2aa   : > { %v1978_v34 = vrot.slane %v4752_v19, 1  ;;  %v1710_v62 = vrot.slane %v1708_v7, 2  ;;  %v1713_v40 = vrot.slane %v1711_v8, 3  ;;  %v1738_v53 = vshrl.u32 %v4731_v21, 16 }
 0x2ab   : > { %v1731_v18 = vsel %vm816_vm9, %v1729_v57, %v5048_v0  ;;  %v1741_v17 = vshll.u32 %v4731_v21, 16  ;;  %v4783_v48 = vsel %vm786_vm15, %v1394_v6, %v1395_v29  ;;  %v1701_v44 = vrot.slane %v2916_v50, 2 }
 0x2ac   : > { %1732 = vrot.lane.b32.xlu0 %v1731_v18, %s3993_s11  ;;  %v1665_v10 = vsel %vm736_vm11, %v1660_v28, %v4657_v49  ;;  %v1682_v63 = vrot.slane %v1680_v23, 1  ;;  %v1685_v38 = vrot.slane %v1683_v43, 2  ;;  %v1964_v16 = vshll.u32 %v2937_v25, 16 }
 0x2ad   : > { %1666 = vrot.lane.b32.xlu1 %v1665_v10, %s3994_s15  ;;  %v2030_v13 = vsel %vm793_vm13, %v2021_v9, %v2029_v36  ;;  %v1694_v1 = vor.u32 %v4675_v61, %v4661_v58  ;;  %v2943_v21 = vcombine.low %v1950_v45, %v4670_v60  ;;  %v4794_v50 = vsel %vm786_vm15, %v1701_v44, %v1702_v55 }
 0x2ae   : > { %v1752_v57 = vor.u32 %v4742_v41, %v4737_v30  ;;  %v1969_v49 = vshll.u32 %v4529_v14, 16  ;;  %v1995_v39 = vshrl.u32 %v4770_v11, 16  ;;  %v1998_v24 = vshll.u32 %v4770_v11, 16 }
 0x2af   : > { %v5049_v36 = vrot.slane %v4529_v14, 1  ;;  %v1714_v58 = vor.u32 %v1713_v40, %v1710_v62  ;;  %v1740_v61 = vrot.slane %v1738_v53, 3  ;;  %v1743_v60 = vrot.slane %v1741_v17, 4 }
 0x2b0   : > { %2031 = vrot.lane.b32.xlu0 %v2030_v13, %s3994_s15  ;;  %v1686_v55 = vor.u32 %v1685_v38, %v1682_v63  ;;  %v1966_v8 = vrot.slane %v1964_v16, 1  ;;  %v1987_v37 = vshrl.u32 %v4752_v19, 16  ;;  %v1990_v30 = vshll.u32 %v4752_v19, 16 }
 0x2b1   : > { %v1980_v7 = vsel %vm754_vm10, %v1978_v34, %v5049_v36  ;;  %v2045_v41 = vshrl.u32 %v2943_v21, 16  ;;  %v2048_v51 = vshll.u32 %v2943_v21, 16  ;;  %v2053_v22 = vshrl.u32 %v3461_v54, 16 }
 0x2b2   : > { %1981 = vrot.lane.b32.xlu1 %v1980_v7, %s3993_s11  ;;  %v2056_v5 = vshll.u32 %v3461_v54, 16  ;;  %v1962_v14 = vshrl.u32 %v2937_v25, 16  ;;  %v1971_v56 = vrot.slane %v1969_v49, 1  ;;  %v1997_v23 = vrot.slane %v1995_v39, 1  ;;  %v3491_v7 = vld [vmem:[#allocation9 + $0x100] sm:$0xff]  }
 0x2b3   : > { %v2000_v43 = vrot.slane %v1998_v24, 2  ;;  %v5050_v28 = vor.u32 %v4631_v12, %v4610_v42  ;;  %v1744_v6 = vor.u32 %v1743_v60, %v1740_v61  ;;  %v2036_v29 = vrot.slane %v2943_v21, 3 }
 0x2b4   : > { %v2037_v0 = vrot.slane %v4617_v2, 3  ;;  %v1695_v19 = vsel %vm763_vm12, %v1686_v55, %v1694_v1  ;;  %v1967_v18 = vor.u32 %v1966_v8, %v1962_v14  ;;  %v1989_v34 = vrot.slane %v1987_v37, 1  ;;  %v3493_v55 = vld [vmem:[#allocation9 + $0x148] sm:$0xff]  }
 0x2b5   : > { %v1723_v9 = vsel %vm793_vm13, %v1714_v58, %v5050_v28  ;;  %v1992_v62 = vrot.slane %v1990_v30, 2  ;;  %v2047_v25 = vrot.slane %v2045_v41, 3  ;;  %v2050_v40 = vrot.slane %v2048_v51, 4  ;;  %v3495_v30 = vld [vmem:[#allocation9 + $0x108] sm:$0xff]   ;;  %v3497_v51 = vld [vmem:[#allocation9 + $0x150] sm:$0xff]  }
 0x2b6   : > { %1724 = vrot.lane.b32.xlu0 %v1723_v9, %s3994_s15  ;;  %1696 = vrot.lane.b32.xlu1 %v1695_v19, %s3995_s3  ;;  %v2055_v45 = vrot.slane %v2053_v22, 3  ;;  %v2058_v53 = vrot.slane %v2056_v5, 4  ;;  %v1753_v42 = vsel %vm825_vm14, %v1744_v6, %v1752_v57  ;;  %v1972_v12 = vsel %vm736_vm11, %v1967_v18, %v1971_v56  ;;  %v3499_v56 = vld [vmem:[#allocation9 + $0x110] sm:$0xff]   ;;  %v3505_v18 = vld [vmem:[#allocation9 + $0x160] sm:$0xff]  }
 0x2b7   : > { %v1993_v2 = vor.u32 %v1992_v62, %v1989_v34  ;;  %v2001_v17 = vor.u32 %v2000_v43, %v1997_v23  ;;  %v2038_v44 = vsel %vm816_vm9, %v2036_v29, %v2037_v0  ;;  %v2051_v10 = vor.u32 %v2050_v40, %v2047_v25  ;;  %v3502_v29 = vld [vmem:[#allocation9 + $0x118] sm:$0xff]   ;;  %v3506_v34 = vld [vmem:[#allocation9 + $0x1c8] sm:$0xff]   ;;  %v3507_v25 = vld [vmem:[#allocation9 + $0x120] sm:$0xff]  }
 0x2b8   : > { %v2059_v63 = vor.u32 %v2058_v53, %v2055_v45  ;;  %v3508_v40 = vld [vmem:[#allocation9 + $0x188] sm:$0xff]   ;;  %v2009_v26 = vrot.slane %v4770_v11, 2  ;;  %v2936_v11 = vcombine.low %v4713_v15, %v4560_v35  ;;  %v5051_v59 = vmov 0.0  }
 0x2b9   : > { %v2002_v38 = vsel %vm763_vm12, %v1993_v2, %v2001_v17  ;;  %v3509_v53 = vld [vmem:[#allocation9 + $0x168] sm:$0xff]   ;;  %v3512_v17 = vld [vmem:[#allocation9 + $0x190] sm:$0xff]  }
 0x2ba   : > { %1754 = vrot.lane.b32.xlu0 %v1753_v42, %s3995_s3  ;;  %1973 = vrot.lane.b32.xlu1 %v1972_v12, %s3994_s15  ;;  %v2060_v16 = vsel %vm825_vm14, %v2051_v10, %v2059_v63  ;;  %v3510_v42 = vld [vmem:[#allocation9 + $0x1d0] sm:$0xff]   ;;  %v3511_v2 = vld [vmem:[#allocation9 + $0x128] sm:$0xff]  }
 0x2bb   : > { %v3513_v63 = vld [vmem:[#allocation9 + $0x170] sm:$0xff]  }
 0x2be   : > { %2039 = vrot.lane.b32.xlu0 %v2038_v44, %s3993_s11  ;;  %2003 = vrot.lane.b32.xlu1 %v2002_v38, %s3995_s3  ;;  %v3514_v38 = vld [vmem:[#allocation9 + $0x1d8] sm:$0xff]  }
 0x2c2   : > { %2061 = vrot.lane.b32.xlu0 %v2060_v16, %s3995_s3 }
 0x2f6   : > { %v985_v13 = vpop.permute.xlu1 %984 }
 0x2f9   : > { %v919_v1 = vpop.permute.xlu0 %918 }
 0x2fa   : > { %v927_v21 = vpop.permute.xlu1 %926  ;;  %v1009_v39 = vsel %vm845_vm1, %v4554_v31, %v919_v1  ;;  %v788_v31 = vrot.slane %v4503_v52, 2  ;;  %v3515_v1 = vld [vmem:[#allocation9 + $0x130] sm:$0xff]  }
 0x2fb   : > { %v1011_v58 = vsel %vm848_vm2, %v1009_v39, %v927_v21  ;;  %v3516_v21 = vld [vmem:[#allocation9 + $0x198] sm:$0xff]  }
 0x2fd   : > { %v977_v54 = vpop.permute.xlu0 %976 }
 0x2fe   : > { %v1017_v57 = vsel %vm845_vm1, %v4765_v47, %v977_v54  ;;  %v787_v47 = vrot.slane %v4487_v33, 2  ;;  %v3501_v33 = vld [vmem:[#allocation9 + $0x158] sm:$0xff]  }
 0x2ff   : > { %v949_v49 = vpop.permute.xlu1 %948  ;;  %v1019_v36 = vsel %vm848_vm2, %v1017_v57, %v985_v13 }
 0x300   : > { %v1013_v8 = vsel %vm851_vm3, %v1011_v58, %v949_v49  ;;  %v789_v5 = vsel %vm786_vm15, %v787_v47, %v788_v31  ;;  %v3518_v49 = vld [vmem:[#allocation9 + $0x178] sm:$0xff]   ;;  %v3522_v58 = vld [vmem:[#allocation9 + $0x1e8] sm:$0xff]   ;;  %v3525_v47 = vld [vmem:[#allocation9 + $0x200] sm:$0xff]  }
 0x302   : > { %v1007_v24 = vpop.permute.xlu0 %1006 }
 0x303   : > { %v750_v61 = vpop.permute.xlu1 %749  ;;  %v1021_v60 = vsel %vm851_vm3, %v1019_v36, %v1007_v24  ;;  %v3520_v24 = vld [vmem:[#allocation9 + $0x138] sm:$0xff]   ;;  %v3521_v36 = vld [vmem:[#allocation9 + $0x1a0] sm:$0xff]  }
 0x304   : > { %1183 = vmatprep.mubr.bf16.mxu1 %v1021_v60  ;;  %v847_v22 = vsel %vm845_vm1, %v4495_v46, %v750_v61  ;;  %v3503_v46 = vld [vmem:[#allocation9 + $0x180] sm:$0xff]  }
 0x305   : > { %1184 = vmatmul.mubr.bf16.vlgmr.msra.gmra.mrb[0].mxu1 %v1013_v8  ;;  %v3523_v61 = vld [vmem:[#allocation9 + $0x240] sm:$0xff]   ;;  %v3524_v8 = vld [vmem:[#allocation9 + $0x1a8] sm:$0xff]  }
 0x306   : > { %3041 = vmatpush3.bf16.msra.mxu1 %v3491_v7  ;;  %v812_v37 = vpop.permute.xlu0 %811 }
 0x307   : > { %v759_v41 = vpop.permute.xlu1 %758  ;;  %3042 = vmatprep.subr.bf16.mxu1 %v3493_v55  ;;  %v857_v52 = vsel %vm845_vm1, %v789_v5, %v812_v37  ;;  %v3529_v5 = vld [vmem:[#allocation9 + $0x208] sm:$0xff]  }
 0x308   : > { %v850_v23 = vsel %vm848_vm2, %v847_v22, %v759_v41  ;;  %v3527_v41 = vld [vmem:[#allocation9 + $0x248] sm:$0xff]   ;;  %v2008_v22 = vrot.slane %v4687_v3, 2 }
 0x30a   : > { %3043 = vmatpush3.bf16.msra.mxu1 %v3495_v30  ;;  %v821_v14 = vpop.permute.xlu0 %820  ;;  %v3526_v30 = vld [vmem:[#allocation9 + $0x1f0] sm:$0xff]  }
 0x30b   : > { %v782_v43 = vpop.permute.xlu1 %781  ;;  %3044 = vmatprep.subr.bf16.mxu1 %v3497_v51  ;;  %v859_v28 = vsel %vm848_vm2, %v857_v52, %v821_v14 }
 0x30c   : > { %v853_v9 = vsel %vm851_vm3, %v850_v23, %v782_v43  ;;  %v3531_v23 = vld [vmem:[#allocation9 + $0x1f8] sm:$0xff]   ;;  %v3532_v43 = vld [vmem:[#allocation9 + $0x250] sm:$0xff]  }
 0x30e   : > { %3045 = vmatpush3.bf16.msra.mxu1 %v3499_v56  ;;  %v844_v6 = vpop.permute.xlu0 %843 }
 0x30f   : > { %v1368_v0 = vpop.permute.xlu1 %1367  ;;  %v861_v19 = vsel %vm851_vm3, %v859_v28, %v844_v6  ;;  %3046 = vmatprep.subr.bf16.mxu1 %v3501_v33  ;;  %v2010_v33 = vsel %vm786_vm15, %v2008_v22, %v2009_v26  ;;  %v3533_v28 = vld [vmem:[#allocation9 + $0x1b8] sm:$0xff]   ;;  %v3559_v26 = vld [vmem:[#allocation15 + $0x30] sm:$0xff]  }
 0x310   : > { %1320 = vmatprep.mubr.bf16.mxu0 %v861_v19  ;;  %v3558_v22 = vld [vmem:[#allocation15 + $0x28] sm:$0xff]  }
 0x311   : > { %1321 = vmatmul.mubr.bf16.vlgmr.msra.gmra.mrb[4].mxu0 %v853_v9  ;;  %v3534_v9 = vld [vmem:[#allocation9 + $0x210] sm:$0xff]  }
 0x312   : > { %3047 = vmatpush3.bf16.msra.mxu1 %v3502_v29  ;;  %3063 = vmatpush3.bf16.msra.mxu0 %v3503_v46  ;;  %v1426_v62 = vpop.permute.xlu0 %1425  ;;  %v3535_v29 = vld [vmem:[#allocation9 + $0x258] sm:$0xff]  }
 0x313   : > { %v1360_v45 = vpop.permute.xlu1 %1359  ;;  %3048 = vmatprep.subr.bf16.mxu1 %v3505_v18  ;;  %3064 = vmatprep.subr.bf16.mxu0 %v3506_v34  ;;  %v3536_v18 = vld [vmem:[#allocation9 + $0x218] sm:$0xff]   ;;  %v3537_v34 = vld [vmem:[#allocation11] sm:$0xff]  }
 0x314   : > { %v1451_v60 = vsel %vm845_vm1, %v2886_v32, %v1360_v45  ;;  %v3528_v32 = vld [vmem:[#allocation9 + $0x1b0] sm:$0xff]  }
 0x315   : > { %v1453_v31 = vsel %vm848_vm2, %v1451_v60, %v1368_v0 }
 0x316   : > { %3049 = vmatpush3.bf16.msra.mxu1 %v3507_v25  ;;  %3065 = vmatpush3.bf16.msra.mxu0 %v3508_v40  ;;  %v1418_v12 = vpop.permute.xlu0 %1417 }
 0x317   : > { %v1459_v44 = vsel %vm845_vm1, %v4783_v48, %v1418_v12  ;;  %v1390_v10 = vpop.permute.xlu1 %1389  ;;  %3050 = vmatprep.subr.bf16.mxu1 %v3509_v53  ;;  %3066 = vmatprep.subr.bf16.mxu0 %v3510_v42  ;;  %v3519_v48 = vld [vmem:[#allocation9 + $0x1e0] sm:$0xff]   ;;  %v3540_v12 = vld [vmem:[#allocation11 + $0x8] sm:$0xff]  }
 0x318   : > { %v1461_v13 = vsel %vm848_vm2, %v1459_v44, %v1426_v62  ;;  %v1455_v51 = vsel %vm851_vm3, %v1453_v31, %v1390_v10  ;;  %v3539_v42 = vld [vmem:[#allocation9 + $0x220] sm:$0xff]   ;;  %v3542_v44 = vld [vmem:[#allocation9 + $0x228] sm:$0xff]   ;;  %v3543_v10 = vld [vmem:[#allocation11 + $0x10] sm:$0xff]  }
 0x319   : > { %v3555_v31 = vld [vmem:[#allocation15 + $0x10] sm:$0xff]  }
 0x31a   : > { %3051 = vmatpush3.bf16.msra.mxu1 %v3511_v2  ;;  %3067 = vmatpush3.bf16.msra.mxu0 %v3512_v17  ;;  %v1448_v16 = vpop.permute.xlu0 %1447  ;;  %v3541_v17 = vld [vmem:[#allocation9 + $0x268] sm:$0xff]  }
 0x31b   : > { %v4847_v54 = vpop.permute.xlu1 %1674  ;;  %3052 = vmatprep.subr.bf16.mxu1 %v3513_v63  ;;  %v1463_v57 = vsel %vm851_vm3, %v1461_v13, %v1448_v16  ;;  %3068 = vmatprep.subr.bf16.mxu0 %v3514_v38  ;;  %v3544_v63 = vld [vmem:[#allocation9 + $0x270] sm:$0xff]   ;;  %v3546_v16 = vld [vmem:[#allocation11 + $0x18] sm:$0xff]  }
 0x31c   : > { %1625 = vmatprep.mubr.bf16.mxu1 %v1463_v57  ;;  %v3545_v38 = vld [vmem:[#allocation9 + $0x230] sm:$0xff]   ;;  %v3549_v57 = vld [vmem:[#allocation11 + $0x20] sm:$0xff]  }
 0x31d   : > { %v3562_v13 = vld [vmem:[%s4427_s14] sm:$0xff]  }
 0x31e   : > { %3053 = vmatpush3.bf16.msra.mxu1 %v3515_v1  ;;  %3069 = vmatpush3.bf16.msra.mxu0 %v3516_v21  ;;  %v1733_v39 = vpop.permute.xlu0 %1732  ;;  %v2251_v1 = vshrl.u32 %v3562_v13, 16  ;;  %v3547_v21 = vld [vmem:[#allocation9 + $0x278] sm:$0xff]  }
 0x31f   : > { %v1667_v7 = vpop.permute.xlu1 %1666  ;;  %3054 = vmatprep.subr.bf16.mxu1 %v3518_v49  ;;  %3070 = vmatprep.subr.bf16.mxu0 %v3519_v48  ;;  %v2254_v48 = vshll.u32 %v3562_v13, 16 }
 0x320   : > { %v1758_v46 = vsel %vm845_vm1, %v2911_v20, %v1667_v7  ;;  %v2253_v49 = vrot.slane %v2251_v1, 7 }
 0x321   : > { %v1760_v62 = vsel %vm848_vm2, %v1758_v46, %v4847_v54  ;;  %v3548_v54 = vld [vmem:[#allocation9 + $0x238] sm:$0xff]   ;;  %v2262_v7 = vrot.slane %v2254_v48, 1 }
 0x322   : > { %3055 = vmatpush3.bf16.msra.mxu1 %v3520_v24  ;;  %3071 = vmatpush3.bf16.msra.mxu0 %v3521_v36  ;;  %v2032_v55 = vpop.permute.xlu0 %2031  ;;  %v3551_v24 = vld [vmem:[#allocation15] sm:$0xff]   ;;  %v2256_v36 = vor.u32 %v2254_v48, %v2253_v49  ;;  %v2532_v46 = vld [vmem:[#allocation17 + $0x48] sm:$0xff] }
 0x323   : > { %3072 = vmatprep.subr.bf16.mxu0 %v3522_v58  ;;  %3084 = vmatprep.subr.bf16.mxu1 %v3523_v61  ;;  %v2073_v35 = vsel %vm845_vm1, %v2010_v33, %v2032_v55  ;;  %v3552_v58 = vld [vmem:[#allocation11 + $0x30] sm:$0xff]   ;;  %v3553_v61 = vld [vmem:[#allocation15 + $0x8] sm:$0xff]   ;;  %v2263_v55 = vor.u32 %v2262_v7, %v2251_v1 }
 0x324   : > { %v1982_v37 = vpop.permute.xlu1 %1981  ;;  %v2261_v60 = vsel %vm2260_vm6, 4286644096, %v2256_v36  ;;  %v2526_v33 = vld [vmem:[#allocation17 + $0x18] sm:$0xff] }
 0x325   : > { %1626 = vmatmul.mubr.bf16.vlgmr.msra.gmra.mrb[4].mxu1 %v1455_v51  ;;  %v3557_v51 = vld [vmem:[#allocation15 + $0x20] sm:$0xff]  }
 0x326   : > { %3073 = vmatpush3.bf16.msra.mxu0 %v3524_v8  ;;  %3085 = vmatpush3.bf16.msra.mxu1 %v3525_v47  ;;  %v2268_v8 = vmax.bf16 %v3562_v13, %v2261_v60  ;;  %v3554_v47 = vld [vmem:[#allocation11 + $0x38] sm:$0xff]  }
 0x327   : > { %3074 = vmatprep.subr.bf16.mxu0 %v3526_v30  ;;  %3086 = vmatprep.subr.bf16.mxu1 %v3527_v41  ;;  %v3556_v41 = vld [vmem:[#allocation15 + $0x18] sm:$0xff]  }
 0x328   : > { %v1725_v4 = vpop.permute.xlu0 %1724  ;;  %v1697_v56 = vpop.permute.xlu1 %1696 }
 0x329   : > { %v1766_v14 = vsel %vm845_vm1, %v4794_v50, %v1725_v4  ;;  %v1762_v20 = vsel %vm851_vm3, %v1760_v62, %v1697_v56  ;;  %v3560_v4 = vld [vmem:[#allocation15 + $0x38] sm:$0xff]  }
 0x32a   : > { %3075 = vmatpush3.bf16.msra.mxu0 %v3528_v32  ;;  %3087 = vmatpush3.bf16.msra.mxu1 %v3529_v5  ;;  %v1768_v52 = vsel %vm848_vm2, %v1766_v14, %v1733_v39  ;;  %v3550_v39 = vld [vmem:[#allocation11 + $0x28] sm:$0xff]   ;;  %v2523_v5 = vld [vmem:[#allocation17] sm:$0xff]  ;;  %v2524_v14 = vld [vmem:[#allocation17 + $0x8] sm:$0xff] }
 0x32b   : > { %3076 = vmatprep.subr.bf16.mxu0 %v3531_v23  ;;  %3088 = vmatprep.subr.bf16.mxu1 %v3532_v43  ;;  %v3561_v32 = vld [vmem:[%s4445_s2] sm:$0xff]   ;;  %v3996_v23 = vmov 0.0|0.0   ;;  %v3237_v43 = vpack.c.bf16 %v2524_v14, %v2523_v5 }
 0x32c   : > { %v1755_v3 = vpop.permute.xlu0 %1754  ;;  %v1974_v6 = vpop.permute.xlu1 %1973  ;;  %v2525_v56 = vld [vmem:[#allocation17 + $0x10] sm:$0xff] }
 0x32d   : > { %v1770_v50 = vsel %vm851_vm3, %v1768_v52, %v1755_v3  ;;  %v2065_v0 = vsel %vm845_vm1, %v2936_v11, %v1974_v6  ;;  %v3240_v3 = vpack.c.bf16 %v2526_v33, %v2525_v56  ;;  %v2527_v11 = vld [vmem:[#allocation17 + $0x20] sm:$0xff]  ;;  %v2528_v52 = vld [vmem:[#allocation17 + $0x28] sm:$0xff]  ;;  %v2530_v6 = vld [vmem:[#allocation17 + $0x38] sm:$0xff] }
 0x32e   : > { %1932 = vmatprep.mubr.bf16.mxu0 %v1770_v50  ;;  %v2067_v15 = vsel %vm848_vm2, %v2065_v0, %v1982_v37  ;;  %3077 = vmatpush3.bf16.msra.mxu0 %v3533_v28  ;;  %v2267_v37 = vsel %vm2266_vm8, %v2263_v55, 4286644096  ;;  %v2529_v28 = vld [vmem:[#allocation17 + $0x30] sm:$0xff]  ;;  %v2969_v33 = vld [vmem:[#allocation12] ss:$0 sm:$0xff] }
 0x32f   : > { %3089 = vmatpush3.bf16.msra.mxu1 %v3534_v9  ;;  %3161 = vmatprep.subr.bf16.mxu0 %v5051_v59  ;;  %v2269_v30 = vmax.bf16 %v2268_v8, %v2267_v37  ;;  %v3243_v9 = vpack.c.bf16 %v2528_v52, %v2527_v11  ;;  %v3246_v50 = vpack.c.bf16 %v2530_v6, %v2529_v28 }
 0x330   : > { %v2040_v19 = vpop.permute.xlu0 %2039  ;;  %v2004_v25 = vpop.permute.xlu1 %2003  ;;  %3090 = vmatprep.subr.bf16.mxu1 %v3535_v29  ;;  %v2531_v29 = vld [vmem:[#allocation17 + $0x40] sm:$0xff] }
 0x331   : > { %v2069_v40 = vsel %vm851_vm3, %v2067_v15, %v2004_v25  ;;  %v2075_v45 = vsel %vm848_vm2, %v2073_v35, %v2040_v19  ;;  %1933 = vmatmul.mubr.bf16.vlgmr.msra.gmra.mrb[8].mxu0 %v1762_v20  ;;  %v3249_v0 = vpack.c.bf16 %v2532_v46, %v2531_v29  ;;  %v2533_v35 = vld [vmem:[#allocation17 + $0x50] sm:$0xff]  ;;  %v2534_v15 = vld [vmem:[#allocation17 + $0x58] sm:$0xff] }
 0x332   : > { %3162 = vmatpush3.bf16.msra.mxu0 %v3537_v34  ;;  %3177 = vmatprep.mubr.msk.bf16.mxu0 %vm3991_vm0, %v5051_v59  ;;  %v3252_v19 = vpack.c.bf16 %v2534_v15, %v2533_v35  ;;  %v2536_v34 = vld [vmem:[#allocation17 + $0x68] sm:$0xff]  ;;  %v2538_v20 = vld [vmem:[#allocation17 + $0x78] sm:$0xff] }
 0x333   : > { %3091 = vmatpush3.bf16.msra.mxu1 %v3536_v18  ;;  %3163 = vmatprep.subr.bf16.mxu0 %v5051_v59  ;;  %v2535_v18 = vld [vmem:[#allocation17 + $0x60] sm:$0xff] }
 0x334   : > { %v2062_v53 = vpop.permute.xlu0 %2061  ;;  %3092 = vmatprep.subr.bf16.mxu1 %v3538_v27  ;;  %v3255_v25 = vpack.c.bf16 %v2536_v34, %v2535_v18  ;;  %v2537_v27 = vld [vmem:[#allocation17 + $0x70] sm:$0xff] }
 0x335   : > { %v2077_v2 = vsel %vm851_vm3, %v2075_v45, %v2062_v53 }
 0x336   : > { %2239 = vmatprep.mubr.bf16.mxu1 %v2077_v2  ;;  %3164 = vmatpush3.bf16.msra.mxu0 %v3540_v12  ;;  %v3258_v12 = vpack.c.bf16 %v2538_v20, %v2537_v27 }
 0x337   : > { %3093 = vmatpush3.bf16.msra.mxu1 %v3539_v42  ;;  %3165 = vmatprep.subr.bf16.mxu0 %v5051_v59 }
 0x338   : > { %3094 = vmatprep.subr.bf16.mxu1 %v3541_v17 }
 0x33a   : > { %3166 = vmatpush3.bf16.msra.mxu0 %v3543_v10 }
 0x33b   : > { %3095 = vmatpush3.bf16.msra.mxu1 %v3542_v44  ;;  %3167 = vmatprep.subr.bf16.mxu0 %v5051_v59 }
 0x33c   : > { %3096 = vmatprep.subr.bf16.mxu1 %v3544_v63 }
 0x33e   : > { %3168 = vmatpush3.bf16.msra.mxu0 %v3546_v16 }
 0x33f   : > { %3097 = vmatpush3.bf16.msra.mxu1 %v3545_v38  ;;  %3169 = vmatprep.subr.bf16.mxu0 %v5051_v59 }
 0x340   : > { %3098 = vmatprep.subr.bf16.mxu1 %v3547_v21 }
 0x342   : > { %3170 = vmatpush3.bf16.msra.mxu0 %v3549_v57 }
 0x343   : > { %3099 = vmatpush3.bf16.msra.mxu1 %v3548_v54  ;;  %3171 = vmatprep.subr.bf16.mxu0 %v5051_v59 }
 0x344   : > { %3181 = vmatprep.subr.bf16.mxu1 %v5051_v59 }
 0x346   : > { %2240 = vmatmul.mubr.bf16.vlgmr.msra.gmra.mrb[8].mxu1 %v2069_v40  ;;  %3172 = vmatpush3.bf16.msra.mxu0 %v3550_v39 }
 0x347   : > { %3182 = vmatpush3.bf16.msra.mxu1 %v3551_v24  ;;  %3173 = vmatprep.subr.bf16.mxu0 %v5051_v59 }
 0x348   : > { %3183 = vmatprep.subr.bf16.mxu1 %v5051_v59  ;;  %3197 = vmatprep.mubr.msk.bf16.mxu1 %vm3991_vm0, %v5051_v59 }
 0x34a   : > { %3174 = vmatpush3.bf16.msra.mxu0 %v3552_v58 }
 0x34b   : > { %3184 = vmatpush3.bf16.msra.mxu1 %v3553_v61  ;;  %3175 = vmatprep.subr.bf16.mxu0 %v5051_v59 }
 0x34c   : > { %3185 = vmatprep.subr.bf16.mxu1 %v5051_v59 }
 0x34e   : > { %3176 = vmatpush3.bf16.msra.mxu0 %v3554_v47 }
 0x34f   : > { %3186 = vmatpush3.bf16.msra.mxu1 %v3555_v31  ;;  %3236 = vmatprep.subr.bf16.mxu0 %v3996_v23 }
 0x350   : > { %3187 = vmatprep.subr.bf16.mxu1 %v5051_v59 }
 0x351   : > { %3178 = vmatmul.mubr.bf16.vlgmr.msra.gmra.mrb[12].mxu0 %v2269_v30 }
 0x352   : > { %3233 = vmatprep.mubr.msk.f32.mxu0 %vm3991_vm0, %v5051_v59  ;;  %3238 = vmatpush3.bf16.msra.mxu0 %v3237_v43  ;;  %vm2610_vm0 = vcmask 32768  }
 0x353   : > { %3188 = vmatpush3.bf16.msra.mxu1 %v3556_v41  ;;  %3239 = vmatprep.subr.bf16.mxu0 %v3996_v23 }
 0x354   : > { %3189 = vmatprep.subr.bf16.mxu1 %v5051_v59 }
 0x356   : > { %3241 = vmatpush3.bf16.msra.mxu0 %v3240_v3 }
 0x357   : > { %3190 = vmatpush3.bf16.msra.mxu1 %v3557_v51  ;;  %3242 = vmatprep.subr.bf16.mxu0 %v3996_v23 }
 0x358   : > { %3191 = vmatprep.subr.bf16.mxu1 %v5051_v59 }
 0x35a   : > { %3244 = vmatpush3.bf16.msra.mxu0 %v3243_v9  ;;  %v2979_v9 = vld [vmem:[#allocation16] ss:$0 sm:$0xff] }
 0x35b   : > { %3192 = vmatpush3.bf16.msra.mxu1 %v3558_v22  ;;  %3245 = vmatprep.subr.bf16.mxu0 %v3996_v23 }
 0x35c   : > { %3193 = vmatprep.subr.bf16.mxu1 %v5051_v59 }
 0x35e   : > { %3247 = vmatpush3.bf16.msra.mxu0 %v3246_v50 }
 0x35f   : > { %3194 = vmatpush3.bf16.msra.mxu1 %v3559_v26  ;;  %3248 = vmatprep.subr.bf16.mxu0 %v3996_v23 }
 0x360   : > { %3195 = vmatprep.subr.bf16.mxu1 %v5051_v59 }
 0x362   : > { %3250 = vmatpush3.bf16.msra.mxu0 %v3249_v0 }
 0x363   : > { %3196 = vmatpush3.bf16.msra.mxu1 %v3560_v4  ;;  %3251 = vmatprep.subr.bf16.mxu0 %v3996_v23 }
 0x366   : > { %3198 = vmatmul.mubr.bf16.vlgmr.msra.gmra.mrb[12].mxu1 %v3561_v32  ;;  %3253 = vmatpush3.bf16.msra.mxu0 %v3252_v19 }
 0x367   : > { %3254 = vmatprep.subr.bf16.mxu0 %v3996_v23 }
 0x36a   : > { %3256 = vmatpush3.bf16.msra.mxu0 %v3255_v25 }
 0x36b   : > { %3257 = vmatprep.subr.bf16.mxu0 %v3996_v23 }
 0x36e   : > { %3259 = vmatpush3.bf16.msra.mxu0 %v3258_v12 }
 0x3d8   : > { %v3012_v62 = vpop.f32.mrb[0].mxu1 }
 0x3d9   : > { %v3013_v59 = vpop.f32.mrb[1].mxu1 }
 0x3da   : > { %v3014_v40 = vadd.f32 %v3013_v59, %v3012_v62  ;;  %v3015_v45 = vpop.f32.mrb[2].mxu1 }
 0x3db   : > { %v3016_v53 = vpop.f32.mrb[3].mxu1 }
 0x3dc   : > { %v3017_v42 = vadd.f32 %v3016_v53, %v3015_v45 }
 0x3e4   : > { %v3034_v2 = vpop.f32.mrb[4].mxu0 }
 0x3e5   : > { %v3035_v17 = vpop.f32.mrb[5].mxu0 }
 0x3e6   : > { %v3036_v44 = vadd.f32 %v3035_v17, %v3034_v2  ;;  %v3037_v10 = vpop.f32.mrb[6].mxu0 }
 0x3e7   : > { %v3038_v63 = vpop.f32.mrb[7].mxu0 }
 0x3e8   : > { %v1323_v38 = vadd.f32 %v3036_v44, %v3014_v40  ;;  %v3039_v16 = vadd.f32 %v3038_v63, %v3037_v10 }
 0x3ea   : > { %v1326_v13 = vadd.f32 %v3039_v16, %v3017_v42  ;;  %v2539_v42 = vld [vmem:[#allocation18] sm:$0x1] }
 0x3f8   : > { %v3056_v1 = vpop.f32.mrb[4].mxu1 }
 0x3f9   : > { %v3057_v21 = vpop.f32.mrb[5].mxu1 }
 0x3fa   : > { %v3058_v54 = vadd.f32 %v3057_v21, %v3056_v1  ;;  %v3059_v57 = vpop.f32.mrb[6].mxu1 }
 0x3fb   : > { %v3060_v49 = vpop.f32.mrb[7].mxu1 }
 0x3fc   : > { %v1634_v48 = vadd.f32 %v3058_v54, %v1323_v38  ;;  %v3061_v39 = vadd.f32 %v3060_v49, %v3059_v57 }
 0x3fe   : > { %v1635_v24 = vadd.f32 %v3061_v39, %v1326_v13 }
 0x404   : > { %v3078_v36 = vpop.f32.mrb[8].mxu0 }
 0x405   : > { %v3079_v7 = vpop.f32.mrb[9].mxu0 }
 0x406   : > { %v3080_v58 = vadd.f32 %v3079_v7, %v3078_v36  ;;  %v3081_v61 = vpop.f32.mrb[10].mxu0 }
 0x407   : > { %v3082_v60 = vpop.f32.mrb[11].mxu0 }
 0x408   : > { %v1941_v55 = vadd.f32 %v3080_v58, %v1634_v48  ;;  %v3083_v8 = vadd.f32 %v3082_v60, %v3081_v61 }
 0x40a   : > { %v1942_v47 = vadd.f32 %v3083_v8, %v1635_v24 }
 0x419   : > { %v3100_v31 = vpop.f32.mrb[8].mxu1 }
 0x41a   : > { %v3101_v37 = vpop.f32.mrb[9].mxu1 }
 0x41b   : > { %v3102_v30 = vadd.f32 %v3101_v37, %v3100_v31  ;;  %v3103_v41 = vpop.f32.mrb[10].mxu1 }
 0x41c   : > { %v3104_v51 = vpop.f32.mrb[11].mxu1 }
 0x41d   : > { %v3105_v22 = vadd.f32 %v3104_v51, %v3103_v41  ;;  %v2248_v26 = vadd.f32 %v3102_v30, %v1941_v55 }
 0x41f   : > { %v2249_v4 = vadd.f32 %v3105_v22, %v1942_v47 }
 0x424   : > { %v2368_v32 = vpop.f32.mrb[12].mxu0 }
 0x425   : > { %v2375_v5 = vadd.f32 %v2368_v32, %v2248_v26  ;;  %v3179_v14 = vpop.f32.mrb[13].mxu0 }
 0x426   : > { %v2371_v56 = vpop.f32.mrb[14].mxu0 }
 0x427   : > { %v2376_v23 = vadd.f32 %v2371_v56, %v2249_v4  ;;  %v3180_v43 = vpop.f32.mrb[15].mxu0  ;;  %v2384_v3 = vadd.f32 %v2969_v33, %v2375_v5 }
 0x429   : > { %v2385_v11 = vadd.f32 %v2969_v33, %v2376_v23  ;;  %v2386_v52 = vmax.f32 %v2384_v3, 0.0 }
 0x42b   : > { %v2387_v29 = vmax.f32 %v2385_v11, 0.0 }
 0x439   : > { %v2494_v28 = vpop.f32.mrb[12].mxu1 }
 0x43a   : > { %v2501_v6 = vadd.f32 %v2494_v28, %v2386_v52  ;;  %v3199_v50 = vpop.f32.mrb[13].mxu1 }
 0x43b   : > { %v2497_v46 = vpop.f32.mrb[14].mxu1 }
 0x43c   : > { %v2510_v0 = vadd.f32 %v2979_v9, %v2501_v6  ;;  %v2502_v35 = vadd.f32 %v2497_v46, %v2387_v29  ;;  %v3200_v15 = vpop.f32.mrb[15].mxu1 }
 0x43e   : > { %v2511_v19 = vadd.f32 %v2979_v9, %v2502_v35  ;;  %v2512_v18 = vmax.f32 %v2510_v0, 0.0 }
 0x440   : > { %v2513_v34 = vmax.f32 %v2511_v19, 0.0 }
 0x442   : > { %v2514_v62 = vadd.f32 %v2513_v34, %v2512_v18 }
 0x444   : > { %v2515_v25 = vrot.slane %v2514_v62, 4 }
 0x446   : > { %v2516_v59 = vadd.f32 %v2515_v25, %v2514_v62 }
 0x448   : > { %v2517_v27 = vrot.slane %v2516_v59, 2 }
 0x44a   : > { %v2518_v20 = vadd.f32 %v2517_v27, %v2516_v59 }
 0x44c   : > { %v2519_v40 = vrot.slane %v2518_v20, 1 }
 0x44e   : > { %v2520_v45 = vadd.f32 %v2519_v40, %v2518_v20 }
 0x450   : > { %v2522_v53 = vmul.f32 0.0625, %v2520_v45 }
 0x452   : > { %3234 = vmatmul.mubr.f32.vlgmr.msra.gmra.mrb[16].mxu0 %v2522_v53 }
 0x525   : > { %v2606_v12 = vpop.f32.mrb[16].mxu0 }
 0x526   : > { %v2607_v2 = vadd.f32 %v2606_v12, %v2539_v42  ;;  %v3235_v17 = vpop.f32.mrb[17].mxu0 }
 0x528   : > { %2611 = vst.msk [vmem:[%s562_s1] sm:$0x1] %vm2610_vm0, %v2607_v2 }
 0x529   : > { %3888 = shalt.err (!%p3885_p8)
}
 0x52a   : > { %s3889_s4 = scalar_lea.hbm %s4908_s19, 16  ;;  %s3893_s30 = scalar_lea.hbm %s5052_s16, 32 }
 0x52b   : > { %p3890_p1 = scmp.ne.s32.totalorder %s4908_s19, %s3889_s4  ;;  %p3894_p2 = scmp.lt.u32.totalorder %s4908_s19, %s5052_s16 }
 0x52c   : > { %p3895_p4 = scmp.lt.u32.totalorder %s3893_s30, %s3889_s4  ;;  %p3897_p9 = scmp.lt.u32.totalorder %s3889_s4, %s4908_s19 }
 0x52d   : > { %p3891_p13 = pnand %p3890_p1, %p5053_p3 }
 0x52e   : > { %p3896_p11 = por %p3895_p4, %p3894_p2 }
 0x52f   : > { %p3892_p12 = pneg %p3891_p13 }
 0x530   : > { %p3898_p0 = por %p3897_p9, %p3896_p11 }
 0x532   : > { %p3899_p5 = pnand %p3898_p0, %p3892_p12 }
 0x534   : > { %3902 = shalt.err (!%p3899_p5)
}
 0x535   : > { %3300 = dma.vmem_to_hbm [thread:$0]  (%p5053_p3), %s4910_s17, 16, %s4908_s19, %s2613_s26  }
 0x536 PF: > { %s5054_s13 = sld [smem:[#allocation31_spill]]  ;;  %s5055_s0 = sld [smem:[#allocation36_spill]] }
 0x537   : > { %p5057_p7 = scmp.ge.s32.totalorder %s3973_s20, 2 }
 0x53c   : > { %s2637_s14 = sand.u32 1, %s5054_s13   ;;  %p5056_p6 = scmp.ne.s32.totalorder %s5055_s0, 0 }
 0x53d   : > { %s2638_s2 = scalar_lea.sflag [#allocation5], %s2637_s14 }
 0x53e   : > { %p3338_p10 = pnand %p5057_p7, %p5056_p6 }
 0x540   : > { %3956 = dma.done.wait (!%p3338_p10), %s2638_s2, 16  }
 0x541   : > { %3958 = vsyncadd (!%p3338_p10), %s2638_s2, 4294967280  ;;  %s5058_s20 = sld [smem:[#allocation34_spill]]  ;;  %s5059_s11 = sld [smem:[#allocation32_spill]] }
 0x542   : > { %s5060_s19 = sld [smem:[#allocation35_spill]]  ;;  %s5061_s17 = smov %s3965_s18 }
 0x547   : > { %p28_p8 = scmp.ge.s32.totalorder %s5058_s20, 4   ;;  %s5062_s18 = smov %s5059_s11 }
 0x549   :  { %30 = sbr.rel (!%p28_p8) target bundleno = 20 (0x14), region = 156 }
 0x550   :  { %2642 = vsyncpa [#allocation4], 1 }
 0x551   :  { %2644 = vsyncpa [#allocation4 + $0x1], 1 }
 0x552   :  { %2645 = vsyncpa [#allocation7], 1 }
 0x553   :  { %2646 = vsyncpa [#allocation10], 1 }
 0x554   :  { %2647 = vsyncpa [#allocation13], 1 }
 0x555   :  { %2648 = vsyncpa [#allocation19], 1 }
 0x556   :  { %2649 = vsyncpa [#allocation5], 1 }
 0x557   :  { %2651 = vsyncpa [#allocation5 + $0x1], 1 }

// kernel: inception_time_fwd.8
= control target key start
LH: loop header
LB: loop body
LE: loop exit
PB: predicated region body
PF: predicated region fallthrough
CT: control target
= control target key end

     0   :  { %s4674_s0 = inlined_call_operand.hbm [shape: bf16[2,16,128], index: 0, kind: input, shape index: {}]   ;;  %s4675_s1 = inlined_call_operand.hbm [shape: bf16[128,32], index: 1, kind: input, shape index: {}]   ;;  %s4676_s2 = inlined_call_operand.hbm [shape: f32[1,32], index: 2, kind: input, shape index: {}]   ;;  %s4677_s3 = inlined_call_operand.hbm [shape: bf16[1280,128], index: 3, kind: input, shape index: {}]   ;;  %s4678_s4 = inlined_call_operand.hbm [shape: bf16[128,128], index: 4, kind: input, shape index: {}]   ;;  %s4679_s5 = inlined_call_operand.hbm [shape: f32[1,128], index: 5, kind: input, shape index: {}]   ;;  %s4680_s6 = inlined_call_operand.hbm [shape: bf16[2,16,4], index: 6, kind: input, shape index: {}]   ;;  %s4681_s7 = inlined_call_operand.hbm [shape: bf16[4,128], index: 7, kind: input, shape index: {}]   ;;  %s4682_s8 = inlined_call_operand.hbm [shape: f32[1,128], index: 8, kind: input, shape index: {}]   ;;  %s4683_s9 = inlined_call_operand.hbm [shape: bf16[2,16,128], index: 9, kind: output, shape index: {0}]   ;;  %s4684_s10 = inlined_call_operand.hbm [shape: bf16[2,16,128], index: 10, kind: output, shape index: {1}]  }
   0x1   :  { %4707 = sst [smem:[#allocation34_spill]] %s4674_s0 }
   0x2   :  { %4708 = sst [smem:[#allocation35_spill]] %s4675_s1 }
   0x3   :  { %4709 = sst [smem:[#allocation36_spill]] %s4676_s2 }
   0x4   :  { %4710 = sst [smem:[#allocation37_spill]] %s4677_s3 }
   0x5   :  { %4711 = sst [smem:[#allocation38_spill]] %s4678_s4 }
   0x6   :  { %4712 = sst [smem:[#allocation39_spill]] %s4683_s9 }
   0x7   :  { %4713 = sst [smem:[#allocation40_spill]] %s4684_s10 }
   0x8   :  { %16 = vsyncpa [#allocation4], 0 }
   0x9   :  { %18 = vsyncpa [#allocation4 + $0x1], 0 }
   0xa   :  { %19 = vsyncpa [#allocation7], 0 }
   0xb   :  { %20 = vsyncpa [#allocation10], 0 }
   0xc   :  { %21 = vsyncpa [#allocation13], 0 }
   0xd   :  { %22 = vsyncpa [#allocation5], 0 }
   0xe   :  { %24 = vsyncpa [#allocation5 + $0x1], 0 }
   0xf   :  { %25 = vsyncpa [#allocation19], 0 }
  0x10   :  { %27 = vsyncpa [#allocation19 + $0x1], 0  ;;  %s3776_s13 = smov 0   ;;  %s3778_s14 = smov 0  }
  0x11   :  { %s3780_s15 = smov 0   ;;  %s3782_s16 = smov 0  }
  0x12 LB: > { %4714 = sst [smem:[#allocation29_spill]] %s3695_s15  ;;  %s3701_s17 = smov [#allocation6]   ;;  %s3699_s16 = sphi %s3782_s16, %s4771_s16   ;;  %s3695_s15 = sphi %s3780_s15, %s4773_s15   ;;  %s3691_s14 = sphi %s3778_s14, %s4775_s14   ;;  %s3687_s13 = sphi %s3776_s13, %s4774_s13  }
  0x13   : > { %4715 = sst [smem:[#allocation30_spill]] %s3699_s16  ;;  %s301_s18 = sshll.u32 %s3701_s17, 4  ;;  %s3802_s18 = int_to_ptr.vmem [resolvable:$true] %s301_s18 }
  0x14   : > { %s3797_s19 = sadd.s32 4294967295, %s3699_s16   ;;  %p2661_p0 = scmp.ge.s32.totalorder %s3699_s16, 1 }
  0x15   : > { %p4687_p1 = scmp.eq.s32.totalorder %s3797_s19, 0  ;;  %p289_p2 = scmp.lt.s32.totalorder %s3699_s16, 3 }
  0x16   : > { %s3702_s21 = smov [#allocation9]   ;;  %s3703_s24 = smov [#allocation8]  }
  0x17   : > { %p3804_p3 = pnand %p2661_p0, %p289_p2  ;;  %s325_s22 = sshll.u32 %s3702_s21, 4  ;;  %s3817_s22 = int_to_ptr.vmem [resolvable:$true] %s325_s22 }
  0x18   : > { %s315_s25 = sshll.u32 %s3703_s24, 4  ;;  %s4718_s1 = sld [smem:[#allocation35_spill]]  ;;  %s3819_s25 = int_to_ptr.vmem [resolvable:$true] %s315_s25 }
  0x19   : > { %s4716_s20 = scalar_select %p3804_p3, 1, 0 }
  0x1a   : > { %p3079_p5 = pneg %p3804_p3 }
  0x1c   : > { %p3813_p6 = pnand %p3079_p5, %p4687_p1 }
  0x1e   : > { %s4717_s23 = scalar_select %p3813_p6, 1, 0 }
  0x1f   : > { %s3321_s28 = scalar_lea.hbm %s4718_s1, 1024  ;;  %p3829_p8 = pneg %p3813_p6 }
  0x20   : > { %p3322_p7 = scmp.ne.s32.totalorder %s4718_s1, %s3321_s28  ;;  %p3328_p11 = scmp.lt.u32.totalorder %s3321_s28, %s4718_s1 }
  0x22   : > { %p3324_p9 = pnand %p3829_p8, %p3322_p7 }
  0x24   : > { %p3325_p10 = pneg %p3324_p9 }
  0x26   : > { %p3330_p12 = pnand %p3328_p11, %p3325_p10 }
  0x28   : > { %3333 = shalt.err (!%p3330_p12)
}
  0x29   : > { %s3334_s21 = scalar_lea.vmem %s3802_s18, 1024  ;;  %p3342_p5 = scmp.lt.s32.totalorder %s3802_s18, %s3802_s18 }
  0x2a   : > { %p3335_p13 = scmp.ne.s32.totalorder %s3802_s18, %s3334_s21  ;;  %p3343_p4 = scmp.lt.s32.totalorder %s3334_s21, %s3334_s21 }
  0x2c   : > { %p3337_p0 = pnand %p3335_p13, %p3829_p8  ;;  %p3344_p7 = por %p3343_p4, %p3342_p5 }
  0x2e   : > { %p3338_p2 = pneg %p3337_p0 }
  0x30   : > { %p3345_p9 = pnand %p3344_p7, %p3338_p2 }
  0x32   : > { %3348 = shalt.err (!%p3345_p9)
}
  0x33   : > { %s4689_s24 = smov 64   ;;  %s4691_s26 = smov 4  }
  0x34   : > { %3082 = dma.hbm_to_vmem [thread:$0]  (!%p3813_p6), %s4718_s1, 1024, %s3802_s18, [#allocation7], %s4689_s24, %s4689_s24, %s4691_s26  }
  0x35   : > { %s4720_s3 = sld [smem:[#allocation37_spill]] }
  0x3b   : > { %s3349_s12 = scalar_lea.hbm %s4720_s3, 10240 }
  0x3c   : > { %p3350_p4 = scmp.ne.s32.totalorder %s4720_s3, %s3349_s12  ;;  %p3356_p12 = scmp.lt.u32.totalorder %s3349_s12, %s4720_s3 }
  0x3e   : > { %p3352_p10 = pnand %p3350_p4, %p3829_p8 }
  0x40   : > { %p3353_p11 = pneg %p3352_p10 }
  0x42   : > { %p3358_p13 = pnand %p3356_p12, %p3353_p11 }
  0x44   : > { %3361 = shalt.err (!%p3358_p13)
}
  0x45   : > { %s3362_s18 = scalar_lea.vmem %s3817_s22, 10240  ;;  %p3370_p7 = scmp.lt.s32.totalorder %s3817_s22, %s3817_s22 }
  0x46   : > { %p3363_p0 = scmp.ne.s32.totalorder %s3817_s22, %s3362_s18  ;;  %p3371_p9 = scmp.lt.s32.totalorder %s3362_s18, %s3362_s18 }
  0x48   : > { %p3365_p2 = pnand %p3363_p0, %p3829_p8  ;;  %p3372_p4 = por %p3371_p9, %p3370_p7 }
  0x4a   : > { %p3366_p5 = pneg %p3365_p2 }
  0x4c   : > { %p3373_p10 = pnand %p3372_p4, %p3366_p5 }
  0x4e   : > { %3376 = shalt.err (!%p3373_p10)
}
  0x4f   : > { %3088 = dma.hbm_to_vmem [thread:$0]  (!%p3813_p6), %s4720_s3, 10240, %s3817_s22, [#allocation10], %s4689_s24, %s4689_s24, %s4691_s26  }
  0x50   : > { %s4721_s2 = sld [smem:[#allocation36_spill]] }
  0x56   : > { %s3377_s29 = scalar_lea.hbm %s4721_s2, 16 }
  0x57   : > { %p3378_p11 = scmp.ne.s32.totalorder %s4721_s2, %s3377_s29  ;;  %p3384_p0 = scmp.lt.u32.totalorder %s3377_s29, %s4721_s2 }
  0x59   : > { %p3380_p12 = pnand %p3378_p11, %p3829_p8 }
  0x5b   : > { %p3381_p13 = pneg %p3380_p12 }
  0x5d   : > { %p3386_p2 = pnand %p3384_p0, %p3381_p13 }
  0x5f   : > { %3389 = shalt.err (!%p3386_p2)
}
  0x60   : > { %s3390_s22 = scalar_lea.vmem %s3819_s25, 16  ;;  %s3397_s18 = scalar_lea.vmem %s3819_s25, 32 }
  0x61   : > { %p3391_p5 = scmp.ne.s32.totalorder %s3819_s25, %s3390_s22  ;;  %p3398_p4 = scmp.lt.s32.totalorder %s3819_s25, %s3819_s25 }
  0x62   : > { %p3399_p10 = scmp.lt.s32.totalorder %s3397_s18, %s3390_s22 }
  0x63   : > { %p3393_p7 = pnand %p3391_p5, %p3829_p8 }
  0x64   : > { %p3400_p11 = por %p3399_p10, %p3398_p4 }
  0x65   : > { %p3394_p9 = pneg %p3393_p7 }
  0x67   : > { %p3401_p12 = pnand %p3400_p11, %p3394_p9 }
  0x69   : > { %3404 = shalt.err (!%p3401_p12)
}
  0x6a   : > { %3085 = dma.hbm_to_vmem [thread:$0]  (!%p3813_p6), %s4721_s2, 16, %s3819_s25, [#allocation7]  }
  0x6b   : > { %s3706_s27 = smov [#allocation11]   ;;  %s4722_s4 = sld [smem:[#allocation38_spill]] }
  0x6c   : > { %s338_s28 = sshll.u32 %s3706_s27, 4  ;;  %s339_s28 = int_to_ptr.vmem [resolvable:$true] %s338_s28 }
  0x71   : > { %s3405_s12 = scalar_lea.hbm %s4722_s4, 1024 }
  0x72   : > { %p3406_p13 = scmp.ne.s32.totalorder %s4722_s4, %s3405_s12  ;;  %p3412_p5 = scmp.lt.u32.totalorder %s3405_s12, %s4722_s4 }
  0x74   : > { %p3408_p0 = pnand %p3406_p13, %p3829_p8 }
  0x76   : > { %p3409_p2 = pneg %p3408_p0 }
  0x78   : > { %p3414_p7 = pnand %p3412_p5, %p3409_p2 }
  0x7a   : > { %3417 = shalt.err (!%p3414_p7)
}
  0x7b   : > { %s3418_s25 = scalar_lea.vmem %s339_s28, 1024  ;;  %p3426_p11 = scmp.lt.s32.totalorder %s339_s28, %s339_s28 }
  0x7c   : > { %p3419_p9 = scmp.ne.s32.totalorder %s339_s28, %s3418_s25  ;;  %p3427_p12 = scmp.lt.s32.totalorder %s3418_s25, %s3418_s25 }
  0x7e   : > { %p3421_p4 = pnand %p3419_p9, %p3829_p8  ;;  %p3428_p1 = por %p3427_p12, %p3426_p11 }
  0x80   : > { %p3422_p10 = pneg %p3421_p4 }
  0x82   : > { %p3429_p3 = pnand %p3428_p1, %p3422_p10 }
  0x84   : > { %3432 = shalt.err (!%p3429_p3)
}
  0x85   : > { %3091 = dma.hbm_to_vmem [thread:$0]  (!%p3813_p6), %s4722_s4, 1024, %s339_s28, [#allocation10], %s4689_s24, %s4689_s24, %s4691_s26  }
  0x86   : > { %s2660_s27 = sadd.s32 4294967294, %s3699_s16   ;;  %s3926_s29 = sadd.s32 1, %s3699_s16  }
  0x87   : > { %4723 = sst [smem:[#allocation31_spill]] %s3926_s29  ;;  %s37_s30 = ssub.s32 %s3699_s16, %s3926_s29 }
  0x88   : > { %s40_s12 = sadd.s32 1, %s3695_s15  ;;  %p38_p1 = scmp.eq.s32.totalorder %s37_s30, 0 }
  0x89   : > { %p47_p3 = scmp.ne.s32.totalorder %s3695_s15, %s3691_s14  ;;  %p48_p13 = scmp.eq.s32.totalorder %s3699_s16, 0 }
  0x8a   : > { %p53_p0 = scmp.ne.s32.totalorder %s3691_s14, %s3687_s13  ;;  %p4726_p5 = scmp.eq.s32.totalorder %s3797_s19, 0 }
  0x8b   : > { %s3937_s17 = scalar_select %p38_p1, %s3695_s15, %s40_s12  }
  0x8c   : > { %p3939_p2 = por %p48_p13, %p47_p3  ;;  %p3945_p7 = por %p4726_p5, %p53_p0 }
  0x8d   : > { %4724 = sst [smem:[#allocation32_spill]] %s3937_s17  ;;  %p250_p9 = scmp.eq.s32.totalorder %s3797_s19, 1 }
  0x8e   : > { %s4727_s28 = scalar_select %p3945_p7, 1, 0 }
  0x8f   : > { %p256_p4 = scmp.eq.s32.totalorder %s2660_s27, 1  ;;  %p3122_p10 = scmp.lt.s32.totalorder %s3699_s16, 2 }
  0x90   : > { %s385_s22 = sand.u32 1, %s3699_s16   ;;  %p3952_p11 = por %p250_p9, %p47_p3 }
  0x91   : > { %p3956_p12 = por %p256_p4, %p53_p0  ;;  %s387_s9 = sand.u32 1, %s3695_s15  }
  0x92   : > { %s4728_s18 = scalar_select %p3952_p11, 1, 0 }
  0x93   : > { %s4729_s25 = scalar_select %p3956_p12, 1, 0 }
  0x94   : > { %s3961_s10 = sshll.u32 %s387_s9, 3  ;;  %s2847_s30 = sshll.u32 %s3699_s16, 7 }
  0x95   : > { %4730 = sst [smem:[#allocation33_spill]] %s4729_s25  ;;  %s4731_s0 = sld [smem:[#allocation34_spill]] }
  0x96   : > { %s389_s27 = scalar_lea.vmem [#allocation3], %s3961_s10  ;;  %p3972_p1 = pnand %p3122_p10, %p3939_p2 }
  0x97   : > { %s396_s1 = sshll.u32 %s389_s27, 4  ;;  %s3981_s24 = scalar_lea.hbm %s4680_s6, %s2847_s30  ;;  %s3976_s1 = int_to_ptr.vmem [resolvable:$true] %s396_s1 }
  0x98   : > { %s4732_s2 = scalar_select %p3972_p1, 1, 0 }
  0x99   : > { %s3983_s12 = scalar_lea.sflag [#allocation4], %s385_s22  ;;  %p4701_p13 = pneg %p3972_p1 }
  0x9b   : > { %s3967_s26 = scalar_lea.hbm %s4731_s0, %s2847_s30  ;;  %s3438_s17 = scalar_lea.hbm %s4731_s0, 256 }
  0x9c   : > { %s3433_s4 = scalar_lea.hbm %s3967_s26, 128  ;;  %p3439_p5 = scmp.lt.u32.totalorder %s3967_s26, %s4731_s0 }
  0x9d   : > { %p3434_p3 = scmp.ne.s32.totalorder %s3967_s26, %s3433_s4  ;;  %p3440_p9 = scmp.lt.u32.totalorder %s3438_s17, %s3433_s4 }
  0x9e   : > { %p3442_p10 = scmp.lt.u32.totalorder %s3433_s4, %s3967_s26 }
  0x9f   : > { %p3436_p0 = pnand %p4701_p13, %p3434_p3  ;;  %p3441_p4 = por %p3440_p9, %p3439_p5 }
  0xa1   : > { %p3437_p2 = pneg %p3436_p0  ;;  %p3443_p12 = por %p3442_p10, %p3441_p4 }
  0xa3   : > { %p3444_p11 = pnand %p3443_p12, %p3437_p2 }
  0xa5   : > { %3447 = shalt.err (!%p3444_p11)
}
  0xa6   : > { %s3448_s3 = scalar_lea.vmem %s3976_s1, 128  ;;  %s3707_s22 = smov [#allocation3]  }
  0xa7   : > { %p3449_p3 = scmp.ne.s32.totalorder %s3976_s1, %s3448_s3  ;;  %s3453_s30 = sshll.u32 %s3707_s22, 4  ;;  %s3454_s30 = int_to_ptr.vmem [resolvable:$false] %s3453_s30 }
  0xa8   : > { %s3455_s15 = scalar_lea.vmem %s3454_s30, 256  ;;  %p3456_p6 = scmp.lt.s32.totalorder %s3976_s1, %s3454_s30 }
  0xa9   : > { %p3451_p0 = pnand %p3449_p3, %p4701_p13  ;;  %p3457_p5 = scmp.lt.s32.totalorder %s3455_s15, %s3448_s3 }
  0xab   : > { %p3452_p7 = pneg %p3451_p0  ;;  %p3458_p9 = por %p3457_p5, %p3456_p6 }
  0xad   : > { %p3459_p4 = pnand %p3458_p9, %p3452_p7 }
  0xaf   : > { %3462 = shalt.err (!%p3459_p4)
}
  0xb0   : > { %s4733_s4 = smov 4   ;;  %s4734_s29 = smov 64  }
  0xb1   : > { %3104 = dma.hbm_to_vmem [thread:$0]  (!%p3972_p1), %s3967_s26, 128, %s3976_s1, %s3983_s12, %s4734_s29, %s4734_s29, %s4733_s4  }
  0xb2   : > { %s410_s17 = scalar_lea.vmem [#allocation14], %s3961_s10  ;;  %s3708_s21 = smov [#allocation12]  }
  0xb3   : > { %s417_s9 = sshll.u32 %s410_s17, 4  ;;  %s352_s27 = sshll.u32 %s3708_s21, 4  ;;  %s4015_s9 = int_to_ptr.vmem [resolvable:$true] %s417_s9  ;;  %s353_s27 = int_to_ptr.vmem [resolvable:$true] %s352_s27 }
  0xb4   : > { %s3463_s30 = scalar_lea.hbm %s4679_s5, 16 }
  0xb5   : > { %p3464_p6 = scmp.ne.s32.totalorder %s4679_s5, %s3463_s30  ;;  %p3470_p12 = scmp.lt.u32.totalorder %s3463_s30, %s4679_s5 }
  0xb7   : > { %p3466_p7 = pnand %p3464_p6, %p3829_p8 }
  0xb9   : > { %p3467_p11 = pneg %p3466_p7 }
  0xbb   : > { %p3472_p2 = pnand %p3470_p12, %p3467_p11 }
  0xbd   : > { %3475 = shalt.err (!%p3472_p2)
}
  0xbe   : > { %s3476_s26 = scalar_lea.vmem %s353_s27, 16  ;;  %s3483_s10 = scalar_lea.vmem %s353_s27, 32 }
  0xbf   : > { %p3477_p10 = scmp.ne.s32.totalorder %s353_s27, %s3476_s26  ;;  %p3484_p5 = scmp.lt.s32.totalorder %s353_s27, %s353_s27 }
  0xc0   : > { %p3485_p9 = scmp.lt.s32.totalorder %s3483_s10, %s3476_s26 }
  0xc1   : > { %p3479_p3 = pnand %p3477_p10, %p3829_p8 }
  0xc2   : > { %p3486_p4 = por %p3485_p9, %p3484_p5 }
  0xc3   : > { %p3480_p0 = pneg %p3479_p3 }
  0xc5   : > { %p3487_p13 = pnand %p3486_p4, %p3480_p0 }
  0xc7   : > { %3490 = shalt.err (!%p3487_p13)
}
  0xc8   : > { %p4735_p6 = scmp.ne.s32.totalorder %s4717_s23, 0  ;;  %s3709_s16 = smov [#allocation15]  }
  0xc9   : > { %s363_s21 = sshll.u32 %s3709_s16, 4  ;;  %s3710_s3 = smov [#allocation16]   ;;  %s364_s21 = int_to_ptr.vmem [resolvable:$true] %s363_s21 }
  0xca   : > { %3094 = dma.hbm_to_vmem [thread:$0]  (!%p4735_p6), %s4679_s5, 16, %s353_s27, [#allocation13]  }
  0xcb   : > { %s374_s22 = sshll.u32 %s3710_s3, 4  ;;  %s3491_s1 = scalar_lea.hbm %s4681_s7, 32  ;;  %s375_s22 = int_to_ptr.vmem [resolvable:$true] %s374_s22 }
  0xcc   : > { %p3492_p13 = scmp.ne.s32.totalorder %s4681_s7, %s3491_s1  ;;  %p3498_p12 = scmp.lt.u32.totalorder %s3491_s1, %s4681_s7 }
  0xce   : > { %p3494_p7 = pnand %p3492_p13, %p3829_p8 }
  0xd0   : > { %p3495_p11 = pneg %p3494_p7 }
  0xd2   : > { %p3500_p2 = pnand %p3498_p12, %p3495_p11 }
  0xd4   : > { %3503 = shalt.err (!%p3500_p2)
}
  0xd5   : > { %s3504_s27 = scalar_lea.vmem %s364_s21, 32  ;;  %p3512_p5 = scmp.lt.s32.totalorder %s364_s21, %s364_s21 }
  0xd6   : > { %p3505_p10 = scmp.ne.s32.totalorder %s364_s21, %s3504_s27  ;;  %p3513_p9 = scmp.lt.s32.totalorder %s3504_s27, %s3504_s27 }
  0xd8   : > { %p3507_p3 = pnand %p3505_p10, %p3829_p8  ;;  %p3514_p4 = por %p3513_p9, %p3512_p5 }
  0xda   : > { %p3508_p0 = pneg %p3507_p3 }
  0xdc   : > { %p3515_p1 = pnand %p3514_p4, %p3508_p0 }
  0xde   : > { %3518 = shalt.err (!%p3515_p1)
}
  0xdf   : > { %3097 = dma.hbm_to_vmem [thread:$0]  (!%p4735_p6), %s4681_s7, 32, %s364_s21, [#allocation7]  }
  0xe0   : > { %s3519_s30 = scalar_lea.hbm %s4682_s8, 16 }
  0xe1   : > { %p3520_p13 = scmp.ne.s32.totalorder %s4682_s8, %s3519_s30  ;;  %p3526_p1 = scmp.lt.u32.totalorder %s3519_s30, %s4682_s8 }
  0xe3   : > { %p3522_p7 = pnand %p3520_p13, %p3829_p8 }
  0xe5   : > { %p3523_p11 = pneg %p3522_p7 }
  0xe7   : > { %p3528_p12 = pnand %p3526_p1, %p3523_p11 }
  0xe9   : > { %3531 = shalt.err (!%p3528_p12)
}
  0xea   : > { %s3532_s0 = scalar_lea.vmem %s375_s22, 16  ;;  %s3539_s21 = scalar_lea.vmem %s375_s22, 32 }
  0xeb   : > { %p3533_p2 = scmp.ne.s32.totalorder %s375_s22, %s3532_s0  ;;  %p3540_p0 = scmp.lt.s32.totalorder %s375_s22, %s375_s22 }
  0xec   : > { %p3541_p5 = scmp.lt.s32.totalorder %s3539_s21, %s3532_s0 }
  0xed   : > { %p3535_p10 = pnand %p3533_p2, %p3829_p8 }
  0xee   : > { %p3542_p9 = por %p3541_p5, %p3540_p0 }
  0xef   : > { %p3536_p3 = pneg %p3535_p10 }
  0xf1   : > { %p3543_p4 = pnand %p3542_p9, %p3536_p3 }
  0xf3   : > { %3546 = shalt.err (!%p3543_p4)
}
  0xf4   : > { %3100 = dma.hbm_to_vmem [thread:$0]  (!%p4735_p6), %s4682_s8, 16, %s375_s22, [#allocation10]  }
  0xf5   : > { %s3547_s11 = scalar_lea.hbm %s3981_s24, 128  ;;  %p4736_p13 = scmp.ne.s32.totalorder %s4732_s2, 0 }
  0xf6   : > { %p3548_p8 = scmp.ne.s32.totalorder %s3981_s24, %s3547_s11  ;;  %s3552_s3 = scalar_lea.hbm %s4680_s6, 256 }
  0xf7   : > { %p4737_p7 = pneg %p4736_p13  ;;  %p3553_p12 = scmp.lt.u32.totalorder %s3981_s24, %s4680_s6 }
  0xf8   : > { %p3554_p2 = scmp.lt.u32.totalorder %s3552_s3, %s3547_s11  ;;  %p3556_p3 = scmp.lt.u32.totalorder %s3547_s11, %s3981_s24 }
  0xf9   : > { %p3550_p11 = pnand %p3548_p8, %p4737_p7 }
  0xfa   : > { %p3555_p10 = por %p3554_p2, %p3553_p12 }
  0xfb   : > { %p3551_p1 = pneg %p3550_p11 }
  0xfc   : > { %p3557_p0 = por %p3556_p3, %p3555_p10 }
  0xfe   : > { %p3558_p5 = pnand %p3557_p0, %p3551_p1 }
 0x100   : > { %3561 = shalt.err (!%p3558_p5)
}
 0x101   : > { %s3562_s22 = scalar_lea.vmem %s4015_s9, 128  ;;  %p4738_p9 = pmov %p4737_p7 }
 0x102   : > { %p3563_p6 = scmp.ne.s32.totalorder %s4015_s9, %s3562_s22  ;;  %s3711_s15 = smov [#allocation14]  }
 0x103   : > { %s3567_s1 = sshll.u32 %s3711_s15, 4  ;;  %s3568_s1 = int_to_ptr.vmem [resolvable:$false] %s3567_s1 }
 0x104   : > { %p3565_p4 = pnand %p3563_p6, %p4738_p9  ;;  %s3569_s26 = scalar_lea.vmem %s3568_s1, 256 }
 0x105   : > { %p3570_p7 = scmp.lt.s32.totalorder %s4015_s9, %s3568_s1  ;;  %p3571_p11 = scmp.lt.s32.totalorder %s3569_s26, %s3562_s22 }
 0x106   : > { %p3566_p8 = pneg %p3565_p4 }
 0x107   : > { %p3572_p12 = por %p3571_p11, %p3570_p7 }
 0x109   : > { %p3573_p2 = pnand %p3572_p12, %p3566_p8 }
 0x10b   : > { %3576 = shalt.err (!%p3573_p2)
}
 0x10c   : > { %3107 = dma.hbm_to_vmem [thread:$0]  (!%p4736_p13), %s3981_s24, 128, %s4015_s9, %s3983_s12, %s4734_s29, %s4734_s29, %s4733_s4  }
 0x10d   : > { %p4739_p1 = scmp.ne.s32.totalorder %s4716_s20, 0 }
 0x10e   : > { %s431_s10 = sand.u32 (!%p4739_p1), 1, %s3797_s19   ;;  %s4102_s0 = sand.u32 (!%p4739_p1), 1, %s3691_s14  }
 0x10f   : > { %429 = sbr.rel (%p4739_p1) target bundleno = 1029 (0x405), region = 56  ;;  %s4105_s21 = sshll.u32 (!%p4739_p1), %s4102_s0, 3 }
 0x110   : > { %s432_s2 = scalar_lea.sflag (!%p4739_p1), [#allocation4], %s431_s10  ;;  %s435_s27 = scalar_lea.vmem (!%p4739_p1), [#allocation3], %s4105_s21 }
 0x111   : > { %p4740_p10 = scmp.ne.s32.totalorder (!%p4739_p1), %s4727_s28, 0 }
 0x116   : > { %3650 = dma.done.wait (%p4740_p10), %s432_s2, 128  }
 0x117   : > { %3652 = vsyncadd (%p4740_p10), %s432_s2, 4294967168  ;;  %p4741_p13 = scmp.eq.s32.totalorder %s3797_s19, 0 }
 0x119   : > { %3654 = dma.done.wait (%p4741_p13), [#allocation7], 1040   ;;  %p4742_p3 = pmov %p4741_p13 }
 0x11b   : > { %3656 = vsyncadd (%p4742_p3), [#allocation7], 4294966256  ;;  %p4743_p0 = pmov %p4742_p3 }
 0x11d   : > { %3658 = dma.done.wait (%p4743_p0), [#allocation10], 11264   ;;  %p4744_p5 = pmov %p4743_p0 }
 0x11e   : > { %p4745_p6 = pmov %p4743_p0 }
 0x11f   : > { %3660 = vsyncadd (%p4744_p5), [#allocation10], 4294956032 }
 0x120   : > { %3662 = dma.done.wait (%p4745_p6), [#allocation13], 16   ;;  %p4746_p9 = pmov %p4743_p0 }
 0x121   : > { %s464_s20 = scalar_lea.vmem [#allocation14], %s4105_s21 }
 0x122   : > { %3664 = vsyncadd (%p4746_p9), [#allocation13], 4294967280 }
 0x123   : > { %3666 = dma.done.wait (%p4740_p10), %s432_s2, 128  }
 0x124   : > { %3668 = vsyncadd (%p4740_p10), %s432_s2, 4294967168  ;;  %p4747_p4 = pmov %p4743_p0 }
 0x125   : > { %p4748_p8 = pmov %p4743_p0 }
 0x126   : > { %3670 = dma.done.wait (%p4747_p4), [#allocation7], 32  }
 0x127   : > { %3672 = vsyncadd (%p4748_p8), [#allocation7], 4294967264  ;;  %p4749_p7 = pmov %p4743_p0 }
 0x128   : > { %p4750_p11 = pmov %p4743_p0 }
 0x129   : > { %3674 = dma.done.wait (%p4749_p7), [#allocation10], 16  }
 0x12a   : > { %3676 = vsyncadd (%p4750_p11), [#allocation10], 4294967280  ;;  %v4705_v0 = vmov 0.0   ;;  %vm3713_vm0 = vmmov 0   ;;  %v3179_v1 = vld [vmem:[#allocation6] sm:$0xff]   ;;  %v3180_v2 = vld [vmem:[#allocation6 + $0x8] sm:$0xff]  }
 0x12b   : > { %2997 = vmatprep.subr.bf16.mxu0 %v4705_v0  ;;  %3013 = vmatprep.mubr.msk.bf16.mxu0 %vm3713_vm0, %v4705_v0  ;;  %v3181_v3 = vld [vmem:[#allocation6 + $0x10] sm:$0xff]   ;;  %v3182_v4 = vld [vmem:[#allocation6 + $0x18] sm:$0xff]   ;;  %v3183_v5 = vld [vmem:[#allocation6 + $0x20] sm:$0xff]   ;;  %vm642_vm1 = vcmask 257024   ;;  %v3714_v10 = vmov 0   ;;  %vm645_vm2 = vcmask 254976  }
 0x12c   : > { %2998 = vmatpush3.bf16.msra.mxu0 %v3179_v1  ;;  %v3184_v6 = vld [vmem:[#allocation6 + $0x28] sm:$0xff]   ;;  %v3185_v7 = vld [vmem:[#allocation6 + $0x30] sm:$0xff]   ;;  %v3186_v8 = vld [vmem:[#allocation6 + $0x38] sm:$0xff]   ;;  %643 = vst.msk [vmem:[#allocation2] sm:$0xf] %vm642_vm1, %v3714_v10  ;;  %vm663_vm3 = vcmask 257026  }
 0x12d   : > { %2999 = vmatprep.subr.bf16.mxu0 %v4705_v0  ;;  %v3187_v9 = vld [vmem:[%s435_s27] sm:$0xff]   ;;  %644 = vst.msk [vmem:[#allocation2 + $0x4] sm:$0xf] %vm642_vm1, %v3714_v10  ;;  %668 = vst.msk [vmem:[#allocation2 + $0x14] sm:$0xf] %vm642_vm1, %v3714_v10  ;;  %s3715_s28 = smov 32  }
 0x12e   : > { %646 = vst.msk [vmem:[#allocation2 + $0x8] sm:$0x3] %vm645_vm2, %v3714_v10  ;;  %vm670_vm4 = vsmask.f32 3328  ;;  %v672_v14 = vld [vmem:[#allocation2 + $0x18] sm:$0xf] }
 0x12f   : > { %667 = vst.msk [vmem:[#allocation2 + $0x10] sm:$0xc] %vm663_vm3, %v3714_v10  ;;  %vm671_vm5 = vmand %vm642_vm1, %vm670_vm4  ;;  %vm692_vm6 = vsmask.f32 7424  ;;  %v3228_v24 = vld [vmem:[#allocation9 + $0xc0] sm:$0xff]   ;;  %v3230_v26 = vld [vmem:[#allocation9 + $0xc8] sm:$0xff]  }
 0x130   : > { %3000 = vmatpush3.bf16.msra.mxu0 %v3180_v2  ;;  %v673_v15 = vsel %vm671_vm5, 0, %v672_v14  ;;  %v3229_v25 = vld [vmem:[#allocation9 + $0x80] sm:$0xff]   ;;  %2876 = vmatprep.subr.bf16.mxu1 %v3228_v24  ;;  %v3231_v29 = vld [vmem:[#allocation9 + $0x88] sm:$0xff]   ;;  %v3232_v31 = vld [vmem:[#allocation9 + $0xd0] sm:$0xff]   ;;  %vm652_vm7 = vcmask 1041408   ;;  %vm653_vm8 = vcmask 1045508  }
 0x131   : > { %3001 = vmatprep.subr.bf16.mxu0 %v4705_v0  ;;  %674 = vst [vmem:[#allocation2 + $0x18] sm:$0xf] %v673_v15  ;;  %v3233_v27 = vld [vmem:[#allocation9 + $0x40] sm:$0xff]   ;;  %2877 = vmatpush3.bf16.msra.mxu1 %v3229_v25  ;;  %v3237_v30 = vld [vmem:[#allocation9 + $0x48] sm:$0xff]   ;;  %v3241_v33 = vld [vmem:[#allocation9 + $0x50] sm:$0xff]   ;;  %vm772_vm10 = vcmask 1044480  }
 0x132   : > { %v3235_v28 = vld [vmem:[#allocation9] sm:$0xff]   ;;  %2878 = vmatprep.subr.bf16.mxu1 %v3230_v26  ;;  %v3239_v32 = vld [vmem:[#allocation9 + $0x8] sm:$0xff]   ;;  %v3234_v34 = vld [vmem:[#allocation9 + $0x90] sm:$0xff]   ;;  %vm749_vm11 = vsmask.f32 5376  ;;  %vm710_vm12 = vcmask 1046528  }
 0x133   : > { %v675_v11 = vld [vmem:[#allocation2] sm:$0xf]  ;;  %v3236_v35 = vld [vmem:[#allocation9 + $0xd8] sm:$0xff]   ;;  %v3240_v38 = vld [vmem:[#allocation9 + $0xe0] sm:$0xff]   ;;  %vm719_vm13 = vsmask.f32 6400 }
 0x134   : > { %3002 = vmatpush3.bf16.msra.mxu0 %v3181_v3  ;;  %v4154_v12 = vld [vmem:[#allocation2 + $0x4] sm:$0xf]  ;;  %v3242_v39 = vld [vmem:[#allocation9 + $0xa0] sm:$0xff]   ;;  %v680_v40 = vld [vmem:[#allocation2] sm:$0xc]  ;;  %s3716_s24 = smov 64  }
 0x135   : > { %3003 = vmatprep.subr.bf16.mxu0 %v4705_v0  ;;  %v4157_v13 = vcombine.low %v675_v11, %v4154_v12  ;;  %v4160_v16 = vld [vmem:[#allocation2 + $0x8] ss:$0 sps:$4 sm:$0x11]   ;;  %2879 = vmatpush3.bf16.msra.mxu1 %v3231_v29  ;;  %v3243_v36 = vld [vmem:[#allocation9 + $0x10] sm:$0xff]   ;;  %v4168_v42 = vcombine.low %v680_v40, %v4154_v12  ;;  %v2688_v43 = vld [vmem:[#allocation8] ss:$0 sm:$0xff] }
 0x136   : > { %v701_v19 = vshll.u32 %v4160_v16, 16  ;;  %2880 = vmatprep.subr.bf16.mxu1 %v3232_v31  ;;  %v3238_v37 = vld [vmem:[#allocation9 + $0x98] sm:$0xff]   ;;  %v682_v41 = vld [vmem:[#allocation2] sm:$0x8]  ;;  %vm654_vm9 = vmor %vm652_vm7, %vm653_vm8  ;;  %vm781_vm14 = vsmask.f32 4352 }
 0x137   : > { %v694_v17 = vshrl.u32 %v4157_v13, 16  ;;  %v696_v18 = vshll.u32 %v4157_v13, 16  ;;  %v4171_v44 = vcombine.low %v682_v41, %v4154_v12  ;;  %v751_v46 = vshrl.u32 %v4168_v42, 16  ;;  %v678_v50 = vld [vmem:[#allocation2] sm:$0xe]  ;;  %v3247_v41 = vld [vmem:[#allocation9 + $0x18] sm:$0xff]  }
 0x138   : > { %3004 = vmatpush3.bf16.msra.mxu0 %v3182_v4  ;;  %v703_v21 = vrot.slane %v701_v19, 1  ;;  %v754_v49 = vshll.u32 %v4168_v42, 16  ;;  %v4180_v58 = vcombine.low %v678_v50, %v4154_v12  ;;  %v4182_v59 = vld [vmem:[#allocation2 + $0x8] ss:$0 sps:$4 sm:$0x33]   ;;  %s3717_s12 = smov 96  }
 0x139   : > { %3005 = vmatprep.subr.bf16.mxu0 %v4705_v0  ;;  %v698_v20 = vrot.slane %v696_v18, 1  ;;  %2881 = vmatpush3.bf16.msra.mxu1 %v3234_v34  ;;  %v783_v52 = vshrl.u32 %v4171_v44, 16  ;;  %v786_v56 = vshll.u32 %v4171_v44, 16  ;;  %v4177_v57 = vrot.slane %v751_v46, 2  ;;  %v4194_v4 = vld [vmem:[#allocation2 + $0x14] sm:$0xf] }
 0x13a   : > { %2882 = vmatprep.subr.bf16.mxu1 %v3236_v35  ;;  %v4184_v62 = vrot.slane %v754_v49, 3  ;;  %v773_v63 = vrot.slane %v4171_v44, 3  ;;  %v4187_v1 = vld [vmem:[#allocation2 + $0x14] ss:$0 sps:$4 sm:$0x11]   ;;  %v724_v10 = vshll.u32 %v4180_v58, 16  ;;  %v4208_v19 = vcombine.low %v4194_v4, %v4194_v4 }
 0x13b   : > { %v699_v22 = vor.u32 %v698_v20, %v694_v17  ;;  %v4190_v2 = vrot.slane %v783_v52, 3  ;;  %v4192_v3 = vld [vmem:[#allocation2 + $0x14] ss:$0 sps:$4 sm:$0x33]   ;;  %v729_v11 = vshrl.u32 %v4182_v59, 16  ;;  %v732_v14 = vshll.u32 %v4182_v59, 16 }
 0x13c   : > { %3006 = vmatpush3.bf16.msra.mxu0 %v3183_v5  ;;  %v1618_v18 = vshll.u32 %v4187_v1, 16  ;;  %v856_v20 = vld [vmem:[#allocation2 + $0x4] sm:$0x8]  ;;  %v1644_v24 = vshrl.u32 %v4192_v3, 16  ;;  %v1647_v25 = vshll.u32 %v4192_v3, 16  ;;  %v3244_v34 = vld [vmem:[#allocation9 + $0xe8] sm:$0xff]  }
 0x13d   : > { %3007 = vmatprep.subr.bf16.mxu0 %v4705_v0  ;;  %v704_v23 = vsel %vm692_vm6, %v699_v22, %v703_v21  ;;  %2883 = vmatpush3.bf16.msra.mxu1 %v3238_v37  ;;  %v852_v21 = vld [vmem:[#allocation2 + $0x4] sm:$0xe]  ;;  %v711_v22 = vrot.slane %v4180_v58, 1  ;;  %v4226_v37 = vrot.slane %v729_v11, 1  ;;  %v1702_v40 = vshrl.u32 %v4208_v19, 16  ;;  %s2855_s4 = sshll.u32 %s3797_s19, 7 }
 0x13e   : > { %705 = vrot.lane.b32.xlu1 %v704_v23, %s3715_s28  ;;  %2884 = vmatprep.subr.bf16.mxu1 %v3240_v38  ;;  %v712_v23 = vrot.slane %v4160_v16, 1  ;;  %v854_v26 = vld [vmem:[#allocation2 + $0x4] sm:$0xc]  ;;  %v4228_v38 = vrot.slane %v732_v14, 2  ;;  %v4237_v46 = vrot.slane %v1647_v25, 2  ;;  %vm742_vm15 = vcmask 1045504  }
 0x13f   : > { %v3245_v35 = vld [vmem:[#allocation9 + $0x58] sm:$0xff]   ;;  %vm2214_vm4 = vcmask 1040384   ;;  %vm2215_vm5 = vsmask.f32 256  ;;  %s511_s29 = scalar_lea.vmem [#allocation17], %s4105_s21  ;;  %s4762_s16 = sld [smem:[#allocation39_spill]] }
 0x140   : > { %3008 = vmatpush3.bf16.msra.mxu0 %v3184_v6  ;;  %vm2216_vm8 = vmand %vm2214_vm4, %vm2215_vm5  ;;  %s2453_s9 = sshll.u32 %s511_s29, 4  ;;  %s518_s23 = scalar_lea.vmem [#allocation18], %s4105_s21  ;;  %s4591_s9 = int_to_ptr.vmem [resolvable:$true] %s2453_s9 }
 0x141   : > { %3009 = vmatprep.subr.bf16.mxu0 %v4705_v0  ;;  %2885 = vmatpush3.bf16.msra.mxu1 %v3242_v39  ;;  %v4230_v39 = vrot.slane %v1618_v18, 1  ;;  %s2469_s30 = sshll.u32 %s518_s23, 4  ;;  %s4764_s15 = sld [smem:[#allocation40_spill]]  ;;  %s4598_s30 = int_to_ptr.vmem [resolvable:$true] %s2469_s30 }
 0x142   : > { %2886 = vmatprep.subr.bf16.mxu1 %v3244_v34  ;;  %s2435_s10 = scalar_lea.sflag [#allocation5], %s4102_s0  ;;  %s3577_s2 = scalar_lea.vmem %s4591_s9, 128 }
 0x143   : > { %p3578_p12 = scmp.ne.s32.totalorder %s4591_s9, %s3577_s2  ;;  %p4766_p2 = scmp.ne.s32.totalorder %s4728_s18, 0 }
 0x144   : > { %3010 = vmatpush3.bf16.msra.mxu0 %v3185_v7  ;;  %v4197_v7 = vrot.slane %v786_v56, 4  ;;  %v3248_v56 = vld [vmem:[#allocation9 + $0xf0] sm:$0xff]  }
 0x145   : > { %3011 = vmatprep.subr.bf16.mxu0 %v4705_v0  ;;  %s4763_s25 = smov %s4762_s16  ;;  %s4586_s3 = scalar_lea.hbm %s4762_s16, %s2855_s4 }
 0x146   : > { %p3579_p1 = pnand %p3578_p12, %p4766_p2 }
 0x147   : > { %s4765_s1 = smov %s4764_s15  ;;  %s4596_s26 = scalar_lea.hbm %s4764_s15, %s2855_s4 }
 0x148   : > { %3012 = vmatpush3.bf16.msra.mxu0 %v3186_v8  ;;  %v4199_v8 = vld [vmem:[#allocation2 + $0x14] ss:$0 sps:$4 sm:$0x77]   ;;  %p3580_p10 = pneg %p3579_p1 }
 0x149   : > { %2898 = vmatprep.subr.bf16.mxu0 %v3233_v27  ;;  %v1628_v27 = vrot.slane %v4187_v1, 1  ;;  %v1672_v29 = vshrl.u32 %v4199_v8, 16 }
 0x14b   : > { %3014 = vmatmul.mubr.bf16.vlgmr.msra.gmra.mrb[0].mxu0 %v3187_v9  ;;  %v721_v9 = vshrl.u32 %v4180_v58, 16 }
 0x14c   : > { %2899 = vmatpush3.bf16.msra.mxu0 %v3235_v28  ;;  %v1686_v28 = vrot.slane %v4199_v8, 3 }
 0x14d   : > { %2900 = vmatprep.subr.bf16.mxu0 %v3237_v30  ;;  %v4219_v30 = vld [vmem:[#allocation2 + $0x18] ss:$0 sps:$4 sm:$0x11]   ;;  %v4221_v31 = vrot.slane %v721_v9, 1 }
 0x150   : > { %2901 = vmatpush3.bf16.msra.mxu0 %v3239_v32  ;;  %v4223_v32 = vrot.slane %v724_v10, 2 }
 0x151   : > { %2902 = vmatprep.subr.bf16.mxu0 %v3241_v33  ;;  %v1675_v33 = vshll.u32 %v4199_v8, 16 }
 0x154   : > { %2903 = vmatpush3.bf16.msra.mxu0 %v3243_v36  ;;  %v3246_v36 = vld [vmem:[#allocation9 + $0xa8] sm:$0xff]  }
 0x155   : > { %2904 = vmatprep.subr.bf16.mxu0 %v3245_v35  ;;  %2887 = vmatpush3.bf16.msra.mxu1 %v3246_v36 }
 0x156   : > { %2888 = vmatprep.subr.bf16.mxu1 %v3248_v56  ;;  %v3249_v56 = vld [vmem:[#allocation9 + $0x60] sm:$0xff]  }
 0x158   : > { %2905 = vmatpush3.bf16.msra.mxu0 %v3247_v41 }
 0x159   : > { %2906 = vmatprep.subr.bf16.mxu0 %v3249_v56 }
 0x21e   : > { %v634_v45 = vpop.f32.mrb[0].mxu0 }
 0x21f   : > { %v635_v47 = vadd.f32 %v2688_v43, %v634_v45  ;;  %v3015_v48 = vpop.f32.mrb[1].mxu0  ;;  %v4235_v45 = vrot.slane %v1644_v24, 1 }
 0x220   : > { %v637_v51 = vpop.f32.mrb[2].mxu0  ;;  %v4242_v48 = vld [vmem:[#allocation2 + $0x8] ss:$0 sps:$4 sm:$0x77]  }
 0x221   : > { %v2849_v53 = vpack.c.bf16 %v635_v47, %v635_v47  ;;  %v638_v54 = vadd.f32 %v2688_v43, %v637_v51  ;;  %v3016_v55 = vpop.f32.mrb[3].mxu0  ;;  %v4249_v51 = vrot.slane %v1672_v29, 2  ;;  %v759_v9 = vshrl.u32 %v4242_v48, 16 }
 0x222   : > { %v1705_v55 = vshll.u32 %v4208_v19, 16  ;;  %v762_v10 = vshll.u32 %v4242_v48, 16 }
 0x223   : > { %v655_v60 = vrot.slane %v2849_v53, 6  ;;  %v2850_v61 = vpack.c.bf16 %v638_v54, %v638_v54  ;;  %v4254_v53 = vrot.slane %v1675_v33, 3  ;;  %v761_v18 = vrot.slane %v759_v9, 2 }
 0x225   : > { %v656_v5 = vrot.slane %v655_v60, 4  ;;  %664 = vst.msk [vmem:[#allocation2 + $0x8] sm:$0xc] %vm663_vm3, %v655_v60  ;;  %v657_v6 = vrot.slane %v2850_v61, 6  ;;  %v757_v61 = vor.u32 %v4184_v62, %v4177_v57  ;;  %v727_v62 = vor.u32 %v4223_v32, %v4221_v31  ;;  %v1904_v31 = vld [vmem:[#allocation2 + $0x10] sm:$0xc] }
 0x226   : > { %vm807_vm3 = vcmask 785408  }
 0x227   : > { %v658_v15 = vsel %vm654_vm9, %v656_v5, %v657_v6  ;;  %v659_v17 = vrot.slane %v657_v6, 4  ;;  %v4262_v5 = vrot.slane %v1702_v40, 3  ;;  %vm2221_vm9 = vcmask 1047552  }
 0x228   : > { %665 = vst.msk [vmem:[#allocation2 + $0xc] sm:$0xf] %vm642_vm1, %v658_v15  ;;  %vm801_vm1 = vcmask 261120  }
 0x229   : > { %666 = vst.msk [vmem:[#allocation2 + $0x10] sm:$0x3] %vm645_vm2, %v659_v17  ;;  %vm804_vm2 = vcmask 523264  }
 0x22c   : > { %v4233_v43 = vld [vmem:[#allocation2 + $0x8] sm:$0xf] }
 0x22d   : > { %v4240_v47 = vcombine.low %v856_v20, %v4233_v43  ;;  %v2710_v49 = vcombine.low %v852_v21, %v4233_v43  ;;  %v4247_v50 = vcombine.low %v4154_v12, %v4233_v43  ;;  %v4252_v52 = vcombine.low %v854_v26, %v4233_v43 }
 0x22e   : > { %v789_v12 = vor.u32 %v4197_v7, %v4190_v2  ;;  %v764_v20 = vrot.slane %v762_v10, 3 }
 0x22f   : > { %v3190_v60 = vld [vmem:[#allocation2 + $0xc] ss:$0 sps:$4 sm:$0x77]   ;;  %v937_v6 = vrot.slane %v4240_v47, 3  ;;  %v863_v11 = vshrl.u32 %v4247_v50, 16  ;;  %v865_v17 = vshll.u32 %v4247_v50, 16 }
 0x230   : > { %v938_v14 = vrot.slane %v3190_v60, 3  ;;  %v3194_v15 = vld [vmem:[#allocation2 + $0xc] ss:$0 sps:$4 sm:$0x11]   ;;  %v888_v57 = vshrl.u32 %v2710_v49, 16  ;;  %v891_v21 = vshll.u32 %v2710_v49, 16  ;;  %v765_v35 = vor.u32 %v764_v20, %v761_v18 }
 0x231   : > { %v916_v24 = vshrl.u32 %v4252_v52, 16  ;;  %v880_v26 = vrot.slane %v3194_v15, 1  ;;  %v867_v29 = vrot.slane %v865_v17, 1  ;;  %v870_v33 = vshll.u32 %v3194_v15, 16  ;;  %v4277_v54 = vld [vmem:[#allocation2 + $0xc] sm:$0xf] }
 0x232   : > { %v939_v25 = vsel %vm772_vm10, %v937_v6, %v938_v14  ;;  %v4273_v34 = vld [vmem:[#allocation2 + $0xc] ss:$0 sps:$4 sm:$0x33]   ;;  %v879_v36 = vrot.slane %v2710_v49, 1  ;;  %v890_v40 = vrot.slane %v888_v57, 1  ;;  %v893_v41 = vrot.slane %v891_v21, 2 }
 0x233   : > { %940 = vrot.lane.b32.xlu1 %v939_v25, %s3716_s24  ;;  %v868_v9 = vor.u32 %v867_v29, %v863_v11  ;;  %v896_v10 = vshrl.u32 %v4273_v34, 16  ;;  %v918_v0 = vrot.slane %v916_v24, 2  ;;  %v735_v6 = vor.u32 %v4228_v38, %v4226_v37  ;;  %v3250_v49 = vld [vmem:[#allocation9 + $0xb0] sm:$0xff]   ;;  %v3251_v24 = vld [vmem:[#allocation9 + $0x20] sm:$0xff]   ;;  %v3252_v29 = vld [vmem:[#allocation9 + $0xf8] sm:$0xff]  }
 0x234   : > { %v766_v14 = vsel %vm749_vm11, %v757_v61, %v765_v35  ;;  %v872_v15 = vrot.slane %v870_v33, 1  ;;  %v899_v17 = vshll.u32 %v4273_v34, 16  ;;  %v919_v18 = vshll.u32 %v4252_v52, 16  ;;  %2889 = vmatpush3.bf16.msra.mxu1 %v3250_v49  ;;  %2907 = vmatpush3.bf16.msra.mxu0 %v3251_v24  ;;  %v3253_v49 = vld [vmem:[#allocation9 + $0x68] sm:$0xff]  }
 0x235   : > { %767 = vrot.lane.b32.xlu0 %v766_v14, %s3715_s28  ;;  %v881_v11 = vsel %vm710_vm12, %v879_v36, %v880_v26  ;;  %v898_v57 = vrot.slane %v896_v10, 1  ;;  %v924_v20 = vshrl.u32 %v3190_v60, 16  ;;  %v927_v21 = vshll.u32 %v3190_v60, 16  ;;  %v4293_v36 = vld [vmem:[#allocation2 + $0x18] ss:$0 sps:$4 sm:$0x33]   ;;  %2890 = vmatprep.subr.bf16.mxu1 %v3252_v29 }
 0x236   : > { %v901_v37 = vrot.slane %v899_v17, 2  ;;  %v921_v38 = vrot.slane %v919_v18, 3  ;;  %v2715_v61 = vcombine.low %v4277_v54, %v4277_v54  ;;  %v946_v25 = vshrl.u32 %v4240_v47, 16  ;;  %v4296_v18 = vld [vmem:[#allocation2 + $0xc] sm:$0xf]  ;;  %2908 = vmatprep.subr.bf16.mxu0 %v3253_v49 }
 0x237   : > { %882 = vrot.lane.b32.xlu1 %v881_v11, %s3716_s24  ;;  %v926_v33 = vrot.slane %v924_v20, 2  ;;  %v929_v35 = vrot.slane %v927_v21, 3  ;;  %v949_v26 = vshll.u32 %v4240_v47, 16  ;;  %v2707_v60 = vcombine.low %v4233_v43, %v4233_v43  ;;  %v4304_v24 = vld [vmem:[#allocation2 + $0x10] ss:$0 sps:$4 sm:$0x11]  }
 0x238   : > { %v873_v56 = vsel %vm692_vm6, %v868_v9, %v872_v15  ;;  %v894_v10 = vor.u32 %v893_v41, %v890_v40  ;;  %v902_v14 = vor.u32 %v901_v37, %v898_v57  ;;  %v954_v17 = vshrl.u32 %v2715_v61, 16  ;;  %v1288_v57 = vld [vmem:[#allocation2 + $0x8] sm:$0xe]  ;;  %v4339_v49 = vld [vmem:[#allocation2 + $0x14] sm:$0xf] }
 0x239   : > { %874 = vrot.lane.b32.xlu0 %v873_v56, %s3715_s28  ;;  %v922_v11 = vor.u32 %v921_v38, %v918_v0  ;;  %v930_v20 = vor.u32 %v929_v35, %v926_v33  ;;  %v713_v47 = vsel %vm710_vm12, %v711_v22, %v712_v23  ;;  %v957_v21 = vshll.u32 %v2715_v61, 16  ;;  %v3254_v37 = vld [vmem:[#allocation9 + $0xb8] sm:$0xff]   ;;  %v4315_v23 = vld [vmem:[#allocation2 + $0x10] sm:$0xf]  ;;  %v3255_v56 = vld [vmem:[#allocation9 + $0x28] sm:$0xff]  }
 0x23a   : > { %v903_v40 = vsel %vm719_vm13, %v894_v10, %v902_v14  ;;  %v948_v41 = vrot.slane %v946_v25, 3  ;;  %v951_v9 = vrot.slane %v949_v26, 4  ;;  %v956_v15 = vrot.slane %v954_v17, 3  ;;  %v1595_v38 = vld [vmem:[#allocation2 + $0xc] sm:$0xe]  ;;  %2891 = vmatpush3.bf16.msra.mxu1 %v3254_v37  ;;  %v3256_v10 = vld [vmem:[#allocation9 + $0x70] sm:$0xff]   ;;  %2909 = vmatpush3.bf16.msra.mxu0 %v3255_v56 }
 0x23b   : > { %904 = vrot.lane.b32.xlu1 %v903_v40, %s3717_s12  ;;  %v959_v0 = vrot.slane %v957_v21, 4  ;;  %v736_v16 = vsel %vm719_vm13, %v727_v62, %v735_v6  ;;  %v4313_v58 = vcombine.low %v1288_v57, %v4296_v18  ;;  %v791_v22 = vshrl.u32 %v2707_v60, 16  ;;  %v1285_v29 = vld [vmem:[#allocation2 + $0x8] sm:$0xf]  ;;  %2910 = vmatprep.subr.bf16.mxu0 %v3256_v10 }
 0x23c   : > { %v931_v61 = vsel %vm749_vm11, %v922_v11, %v930_v20  ;;  %v794_v25 = vshll.u32 %v2707_v60, 16  ;;  %v4322_v35 = vrot.slane %v1705_v55, 4  ;;  %v4326_v62 = vcombine.low %v1285_v29, %v4296_v18  ;;  %v4331_v60 = vld [vmem:[#allocation2 + $0x18] ss:$0 sps:$4 sm:$0x77]   ;;  %v3257_v20 = vld [vmem:[#allocation9 + $0x140] sm:$0xff]  }
 0x23d   : > { %932 = vrot.lane.b32.xlu0 %v931_v61, %s3715_s28  ;;  %v960_v32 = vor.u32 %v959_v0, %v956_v15  ;;  %v952_v19 = vor.u32 %v951_v9, %v948_v41  ;;  %v774_v55 = vrot.slane %v4242_v48, 3  ;;  %v4335_v14 = vcombine.low %v1595_v38, %v4315_v23  ;;  %v4337_v17 = vld [vmem:[#allocation2 + $0x10] ss:$0 sps:$4 sm:$0x77]   ;;  %v3258_v48 = vld [vmem:[#allocation9 + $0x30] sm:$0xff]   ;;  %2920 = vmatprep.subr.bf16.mxu1 %v3257_v20 }
 0x23e   : > { %v1320_v21 = vrot.slane %v4313_v58, 1  ;;  %v1321_v40 = vrot.slane %v4304_v24, 1  ;;  %v793_v15 = vrot.slane %v791_v22, 3  ;;  %v796_v41 = vrot.slane %v794_v25, 4  ;;  %v1292_v61 = vld [vmem:[#allocation2 + $0x8] sm:$0x8]  ;;  %2911 = vmatpush3.bf16.msra.mxu0 %v3258_v48 }
 0x23f   : > { %714 = vrot.lane.b32.xlu1 %v713_v47, %s3716_s24  ;;  %v961_v9 = vsel %vm781_vm14, %v952_v19, %v960_v32  ;;  %v1306_v57 = vshll.u32 %v4326_v62, 16  ;;  %v4347_v37 = vld [vmem:[#allocation2 + $0x10] ss:$0 sps:$4 sm:$0x33]   ;;  %v3260_v47 = vld [vmem:[#allocation9 + $0x78] sm:$0xff]   ;;  %v4354_v22 = vcombine.low %v1904_v31, %v4339_v49  ;;  %v775_v56 = vsel %vm772_vm10, %v773_v63, %v774_v55 }
 0x240   : > { %v1627_v10 = vrot.slane %v4335_v14, 1  ;;  %v4364_v19 = vcombine.low %v1292_v61, %v4296_v18  ;;  %v1599_v31 = vld [vmem:[#allocation2 + $0xc] sm:$0x8]  ;;  %v1290_v0 = vld [vmem:[#allocation2 + $0x8] sm:$0xc]  ;;  %v1322_v6 = vsel %vm710_vm12, %v1320_v21, %v1321_v40  ;;  %v797_v20 = vor.u32 %v796_v41, %v793_v15  ;;  %2912 = vmatprep.subr.bf16.mxu0 %v3260_v47 }
 0x241   : > { %962 = vrot.lane.b32.xlu0 %v961_v9, %s3717_s12  ;;  %v1379_v9 = vrot.slane %v4337_v17, 3  ;;  %v1304_v11 = vshrl.u32 %v4326_v62, 16  ;;  %v4371_v44 = vcombine.low %v1290_v0, %v4296_v18  ;;  %v1592_v63 = vld [vmem:[#allocation2 + $0xc] sm:$0xf]  ;;  %v4373_v55 = vld [vmem:[#allocation2 + $0x10] sm:$0xf] }
 0x242   : > { %v3262_v61 = vld [vmem:[#allocation9 + $0x38] sm:$0xff]   ;;  %v1308_v26 = vrot.slane %v1306_v57, 1  ;;  %v1329_v38 = vshrl.u32 %v4313_v58, 16  ;;  %v1332_v33 = vshll.u32 %v4313_v58, 16  ;;  %v3265_v21 = vld [vmem:[#allocation9 + $0x1c0] sm:$0xff]   ;;  %v1311_v62 = vshll.u32 %v4304_v24, 16 }
 0x243   : > { %737 = vrot.lane.b32.xlu1 %v736_v16, %s3717_s12  ;;  %v1337_v16 = vshrl.u32 %v4347_v37, 16  ;;  %v1340_v40 = vshll.u32 %v4347_v37, 16  ;;  %v1357_v15 = vshrl.u32 %v4371_v44, 16  ;;  %v1360_v41 = vshll.u32 %v4371_v44, 16  ;;  %2913 = vmatpush3.bf16.msra.mxu0 %v3262_v61  ;;  %v1597_v32 = vld [vmem:[#allocation2 + $0xc] sm:$0xc] }
 0x244   : > { %v1629_v48 = vsel %vm710_vm12, %v1627_v10, %v1628_v27  ;;  %v1365_v58 = vshrl.u32 %v4337_v17, 16  ;;  %v1368_v57 = vshll.u32 %v4337_v17, 16  ;;  %v2774_v0 = vcombine.low %v1592_v63, %v4315_v23  ;;  %2942 = vmatprep.subr.bf16.mxu0 %v3265_v21 }
 0x245   : > { %776 = vrot.lane.b32.xlu0 %v775_v56, %s3716_s24  ;;  %v798_v24 = vsel %vm781_vm14, %v789_v12, %v797_v20  ;;  %v1378_v47 = vrot.slane %v4364_v19, 3  ;;  %v4396_v56 = vcombine.low %v1599_v31, %v4315_v23  ;;  %v2756_v1 = vcombine.low %v4373_v55, %v4373_v55 }
 0x246   : > { %v1309_v27 = vor.u32 %v1308_v26, %v1304_v11  ;;  %v1331_v17 = vrot.slane %v1329_v38, 1  ;;  %v1334_v10 = vrot.slane %v1332_v33, 2  ;;  %v1339_v63 = vrot.slane %v1337_v16, 1 }
 0x247   : > { %1323 = vrot.lane.b32.xlu1 %v1322_v6, %s3716_s24  ;;  %v1342_v2 = vrot.slane %v1340_v40, 2  ;;  %v1359_v7 = vrot.slane %v1357_v15, 2  ;;  %v1362_v12 = vrot.slane %v1360_v41, 3  ;;  %v1613_v6 = vshll.u32 %v2774_v0, 16 }
 0x248   : > { %v1313_v20 = vrot.slane %v1311_v62, 1  ;;  %v1367_v29 = vrot.slane %v1365_v58, 2  ;;  %v1370_v31 = vrot.slane %v1368_v57, 3  ;;  %v1387_v25 = vshrl.u32 %v4364_v19, 16 }
 0x249   : > { %799 = vrot.lane.b32.xlu0 %v798_v24, %s3717_s12  ;;  %v1390_v26 = vshll.u32 %v4364_v19, 16  ;;  %v1395_v11 = vshrl.u32 %v2756_v1, 16  ;;  %v1398_v33 = vshll.u32 %v2756_v1, 16  ;;  %v4405_v38 = vcombine.low %v1597_v32, %v4315_v23  ;;  %v1906_v19 = vld [vmem:[#allocation2 + $0x10] sm:$0x8] }
 0x24a   : > { %v1380_v61 = vsel %vm772_vm10, %v1378_v47, %v1379_v9  ;;  %v1314_v16 = vsel %vm692_vm6, %v1309_v27, %v1313_v20  ;;  %v1685_v21 = vrot.slane %v4396_v56, 3  ;;  %v1335_v62 = vor.u32 %v1334_v10, %v1331_v17  ;;  %v1899_v17 = vld [vmem:[#allocation2 + $0x10] sm:$0xf] }
 0x24b   : > { %1630 = vrot.lane.b32.xlu1 %v1629_v48, %s3716_s24  ;;  %v1343_v40 = vor.u32 %v1342_v2, %v1339_v63  ;;  %v1363_v15 = vor.u32 %v1362_v12, %v1359_v7  ;;  %v1611_v41 = vshrl.u32 %v2774_v0, 16  ;;  %v1615_v48 = vrot.slane %v1613_v6, 1  ;;  %v1902_v20 = vld [vmem:[#allocation2 + $0x10] sm:$0xe] }
 0x24c   : > { %v1371_v58 = vor.u32 %v1370_v31, %v1367_v29  ;;  %v1389_v57 = vrot.slane %v1387_v25, 3  ;;  %v1636_v32 = vshrl.u32 %v4335_v14, 16  ;;  %v1639_v24 = vshll.u32 %v4335_v14, 16 }
 0x24d   : > { %1381 = vrot.lane.b32.xlu0 %v1380_v61, %s3716_s24  ;;  %v1392_v9 = vrot.slane %v1390_v26, 4  ;;  %v1397_v47 = vrot.slane %v1395_v11, 3  ;;  %v1400_v1 = vrot.slane %v1398_v33, 4  ;;  %v1664_v27 = vshrl.u32 %v4405_v38, 16 }
 0x24e   : > { %v1687_v0 = vsel %vm772_vm10, %v1685_v21, %v1686_v28  ;;  %v1667_v10 = vshll.u32 %v4405_v38, 16  ;;  %v1971_v25 = vshrl.u32 %v4354_v22, 16  ;;  %v4421_v29 = vcombine.low %v1906_v19, %v4339_v49 }
 0x24f   : > { %1315 = vrot.lane.b32.xlu1 %v1314_v16, %s3715_s28  ;;  %v1344_v14 = vsel %vm719_vm13, %v1335_v62, %v1343_v40  ;;  %v1616_v63 = vor.u32 %v1615_v48, %v1611_v41  ;;  %v1974_v2 = vshll.u32 %v4354_v22, 16  ;;  %v4751_v7 = vshrl.u32 %v4331_v60, 16 }
 0x250   : > { %v1372_v8 = vsel %vm749_vm11, %v1363_v15, %v1371_v58  ;;  %v1638_v28 = vrot.slane %v1636_v32, 1  ;;  %v1641_v6 = vrot.slane %v1639_v24, 2  ;;  %v2799_v31 = vcombine.low %v1899_v17, %v4339_v49 }
 0x251   : > { %1688 = vrot.lane.b32.xlu0 %v1687_v0, %s3716_s24  ;;  %v4428_v12 = vrot.slane %v4751_v7, 2  ;;  %v1393_v26 = vor.u32 %v1392_v9, %v1389_v57  ;;  %v1401_v11 = vor.u32 %v1400_v1, %v1397_v47  ;;  %v1666_v33 = vrot.slane %v1664_v27, 2  ;;  %v3227_v0 = vld [vmem:[#allocation2 + $0x18] ss:$0 sps:$4 sm:$0xff]  }
 0x252   : > { %v1694_v61 = vshrl.u32 %v4396_v56, 16  ;;  %v1669_v16 = vrot.slane %v1667_v10, 3  ;;  %v1697_v21 = vshll.u32 %v4396_v56, 16  ;;  %v909_v62 = vrot.slane %v4252_v52, 2 }
 0x253   : > { %1345 = vrot.lane.b32.xlu1 %v1344_v14, %s3717_s12  ;;  %v910_v40 = vrot.slane %v4273_v34, 2  ;;  %v1621_v15 = vsel %vm692_vm6, %v1616_v63, %v4230_v39  ;;  %v2801_v41 = vcombine.low %v1902_v20, %v4339_v49  ;;  %v2748_v48 = vcombine.low %v4233_v43, %v4277_v54 }
 0x254   : > { %v1350_v19 = vrot.slane %v4371_v44, 2  ;;  %v1642_v58 = vor.u32 %v1641_v6, %v1638_v28  ;;  %v1920_v57 = vshll.u32 %v2799_v31, 16  ;;  %v1351_v52 = vrot.slane %v4347_v37, 2 }
 0x255   : > { %1373 = vrot.lane.b32.xlu0 %v1372_v8, %s3715_s28  ;;  %v4445_v56 = vsel %vm742_vm15, %v909_v62, %v910_v40  ;;  %v1402_v34 = vsel %vm781_vm14, %v1393_v26, %v1401_v11  ;;  %v4752_v39 = vshll.u32 %v4331_v60, 16  ;;  %v2773_v49 = vcombine.low %v4296_v18, %v4373_v55  ;;  %v3302_v18 = vld [vmem:[#allocation9 + $0x258] sm:$0xff]  }
 0x256   : > { %v1657_v24 = vrot.slane %v4405_v38, 2  ;;  %v1670_v44 = vor.u32 %v1669_v16, %v1666_v33  ;;  %v1696_v9 = vrot.slane %v1694_v61, 3  ;;  %v1699_v47 = vrot.slane %v1697_v21, 4 }
 0x257   : > { %1622 = vrot.lane.b32.xlu1 %v1621_v15, %s3715_s28  ;;  %v1984_v32 = vrot.slane %v4752_v39, 3  ;;  %v4456_v1 = vsel %vm742_vm15, %v1350_v19, %v1351_v52  ;;  %v1934_v37 = vrot.slane %v2801_v41, 1  ;;  %v1973_v27 = vrot.slane %v1971_v25, 2 }
 0x258   : > { %v1976_v17 = vrot.slane %v1974_v2, 3  ;;  %v4753_v10 = vrot.slane %v4192_v3, 2  ;;  %v4754_v38 = vor.u32 %v4237_v46, %v4235_v45  ;;  %v1922_v7 = vrot.slane %v1920_v57, 1 }
 0x259   : > { %1403 = vrot.lane.b32.xlu0 %v1402_v34, %s3717_s12  ;;  %v1943_v8 = vshrl.u32 %v2801_v41, 16  ;;  %v1946_v28 = vshll.u32 %v2801_v41, 16  ;;  %v4755_v6 = vshll.u32 %v4219_v30, 16  ;;  %v4756_v2 = vshrl.u32 %v4293_v36, 16 }
 0x25a   : > { %v4462_v14 = vsel %vm742_vm15, %v1657_v24, %v4753_v10  ;;  %v1651_v63 = vsel %vm719_vm13, %v1642_v58, %v4754_v38  ;;  %v4757_v3 = vshll.u32 %v4293_v36, 16  ;;  %v2001_v11 = vshrl.u32 %v4421_v29, 16 }
 0x25b   : > { %1652 = vrot.lane.b32.xlu1 %v1651_v63, %s3717_s12  ;;  %v1927_v25 = vrot.slane %v4755_v6, 1  ;;  %v1953_v20 = vrot.slane %v4756_v2, 1  ;;  %v4758_v45 = vor.u32 %v4254_v53, %v4249_v51  ;;  %v1700_v33 = vor.u32 %v1699_v47, %v1696_v9 }
 0x25c   : > { %v1956_v26 = vrot.slane %v4757_v3, 2  ;;  %v1918_v61 = vshrl.u32 %v2799_v31, 16  ;;  %v2004_v16 = vshll.u32 %v4421_v29, 16  ;;  %v1977_v21 = vor.u32 %v1976_v17, %v1973_v27  ;;  %v706_v27 = vpop.permute.xlu1 %705 }
 0x25d   : > { %v1679_v46 = vsel %vm749_vm11, %v1670_v44, %v4758_v45  ;;  %v1985_v62 = vor.u32 %v1984_v32, %v4428_v12  ;;  %v2009_v40 = vshrl.u32 %v3227_v0, 16  ;;  %v2012_v15 = vshll.u32 %v3227_v0, 16 }
 0x25e   : > { %1680 = vrot.lane.b32.xlu0 %v1679_v46, %s3715_s28  ;;  %v4759_v41 = vrot.slane %v4219_v30, 1  ;;  %v1923_v58 = vor.u32 %v1922_v7, %v1918_v61  ;;  %v1945_v57 = vrot.slane %v1943_v8, 1  ;;  %v1948_v51 = vrot.slane %v1946_v28, 2 }
 0x25f   : > { %v4760_v53 = vor.u32 %v4322_v35, %v4262_v5  ;;  %v1957_v52 = vor.u32 %v1956_v26, %v1953_v20  ;;  %v1993_v34 = vrot.slane %v4331_v60, 3  ;;  %v1992_v12 = vrot.slane %v4421_v29, 3 }
 0x260   : > { %v1936_v19 = vsel %vm710_vm12, %v1934_v37, %v4759_v41  ;;  %v2003_v30 = vrot.slane %v2001_v11, 3  ;;  %v2006_v39 = vrot.slane %v2004_v16, 4  ;;  %v2011_v32 = vrot.slane %v2009_v40, 3  ;;  %v3259_v11 = vld [vmem:[#allocation9 + $0x100] sm:$0xff]   ;;  %v3263_v16 = vld [vmem:[#allocation9 + $0x108] sm:$0xff]   ;;  %v3266_v41 = vld [vmem:[#allocation9 + $0x110] sm:$0xff]  }
 0x261   : > { %1937 = vrot.lane.b32.xlu1 %v1936_v19, %s3716_s24  ;;  %v1709_v31 = vsel %vm781_vm14, %v1700_v33, %v4760_v53  ;;  %v1928_v24 = vsel %vm692_vm6, %v1923_v58, %v1927_v25  ;;  %v1949_v44 = vor.u32 %v1948_v51, %v1945_v57  ;;  %v1986_v9 = vsel %vm749_vm11, %v1977_v21, %v1985_v62  ;;  %v3267_v19 = vld [vmem:[#allocation9 + $0x180] sm:$0xff]   ;;  %v3268_v51 = vld [vmem:[#allocation9 + $0x158] sm:$0xff]   ;;  %v3269_v53 = vld [vmem:[#allocation9 + $0x1c8] sm:$0xff]  }
 0x262   : > { %1710 = vrot.lane.b32.xlu0 %v1709_v31, %s3717_s12  ;;  %v2014_v47 = vrot.slane %v2012_v15, 4  ;;  %v1994_v35 = vsel %vm772_vm10, %v1992_v12, %v1993_v34  ;;  %v2007_v60 = vor.u32 %v2006_v39, %v2003_v30  ;;  %v743_v2 = vrot.slane %v4168_v42, 2  ;;  %v3264_v42 = vld [vmem:[#allocation9 + $0x150] sm:$0xff]   ;;  %v3271_v34 = vld [vmem:[#allocation9 + $0x118] sm:$0xff]   ;;  %v3272_v12 = vld [vmem:[#allocation9 + $0x188] sm:$0xff]  }
 0x263   : > { %v1958_v5 = vsel %vm719_vm13, %v1949_v44, %v1957_v52  ;;  %v744_v20 = vrot.slane %v4182_v59, 2  ;;  %v803_v62 = vsel %vm801_vm1, %v4157_v13, %v706_v27  ;;  %v3273_v30 = vld [vmem:[#allocation9 + $0x160] sm:$0xff]   ;;  %v3274_v39 = vld [vmem:[#allocation9 + $0x1d0] sm:$0xff]   ;;  %v2798_v54 = vcombine.low %v4315_v23, %v4194_v4  ;;  %vm2222_vm10 = vmand %vm2221_vm9, %vm692_vm6 }
 0x264   : > { %v2015_v37 = vor.u32 %v2014_v47, %v2011_v32  ;;  %v3275_v44 = vld [vmem:[#allocation9 + $0x120] sm:$0xff]   ;;  %v3277_v47 = vld [vmem:[#allocation9 + $0x168] sm:$0xff]   ;;  %v3299_v4 = vld [vmem:[#allocation9 + $0x250] sm:$0xff]   ;;  %vm2352_vm11 = vcmask 31744  }
 0x265   : > { %1929 = vrot.lane.b32.xlu1 %v1928_v24, %s3715_s28 }
 0x266   : > { %1987 = vrot.lane.b32.xlu0 %v1986_v9, %s3715_s28  ;;  %v2016_v29 = vsel %vm781_vm14, %v2007_v60, %v2015_v37  ;;  %v3276_v9 = vld [vmem:[#allocation9 + $0x190] sm:$0xff]   ;;  %v3280_v37 = vld [vmem:[#allocation9 + $0x128] sm:$0xff]  }
 0x269   : > { %1959 = vrot.lane.b32.xlu1 %v1958_v5, %s3717_s12  ;;  %v3278_v5 = vld [vmem:[#allocation9 + $0x1d8] sm:$0xff]  }
 0x26a   : > { %1995 = vrot.lane.b32.xlu0 %v1994_v35, %s3716_s24 }
 0x26e   : > { %2017 = vrot.lane.b32.xlu0 %v2016_v29, %s3717_s12  ;;  %v3281_v29 = vld [vmem:[#allocation9 + $0x198] sm:$0xff]  }
 0x2a5   : > { %v941_v17 = vpop.permute.xlu1 %940 }
 0x2a7   : > { %v768_v0 = vpop.permute.xlu0 %767 }
 0x2a9   : > { %v883_v10 = vpop.permute.xlu1 %882 }
 0x2ab   : > { %v875_v38 = vpop.permute.xlu0 %874 }
 0x2ac   : > { %v965_v7 = vsel %vm801_vm1, %v4247_v50, %v875_v38  ;;  %v3261_v50 = vld [vmem:[#allocation9 + $0x148] sm:$0xff]  }
 0x2ad   : > { %v905_v63 = vpop.permute.xlu1 %904  ;;  %v967_v25 = vsel %vm804_vm2, %v965_v7, %v883_v10  ;;  %v3284_v7 = vld [vmem:[#allocation9 + $0x130] sm:$0xff]  }
 0x2ae   : > { %v969_v33 = vsel %vm807_vm3, %v967_v25, %v905_v63  ;;  %v3287_v25 = vld [vmem:[#allocation9 + $0x1e8] sm:$0xff]  }
 0x2af   : > { %v933_v8 = vpop.permute.xlu0 %932 }
 0x2b0   : > { %v973_v28 = vsel %vm801_vm1, %v4445_v56, %v933_v8  ;;  %v745_v56 = vsel %vm742_vm15, %v743_v2, %v744_v20  ;;  %v3285_v8 = vld [vmem:[#allocation9 + $0x1a0] sm:$0xff]   ;;  %v3288_v20 = vld [vmem:[#allocation9 + $0x138] sm:$0xff]  }
 0x2b1   : > { %v715_v6 = vpop.permute.xlu1 %714  ;;  %v975_v26 = vsel %vm804_vm2, %v973_v28, %v941_v17  ;;  %v813_v21 = vsel %vm801_vm1, %v745_v56, %v768_v0  ;;  %v3282_v17 = vld [vmem:[#allocation9 + $0x170] sm:$0xff]   ;;  %v3283_v0 = vld [vmem:[#allocation9 + $0x1e0] sm:$0xff]  }
 0x2b2   : > { %v806_v58 = vsel %vm804_vm2, %v803_v62, %v715_v6  ;;  %v3286_v6 = vld [vmem:[#allocation9 + $0x178] sm:$0xff]   ;;  %v3296_v62 = vld [vmem:[#allocation9 + $0x248] sm:$0xff]  }
 0x2b3   : > { %v963_v3 = vpop.permute.xlu0 %962 }
 0x2b4   : > { %v977_v45 = vsel %vm807_vm3, %v975_v26, %v963_v3  ;;  %v3289_v3 = vld [vmem:[#allocation9 + $0x1a8] sm:$0xff]  }
 0x2b5   : > { %1139 = vmatprep.mubr.bf16.mxu1 %v977_v45  ;;  %v738_v46 = vpop.permute.xlu1 %737  ;;  %v3291_v45 = vld [vmem:[#allocation9 + $0x240] sm:$0xff]  }
 0x2b6   : > { %1140 = vmatmul.mubr.bf16.vlgmr.msra.gmra.mrb[0].mxu1 %v969_v33  ;;  %v809_v31 = vsel %vm807_vm3, %v806_v58, %v738_v46 }
 0x2b7   : > { %2921 = vmatpush3.bf16.msra.mxu1 %v3259_v11  ;;  %v777_v61 = vpop.permute.xlu0 %776  ;;  %v3290_v11 = vld [vmem:[#allocation9 + $0x1f0] sm:$0xff]  }
 0x2b8   : > { %2922 = vmatprep.subr.bf16.mxu1 %v3261_v50  ;;  %v815_v40 = vsel %vm804_vm2, %v813_v21, %v777_v61  ;;  %v3293_v61 = vld [vmem:[#allocation9 + $0x1b0] sm:$0xff]  }
 0x2b9   : > { %v4515_v59 = vpop.permute.xlu1 %1323 }
 0x2bb   : > { %2923 = vmatpush3.bf16.msra.mxu1 %v3263_v16  ;;  %v800_v15 = vpop.permute.xlu0 %799  ;;  %v3294_v16 = vld [vmem:[#allocation9 + $0x200] sm:$0xff]  }
 0x2bc   : > { %v817_v57 = vsel %vm807_vm3, %v815_v40, %v800_v15  ;;  %2924 = vmatprep.subr.bf16.mxu1 %v3264_v42  ;;  %v1964_v42 = vrot.slane %v4354_v22, 2 }
 0x2bd   : > { %1276 = vmatprep.mubr.bf16.mxu0 %v817_v57  ;;  %v4524_v52 = vpop.permute.xlu1 %1630 }
 0x2be   : > { %1277 = vmatmul.mubr.bf16.vlgmr.msra.gmra.mrb[4].mxu0 %v809_v31  ;;  %v3300_v31 = vld [vmem:[#allocation9 + $0x210] sm:$0xff]  }
 0x2bf   : > { %2925 = vmatpush3.bf16.msra.mxu1 %v3266_v41  ;;  %2943 = vmatpush3.bf16.msra.mxu0 %v3267_v19  ;;  %v1382_v13 = vpop.permute.xlu0 %1381  ;;  %v3298_v41 = vld [vmem:[#allocation9 + $0x208] sm:$0xff]  }
 0x2c0   : > { %2926 = vmatprep.subr.bf16.mxu1 %v3268_v51  ;;  %2944 = vmatprep.subr.bf16.mxu0 %v3269_v53 }
 0x2c1   : > { %v1316_v32 = vpop.permute.xlu1 %1315 }
 0x2c2   : > { %v1407_v50 = vsel %vm801_vm1, %v2748_v48, %v1316_v32  ;;  %v3295_v48 = vld [vmem:[#allocation9 + $0x1f8] sm:$0xff]   ;;  %v3304_v32 = vld [vmem:[#allocation11 + $0x8] sm:$0xff]  }
 0x2c3   : > { %2927 = vmatpush3.bf16.msra.mxu1 %v3271_v34  ;;  %2945 = vmatpush3.bf16.msra.mxu0 %v3272_v12  ;;  %v1689_v24 = vpop.permute.xlu0 %1688  ;;  %v1409_v21 = vsel %vm804_vm2, %v1407_v50, %v4515_v59  ;;  %v3297_v59 = vld [vmem:[#allocation9 + $0x1b8] sm:$0xff]  }
 0x2c4   : > { %2928 = vmatprep.subr.bf16.mxu1 %v3273_v30  ;;  %2946 = vmatprep.subr.bf16.mxu0 %v3274_v39  ;;  %v4761_v30 = vmov 0.0   ;;  %v3303_v39 = vld [vmem:[#allocation9 + $0x218] sm:$0xff]  }
 0x2c5   : > { %v1346_v35 = vpop.permute.xlu1 %1345 }
 0x2c6   : > { %v1411_v40 = vsel %vm807_vm3, %v1409_v21, %v1346_v35  ;;  %v3309_v35 = vld [vmem:[#allocation9 + $0x228] sm:$0xff]  }
 0x2c7   : > { %2929 = vmatpush3.bf16.msra.mxu1 %v3275_v44  ;;  %2947 = vmatpush3.bf16.msra.mxu0 %v3276_v9  ;;  %v1374_v60 = vpop.permute.xlu0 %1373  ;;  %v3305_v44 = vld [vmem:[#allocation9 + $0x260] sm:$0xff]  }
 0x2c8   : > { %v1415_v27 = vsel %vm801_vm1, %v4456_v1, %v1374_v60  ;;  %2930 = vmatprep.subr.bf16.mxu1 %v3277_v47  ;;  %2948 = vmatprep.subr.bf16.mxu0 %v3278_v5  ;;  %v3306_v9 = vld [vmem:[#allocation9 + $0x220] sm:$0xff]   ;;  %v3307_v47 = vld [vmem:[#allocation11 + $0x10] sm:$0xff]   ;;  %v3308_v5 = vld [vmem:[#allocation9 + $0x268] sm:$0xff]  }
 0x2c9   : > { %v1623_v10 = vpop.permute.xlu1 %1622  ;;  %v1417_v63 = vsel %vm804_vm2, %v1415_v27, %v1382_v13  ;;  %v3301_v13 = vld [vmem:[#allocation11] sm:$0xff]   ;;  %v3310_v60 = vld [vmem:[#allocation11 + $0x18] sm:$0xff]   ;;  %v3311_v27 = vld [vmem:[#allocation9 + $0x270] sm:$0xff]  }
 0x2ca   : > { %v1714_v23 = vsel %vm801_vm1, %v2773_v49, %v1623_v10 }
 0x2cb   : > { %2931 = vmatpush3.bf16.msra.mxu1 %v3280_v37  ;;  %2949 = vmatpush3.bf16.msra.mxu0 %v3281_v29  ;;  %v1404_v38 = vpop.permute.xlu0 %1403  ;;  %v1716_v12 = vsel %vm804_vm2, %v1714_v23, %v4524_v52  ;;  %v3320_v37 = vld [vmem:[%s435_s27] sm:$0xff]   ;;  %s3718_s27 = smov [#allocation17]  }
 0x2cc   : > { %2932 = vmatprep.subr.bf16.mxu1 %v3282_v17  ;;  %v1419_v28 = vsel %vm807_vm3, %v1417_v63, %v1404_v38  ;;  %2950 = vmatprep.subr.bf16.mxu0 %v3283_v0  ;;  %v2207_v29 = vshrl.u32 %v3320_v37, 16  ;;  %v3312_v17 = vld [vmem:[#allocation9 + $0x230] sm:$0xff]   ;;  %v3313_v0 = vld [vmem:[#allocation11 + $0x20] sm:$0xff]   ;;  %v2210_v38 = vshll.u32 %v3320_v37, 16  ;;  %v3314_v63 = vld [vmem:[#allocation9 + $0x278] sm:$0xff]  }
 0x2cd   : > { %1581 = vmatprep.mubr.bf16.mxu1 %v1419_v28  ;;  %v1653_v1 = vpop.permute.xlu1 %1652 }
 0x2ce   : > { %v1718_v55 = vsel %vm807_vm3, %v1716_v12, %v1653_v1  ;;  %v2209_v10 = vrot.slane %v2207_v29, 7  ;;  %v3317_v1 = vld [vmem:[#allocation11 + $0x30] sm:$0xff]  }
 0x2cf   : > { %2933 = vmatpush3.bf16.msra.mxu1 %v3284_v7  ;;  %2951 = vmatpush3.bf16.msra.mxu0 %v3285_v8  ;;  %v3315_v7 = vld [vmem:[#allocation9 + $0x238] sm:$0xff]   ;;  %v3316_v8 = vld [vmem:[#allocation11 + $0x28] sm:$0xff]  }
 0x2d0   : > { %v1681_v2 = vpop.permute.xlu0 %1680  ;;  %2934 = vmatprep.subr.bf16.mxu1 %v3286_v6  ;;  %2952 = vmatprep.subr.bf16.mxu0 %v3287_v25  ;;  %v2212_v28 = vor.u32 %v2210_v38, %v2209_v10  ;;  %v2218_v6 = vrot.slane %v2210_v38, 1  ;;  %v2346_v25 = vld [vmem:[#allocation15] sm:$0x3] }
 0x2d1   : > { %v1722_v26 = vsel %vm801_vm1, %v4462_v14, %v1681_v2  ;;  %v1965_v14 = vrot.slane %v4293_v36, 2 }
 0x2d2   : > { %v1724_v56 = vsel %vm804_vm2, %v1722_v26, %v1689_v24  ;;  %v2217_v2 = vsel %vm2216_vm8, 4286644096, %v2212_v28  ;;  %v2834_v28 = vld [vmem:[#allocation16] ss:$0 sm:$0xff] }
 0x2d3   : > { %v1938_v46 = vpop.permute.xlu1 %1937  ;;  %2935 = vmatpush3.bf16.msra.mxu1 %v3288_v20  ;;  %2953 = vmatpush3.bf16.msra.mxu0 %v3289_v3  ;;  %v1966_v19 = vsel %vm742_vm15, %v1964_v42, %v1965_v14  ;;  %v2219_v20 = vor.u32 %v2218_v6, %v2207_v29  ;;  %v2358_v3 = vsel %vm652_vm7, %v2346_v25, 0  ;;  %v2224_v26 = vmax.bf16 %v3320_v37, %v2217_v2 }
 0x2d4   : > { %v1711_v33 = vpop.permute.xlu0 %1710  ;;  %2954 = vmatprep.subr.bf16.mxu0 %v3290_v11  ;;  %2964 = vmatprep.subr.bf16.mxu1 %v3291_v45  ;;  %v3318_v11 = vld [vmem:[#allocation11 + $0x38] sm:$0xff]  }
 0x2d5   : > { %v1726_v43 = vsel %vm807_vm3, %v1724_v56, %v1711_v33  ;;  %v2223_v45 = vsel %vm2222_vm10, %v2219_v20, 4286644096 }
 0x2d6   : > { %1888 = vmatprep.mubr.bf16.mxu0 %v1726_v43  ;;  %1582 = vmatmul.mubr.bf16.vlgmr.msra.gmra.mrb[4].mxu1 %v1411_v40  ;;  %v2225_v50 = vmax.bf16 %v2224_v26, %v2223_v45 }
 0x2d7   : > { %v1930_v15 = vpop.permute.xlu1 %1929  ;;  %2955 = vmatpush3.bf16.msra.mxu0 %v3293_v61  ;;  %2965 = vmatpush3.bf16.msra.mxu1 %v3294_v16 }
 0x2d8   : > { %v2021_v22 = vsel %vm801_vm1, %v2798_v54, %v1930_v15  ;;  %v1988_v58 = vpop.permute.xlu0 %1987  ;;  %2956 = vmatprep.subr.bf16.mxu0 %v3295_v48  ;;  %2966 = vmatprep.subr.bf16.mxu1 %v3296_v62 }
 0x2d9   : > { %v2023_v36 = vsel %vm804_vm2, %v2021_v22, %v1938_v46  ;;  %v2029_v53 = vsel %vm801_vm1, %v1966_v19, %v1988_v58  ;;  %v3319_v46 = vld [vmem:[%s464_s20] sm:$0xff]   ;;  %s3581_s20 = sshll.u32 %s3718_s27, 4  ;;  %s3582_s20 = int_to_ptr.vmem [resolvable:$false] %s3581_s20 }
 0x2da   : > { %s3583_s28 = scalar_lea.vmem %s3582_s20, 256  ;;  %p3584_p13 = scmp.lt.s32.totalorder %s4591_s9, %s3582_s20 }
 0x2db   : > { %v1960_v57 = vpop.permute.xlu1 %1959  ;;  %2957 = vmatpush3.bf16.msra.mxu0 %v3297_v59  ;;  %2967 = vmatpush3.bf16.msra.mxu1 %v3298_v41  ;;  %p3585_p3 = scmp.lt.s32.totalorder %s3583_s28, %s3577_s2 }
 0x2dc   : > { %v4553_v51 = vsel %vm807_vm3, %v2023_v36, %v1960_v57  ;;  %v1996_v34 = vpop.permute.xlu0 %1995  ;;  %2968 = vmatprep.subr.bf16.mxu1 %v3299_v4  ;;  %3017 = vmatprep.subr.bf16.mxu0 %v4761_v30 }
 0x2dd   : > { %v2031_v49 = vsel %vm804_vm2, %v2029_v53, %v1996_v34  ;;  %p3586_p0 = por %p3585_p3, %p3584_p13 }
 0x2de   : > { %1889 = vmatmul.mubr.bf16.vlgmr.msra.gmra.mrb[8].mxu0 %v1718_v55 }
 0x2df   : > { %2969 = vmatpush3.bf16.msra.mxu1 %v3300_v31  ;;  %3018 = vmatpush3.bf16.msra.mxu0 %v3301_v13  ;;  %p3587_p5 = pnand %p3586_p0, %p3580_p10 }
 0x2e0   : > { %v2018_v24 = vpop.permute.xlu0 %2017  ;;  %2970 = vmatprep.subr.bf16.mxu1 %v3302_v18  ;;  %3019 = vmatprep.subr.bf16.mxu0 %v4761_v30 }
 0x2e1   : > { %v2033_v52 = vsel %vm807_vm3, %v2031_v49, %v2018_v24  ;;  %3033 = vmatprep.mubr.msk.bf16.mxu0 %vm3713_vm0, %v4761_v30 }
 0x2e2   : > { %2195 = vmatprep.mubr.bf16.mxu1 %v2033_v52 }
 0x2e3   : > { %2971 = vmatpush3.bf16.msra.mxu1 %v3303_v39  ;;  %3020 = vmatpush3.bf16.msra.mxu0 %v3304_v32 }
 0x2e4   : > { %2972 = vmatprep.subr.bf16.mxu1 %v3305_v44  ;;  %3021 = vmatprep.subr.bf16.mxu0 %v4761_v30 }
 0x2e7   : > { %2973 = vmatpush3.bf16.msra.mxu1 %v3306_v9  ;;  %3022 = vmatpush3.bf16.msra.mxu0 %v3307_v47 }
 0x2e8   : > { %2974 = vmatprep.subr.bf16.mxu1 %v3308_v5  ;;  %3023 = vmatprep.subr.bf16.mxu0 %v4761_v30  ;;  %v2831_v5 = vld [vmem:[#allocation12] ss:$0 sm:$0xff] }
 0x2eb   : > { %2975 = vmatpush3.bf16.msra.mxu1 %v3309_v35  ;;  %3024 = vmatpush3.bf16.msra.mxu0 %v3310_v60 }
 0x2ec   : > { %2976 = vmatprep.subr.bf16.mxu1 %v3311_v27  ;;  %3025 = vmatprep.subr.bf16.mxu0 %v4761_v30 }
 0x2ef   : > { %2977 = vmatpush3.bf16.msra.mxu1 %v3312_v17  ;;  %3026 = vmatpush3.bf16.msra.mxu0 %v3313_v0 }
 0x2f0   : > { %2978 = vmatprep.subr.bf16.mxu1 %v3314_v63  ;;  %3027 = vmatprep.subr.bf16.mxu0 %v4761_v30 }
 0x2f3   : > { %2979 = vmatpush3.bf16.msra.mxu1 %v3315_v7  ;;  %3028 = vmatpush3.bf16.msra.mxu0 %v3316_v8 }
 0x2f4   : > { %3029 = vmatprep.subr.bf16.mxu0 %v4761_v30  ;;  %3037 = vmatprep.subr.bf16.mxu1 %v4761_v30 }
 0x2f6   : > { %2196 = vmatmul.mubr.bf16.vlgmr.msra.gmra.mrb[8].mxu1 %v4553_v51 }
 0x2f7   : > { %3030 = vmatpush3.bf16.msra.mxu0 %v3317_v1  ;;  %3038 = vmatpush3.bf16.msra.mxu1 %v2358_v3 }
 0x2f8   : > { %3031 = vmatprep.subr.bf16.mxu0 %v4761_v30  ;;  %3039 = vmatprep.mubr.msk.bf16.mxu1 %vm3713_vm0, %v4761_v30 }
 0x2fb   : > { %3032 = vmatpush3.bf16.msra.mxu0 %v3318_v11 }
 0x2fe   : > { %3034 = vmatmul.mubr.bf16.vlgmr.msra.gmra.mrb[12].mxu0 %v2225_v50  ;;  %3040 = vmatmul.mubr.msk.bf16.vlgmr.msra.gmra.mrb[12].mxu1 %vm2352_vm11, %v3319_v46 }
 0x389   : > { %v2892_v33 = vpop.f32.mrb[0].mxu1 }
 0x38a   : > { %v2893_v56 = vpop.f32.mrb[1].mxu1 }
 0x38b   : > { %v2894_v61 = vadd.f32 %v2893_v56, %v2892_v33  ;;  %v2895_v16 = vpop.f32.mrb[2].mxu1 }
 0x38c   : > { %v2896_v42 = vpop.f32.mrb[3].mxu1 }
 0x38d   : > { %v2897_v14 = vadd.f32 %v2896_v42, %v2895_v16 }
 0x391   : > { %v2914_v21 = vpop.f32.mrb[4].mxu0 }
 0x392   : > { %v2915_v43 = vpop.f32.mrb[5].mxu0 }
 0x393   : > { %v2916_v54 = vadd.f32 %v2915_v43, %v2914_v21  ;;  %v2917_v48 = vpop.f32.mrb[6].mxu0 }
 0x394   : > { %v2918_v62 = vpop.f32.mrb[7].mxu0 }
 0x395   : > { %v1279_v40 = vadd.f32 %v2916_v54, %v2894_v61  ;;  %v2919_v15 = vadd.f32 %v2918_v62, %v2917_v48 }
 0x397   : > { %v1282_v22 = vadd.f32 %v2919_v15, %v2897_v14 }
 0x3a9   : > { %v2936_v36 = vpop.f32.mrb[4].mxu1 }
 0x3aa   : > { %v2937_v59 = vpop.f32.mrb[5].mxu1 }
 0x3ab   : > { %v2938_v41 = vadd.f32 %v2937_v59, %v2936_v36  ;;  %v2939_v19 = vpop.f32.mrb[6].mxu1 }
 0x3ac   : > { %v2940_v58 = vpop.f32.mrb[7].mxu1 }
 0x3ad   : > { %v1590_v4 = vadd.f32 %v2938_v41, %v1279_v40  ;;  %v2941_v23 = vadd.f32 %v2940_v58, %v2939_v19 }
 0x3af   : > { %v1591_v57 = vadd.f32 %v2941_v23, %v1282_v22 }
 0x3b1   : > { %v2958_v51 = vpop.f32.mrb[8].mxu0 }
 0x3b2   : > { %v2959_v53 = vpop.f32.mrb[9].mxu0 }
 0x3b3   : > { %v2960_v31 = vadd.f32 %v2959_v53, %v2958_v51  ;;  %v2961_v13 = vpop.f32.mrb[10].mxu0 }
 0x3b4   : > { %v2962_v34 = vpop.f32.mrb[11].mxu0 }
 0x3b5   : > { %v1897_v12 = vadd.f32 %v2960_v31, %v1590_v4  ;;  %v2963_v30 = vadd.f32 %v2962_v34, %v2961_v13 }
 0x3b7   : > { %v1898_v18 = vadd.f32 %v2963_v30, %v1591_v57 }
 0x3c9   : > { %v2980_v55 = vpop.f32.mrb[8].mxu1 }
 0x3ca   : > { %v2981_v49 = vpop.f32.mrb[9].mxu1 }
 0x3cb   : > { %v2982_v39 = vadd.f32 %v2981_v49, %v2980_v55  ;;  %v2983_v32 = vpop.f32.mrb[10].mxu1 }
 0x3cc   : > { %v2984_v24 = vpop.f32.mrb[11].mxu1 }
 0x3cd   : > { %v2985_v44 = vadd.f32 %v2984_v24, %v2983_v32  ;;  %v2204_v52 = vadd.f32 %v2982_v39, %v1897_v12 }
 0x3cf   : > { %v2205_v9 = vadd.f32 %v2985_v44, %v1898_v18 }
 0x3d1   : > { %v2324_v47 = vpop.f32.mrb[12].mxu0  ;;  %v2394_v35 = vpop.f32.mrb[12].mxu1 }
 0x3d2   : > { %v2331_v60 = vadd.f32 %v2324_v47, %v2204_v52  ;;  %v3035_v37 = vpop.f32.mrb[13].mxu0  ;;  %v3041_v29 = vpop.f32.mrb[13].mxu1 }
 0x3d3   : > { %v2327_v27 = vpop.f32.mrb[14].mxu0  ;;  %v2397_v17 = vpop.f32.mrb[14].mxu1 }
 0x3d4   : > { %v2340_v0 = vadd.f32 %v2831_v5, %v2331_v60  ;;  %v2332_v10 = vadd.f32 %v2327_v27, %v2205_v9  ;;  %v3036_v38 = vpop.f32.mrb[15].mxu0  ;;  %v3042_v63 = vpop.f32.mrb[15].mxu1 }
 0x3d6   : > { %v2341_v7 = vadd.f32 %v2831_v5, %v2332_v10  ;;  %v2342_v8 = vmax.f32 %v2340_v0, 0.0 }
 0x3d8   : > { %v2401_v6 = vadd.f32 %v2394_v35, %v2342_v8  ;;  %v2343_v25 = vmax.f32 %v2341_v7, 0.0 }
 0x3da   : > { %v2410_v1 = vadd.f32 %v2834_v28, %v2401_v6  ;;  %v2402_v2 = vadd.f32 %v2397_v17, %v2343_v25 }
 0x3dc   : > { %v2411_v20 = vadd.f32 %v2834_v28, %v2402_v2  ;;  %v2422_v3 = vmax.f32 %v2410_v1, 0.0 }
 0x3de   : > { %v2860_v26 = vpack.c.bf16 %v2411_v20, %v2410_v1  ;;  %v2423_v11 = vmax.f32 %v2411_v20, 0.0 }
 0x3e0   : > { %2861 = vst [vmem:[%s511_s29] sm:$0xff] %v2860_v26   ;;  %v2865_v45 = vpack.c.bf16 %v2423_v11, %v2422_v3 }
 0x3e1   : > { %3590 = shalt.err (!%p3587_p5)
}
 0x3e2   : > { %s3591_s12 = scalar_lea.hbm %s4586_s3, 128  ;;  %s3595_s17 = scalar_lea.hbm %s4763_s25, 256 }
 0x3e3   : > { %p3592_p6 = scmp.ne.s32.totalorder %s4586_s3, %s3591_s12  ;;  %p3596_p8 = scmp.lt.u32.totalorder %s4586_s3, %s4763_s25 }
 0x3e4   : > { %p3597_p7 = scmp.lt.u32.totalorder %s3595_s17, %s3591_s12  ;;  %p3599_p12 = scmp.lt.u32.totalorder %s3591_s12, %s4586_s3 }
 0x3e5   : > { %p3593_p9 = pnand %p3592_p6, %p4766_p2 }
 0x3e6   : > { %p3598_p11 = por %p3597_p7, %p3596_p8 }
 0x3e7   : > { %p3594_p4 = pneg %p3593_p9 }
 0x3e8   : > { %p3600_p1 = por %p3599_p12, %p3598_p11 }
 0x3ea   : > { %p3601_p10 = pnand %p3600_p1, %p3594_p4 }
 0x3ec   : > { %3604 = shalt.err (!%p3601_p10)
}
 0x3ed   : > { %s3719_s19 = smov 4   ;;  %2866 = vst [vmem:[%s518_s23] sm:$0xff] %v2865_v45   ;;  %s2440_s22 = scalar_lea.sflag [#allocation19], %s4102_s0 }
 0x3ee   : > { %3075 = dma.vmem_to_hbm [thread:$0]  (%p4766_p2), %s4591_s9, 128, %s4586_s3, %s2435_s10, %s3716_s24, %s3716_s24, %s3719_s19  }
 0x3ef   : > { %s3605_s15 = scalar_lea.vmem %s4598_s30, 128  ;;  %s3720_s2 = smov [#allocation18]  }
 0x3f0   : > { %p3606_p13 = scmp.ne.s32.totalorder %s4598_s30, %s3605_s15  ;;  %s3609_s27 = sshll.u32 %s3720_s2, 4  ;;  %s3610_s27 = int_to_ptr.vmem [resolvable:$false] %s3609_s27 }
 0x3f1   : > { %s3611_s20 = scalar_lea.vmem %s3610_s27, 256  ;;  %p3612_p5 = scmp.lt.s32.totalorder %s4598_s30, %s3610_s27 }
 0x3f2   : > { %p3607_p3 = pnand %p3606_p13, %p4766_p2  ;;  %p3613_p6 = scmp.lt.s32.totalorder %s3611_s20, %s3605_s15 }
 0x3f4   : > { %p3608_p0 = pneg %p3607_p3  ;;  %p3614_p9 = por %p3613_p6, %p3612_p5 }
 0x3f6   : > { %p3615_p4 = pnand %p3614_p9, %p3608_p0 }
 0x3f8   : > { %3618 = shalt.err (!%p3615_p4)
}
 0x3f9   : > { %s3619_s21 = scalar_lea.hbm %s4596_s26, 128  ;;  %s3623_s23 = scalar_lea.hbm %s4765_s1, 256 }
 0x3fa   : > { %p3620_p8 = scmp.ne.s32.totalorder %s4596_s26, %s3619_s21  ;;  %p3624_p12 = scmp.lt.u32.totalorder %s4596_s26, %s4765_s1 }
 0x3fb   : > { %p3625_p1 = scmp.lt.u32.totalorder %s3623_s23, %s3619_s21  ;;  %p3627_p13 = scmp.lt.u32.totalorder %s3619_s21, %s4596_s26 }
 0x3fc   : > { %p3621_p7 = pnand %p3620_p8, %p4766_p2 }
 0x3fd   : > { %p3626_p10 = por %p3625_p1, %p3624_p12 }
 0x3fe   : > { %p3622_p11 = pneg %p3621_p7 }
 0x3ff   : > { %p3628_p3 = por %p3627_p13, %p3626_p10 }
 0x401   : > { %p3629_p0 = pnand %p3628_p3, %p3622_p11 }
 0x403   : > { %3632 = shalt.err (!%p3629_p0)
}
 0x404   : > { %3076 = dma.vmem_to_hbm [thread:$0]  (%p4766_p2), %s4598_s30, 128, %s4596_s26, %s2440_s22, %s3716_s24, %s3716_s24, %s3719_s19  }
 0x405 PF: > { %s4767_s12 = sld [smem:[#allocation33_spill]]  ;;  %s4768_s4 = sld [smem:[#allocation30_spill]] }
 0x406   : > { %s2484_s29 = sand.u32 1, %s3687_s13  }
 0x407   : > { %s2485_s17 = scalar_lea.sflag [#allocation5], %s2484_s29 }
 0x40b   : > { %p4769_p5 = scmp.ne.s32.totalorder %s4767_s12, 0  ;;  %p4770_p6 = scmp.ge.s32.totalorder %s4768_s4, 2 }
 0x40d   : > { %p3109_p9 = pnand %p4770_p6, %p4769_p5 }
 0x40f   : > { %3678 = dma.done.wait (!%p3109_p9), %s2485_s17, 128  }
 0x410   : > { %3680 = vsyncadd (!%p3109_p9), %s2485_s17, 4294967168  ;;  %s2494_s18 = scalar_lea.sflag [#allocation19], %s2484_s29 }
 0x411   : > { %3682 = dma.done.wait (!%p3109_p9), %s2494_s18, 128  }
 0x412   : > { %3684 = vsyncadd (!%p3109_p9), %s2494_s18, 4294967168  ;;  %s4771_s16 = sld [smem:[#allocation31_spill]]  ;;  %s4772_s0 = sld [smem:[#allocation29_spill]] }
 0x413   : > { %s4773_s15 = sld [smem:[#allocation32_spill]]  ;;  %s4774_s13 = smov %s3691_s14 }
 0x418   : > { %p30_p2 = scmp.ge.s32.totalorder %s4771_s16, 4   ;;  %s4775_s14 = smov %s4772_s0 }
 0x41a   :  { %32 = sbr.rel (!%p30_p2) target bundleno = 18 (0x12), region = 157 }
 0x421   :  { %2499 = vsyncpa [#allocation4], 1 }
 0x422   :  { %2501 = vsyncpa [#allocation4 + $0x1], 1 }
 0x423   :  { %2502 = vsyncpa [#allocation7], 1 }
 0x424   :  { %2503 = vsyncpa [#allocation10], 1 }
 0x425   :  { %2504 = vsyncpa [#allocation13], 1 }
 0x426   :  { %2505 = vsyncpa [#allocation5], 1 }
 0x427   :  { %2507 = vsyncpa [#allocation5 + $0x1], 1 }
 0x428   :  { %2508 = vsyncpa [#allocation19], 1 }
 0x429   :  { %2510 = vsyncpa [#allocation19 + $0x1], 1 }

// kernel: inception_time_fwd.7
= control target key start
LH: loop header
LB: loop body
LE: loop exit
PB: predicated region body
PF: predicated region fallthrough
CT: control target
= control target key end

     0   :  { %11 = vsyncpa [#allocation4], 0  ;;  %s3964_s0 = inlined_call_operand.hbm [shape: bf16[2,16,128], index: 0, kind: input, shape index: {}]   ;;  %s3965_s1 = inlined_call_operand.hbm [shape: bf16[128,32], index: 1, kind: input, shape index: {}]   ;;  %s3966_s2 = inlined_call_operand.hbm [shape: f32[1,32], index: 2, kind: input, shape index: {}]   ;;  %s3967_s3 = inlined_call_operand.hbm [shape: bf16[1280,128], index: 3, kind: input, shape index: {}]   ;;  %s3968_s4 = inlined_call_operand.hbm [shape: bf16[128,128], index: 4, kind: input, shape index: {}]   ;;  %s3969_s5 = inlined_call_operand.hbm [shape: f32[1,128], index: 5, kind: input, shape index: {}]   ;;  %s3970_s6 = inlined_call_operand.hbm [shape: bf16[2,16,128], index: 6, kind: output, shape index: {}]  }
   0x1   :  { %13 = vsyncpa [#allocation4 + $0x1], 0 }
   0x2   :  { %14 = vsyncpa [#allocation7], 0 }
   0x3   :  { %15 = vsyncpa [#allocation10], 0 }
   0x4   :  { %16 = vsyncpa [#allocation13], 0 }
   0x5   :  { %17 = vsyncpa [#allocation5], 0 }
   0x6   :  { %19 = vsyncpa [#allocation5 + $0x1], 0  ;;  %s3206_s21 = smov 0   ;;  %s3208_s22 = smov 0  }
   0x7   :  { %s3210_s23 = smov 0   ;;  %s3212_s24 = smov 0  }
   0x8 LB: > { %s3155_s25 = smov [#allocation6]   ;;  %s3227_s27 = sadd.s32 4294967295, %s3153_s24   ;;  %s3153_s24 = sphi %s3212_s24, %s4008_s24   ;;  %s3149_s23 = sphi %s3210_s23, %s4007_s23   ;;  %s3145_s22 = sphi %s3208_s22, %s4006_s22   ;;  %s3141_s21 = sphi %s3206_s21, %s4005_s21  }
   0x9   : > { %s199_s26 = sshll.u32 %s3155_s25, 4  ;;  %p2310_p0 = scmp.ge.s32.totalorder %s3153_s24, 1  ;;  %s3232_s26 = int_to_ptr.vmem [resolvable:$true] %s199_s26 }
   0xa   : > { %p3971_p1 = scmp.eq.s32.totalorder %s3227_s27, 0  ;;  %p187_p2 = scmp.lt.s32.totalorder %s3153_s24, 3 }
   0xb   : > { %s3156_s29 = smov [#allocation9]   ;;  %s3157_s8 = smov [#allocation8]  }
   0xc   : > { %p3234_p3 = pnand %p2310_p0, %p187_p2  ;;  %s223_s30 = sshll.u32 %s3156_s29, 4  ;;  %s3247_s30 = int_to_ptr.vmem [resolvable:$true] %s223_s30 }
   0xd   : > { %s213_s9 = sshll.u32 %s3157_s8, 4  ;;  %s2905_s12 = scalar_lea.hbm %s3965_s1, 1024  ;;  %s3249_s9 = int_to_ptr.vmem [resolvable:$true] %s213_s9 }
   0xe   : > { %s3976_s28 = scalar_select %p3234_p3, 1, 0 }
   0xf   : > { %p2682_p5 = pneg %p3234_p3  ;;  %p2906_p7 = scmp.ne.s32.totalorder %s3965_s1, %s2905_s12 }
  0x10   : > { %p2912_p11 = scmp.lt.u32.totalorder %s2905_s12, %s3965_s1 }
  0x11   : > { %p3243_p6 = pnand %p2682_p5, %p3971_p1 }
  0x13   : > { %p3259_p8 = pneg %p3243_p6 }
  0x15   : > { %p2908_p9 = pnand %p3259_p8, %p2906_p7 }
  0x17   : > { %p2909_p10 = pneg %p2908_p9 }
  0x19   : > { %p2914_p12 = pnand %p2912_p11, %p2909_p10 }
  0x1b   : > { %2917 = shalt.err (!%p2914_p12)
}
  0x1c   : > { %s2918_s18 = scalar_lea.vmem %s3232_s26, 1024  ;;  %p2926_p5 = scmp.lt.s32.totalorder %s3232_s26, %s3232_s26 }
  0x1d   : > { %p2919_p13 = scmp.ne.s32.totalorder %s3232_s26, %s2918_s18  ;;  %p2927_p4 = scmp.lt.s32.totalorder %s2918_s18, %s2918_s18 }
  0x1f   : > { %p2921_p0 = pnand %p2919_p13, %p3259_p8  ;;  %p2928_p7 = por %p2927_p4, %p2926_p5 }
  0x21   : > { %p2922_p2 = pneg %p2921_p0 }
  0x23   : > { %p2929_p9 = pnand %p2928_p7, %p2922_p2 }
  0x25   : > { %2932 = shalt.err (!%p2929_p9)
}
  0x26   : > { %s3158_s19 = smov 64   ;;  %s3159_s20 = smov 4  }
  0x27   : > { %2685 = dma.hbm_to_vmem [thread:$0]  (!%p3243_p6), %s3965_s1, 1024, %s3232_s26, [#allocation7], %s3158_s19, %s3158_s19, %s3159_s20  }
  0x28   : > { %s2933_s11 = scalar_lea.hbm %s3967_s3, 10240 }
  0x29   : > { %p2934_p4 = scmp.ne.s32.totalorder %s3967_s3, %s2933_s11  ;;  %p2940_p12 = scmp.lt.u32.totalorder %s2933_s11, %s3967_s3 }
  0x2b   : > { %p2936_p10 = pnand %p2934_p4, %p3259_p8 }
  0x2d   : > { %p2937_p11 = pneg %p2936_p10 }
  0x2f   : > { %p2942_p13 = pnand %p2940_p12, %p2937_p11 }
  0x31   : > { %2945 = shalt.err (!%p2942_p13)
}
  0x32   : > { %s2946_s26 = scalar_lea.vmem %s3247_s30, 10240  ;;  %p2954_p7 = scmp.lt.s32.totalorder %s3247_s30, %s3247_s30 }
  0x33   : > { %p2947_p0 = scmp.ne.s32.totalorder %s3247_s30, %s2946_s26  ;;  %p2955_p9 = scmp.lt.s32.totalorder %s2946_s26, %s2946_s26 }
  0x35   : > { %p2949_p2 = pnand %p2947_p0, %p3259_p8  ;;  %p2956_p4 = por %p2955_p9, %p2954_p7 }
  0x37   : > { %p2950_p5 = pneg %p2949_p2 }
  0x39   : > { %p2957_p10 = pnand %p2956_p4, %p2950_p5 }
  0x3b   : > { %2960 = shalt.err (!%p2957_p10)
}
  0x3c   : > { %2691 = dma.hbm_to_vmem [thread:$0]  (!%p3243_p6), %s3967_s3, 10240, %s3247_s30, [#allocation10], %s3158_s19, %s3158_s19, %s3159_s20  }
  0x3d   : > { %s2961_s8 = scalar_lea.hbm %s3966_s2, 16 }
  0x3e   : > { %p2962_p11 = scmp.ne.s32.totalorder %s3966_s2, %s2961_s8  ;;  %p2968_p0 = scmp.lt.u32.totalorder %s2961_s8, %s3966_s2 }
  0x40   : > { %p2964_p12 = pnand %p2962_p11, %p3259_p8 }
  0x42   : > { %p2965_p13 = pneg %p2964_p12 }
  0x44   : > { %p2970_p2 = pnand %p2968_p0, %p2965_p13 }
  0x46   : > { %2973 = shalt.err (!%p2970_p2)
}
  0x47   : > { %s2974_s30 = scalar_lea.vmem %s3249_s9, 16  ;;  %s2981_s14 = scalar_lea.vmem %s3249_s9, 32 }
  0x48   : > { %p2975_p5 = scmp.ne.s32.totalorder %s3249_s9, %s2974_s30  ;;  %p2982_p4 = scmp.lt.s32.totalorder %s3249_s9, %s3249_s9 }
  0x49   : > { %p2983_p10 = scmp.lt.s32.totalorder %s2981_s14, %s2974_s30 }
  0x4a   : > { %p2977_p7 = pnand %p2975_p5, %p3259_p8 }
  0x4b   : > { %p2984_p11 = por %p2983_p10, %p2982_p4 }
  0x4c   : > { %p2978_p9 = pneg %p2977_p7 }
  0x4e   : > { %p2985_p12 = pnand %p2984_p11, %p2978_p9 }
  0x50   : > { %2988 = shalt.err (!%p2985_p12)
}
  0x51   : > { %2688 = dma.hbm_to_vmem [thread:$0]  (!%p3243_p6), %s3966_s2, 16, %s3249_s9, [#allocation7]  }
  0x52   : > { %s3160_s17 = smov [#allocation11]   ;;  %s3161_s25 = smov [#allocation12]  }
  0x53   : > { %s236_s18 = sshll.u32 %s3160_s17, 4  ;;  %s250_s29 = sshll.u32 %s3161_s25, 4  ;;  %s237_s18 = int_to_ptr.vmem [resolvable:$true] %s236_s18  ;;  %s251_s29 = int_to_ptr.vmem [resolvable:$true] %s250_s29 }
  0x54   : > { %s2989_s11 = scalar_lea.hbm %s3968_s4, 1024 }
  0x55   : > { %p2990_p13 = scmp.ne.s32.totalorder %s3968_s4, %s2989_s11  ;;  %p2996_p5 = scmp.lt.u32.totalorder %s2989_s11, %s3968_s4 }
  0x57   : > { %p2992_p0 = pnand %p2990_p13, %p3259_p8 }
  0x59   : > { %p2993_p2 = pneg %p2992_p0 }
  0x5b   : > { %p2998_p7 = pnand %p2996_p5, %p2993_p2 }
  0x5d   : > { %3001 = shalt.err (!%p2998_p7)
}
  0x5e   : > { %s3002_s9 = scalar_lea.vmem %s237_s18, 1024  ;;  %p3010_p11 = scmp.lt.s32.totalorder %s237_s18, %s237_s18 }
  0x5f   : > { %p3003_p9 = scmp.ne.s32.totalorder %s237_s18, %s3002_s9  ;;  %p3011_p12 = scmp.lt.s32.totalorder %s3002_s9, %s3002_s9 }
  0x61   : > { %p3005_p4 = pnand %p3003_p9, %p3259_p8  ;;  %p3012_p1 = por %p3011_p12, %p3010_p11 }
  0x63   : > { %p3006_p10 = pneg %p3005_p4 }
  0x65   : > { %p3013_p3 = pnand %p3012_p1, %p3006_p10 }
  0x67   : > { %3016 = shalt.err (!%p3013_p3)
}
  0x68   : > { %2694 = dma.hbm_to_vmem [thread:$0]  (!%p3243_p6), %s3968_s4, 1024, %s237_s18, [#allocation10], %s3158_s19, %s3158_s19, %s3159_s20  }
  0x69   : > { %s3017_s8 = scalar_lea.hbm %s3969_s5, 16 }
  0x6a   : > { %p3018_p1 = scmp.ne.s32.totalorder %s3969_s5, %s3017_s8  ;;  %p3024_p0 = scmp.lt.u32.totalorder %s3017_s8, %s3969_s5 }
  0x6c   : > { %p3020_p3 = pnand %p3018_p1, %p3259_p8 }
  0x6e   : > { %p3021_p13 = pneg %p3020_p3 }
  0x70   : > { %p3026_p2 = pnand %p3024_p0, %p3021_p13 }
  0x72   : > { %3029 = shalt.err (!%p3026_p2)
}
  0x73   : > { %s3030_s30 = scalar_lea.vmem %s251_s29, 16  ;;  %s3037_s18 = scalar_lea.vmem %s251_s29, 32 }
  0x74   : > { %p3031_p5 = scmp.ne.s32.totalorder %s251_s29, %s3030_s30  ;;  %p3038_p4 = scmp.lt.s32.totalorder %s251_s29, %s251_s29 }
  0x75   : > { %p3039_p10 = scmp.lt.s32.totalorder %s3037_s18, %s3030_s30 }
  0x76   : > { %p3033_p7 = pnand %p3031_p5, %p3259_p8 }
  0x77   : > { %p3040_p11 = por %p3039_p10, %p3038_p4 }
  0x78   : > { %p3034_p9 = pneg %p3033_p7 }
  0x7a   : > { %p3041_p12 = pnand %p3040_p11, %p3034_p9 }
  0x7c   : > { %3044 = shalt.err (!%p3041_p12)
}
  0x7d   : > { %2697 = dma.hbm_to_vmem [thread:$0]  (!%p3243_p6), %s3969_s5, 16, %s251_s29, [#allocation13]  }
  0x7e   : > { %s2309_s15 = sadd.s32 4294967294, %s3153_s24   ;;  %s3374_s7 = sadd.s32 1, %s3153_s24  }
  0x7f   : > { %s32_s16 = sadd.s32 1, %s3149_s23  ;;  %s29_s26 = ssub.s32 %s3153_s24, %s3374_s7 }
  0x80   : > { %p39_p8 = scmp.ne.s32.totalorder %s3149_s23, %s3145_s22  ;;  %p30_p1 = scmp.eq.s32.totalorder %s29_s26, 0 }
  0x81   : > { %p40_p3 = scmp.eq.s32.totalorder %s3153_s24, 0  ;;  %p45_p13 = scmp.ne.s32.totalorder %s3145_s22, %s3141_s21 }
  0x82   : > { %p174_p0 = scmp.eq.s32.totalorder %s3227_s27, 1  ;;  %p3979_p5 = scmp.eq.s32.totalorder %s3227_s27, 0 }
  0x83   : > { %s3386_s17 = scalar_select %p30_p1, %s3149_s23, %s32_s16  }
  0x84   : > { %p41_p2 = por %p40_p3, %p39_p8  ;;  %p3390_p7 = por %p3979_p5, %p45_p13 }
  0x85   : > { %p3394_p6 = por %p174_p0, %p39_p8  ;;  %p180_p9 = scmp.eq.s32.totalorder %s2309_s15, 1 }
  0x86   : > { %p2711_p4 = scmp.lt.s32.totalorder %s3153_s24, 2  ;;  %s261_s8 = sand.u32 1, %s3149_s23  }
  0x87   : > { %s3981_s29 = scalar_select %p3394_p6, 1, 0 }
  0x88   : > { %p3400_p10 = por %p180_p9, %p45_p13  ;;  %s2317_s11 = sshll.u32 %s261_s8, 3 }
  0x89   : > { %s2479_s12 = sshll.u32 %s3153_s24, 7  ;;  %s265_s14 = scalar_lea.vmem [#allocation3], %s2317_s11 }
  0x8a   : > { %s3982_s10 = scalar_select %p3400_p10, 1, 0 }
  0x8b   : > { %s3408_s18 = scalar_lea.hbm %s3964_s0, %s2479_s12  ;;  %s272_s9 = sshll.u32 %s265_s14, 4  ;;  %s3414_s9 = int_to_ptr.vmem [resolvable:$true] %s272_s9 }
  0x8c   : > { %p3410_p11 = pnand %p2711_p4, %p41_p2  ;;  %s3416_s16 = scalar_lea.sflag [#allocation4], %s261_s8 }
  0x8d   : > { %s3045_s26 = scalar_lea.hbm %s3408_s18, 128  ;;  %s3050_s13 = scalar_lea.hbm %s3964_s0, 256 }
  0x8e   : > { %p3046_p12 = scmp.ne.s32.totalorder %s3408_s18, %s3045_s26  ;;  %p3047_p8 = pneg %p3410_p11 }
  0x8f   : > { %p3051_p13 = scmp.lt.u32.totalorder %s3408_s18, %s3964_s0  ;;  %p3052_p0 = scmp.lt.u32.totalorder %s3050_s13, %s3045_s26 }
  0x90   : > { %p3048_p1 = pnand %p3047_p8, %p3046_p12  ;;  %p3054_p5 = scmp.lt.u32.totalorder %s3045_s26, %s3408_s18 }
  0x91   : > { %p3053_p2 = por %p3052_p0, %p3051_p13 }
  0x92   : > { %p3049_p3 = pneg %p3048_p1 }
  0x93   : > { %p3055_p9 = por %p3054_p5, %p3053_p2 }
  0x95   : > { %p3056_p4 = pnand %p3055_p9, %p3049_p3 }
  0x97   : > { %3059 = shalt.err (!%p3056_p4)
}
  0x98   : > { %s3060_s8 = scalar_lea.vmem %s3414_s9, 128  ;;  %s3162_s11 = smov [#allocation3]  }
  0x99   : > { %p3061_p12 = scmp.ne.s32.totalorder %s3414_s9, %s3060_s8  ;;  %s3065_s12 = sshll.u32 %s3162_s11, 4  ;;  %s3066_s12 = int_to_ptr.vmem [resolvable:$false] %s3065_s12 }
  0x9a   : > { %s3067_s30 = scalar_lea.vmem %s3066_s12, 256  ;;  %p3068_p6 = scmp.lt.s32.totalorder %s3414_s9, %s3066_s12 }
  0x9b   : > { %p3063_p1 = pnand %p3061_p12, %p3047_p8  ;;  %p3069_p13 = scmp.lt.s32.totalorder %s3067_s30, %s3060_s8 }
  0x9d   : > { %p3064_p10 = pneg %p3063_p1  ;;  %p3070_p0 = por %p3069_p13, %p3068_p6 }
  0x9f   : > { %p3071_p2 = pnand %p3070_p0, %p3064_p10 }
  0xa1   : > { %3074 = shalt.err (!%p3071_p2)
}
  0xa2   : > { %2701 = dma.hbm_to_vmem [thread:$0]  (!%p3410_p11), %s3408_s18, 128, %s3414_s9, %s3416_s16, %s3158_s19, %s3158_s19, %s3159_s20  }
  0xa3   : > { %p3984_p8 = scmp.ne.s32.totalorder %s3976_s28, 0 }
  0xa4   : > { %s3450_s26 = sand.u32 (!%p3984_p8), 1, %s3145_s22  }
  0xa5   : > { %284 = sbr.rel (%p3984_p8) target bundleno = 888 (0x378), region = 44  ;;  %s2321_s13 = sshll.u32 (!%p3984_p8), %s3450_s26, 3 }
  0xa6   : > { %s287_s14 = scalar_lea.sflag (!%p3984_p8), [#allocation4], %s3450_s26  ;;  %s3456_s15 = scalar_lea.vmem (!%p3984_p8), [#allocation3], %s2321_s13 }
  0xac   : > { %3120 = dma.done.wait (%p3390_p7), %s287_s14, 128  }
  0xad   : > { %3122 = vsyncadd (%p3390_p7), %s287_s14, 4294967168  ;;  %p3985_p6 = scmp.eq.s32.totalorder %s3227_s27, 0 }
  0xaf   : > { %3124 = dma.done.wait (%p3985_p6), [#allocation7], 1040   ;;  %p3986_p10 = pmov %p3985_p6 }
  0xb0   : > { %p3987_p11 = pmov %p3985_p6 }
  0xb1   : > { %3126 = vsyncadd (%p3986_p10), [#allocation7], 4294966256 }
  0xb2   : > { %3128 = dma.done.wait (%p3987_p11), [#allocation10], 11264   ;;  %p3988_p3 = pmov %p3985_p6 }
  0xb4   : > { %3130 = vsyncadd (%p3988_p3), [#allocation10], 4294956032  ;;  %p3989_p5 = pmov %p3988_p3 }
  0xb5   : > { %p3990_p9 = pmov %p3988_p3 }
  0xb6   : > { %3132 = dma.done.wait (%p3989_p5), [#allocation13], 16  }
  0xb7   : > { %3134 = vsyncadd (%p3990_p9), [#allocation13], 4294967280  ;;  %v3974_v0 = vmov 0.0   ;;  %vm3164_vm0 = vmmov 0   ;;  %v2764_v1 = vld [vmem:[#allocation6] sm:$0xff]   ;;  %v2765_v2 = vld [vmem:[#allocation6 + $0x8] sm:$0xff]  }
  0xb8   : > { %2618 = vmatprep.subr.bf16.mxu0 %v3974_v0  ;;  %2634 = vmatprep.mubr.msk.bf16.mxu0 %vm3164_vm0, %v3974_v0  ;;  %v2766_v3 = vld [vmem:[#allocation6 + $0x10] sm:$0xff]   ;;  %v2767_v4 = vld [vmem:[#allocation6 + $0x18] sm:$0xff]   ;;  %v2768_v5 = vld [vmem:[#allocation6 + $0x20] sm:$0xff]   ;;  %vm462_vm1 = vcmask 257024   ;;  %v3165_v10 = vmov 0   ;;  %vm465_vm2 = vcmask 254976  }
  0xb9   : > { %2619 = vmatpush3.bf16.msra.mxu0 %v2764_v1  ;;  %v2769_v6 = vld [vmem:[#allocation6 + $0x28] sm:$0xff]   ;;  %v2770_v7 = vld [vmem:[#allocation6 + $0x30] sm:$0xff]   ;;  %v2771_v8 = vld [vmem:[#allocation6 + $0x38] sm:$0xff]   ;;  %463 = vst.msk [vmem:[#allocation2] sm:$0xf] %vm462_vm1, %v3165_v10  ;;  %vm483_vm3 = vcmask 257026  }
  0xba   : > { %2620 = vmatprep.subr.bf16.mxu0 %v3974_v0  ;;  %v2772_v9 = vld [vmem:[%s3456_s15] sm:$0xff]   ;;  %464 = vst.msk [vmem:[#allocation2 + $0x4] sm:$0xf] %vm462_vm1, %v3165_v10  ;;  %488 = vst.msk [vmem:[#allocation2 + $0x14] sm:$0xf] %vm462_vm1, %v3165_v10  ;;  %s3166_s28 = smov 32  }
  0xbb   : > { %466 = vst.msk [vmem:[#allocation2 + $0x8] sm:$0x3] %vm465_vm2, %v3165_v10  ;;  %vm490_vm4 = vsmask.f32 3328  ;;  %v492_v14 = vld [vmem:[#allocation2 + $0x18] sm:$0xf] }
  0xbc   : > { %487 = vst.msk [vmem:[#allocation2 + $0x10] sm:$0xc] %vm483_vm3, %v3165_v10  ;;  %vm491_vm5 = vmand %vm462_vm1, %vm490_vm4  ;;  %vm512_vm6 = vsmask.f32 7424  ;;  %v2813_v24 = vld [vmem:[#allocation9 + $0xc0] sm:$0xff]   ;;  %v2815_v26 = vld [vmem:[#allocation9 + $0xc8] sm:$0xff]  }
  0xbd   : > { %2621 = vmatpush3.bf16.msra.mxu0 %v2765_v2  ;;  %v493_v15 = vsel %vm491_vm5, 0, %v492_v14  ;;  %v2814_v25 = vld [vmem:[#allocation9 + $0x80] sm:$0xff]   ;;  %2499 = vmatprep.subr.bf16.mxu1 %v2813_v24  ;;  %v2816_v29 = vld [vmem:[#allocation9 + $0x88] sm:$0xff]   ;;  %v2817_v31 = vld [vmem:[#allocation9 + $0xd0] sm:$0xff]   ;;  %vm472_vm7 = vcmask 1041408   ;;  %vm473_vm8 = vcmask 1045508  }
  0xbe   : > { %2622 = vmatprep.subr.bf16.mxu0 %v3974_v0  ;;  %494 = vst [vmem:[#allocation2 + $0x18] sm:$0xf] %v493_v15  ;;  %v2818_v27 = vld [vmem:[#allocation9 + $0x40] sm:$0xff]   ;;  %2500 = vmatpush3.bf16.msra.mxu1 %v2814_v25  ;;  %v2822_v30 = vld [vmem:[#allocation9 + $0x48] sm:$0xff]   ;;  %v2826_v33 = vld [vmem:[#allocation9 + $0x50] sm:$0xff]   ;;  %vm592_vm10 = vcmask 1044480  }
  0xbf   : > { %v2820_v28 = vld [vmem:[#allocation9] sm:$0xff]   ;;  %2501 = vmatprep.subr.bf16.mxu1 %v2815_v26  ;;  %v2824_v32 = vld [vmem:[#allocation9 + $0x8] sm:$0xff]   ;;  %v2819_v34 = vld [vmem:[#allocation9 + $0x90] sm:$0xff]   ;;  %vm569_vm11 = vsmask.f32 5376  ;;  %vm530_vm12 = vcmask 1046528  }
  0xc0   : > { %v495_v11 = vld [vmem:[#allocation2] sm:$0xf]  ;;  %v2821_v35 = vld [vmem:[#allocation9 + $0xd8] sm:$0xff]   ;;  %v2825_v38 = vld [vmem:[#allocation9 + $0xe0] sm:$0xff]   ;;  %vm539_vm13 = vsmask.f32 6400 }
  0xc1   : > { %2623 = vmatpush3.bf16.msra.mxu0 %v2766_v3  ;;  %v3490_v12 = vld [vmem:[#allocation2 + $0x4] sm:$0xf]  ;;  %v2827_v39 = vld [vmem:[#allocation9 + $0xa0] sm:$0xff]   ;;  %v500_v40 = vld [vmem:[#allocation2] sm:$0xc]  ;;  %s3167_s19 = smov 64  }
  0xc2   : > { %2624 = vmatprep.subr.bf16.mxu0 %v3974_v0  ;;  %v3493_v13 = vcombine.low %v495_v11, %v3490_v12  ;;  %v3496_v16 = vld [vmem:[#allocation2 + $0x8] ss:$0 sps:$4 sm:$0x11]   ;;  %2502 = vmatpush3.bf16.msra.mxu1 %v2816_v29  ;;  %v2828_v36 = vld [vmem:[#allocation9 + $0x10] sm:$0xff]   ;;  %v3504_v42 = vcombine.low %v500_v40, %v3490_v12  ;;  %v2328_v43 = vld [vmem:[#allocation8] ss:$0 sm:$0xff] }
  0xc3   : > { %v521_v19 = vshll.u32 %v3496_v16, 16  ;;  %2503 = vmatprep.subr.bf16.mxu1 %v2817_v31  ;;  %v2823_v37 = vld [vmem:[#allocation9 + $0x98] sm:$0xff]   ;;  %v502_v41 = vld [vmem:[#allocation2] sm:$0x8]  ;;  %vm474_vm9 = vmor %vm472_vm7, %vm473_vm8  ;;  %vm601_vm14 = vsmask.f32 4352 }
  0xc4   : > { %v514_v17 = vshrl.u32 %v3493_v13, 16  ;;  %v516_v18 = vshll.u32 %v3493_v13, 16  ;;  %v3507_v44 = vcombine.low %v502_v41, %v3490_v12  ;;  %v571_v46 = vshrl.u32 %v3504_v42, 16  ;;  %v498_v50 = vld [vmem:[#allocation2] sm:$0xe]  ;;  %v2832_v41 = vld [vmem:[#allocation9 + $0x18] sm:$0xff]  }
  0xc5   : > { %2625 = vmatpush3.bf16.msra.mxu0 %v2767_v4  ;;  %v523_v21 = vrot.slane %v521_v19, 1  ;;  %v574_v49 = vshll.u32 %v3504_v42, 16  ;;  %v3516_v58 = vcombine.low %v498_v50, %v3490_v12  ;;  %v3518_v59 = vld [vmem:[#allocation2 + $0x8] ss:$0 sps:$4 sm:$0x33]   ;;  %s3168_s20 = smov 96  }
  0xc6   : > { %2626 = vmatprep.subr.bf16.mxu0 %v3974_v0  ;;  %v518_v20 = vrot.slane %v516_v18, 1  ;;  %2504 = vmatpush3.bf16.msra.mxu1 %v2819_v34  ;;  %v603_v52 = vshrl.u32 %v3507_v44, 16  ;;  %v606_v56 = vshll.u32 %v3507_v44, 16  ;;  %v3513_v57 = vrot.slane %v571_v46, 2  ;;  %v3530_v4 = vld [vmem:[#allocation2 + $0x14] sm:$0xf] }
  0xc7   : > { %2505 = vmatprep.subr.bf16.mxu1 %v2821_v35  ;;  %v3520_v62 = vrot.slane %v574_v49, 3  ;;  %v593_v63 = vrot.slane %v3507_v44, 3  ;;  %v3523_v1 = vld [vmem:[#allocation2 + $0x14] ss:$0 sps:$4 sm:$0x11]   ;;  %v544_v10 = vshll.u32 %v3516_v58, 16  ;;  %v3544_v19 = vcombine.low %v3530_v4, %v3530_v4 }
  0xc8   : > { %v519_v22 = vor.u32 %v518_v20, %v514_v17  ;;  %v3526_v2 = vrot.slane %v603_v52, 3  ;;  %v3528_v3 = vld [vmem:[#allocation2 + $0x14] ss:$0 sps:$4 sm:$0x33]   ;;  %v549_v11 = vshrl.u32 %v3518_v59, 16  ;;  %v552_v14 = vshll.u32 %v3518_v59, 16 }
  0xc9   : > { %2627 = vmatpush3.bf16.msra.mxu0 %v2768_v5  ;;  %v1438_v18 = vshll.u32 %v3523_v1, 16  ;;  %v676_v20 = vld [vmem:[#allocation2 + $0x4] sm:$0x8]  ;;  %v1464_v24 = vshrl.u32 %v3528_v3, 16  ;;  %v1467_v25 = vshll.u32 %v3528_v3, 16  ;;  %v2829_v34 = vld [vmem:[#allocation9 + $0xe8] sm:$0xff]  }
  0xca   : > { %2628 = vmatprep.subr.bf16.mxu0 %v3974_v0  ;;  %v524_v23 = vsel %vm512_vm6, %v519_v22, %v523_v21  ;;  %2506 = vmatpush3.bf16.msra.mxu1 %v2823_v37  ;;  %v672_v21 = vld [vmem:[#allocation2 + $0x4] sm:$0xe]  ;;  %v531_v22 = vrot.slane %v3516_v58, 1  ;;  %v3562_v37 = vrot.slane %v549_v11, 1  ;;  %v1522_v40 = vshrl.u32 %v3544_v19, 16  ;;  %s2484_s25 = sshll.u32 %s3227_s27, 7 }
  0xcb   : > { %525 = vrot.lane.b32.xlu1 %v524_v23, %s3166_s28  ;;  %2507 = vmatprep.subr.bf16.mxu1 %v2825_v38  ;;  %v532_v23 = vrot.slane %v3496_v16, 1  ;;  %v674_v26 = vld [vmem:[#allocation2 + $0x4] sm:$0xc]  ;;  %v3564_v38 = vrot.slane %v552_v14, 2  ;;  %v3573_v46 = vrot.slane %v1467_v25, 2  ;;  %vm562_vm15 = vcmask 1045504   ;;  %s3916_s11 = scalar_lea.hbm %s3970_s6, %s2484_s25 }
  0xcc   : > { %v2830_v35 = vld [vmem:[#allocation9 + $0x58] sm:$0xff]   ;;  %vm2035_vm4 = vsmask.f32 256  ;;  %vm2041_vm7 = vcmask 1047552   ;;  %s338_s18 = scalar_lea.vmem [#allocation14], %s2321_s13  ;;  %s2175_s12 = scalar_lea.sflag [#allocation5], %s3450_s26 }
  0xcd   : > { %2629 = vmatpush3.bf16.msra.mxu0 %v2769_v6  ;;  %vm2042_vm8 = vmand %vm2041_vm7, %vm512_vm6  ;;  %s2188_s9 = sshll.u32 %s338_s18, 4  ;;  %p4002_p4 = scmp.ne.s32.totalorder %s3981_s29, 0  ;;  %s3918_s9 = int_to_ptr.vmem [resolvable:$true] %s2188_s9 }
  0xce   : > { %2630 = vmatprep.subr.bf16.mxu0 %v3974_v0  ;;  %2508 = vmatpush3.bf16.msra.mxu1 %v2827_v39  ;;  %v3566_v39 = vrot.slane %v1438_v18, 1  ;;  %s3075_s30 = scalar_lea.vmem %s3918_s9, 128  ;;  %s3169_s27 = smov [#allocation14]  }
  0xcf   : > { %2509 = vmatprep.subr.bf16.mxu1 %v2829_v34  ;;  %p3076_p7 = scmp.ne.s32.totalorder %s3918_s9, %s3075_s30  ;;  %s3079_s13 = sshll.u32 %s3169_s27, 4  ;;  %s3080_s13 = int_to_ptr.vmem [resolvable:$false] %s3079_s13 }
  0xd0   : > { %s3081_s14 = scalar_lea.vmem %s3080_s13, 256  ;;  %p3082_p13 = scmp.lt.s32.totalorder %s3918_s9, %s3080_s13 }
  0xd1   : > { %2631 = vmatpush3.bf16.msra.mxu0 %v2770_v7  ;;  %v3533_v7 = vrot.slane %v606_v56, 4  ;;  %v2833_v56 = vld [vmem:[#allocation9 + $0xf0] sm:$0xff]   ;;  %p3077_p12 = pnand %p3076_p7, %p4002_p4  ;;  %p3083_p0 = scmp.lt.s32.totalorder %s3081_s14, %s3075_s30 }
  0xd2   : > { %2632 = vmatprep.subr.bf16.mxu0 %v3974_v0 }
  0xd3   : > { %p3078_p1 = pneg %p3077_p12  ;;  %p3084_p2 = por %p3083_p0, %p3082_p13 }
  0xd5   : > { %2633 = vmatpush3.bf16.msra.mxu0 %v2771_v8  ;;  %v3535_v8 = vld [vmem:[#allocation2 + $0x14] ss:$0 sps:$4 sm:$0x77]   ;;  %p3085_p8 = pnand %p3084_p2, %p3078_p1 }
  0xd6   : > { %2521 = vmatprep.subr.bf16.mxu0 %v2818_v27  ;;  %v1448_v27 = vrot.slane %v3523_v1, 1  ;;  %v1492_v29 = vshrl.u32 %v3535_v8, 16 }
  0xd8   : > { %2635 = vmatmul.mubr.bf16.vlgmr.msra.gmra.mrb[0].mxu0 %v2772_v9  ;;  %v541_v9 = vshrl.u32 %v3516_v58, 16 }
  0xd9   : > { %2522 = vmatpush3.bf16.msra.mxu0 %v2820_v28  ;;  %v1506_v28 = vrot.slane %v3535_v8, 3 }
  0xda   : > { %2523 = vmatprep.subr.bf16.mxu0 %v2822_v30  ;;  %v3555_v30 = vld [vmem:[#allocation2 + $0x18] ss:$0 sps:$4 sm:$0x11]   ;;  %v3557_v31 = vrot.slane %v541_v9, 1 }
  0xdd   : > { %2524 = vmatpush3.bf16.msra.mxu0 %v2824_v32  ;;  %v3559_v32 = vrot.slane %v544_v10, 2 }
  0xde   : > { %2525 = vmatprep.subr.bf16.mxu0 %v2826_v33  ;;  %v1495_v33 = vshll.u32 %v3535_v8, 16 }
  0xe1   : > { %2526 = vmatpush3.bf16.msra.mxu0 %v2828_v36  ;;  %v2831_v36 = vld [vmem:[#allocation9 + $0xa8] sm:$0xff]  }
  0xe2   : > { %2527 = vmatprep.subr.bf16.mxu0 %v2830_v35  ;;  %2510 = vmatpush3.bf16.msra.mxu1 %v2831_v36 }
  0xe3   : > { %2511 = vmatprep.subr.bf16.mxu1 %v2833_v56  ;;  %v2834_v56 = vld [vmem:[#allocation9 + $0x60] sm:$0xff]  }
  0xe5   : > { %2528 = vmatpush3.bf16.msra.mxu0 %v2832_v41 }
  0xe6   : > { %2529 = vmatprep.subr.bf16.mxu0 %v2834_v56 }
 0x1ab   : > { %v454_v45 = vpop.f32.mrb[0].mxu0 }
 0x1ac   : > { %v455_v47 = vadd.f32 %v2328_v43, %v454_v45  ;;  %v2636_v48 = vpop.f32.mrb[1].mxu0  ;;  %v3571_v45 = vrot.slane %v1464_v24, 1 }
 0x1ad   : > { %v457_v51 = vpop.f32.mrb[2].mxu0  ;;  %v3578_v48 = vld [vmem:[#allocation2 + $0x8] ss:$0 sps:$4 sm:$0x77]  }
 0x1ae   : > { %v2480_v53 = vpack.c.bf16 %v455_v47, %v455_v47  ;;  %v458_v54 = vadd.f32 %v2328_v43, %v457_v51  ;;  %v2637_v55 = vpop.f32.mrb[3].mxu0  ;;  %v3585_v51 = vrot.slane %v1492_v29, 2  ;;  %v579_v9 = vshrl.u32 %v3578_v48, 16 }
 0x1af   : > { %v1525_v55 = vshll.u32 %v3544_v19, 16  ;;  %v582_v10 = vshll.u32 %v3578_v48, 16 }
 0x1b0   : > { %v475_v60 = vrot.slane %v2480_v53, 6  ;;  %v2481_v61 = vpack.c.bf16 %v458_v54, %v458_v54  ;;  %v3590_v53 = vrot.slane %v1495_v33, 3  ;;  %v581_v18 = vrot.slane %v579_v9, 2 }
 0x1b2   : > { %v476_v5 = vrot.slane %v475_v60, 4  ;;  %484 = vst.msk [vmem:[#allocation2 + $0x8] sm:$0xc] %vm483_vm3, %v475_v60  ;;  %v477_v6 = vrot.slane %v2481_v61, 6  ;;  %v577_v61 = vor.u32 %v3520_v62, %v3513_v57  ;;  %v547_v62 = vor.u32 %v3559_v32, %v3557_v31  ;;  %v1724_v31 = vld [vmem:[#allocation2 + $0x10] sm:$0xc] }
 0x1b3   : > { %vm627_vm3 = vcmask 785408  }
 0x1b4   : > { %v478_v15 = vsel %vm474_vm9, %v476_v5, %v477_v6  ;;  %v479_v17 = vrot.slane %v477_v6, 4  ;;  %v3598_v5 = vrot.slane %v1522_v40, 3 }
 0x1b5   : > { %485 = vst.msk [vmem:[#allocation2 + $0xc] sm:$0xf] %vm462_vm1, %v478_v15  ;;  %vm621_vm1 = vcmask 261120  }
 0x1b6   : > { %486 = vst.msk [vmem:[#allocation2 + $0x10] sm:$0x3] %vm465_vm2, %v479_v17  ;;  %vm624_vm2 = vcmask 523264  }
 0x1b9   : > { %v3569_v43 = vld [vmem:[#allocation2 + $0x8] sm:$0xf] }
 0x1ba   : > { %v3576_v47 = vcombine.low %v676_v20, %v3569_v43  ;;  %v2350_v49 = vcombine.low %v672_v21, %v3569_v43  ;;  %v3583_v50 = vcombine.low %v3490_v12, %v3569_v43  ;;  %v3588_v52 = vcombine.low %v674_v26, %v3569_v43 }
 0x1bb   : > { %v609_v12 = vor.u32 %v3533_v7, %v3526_v2  ;;  %v584_v20 = vrot.slane %v582_v10, 3 }
 0x1bc   : > { %v2775_v60 = vld [vmem:[#allocation2 + $0xc] ss:$0 sps:$4 sm:$0x77]   ;;  %v757_v6 = vrot.slane %v3576_v47, 3  ;;  %v683_v11 = vshrl.u32 %v3583_v50, 16  ;;  %v685_v17 = vshll.u32 %v3583_v50, 16 }
 0x1bd   : > { %v758_v14 = vrot.slane %v2775_v60, 3  ;;  %v2779_v15 = vld [vmem:[#allocation2 + $0xc] ss:$0 sps:$4 sm:$0x11]   ;;  %v708_v57 = vshrl.u32 %v2350_v49, 16  ;;  %v711_v21 = vshll.u32 %v2350_v49, 16  ;;  %v585_v35 = vor.u32 %v584_v20, %v581_v18 }
 0x1be   : > { %v736_v24 = vshrl.u32 %v3588_v52, 16  ;;  %v700_v26 = vrot.slane %v2779_v15, 1  ;;  %v687_v29 = vrot.slane %v685_v17, 1  ;;  %v690_v33 = vshll.u32 %v2779_v15, 16  ;;  %v3613_v54 = vld [vmem:[#allocation2 + $0xc] sm:$0xf] }
 0x1bf   : > { %v759_v25 = vsel %vm592_vm10, %v757_v6, %v758_v14  ;;  %v3609_v34 = vld [vmem:[#allocation2 + $0xc] ss:$0 sps:$4 sm:$0x33]   ;;  %v699_v36 = vrot.slane %v2350_v49, 1  ;;  %v710_v40 = vrot.slane %v708_v57, 1  ;;  %v713_v41 = vrot.slane %v711_v21, 2 }
 0x1c0   : > { %760 = vrot.lane.b32.xlu1 %v759_v25, %s3167_s19  ;;  %v688_v9 = vor.u32 %v687_v29, %v683_v11  ;;  %v716_v10 = vshrl.u32 %v3609_v34, 16  ;;  %v738_v0 = vrot.slane %v736_v24, 2  ;;  %v555_v6 = vor.u32 %v3564_v38, %v3562_v37  ;;  %v2835_v49 = vld [vmem:[#allocation9 + $0xb0] sm:$0xff]   ;;  %v2836_v24 = vld [vmem:[#allocation9 + $0x20] sm:$0xff]   ;;  %v2837_v29 = vld [vmem:[#allocation9 + $0xf8] sm:$0xff]  }
 0x1c1   : > { %v586_v14 = vsel %vm569_vm11, %v577_v61, %v585_v35  ;;  %v692_v15 = vrot.slane %v690_v33, 1  ;;  %v719_v17 = vshll.u32 %v3609_v34, 16  ;;  %v739_v18 = vshll.u32 %v3588_v52, 16  ;;  %2512 = vmatpush3.bf16.msra.mxu1 %v2835_v49  ;;  %2530 = vmatpush3.bf16.msra.mxu0 %v2836_v24  ;;  %v2838_v49 = vld [vmem:[#allocation9 + $0x68] sm:$0xff]  }
 0x1c2   : > { %587 = vrot.lane.b32.xlu0 %v586_v14, %s3166_s28  ;;  %v701_v11 = vsel %vm530_vm12, %v699_v36, %v700_v26  ;;  %v718_v57 = vrot.slane %v716_v10, 1  ;;  %v744_v20 = vshrl.u32 %v2775_v60, 16  ;;  %v747_v21 = vshll.u32 %v2775_v60, 16  ;;  %v3629_v36 = vld [vmem:[#allocation2 + $0x18] ss:$0 sps:$4 sm:$0x33]   ;;  %2513 = vmatprep.subr.bf16.mxu1 %v2837_v29 }
 0x1c3   : > { %v721_v37 = vrot.slane %v719_v17, 2  ;;  %v741_v38 = vrot.slane %v739_v18, 3  ;;  %v2355_v61 = vcombine.low %v3613_v54, %v3613_v54  ;;  %v766_v25 = vshrl.u32 %v3576_v47, 16  ;;  %v3632_v18 = vld [vmem:[#allocation2 + $0xc] sm:$0xf]  ;;  %2531 = vmatprep.subr.bf16.mxu0 %v2838_v49 }
 0x1c4   : > { %702 = vrot.lane.b32.xlu1 %v701_v11, %s3167_s19  ;;  %v746_v33 = vrot.slane %v744_v20, 2  ;;  %v749_v35 = vrot.slane %v747_v21, 3  ;;  %v769_v26 = vshll.u32 %v3576_v47, 16  ;;  %v2347_v60 = vcombine.low %v3569_v43, %v3569_v43  ;;  %v3640_v24 = vld [vmem:[#allocation2 + $0x10] ss:$0 sps:$4 sm:$0x11]  }
 0x1c5   : > { %v693_v56 = vsel %vm512_vm6, %v688_v9, %v692_v15  ;;  %v714_v10 = vor.u32 %v713_v41, %v710_v40  ;;  %v722_v14 = vor.u32 %v721_v37, %v718_v57  ;;  %v774_v17 = vshrl.u32 %v2355_v61, 16  ;;  %v1108_v57 = vld [vmem:[#allocation2 + $0x8] sm:$0xe]  ;;  %v3675_v49 = vld [vmem:[#allocation2 + $0x14] sm:$0xf] }
 0x1c6   : > { %694 = vrot.lane.b32.xlu0 %v693_v56, %s3166_s28  ;;  %v742_v11 = vor.u32 %v741_v38, %v738_v0  ;;  %v750_v20 = vor.u32 %v749_v35, %v746_v33  ;;  %v533_v47 = vsel %vm530_vm12, %v531_v22, %v532_v23  ;;  %v777_v21 = vshll.u32 %v2355_v61, 16  ;;  %v2839_v37 = vld [vmem:[#allocation9 + $0xb8] sm:$0xff]   ;;  %v3651_v23 = vld [vmem:[#allocation2 + $0x10] sm:$0xf]  ;;  %v2840_v56 = vld [vmem:[#allocation9 + $0x28] sm:$0xff]  }
 0x1c7   : > { %v723_v40 = vsel %vm539_vm13, %v714_v10, %v722_v14  ;;  %v768_v41 = vrot.slane %v766_v25, 3  ;;  %v771_v9 = vrot.slane %v769_v26, 4  ;;  %v776_v15 = vrot.slane %v774_v17, 3  ;;  %v1415_v38 = vld [vmem:[#allocation2 + $0xc] sm:$0xe]  ;;  %2514 = vmatpush3.bf16.msra.mxu1 %v2839_v37  ;;  %v2841_v10 = vld [vmem:[#allocation9 + $0x70] sm:$0xff]   ;;  %2532 = vmatpush3.bf16.msra.mxu0 %v2840_v56 }
 0x1c8   : > { %724 = vrot.lane.b32.xlu1 %v723_v40, %s3168_s20  ;;  %v779_v0 = vrot.slane %v777_v21, 4  ;;  %v556_v16 = vsel %vm539_vm13, %v547_v62, %v555_v6  ;;  %v3649_v58 = vcombine.low %v1108_v57, %v3632_v18  ;;  %v611_v22 = vshrl.u32 %v2347_v60, 16  ;;  %v1105_v29 = vld [vmem:[#allocation2 + $0x8] sm:$0xf]  ;;  %2533 = vmatprep.subr.bf16.mxu0 %v2841_v10 }
 0x1c9   : > { %v751_v61 = vsel %vm569_vm11, %v742_v11, %v750_v20  ;;  %v614_v25 = vshll.u32 %v2347_v60, 16  ;;  %v3658_v35 = vrot.slane %v1525_v55, 4  ;;  %v3662_v62 = vcombine.low %v1105_v29, %v3632_v18  ;;  %v3667_v60 = vld [vmem:[#allocation2 + $0x18] ss:$0 sps:$4 sm:$0x77]   ;;  %v2842_v20 = vld [vmem:[#allocation9 + $0x140] sm:$0xff]  }
 0x1ca   : > { %752 = vrot.lane.b32.xlu0 %v751_v61, %s3166_s28  ;;  %v780_v32 = vor.u32 %v779_v0, %v776_v15  ;;  %v772_v19 = vor.u32 %v771_v9, %v768_v41  ;;  %v594_v55 = vrot.slane %v3578_v48, 3  ;;  %v3671_v14 = vcombine.low %v1415_v38, %v3651_v23  ;;  %v3673_v17 = vld [vmem:[#allocation2 + $0x10] ss:$0 sps:$4 sm:$0x77]   ;;  %v2843_v48 = vld [vmem:[#allocation9 + $0x30] sm:$0xff]   ;;  %2543 = vmatprep.subr.bf16.mxu1 %v2842_v20 }
 0x1cb   : > { %v1140_v21 = vrot.slane %v3649_v58, 1  ;;  %v1141_v40 = vrot.slane %v3640_v24, 1  ;;  %v613_v15 = vrot.slane %v611_v22, 3  ;;  %v616_v41 = vrot.slane %v614_v25, 4  ;;  %v1112_v61 = vld [vmem:[#allocation2 + $0x8] sm:$0x8]  ;;  %2534 = vmatpush3.bf16.msra.mxu0 %v2843_v48 }
 0x1cc   : > { %534 = vrot.lane.b32.xlu1 %v533_v47, %s3167_s19  ;;  %v781_v9 = vsel %vm601_vm14, %v772_v19, %v780_v32  ;;  %v1126_v57 = vshll.u32 %v3662_v62, 16  ;;  %v3683_v37 = vld [vmem:[#allocation2 + $0x10] ss:$0 sps:$4 sm:$0x33]   ;;  %v2845_v47 = vld [vmem:[#allocation9 + $0x78] sm:$0xff]   ;;  %v3690_v22 = vcombine.low %v1724_v31, %v3675_v49  ;;  %v595_v56 = vsel %vm592_vm10, %v593_v63, %v594_v55 }
 0x1cd   : > { %v1447_v10 = vrot.slane %v3671_v14, 1  ;;  %v3700_v19 = vcombine.low %v1112_v61, %v3632_v18  ;;  %v1419_v31 = vld [vmem:[#allocation2 + $0xc] sm:$0x8]  ;;  %v1110_v0 = vld [vmem:[#allocation2 + $0x8] sm:$0xc]  ;;  %v1142_v6 = vsel %vm530_vm12, %v1140_v21, %v1141_v40  ;;  %v617_v20 = vor.u32 %v616_v41, %v613_v15  ;;  %2535 = vmatprep.subr.bf16.mxu0 %v2845_v47 }
 0x1ce   : > { %782 = vrot.lane.b32.xlu0 %v781_v9, %s3168_s20  ;;  %v1199_v9 = vrot.slane %v3673_v17, 3  ;;  %v1124_v11 = vshrl.u32 %v3662_v62, 16  ;;  %v3707_v44 = vcombine.low %v1110_v0, %v3632_v18  ;;  %v1412_v63 = vld [vmem:[#allocation2 + $0xc] sm:$0xf]  ;;  %v3709_v55 = vld [vmem:[#allocation2 + $0x10] sm:$0xf] }
 0x1cf   : > { %v2847_v61 = vld [vmem:[#allocation9 + $0x38] sm:$0xff]   ;;  %v1128_v26 = vrot.slane %v1126_v57, 1  ;;  %v1149_v38 = vshrl.u32 %v3649_v58, 16  ;;  %v1152_v33 = vshll.u32 %v3649_v58, 16  ;;  %v2850_v21 = vld [vmem:[#allocation9 + $0x1c0] sm:$0xff]   ;;  %v1131_v62 = vshll.u32 %v3640_v24, 16 }
 0x1d0   : > { %557 = vrot.lane.b32.xlu1 %v556_v16, %s3168_s20  ;;  %v1157_v16 = vshrl.u32 %v3683_v37, 16  ;;  %v1160_v40 = vshll.u32 %v3683_v37, 16  ;;  %v1177_v15 = vshrl.u32 %v3707_v44, 16  ;;  %v1180_v41 = vshll.u32 %v3707_v44, 16  ;;  %2536 = vmatpush3.bf16.msra.mxu0 %v2847_v61  ;;  %v1417_v32 = vld [vmem:[#allocation2 + $0xc] sm:$0xc] }
 0x1d1   : > { %v1449_v48 = vsel %vm530_vm12, %v1447_v10, %v1448_v27  ;;  %v1185_v58 = vshrl.u32 %v3673_v17, 16  ;;  %v1188_v57 = vshll.u32 %v3673_v17, 16  ;;  %v2414_v0 = vcombine.low %v1412_v63, %v3651_v23  ;;  %2565 = vmatprep.subr.bf16.mxu0 %v2850_v21 }
 0x1d2   : > { %596 = vrot.lane.b32.xlu0 %v595_v56, %s3167_s19  ;;  %v618_v24 = vsel %vm601_vm14, %v609_v12, %v617_v20  ;;  %v1198_v47 = vrot.slane %v3700_v19, 3  ;;  %v3732_v56 = vcombine.low %v1419_v31, %v3651_v23  ;;  %v2396_v1 = vcombine.low %v3709_v55, %v3709_v55 }
 0x1d3   : > { %v1129_v27 = vor.u32 %v1128_v26, %v1124_v11  ;;  %v1151_v17 = vrot.slane %v1149_v38, 1  ;;  %v1154_v10 = vrot.slane %v1152_v33, 2  ;;  %v1159_v63 = vrot.slane %v1157_v16, 1 }
 0x1d4   : > { %1143 = vrot.lane.b32.xlu1 %v1142_v6, %s3167_s19  ;;  %v1162_v2 = vrot.slane %v1160_v40, 2  ;;  %v1179_v7 = vrot.slane %v1177_v15, 2  ;;  %v1182_v12 = vrot.slane %v1180_v41, 3  ;;  %v1433_v6 = vshll.u32 %v2414_v0, 16 }
 0x1d5   : > { %v1133_v20 = vrot.slane %v1131_v62, 1  ;;  %v1187_v29 = vrot.slane %v1185_v58, 2  ;;  %v1190_v31 = vrot.slane %v1188_v57, 3  ;;  %v1207_v25 = vshrl.u32 %v3700_v19, 16 }
 0x1d6   : > { %619 = vrot.lane.b32.xlu0 %v618_v24, %s3168_s20  ;;  %v1210_v26 = vshll.u32 %v3700_v19, 16  ;;  %v1215_v11 = vshrl.u32 %v2396_v1, 16  ;;  %v1218_v33 = vshll.u32 %v2396_v1, 16  ;;  %v3741_v38 = vcombine.low %v1417_v32, %v3651_v23  ;;  %v1726_v19 = vld [vmem:[#allocation2 + $0x10] sm:$0x8] }
 0x1d7   : > { %v1200_v61 = vsel %vm592_vm10, %v1198_v47, %v1199_v9  ;;  %v1134_v16 = vsel %vm512_vm6, %v1129_v27, %v1133_v20  ;;  %v1505_v21 = vrot.slane %v3732_v56, 3  ;;  %v1155_v62 = vor.u32 %v1154_v10, %v1151_v17  ;;  %v1719_v17 = vld [vmem:[#allocation2 + $0x10] sm:$0xf] }
 0x1d8   : > { %1450 = vrot.lane.b32.xlu1 %v1449_v48, %s3167_s19  ;;  %v1163_v40 = vor.u32 %v1162_v2, %v1159_v63  ;;  %v1183_v15 = vor.u32 %v1182_v12, %v1179_v7  ;;  %v1431_v41 = vshrl.u32 %v2414_v0, 16  ;;  %v1435_v48 = vrot.slane %v1433_v6, 1  ;;  %v1722_v20 = vld [vmem:[#allocation2 + $0x10] sm:$0xe] }
 0x1d9   : > { %v1191_v58 = vor.u32 %v1190_v31, %v1187_v29  ;;  %v1209_v57 = vrot.slane %v1207_v25, 3  ;;  %v1456_v32 = vshrl.u32 %v3671_v14, 16  ;;  %v1459_v24 = vshll.u32 %v3671_v14, 16 }
 0x1da   : > { %1201 = vrot.lane.b32.xlu0 %v1200_v61, %s3167_s19  ;;  %v1212_v9 = vrot.slane %v1210_v26, 4  ;;  %v1217_v47 = vrot.slane %v1215_v11, 3  ;;  %v1220_v1 = vrot.slane %v1218_v33, 4  ;;  %v1484_v27 = vshrl.u32 %v3741_v38, 16 }
 0x1db   : > { %v1507_v0 = vsel %vm592_vm10, %v1505_v21, %v1506_v28  ;;  %v1487_v10 = vshll.u32 %v3741_v38, 16  ;;  %v1791_v25 = vshrl.u32 %v3690_v22, 16  ;;  %v3757_v29 = vcombine.low %v1726_v19, %v3675_v49 }
 0x1dc   : > { %1135 = vrot.lane.b32.xlu1 %v1134_v16, %s3166_s28  ;;  %v1164_v14 = vsel %vm539_vm13, %v1155_v62, %v1163_v40  ;;  %v1436_v63 = vor.u32 %v1435_v48, %v1431_v41  ;;  %v1794_v2 = vshll.u32 %v3690_v22, 16  ;;  %v3991_v7 = vshrl.u32 %v3667_v60, 16 }
 0x1dd   : > { %v1192_v8 = vsel %vm569_vm11, %v1183_v15, %v1191_v58  ;;  %v1458_v28 = vrot.slane %v1456_v32, 1  ;;  %v1461_v6 = vrot.slane %v1459_v24, 2  ;;  %v2439_v31 = vcombine.low %v1719_v17, %v3675_v49 }
 0x1de   : > { %1508 = vrot.lane.b32.xlu0 %v1507_v0, %s3167_s19  ;;  %v3764_v12 = vrot.slane %v3991_v7, 2  ;;  %v1213_v26 = vor.u32 %v1212_v9, %v1209_v57  ;;  %v1221_v11 = vor.u32 %v1220_v1, %v1217_v47  ;;  %v1486_v33 = vrot.slane %v1484_v27, 2  ;;  %v2812_v0 = vld [vmem:[#allocation2 + $0x18] ss:$0 sps:$4 sm:$0xff]  }
 0x1df   : > { %v1514_v61 = vshrl.u32 %v3732_v56, 16  ;;  %v1489_v16 = vrot.slane %v1487_v10, 3  ;;  %v1517_v21 = vshll.u32 %v3732_v56, 16  ;;  %v729_v62 = vrot.slane %v3588_v52, 2 }
 0x1e0   : > { %1165 = vrot.lane.b32.xlu1 %v1164_v14, %s3168_s20  ;;  %v730_v40 = vrot.slane %v3609_v34, 2  ;;  %v1441_v15 = vsel %vm512_vm6, %v1436_v63, %v3566_v39  ;;  %v2441_v41 = vcombine.low %v1722_v20, %v3675_v49  ;;  %v2388_v48 = vcombine.low %v3569_v43, %v3613_v54 }
 0x1e1   : > { %v1170_v19 = vrot.slane %v3707_v44, 2  ;;  %v1462_v58 = vor.u32 %v1461_v6, %v1458_v28  ;;  %v1740_v57 = vshll.u32 %v2439_v31, 16  ;;  %v1171_v52 = vrot.slane %v3683_v37, 2 }
 0x1e2   : > { %1193 = vrot.lane.b32.xlu0 %v1192_v8, %s3166_s28  ;;  %v3781_v56 = vsel %vm562_vm15, %v729_v62, %v730_v40  ;;  %v1222_v34 = vsel %vm601_vm14, %v1213_v26, %v1221_v11  ;;  %v3992_v39 = vshll.u32 %v3667_v60, 16  ;;  %v2413_v49 = vcombine.low %v3632_v18, %v3709_v55  ;;  %v2887_v18 = vld [vmem:[#allocation9 + $0x258] sm:$0xff]  }
 0x1e3   : > { %v1477_v24 = vrot.slane %v3741_v38, 2  ;;  %v1490_v44 = vor.u32 %v1489_v16, %v1486_v33  ;;  %v1516_v9 = vrot.slane %v1514_v61, 3  ;;  %v1519_v47 = vrot.slane %v1517_v21, 4 }
 0x1e4   : > { %1442 = vrot.lane.b32.xlu1 %v1441_v15, %s3166_s28  ;;  %v1804_v32 = vrot.slane %v3992_v39, 3  ;;  %v3792_v1 = vsel %vm562_vm15, %v1170_v19, %v1171_v52  ;;  %v1754_v37 = vrot.slane %v2441_v41, 1  ;;  %v1793_v27 = vrot.slane %v1791_v25, 2 }
 0x1e5   : > { %v1796_v17 = vrot.slane %v1794_v2, 3  ;;  %v3993_v10 = vrot.slane %v3528_v3, 2  ;;  %v3994_v38 = vor.u32 %v3573_v46, %v3571_v45  ;;  %v1742_v7 = vrot.slane %v1740_v57, 1 }
 0x1e6   : > { %1223 = vrot.lane.b32.xlu0 %v1222_v34, %s3168_s20  ;;  %v1763_v8 = vshrl.u32 %v2441_v41, 16  ;;  %v1766_v28 = vshll.u32 %v2441_v41, 16  ;;  %v3995_v6 = vshll.u32 %v3555_v30, 16  ;;  %v3996_v2 = vshrl.u32 %v3629_v36, 16 }
 0x1e7   : > { %v3798_v14 = vsel %vm562_vm15, %v1477_v24, %v3993_v10  ;;  %v1471_v63 = vsel %vm539_vm13, %v1462_v58, %v3994_v38  ;;  %v3997_v3 = vshll.u32 %v3629_v36, 16  ;;  %v1821_v11 = vshrl.u32 %v3757_v29, 16 }
 0x1e8   : > { %1472 = vrot.lane.b32.xlu1 %v1471_v63, %s3168_s20  ;;  %v1747_v25 = vrot.slane %v3995_v6, 1  ;;  %v1773_v20 = vrot.slane %v3996_v2, 1  ;;  %v3998_v45 = vor.u32 %v3590_v53, %v3585_v51  ;;  %v1520_v33 = vor.u32 %v1519_v47, %v1516_v9 }
 0x1e9   : > { %v1776_v26 = vrot.slane %v3997_v3, 2  ;;  %v1738_v61 = vshrl.u32 %v2439_v31, 16  ;;  %v1824_v16 = vshll.u32 %v3757_v29, 16  ;;  %v1797_v21 = vor.u32 %v1796_v17, %v1793_v27  ;;  %v526_v27 = vpop.permute.xlu1 %525 }
 0x1ea   : > { %v1499_v46 = vsel %vm569_vm11, %v1490_v44, %v3998_v45  ;;  %v1805_v62 = vor.u32 %v1804_v32, %v3764_v12  ;;  %v1829_v40 = vshrl.u32 %v2812_v0, 16  ;;  %v1832_v15 = vshll.u32 %v2812_v0, 16 }
 0x1eb   : > { %1500 = vrot.lane.b32.xlu0 %v1499_v46, %s3166_s28  ;;  %v3999_v41 = vrot.slane %v3555_v30, 1  ;;  %v1743_v58 = vor.u32 %v1742_v7, %v1738_v61  ;;  %v1765_v57 = vrot.slane %v1763_v8, 1  ;;  %v1768_v51 = vrot.slane %v1766_v28, 2 }
 0x1ec   : > { %v4000_v53 = vor.u32 %v3658_v35, %v3598_v5  ;;  %v1777_v52 = vor.u32 %v1776_v26, %v1773_v20  ;;  %v1813_v34 = vrot.slane %v3667_v60, 3  ;;  %v1812_v12 = vrot.slane %v3757_v29, 3 }
 0x1ed   : > { %v1756_v19 = vsel %vm530_vm12, %v1754_v37, %v3999_v41  ;;  %v1823_v30 = vrot.slane %v1821_v11, 3  ;;  %v1826_v39 = vrot.slane %v1824_v16, 4  ;;  %v1831_v32 = vrot.slane %v1829_v40, 3  ;;  %v2844_v11 = vld [vmem:[#allocation9 + $0x100] sm:$0xff]   ;;  %v2848_v16 = vld [vmem:[#allocation9 + $0x108] sm:$0xff]   ;;  %v2851_v41 = vld [vmem:[#allocation9 + $0x110] sm:$0xff]  }
 0x1ee   : > { %1757 = vrot.lane.b32.xlu1 %v1756_v19, %s3167_s19  ;;  %v1529_v31 = vsel %vm601_vm14, %v1520_v33, %v4000_v53  ;;  %v1748_v24 = vsel %vm512_vm6, %v1743_v58, %v1747_v25  ;;  %v1769_v44 = vor.u32 %v1768_v51, %v1765_v57  ;;  %v1806_v9 = vsel %vm569_vm11, %v1797_v21, %v1805_v62  ;;  %v2852_v19 = vld [vmem:[#allocation9 + $0x180] sm:$0xff]   ;;  %v2853_v51 = vld [vmem:[#allocation9 + $0x158] sm:$0xff]   ;;  %v2854_v53 = vld [vmem:[#allocation9 + $0x1c8] sm:$0xff]  }
 0x1ef   : > { %1530 = vrot.lane.b32.xlu0 %v1529_v31, %s3168_s20  ;;  %v1834_v47 = vrot.slane %v1832_v15, 4  ;;  %v1814_v35 = vsel %vm592_vm10, %v1812_v12, %v1813_v34  ;;  %v1827_v60 = vor.u32 %v1826_v39, %v1823_v30  ;;  %v563_v2 = vrot.slane %v3504_v42, 2  ;;  %v2849_v42 = vld [vmem:[#allocation9 + $0x150] sm:$0xff]   ;;  %v2856_v34 = vld [vmem:[#allocation9 + $0x118] sm:$0xff]   ;;  %v2857_v12 = vld [vmem:[#allocation9 + $0x188] sm:$0xff]  }
 0x1f0   : > { %v1778_v5 = vsel %vm539_vm13, %v1769_v44, %v1777_v52  ;;  %v564_v20 = vrot.slane %v3518_v59, 2  ;;  %v623_v62 = vsel %vm621_vm1, %v3493_v13, %v526_v27  ;;  %v2858_v30 = vld [vmem:[#allocation9 + $0x160] sm:$0xff]   ;;  %v2859_v39 = vld [vmem:[#allocation9 + $0x1d0] sm:$0xff]   ;;  %v2438_v54 = vcombine.low %v3651_v23, %v3530_v4 }
 0x1f1   : > { %v1835_v37 = vor.u32 %v1834_v47, %v1831_v32  ;;  %v2860_v44 = vld [vmem:[#allocation9 + $0x120] sm:$0xff]   ;;  %v2862_v47 = vld [vmem:[#allocation9 + $0x168] sm:$0xff]   ;;  %v2884_v4 = vld [vmem:[#allocation9 + $0x250] sm:$0xff]  }
 0x1f2   : > { %1749 = vrot.lane.b32.xlu1 %v1748_v24, %s3166_s28 }
 0x1f3   : > { %1807 = vrot.lane.b32.xlu0 %v1806_v9, %s3166_s28  ;;  %v1836_v29 = vsel %vm601_vm14, %v1827_v60, %v1835_v37  ;;  %v2861_v9 = vld [vmem:[#allocation9 + $0x190] sm:$0xff]   ;;  %v2865_v37 = vld [vmem:[#allocation9 + $0x128] sm:$0xff]  }
 0x1f6   : > { %1779 = vrot.lane.b32.xlu1 %v1778_v5, %s3168_s20  ;;  %v2863_v5 = vld [vmem:[#allocation9 + $0x1d8] sm:$0xff]  }
 0x1f7   : > { %1815 = vrot.lane.b32.xlu0 %v1814_v35, %s3167_s19 }
 0x1fb   : > { %1837 = vrot.lane.b32.xlu0 %v1836_v29, %s3168_s20  ;;  %v2866_v29 = vld [vmem:[#allocation9 + $0x198] sm:$0xff]  }
 0x232   : > { %v761_v17 = vpop.permute.xlu1 %760 }
 0x234   : > { %v588_v0 = vpop.permute.xlu0 %587 }
 0x236   : > { %v703_v10 = vpop.permute.xlu1 %702 }
 0x238   : > { %v695_v38 = vpop.permute.xlu0 %694 }
 0x239   : > { %v785_v7 = vsel %vm621_vm1, %v3583_v50, %v695_v38  ;;  %v2846_v50 = vld [vmem:[#allocation9 + $0x148] sm:$0xff]  }
 0x23a   : > { %v725_v63 = vpop.permute.xlu1 %724  ;;  %v787_v25 = vsel %vm624_vm2, %v785_v7, %v703_v10  ;;  %v2869_v7 = vld [vmem:[#allocation9 + $0x130] sm:$0xff]  }
 0x23b   : > { %v789_v33 = vsel %vm627_vm3, %v787_v25, %v725_v63  ;;  %v2872_v25 = vld [vmem:[#allocation9 + $0x1e8] sm:$0xff]  }
 0x23c   : > { %v753_v8 = vpop.permute.xlu0 %752 }
 0x23d   : > { %v793_v28 = vsel %vm621_vm1, %v3781_v56, %v753_v8  ;;  %v565_v56 = vsel %vm562_vm15, %v563_v2, %v564_v20  ;;  %v2870_v8 = vld [vmem:[#allocation9 + $0x1a0] sm:$0xff]   ;;  %v2873_v20 = vld [vmem:[#allocation9 + $0x138] sm:$0xff]  }
 0x23e   : > { %v535_v6 = vpop.permute.xlu1 %534  ;;  %v795_v26 = vsel %vm624_vm2, %v793_v28, %v761_v17  ;;  %v633_v21 = vsel %vm621_vm1, %v565_v56, %v588_v0  ;;  %v2867_v17 = vld [vmem:[#allocation9 + $0x170] sm:$0xff]   ;;  %v2868_v0 = vld [vmem:[#allocation9 + $0x1e0] sm:$0xff]  }
 0x23f   : > { %v626_v58 = vsel %vm624_vm2, %v623_v62, %v535_v6  ;;  %v2871_v6 = vld [vmem:[#allocation9 + $0x178] sm:$0xff]   ;;  %v2881_v62 = vld [vmem:[#allocation9 + $0x248] sm:$0xff]  }
 0x240   : > { %v783_v3 = vpop.permute.xlu0 %782 }
 0x241   : > { %v797_v45 = vsel %vm627_vm3, %v795_v26, %v783_v3  ;;  %v2874_v3 = vld [vmem:[#allocation9 + $0x1a8] sm:$0xff]  }
 0x242   : > { %959 = vmatprep.mubr.bf16.mxu1 %v797_v45  ;;  %v558_v46 = vpop.permute.xlu1 %557  ;;  %v2876_v45 = vld [vmem:[#allocation9 + $0x240] sm:$0xff]  }
 0x243   : > { %960 = vmatmul.mubr.bf16.vlgmr.msra.gmra.mrb[0].mxu1 %v789_v33  ;;  %v629_v31 = vsel %vm627_vm3, %v626_v58, %v558_v46 }
 0x244   : > { %2544 = vmatpush3.bf16.msra.mxu1 %v2844_v11  ;;  %v597_v61 = vpop.permute.xlu0 %596  ;;  %v2875_v11 = vld [vmem:[#allocation9 + $0x1f0] sm:$0xff]  }
 0x245   : > { %2545 = vmatprep.subr.bf16.mxu1 %v2846_v50  ;;  %v635_v40 = vsel %vm624_vm2, %v633_v21, %v597_v61  ;;  %v2878_v61 = vld [vmem:[#allocation9 + $0x1b0] sm:$0xff]  }
 0x246   : > { %v3851_v59 = vpop.permute.xlu1 %1143 }
 0x248   : > { %2546 = vmatpush3.bf16.msra.mxu1 %v2848_v16  ;;  %v620_v15 = vpop.permute.xlu0 %619  ;;  %v2879_v16 = vld [vmem:[#allocation9 + $0x200] sm:$0xff]  }
 0x249   : > { %v637_v57 = vsel %vm627_vm3, %v635_v40, %v620_v15  ;;  %2547 = vmatprep.subr.bf16.mxu1 %v2849_v42  ;;  %v1784_v42 = vrot.slane %v3690_v22, 2 }
 0x24a   : > { %1096 = vmatprep.mubr.bf16.mxu0 %v637_v57  ;;  %v3860_v52 = vpop.permute.xlu1 %1450 }
 0x24b   : > { %1097 = vmatmul.mubr.bf16.vlgmr.msra.gmra.mrb[4].mxu0 %v629_v31  ;;  %v2885_v31 = vld [vmem:[#allocation9 + $0x210] sm:$0xff]  }
 0x24c   : > { %2548 = vmatpush3.bf16.msra.mxu1 %v2851_v41  ;;  %2566 = vmatpush3.bf16.msra.mxu0 %v2852_v19  ;;  %v1202_v13 = vpop.permute.xlu0 %1201  ;;  %v2883_v41 = vld [vmem:[#allocation9 + $0x208] sm:$0xff]  }
 0x24d   : > { %2549 = vmatprep.subr.bf16.mxu1 %v2853_v51  ;;  %2567 = vmatprep.subr.bf16.mxu0 %v2854_v53 }
 0x24e   : > { %v1136_v32 = vpop.permute.xlu1 %1135 }
 0x24f   : > { %v1227_v50 = vsel %vm621_vm1, %v2388_v48, %v1136_v32  ;;  %v2880_v48 = vld [vmem:[#allocation9 + $0x1f8] sm:$0xff]   ;;  %v2889_v32 = vld [vmem:[#allocation11 + $0x8] sm:$0xff]  }
 0x250   : > { %2550 = vmatpush3.bf16.msra.mxu1 %v2856_v34  ;;  %2568 = vmatpush3.bf16.msra.mxu0 %v2857_v12  ;;  %v1509_v24 = vpop.permute.xlu0 %1508  ;;  %v1229_v21 = vsel %vm624_vm2, %v1227_v50, %v3851_v59  ;;  %v2882_v59 = vld [vmem:[#allocation9 + $0x1b8] sm:$0xff]  }
 0x251   : > { %2551 = vmatprep.subr.bf16.mxu1 %v2858_v30  ;;  %2569 = vmatprep.subr.bf16.mxu0 %v2859_v39  ;;  %v4001_v30 = vmov 0.0   ;;  %v2888_v39 = vld [vmem:[#allocation9 + $0x218] sm:$0xff]  }
 0x252   : > { %v1166_v35 = vpop.permute.xlu1 %1165 }
 0x253   : > { %v1231_v40 = vsel %vm627_vm3, %v1229_v21, %v1166_v35  ;;  %v2894_v35 = vld [vmem:[#allocation9 + $0x228] sm:$0xff]  }
 0x254   : > { %2552 = vmatpush3.bf16.msra.mxu1 %v2860_v44  ;;  %2570 = vmatpush3.bf16.msra.mxu0 %v2861_v9  ;;  %v1194_v60 = vpop.permute.xlu0 %1193  ;;  %v2890_v44 = vld [vmem:[#allocation9 + $0x260] sm:$0xff]  }
 0x255   : > { %v1235_v27 = vsel %vm621_vm1, %v3792_v1, %v1194_v60  ;;  %2553 = vmatprep.subr.bf16.mxu1 %v2862_v47  ;;  %2571 = vmatprep.subr.bf16.mxu0 %v2863_v5  ;;  %v2891_v9 = vld [vmem:[#allocation9 + $0x220] sm:$0xff]   ;;  %v2892_v47 = vld [vmem:[#allocation11 + $0x10] sm:$0xff]   ;;  %v2893_v5 = vld [vmem:[#allocation9 + $0x268] sm:$0xff]  }
 0x256   : > { %v1443_v10 = vpop.permute.xlu1 %1442  ;;  %v1237_v63 = vsel %vm624_vm2, %v1235_v27, %v1202_v13  ;;  %v2886_v13 = vld [vmem:[#allocation11] sm:$0xff]   ;;  %v2895_v60 = vld [vmem:[#allocation11 + $0x18] sm:$0xff]   ;;  %v2896_v27 = vld [vmem:[#allocation9 + $0x270] sm:$0xff]  }
 0x257   : > { %v1534_v23 = vsel %vm621_vm1, %v2413_v49, %v1443_v10 }
 0x258   : > { %2554 = vmatpush3.bf16.msra.mxu1 %v2865_v37  ;;  %2572 = vmatpush3.bf16.msra.mxu0 %v2866_v29  ;;  %v1224_v38 = vpop.permute.xlu0 %1223  ;;  %v1536_v12 = vsel %vm624_vm2, %v1534_v23, %v3860_v52  ;;  %v2904_v37 = vld [vmem:[%s3456_s15] sm:$0xff]  }
 0x259   : > { %2555 = vmatprep.subr.bf16.mxu1 %v2867_v17  ;;  %v1239_v28 = vsel %vm627_vm3, %v1237_v63, %v1224_v38  ;;  %2573 = vmatprep.subr.bf16.mxu0 %v2868_v0  ;;  %v2027_v29 = vshrl.u32 %v2904_v37, 16  ;;  %v2897_v17 = vld [vmem:[#allocation9 + $0x230] sm:$0xff]   ;;  %v2898_v0 = vld [vmem:[#allocation11 + $0x20] sm:$0xff]   ;;  %v2030_v38 = vshll.u32 %v2904_v37, 16  ;;  %v2899_v63 = vld [vmem:[#allocation9 + $0x278] sm:$0xff]  }
 0x25a   : > { %1401 = vmatprep.mubr.bf16.mxu1 %v1239_v28  ;;  %v1473_v1 = vpop.permute.xlu1 %1472 }
 0x25b   : > { %v1538_v55 = vsel %vm627_vm3, %v1536_v12, %v1473_v1  ;;  %v2029_v10 = vrot.slane %v2027_v29, 7 }
 0x25c   : > { %2556 = vmatpush3.bf16.msra.mxu1 %v2869_v7  ;;  %2574 = vmatpush3.bf16.msra.mxu0 %v2870_v8  ;;  %v2900_v7 = vld [vmem:[#allocation9 + $0x238] sm:$0xff]   ;;  %v2901_v8 = vld [vmem:[#allocation11 + $0x28] sm:$0xff]  }
 0x25d   : > { %v1501_v2 = vpop.permute.xlu0 %1500  ;;  %2557 = vmatprep.subr.bf16.mxu1 %v2871_v6  ;;  %2575 = vmatprep.subr.bf16.mxu0 %v2872_v25  ;;  %v2032_v28 = vor.u32 %v2030_v38, %v2029_v10  ;;  %v2038_v6 = vrot.slane %v2030_v38, 1  ;;  %v2902_v25 = vld [vmem:[#allocation11 + $0x30] sm:$0xff]  }
 0x25e   : > { %v1542_v26 = vsel %vm621_vm1, %v3798_v14, %v1501_v2  ;;  %v1785_v14 = vrot.slane %v3629_v36, 2 }
 0x25f   : > { %v1544_v56 = vsel %vm624_vm2, %v1542_v26, %v1509_v24  ;;  %v2039_v2 = vor.u32 %v2038_v6, %v2027_v29 }
 0x260   : > { %v1758_v46 = vpop.permute.xlu1 %1757  ;;  %2558 = vmatpush3.bf16.msra.mxu1 %v2873_v20  ;;  %2576 = vmatpush3.bf16.msra.mxu0 %v2874_v3  ;;  %v1786_v19 = vsel %vm562_vm15, %v1784_v42, %v1785_v14  ;;  %v2903_v3 = vld [vmem:[#allocation11 + $0x38] sm:$0xff]  }
 0x261   : > { %v1531_v33 = vpop.permute.xlu0 %1530  ;;  %2577 = vmatprep.subr.bf16.mxu0 %v2875_v11  ;;  %2587 = vmatprep.subr.bf16.mxu1 %v2876_v45  ;;  %v2043_v26 = vsel %vm2042_vm8, %v2039_v2, 4286644096 }
 0x262   : > { %v1546_v43 = vsel %vm627_vm3, %v1544_v56, %v1531_v33 }
 0x263   : > { %1708 = vmatprep.mubr.bf16.mxu0 %v1546_v43  ;;  %1402 = vmatmul.mubr.bf16.vlgmr.msra.gmra.mrb[4].mxu1 %v1231_v40 }
 0x264   : > { %v1750_v15 = vpop.permute.xlu1 %1749  ;;  %2578 = vmatpush3.bf16.msra.mxu0 %v2878_v61  ;;  %2588 = vmatpush3.bf16.msra.mxu1 %v2879_v16 }
 0x265   : > { %v1841_v22 = vsel %vm621_vm1, %v2438_v54, %v1750_v15  ;;  %v1808_v58 = vpop.permute.xlu0 %1807  ;;  %2579 = vmatprep.subr.bf16.mxu0 %v2880_v48  ;;  %2589 = vmatprep.subr.bf16.mxu1 %v2881_v62 }
 0x266   : > { %v1843_v36 = vsel %vm624_vm2, %v1841_v22, %v1758_v46  ;;  %v1849_v53 = vsel %vm621_vm1, %v1786_v19, %v1808_v58 }
 0x268   : > { %v1780_v57 = vpop.permute.xlu1 %1779  ;;  %2580 = vmatpush3.bf16.msra.mxu0 %v2882_v59  ;;  %2590 = vmatpush3.bf16.msra.mxu1 %v2883_v41 }
 0x269   : > { %v3889_v51 = vsel %vm627_vm3, %v1843_v36, %v1780_v57  ;;  %v1816_v34 = vpop.permute.xlu0 %1815  ;;  %2591 = vmatprep.subr.bf16.mxu1 %v2884_v4  ;;  %2638 = vmatprep.subr.bf16.mxu0 %v4001_v30 }
 0x26a   : > { %v1851_v49 = vsel %vm624_vm2, %v1849_v53, %v1816_v34 }
 0x26b   : > { %1709 = vmatmul.mubr.bf16.vlgmr.msra.gmra.mrb[8].mxu0 %v1538_v55 }
 0x26c   : > { %2592 = vmatpush3.bf16.msra.mxu1 %v2885_v31  ;;  %2639 = vmatpush3.bf16.msra.mxu0 %v2886_v13 }
 0x26d   : > { %v1838_v24 = vpop.permute.xlu0 %1837  ;;  %2593 = vmatprep.subr.bf16.mxu1 %v2887_v18  ;;  %2640 = vmatprep.subr.bf16.mxu0 %v4001_v30 }
 0x26e   : > { %v1853_v52 = vsel %vm627_vm3, %v1851_v49, %v1838_v24  ;;  %2654 = vmatprep.mubr.msk.bf16.mxu0 %vm3164_vm0, %v4001_v30  ;;  %vm2034_vm0 = vcmask 1040384  }
 0x26f   : > { %2015 = vmatprep.mubr.bf16.mxu1 %v1853_v52  ;;  %vm2036_vm5 = vmand %vm2034_vm0, %vm2035_vm4  ;;  %v2471_v52 = vld [vmem:[#allocation12] ss:$0 sm:$0xff] }
 0x270   : > { %2594 = vmatpush3.bf16.msra.mxu1 %v2888_v39  ;;  %2641 = vmatpush3.bf16.msra.mxu0 %v2889_v32  ;;  %v2037_v1 = vsel %vm2036_vm5, 4286644096, %v2032_v28 }
 0x271   : > { %2595 = vmatprep.subr.bf16.mxu1 %v2890_v44  ;;  %2642 = vmatprep.subr.bf16.mxu0 %v4001_v30  ;;  %v2044_v20 = vmax.bf16 %v2904_v37, %v2037_v1 }
 0x273   : > { %v2045_v11 = vmax.bf16 %v2044_v20, %v2043_v26 }
 0x274   : > { %2596 = vmatpush3.bf16.msra.mxu1 %v2891_v9  ;;  %2643 = vmatpush3.bf16.msra.mxu0 %v2892_v47 }
 0x275   : > { %2597 = vmatprep.subr.bf16.mxu1 %v2893_v5  ;;  %2644 = vmatprep.subr.bf16.mxu0 %v4001_v30 }
 0x278   : > { %2598 = vmatpush3.bf16.msra.mxu1 %v2894_v35  ;;  %2645 = vmatpush3.bf16.msra.mxu0 %v2895_v60 }
 0x279   : > { %2599 = vmatprep.subr.bf16.mxu1 %v2896_v27  ;;  %2646 = vmatprep.subr.bf16.mxu0 %v4001_v30 }
 0x27c   : > { %2600 = vmatpush3.bf16.msra.mxu1 %v2897_v17  ;;  %2647 = vmatpush3.bf16.msra.mxu0 %v2898_v0 }
 0x27d   : > { %2601 = vmatprep.subr.bf16.mxu1 %v2899_v63  ;;  %2648 = vmatprep.subr.bf16.mxu0 %v4001_v30 }
 0x280   : > { %2602 = vmatpush3.bf16.msra.mxu1 %v2900_v7  ;;  %2649 = vmatpush3.bf16.msra.mxu0 %v2901_v8 }
 0x281   : > { %2650 = vmatprep.subr.bf16.mxu0 %v4001_v30 }
 0x283   : > { %2016 = vmatmul.mubr.bf16.vlgmr.msra.gmra.mrb[8].mxu1 %v3889_v51 }
 0x284   : > { %2651 = vmatpush3.bf16.msra.mxu0 %v2902_v25 }
 0x285   : > { %2652 = vmatprep.subr.bf16.mxu0 %v4001_v30 }
 0x288   : > { %2653 = vmatpush3.bf16.msra.mxu0 %v2903_v3 }
 0x28b   : > { %2655 = vmatmul.mubr.bf16.vlgmr.msra.gmra.mrb[12].mxu0 %v2045_v11 }
 0x316   : > { %v2515_v45 = vpop.f32.mrb[0].mxu1 }
 0x317   : > { %v2516_v50 = vpop.f32.mrb[1].mxu1 }
 0x318   : > { %v2517_v46 = vadd.f32 %v2516_v50, %v2515_v45  ;;  %v2518_v33 = vpop.f32.mrb[2].mxu1 }
 0x319   : > { %v2519_v56 = vpop.f32.mrb[3].mxu1 }
 0x31a   : > { %v2520_v61 = vadd.f32 %v2519_v56, %v2518_v33 }
 0x31e   : > { %v2537_v16 = vpop.f32.mrb[4].mxu0 }
 0x31f   : > { %v2538_v42 = vpop.f32.mrb[5].mxu0 }
 0x320   : > { %v2539_v14 = vadd.f32 %v2538_v42, %v2537_v16  ;;  %v2540_v21 = vpop.f32.mrb[6].mxu0 }
 0x321   : > { %v2541_v43 = vpop.f32.mrb[7].mxu0 }
 0x322   : > { %v1099_v54 = vadd.f32 %v2539_v14, %v2517_v46  ;;  %v2542_v48 = vadd.f32 %v2541_v43, %v2540_v21 }
 0x324   : > { %v1102_v62 = vadd.f32 %v2542_v48, %v2520_v61 }
 0x336   : > { %v2559_v40 = vpop.f32.mrb[4].mxu1 }
 0x337   : > { %v2560_v15 = vpop.f32.mrb[5].mxu1 }
 0x338   : > { %v2561_v22 = vadd.f32 %v2560_v15, %v2559_v40  ;;  %v2562_v36 = vpop.f32.mrb[6].mxu1 }
 0x339   : > { %v2563_v59 = vpop.f32.mrb[7].mxu1 }
 0x33a   : > { %v1410_v41 = vadd.f32 %v2561_v22, %v1099_v54  ;;  %v2564_v19 = vadd.f32 %v2563_v59, %v2562_v36 }
 0x33c   : > { %v1411_v58 = vadd.f32 %v2564_v19, %v1102_v62 }
 0x33e   : > { %v2581_v4 = vpop.f32.mrb[8].mxu0 }
 0x33f   : > { %v2582_v23 = vpop.f32.mrb[9].mxu0 }
 0x340   : > { %v2583_v57 = vadd.f32 %v2582_v23, %v2581_v4  ;;  %v2584_v51 = vpop.f32.mrb[10].mxu0 }
 0x341   : > { %v2585_v53 = vpop.f32.mrb[11].mxu0 }
 0x342   : > { %v1717_v31 = vadd.f32 %v2583_v57, %v1410_v41  ;;  %v2586_v13 = vadd.f32 %v2585_v53, %v2584_v51 }
 0x344   : > { %v1718_v34 = vadd.f32 %v2586_v13, %v1411_v58 }
 0x356   : > { %v2603_v12 = vpop.f32.mrb[8].mxu1 }
 0x357   : > { %v2604_v30 = vpop.f32.mrb[9].mxu1 }
 0x358   : > { %v2605_v18 = vadd.f32 %v2604_v30, %v2603_v12  ;;  %v2606_v55 = vpop.f32.mrb[10].mxu1 }
 0x359   : > { %v2607_v49 = vpop.f32.mrb[11].mxu1 }
 0x35a   : > { %v2608_v39 = vadd.f32 %v2607_v49, %v2606_v55  ;;  %v2024_v32 = vadd.f32 %v2605_v18, %v1717_v31 }
 0x35c   : > { %v2025_v24 = vadd.f32 %v2608_v39, %v1718_v34 }
 0x35e   : > { %v2144_v44 = vpop.f32.mrb[12].mxu0 }
 0x35f   : > { %v2151_v9 = vadd.f32 %v2144_v44, %v2024_v32  ;;  %v2656_v47 = vpop.f32.mrb[13].mxu0 }
 0x360   : > { %v2147_v5 = vpop.f32.mrb[14].mxu0 }
 0x361   : > { %v2160_v35 = vadd.f32 %v2471_v52, %v2151_v9  ;;  %v2152_v60 = vadd.f32 %v2147_v5, %v2025_v24  ;;  %v2657_v37 = vpop.f32.mrb[15].mxu0 }
 0x363   : > { %v2161_v29 = vadd.f32 %v2471_v52, %v2152_v60  ;;  %v2162_v27 = vmax.f32 %v2160_v35, 0.0 }
 0x365   : > { %v2163_v17 = vmax.f32 %v2161_v29, 0.0 }
 0x367   : > { %v2488_v0 = vpack.c.bf16 %v2163_v17, %v2162_v27 }
 0x369   : > { %2489 = vst [vmem:[%s338_s18] sm:$0xff] %v2488_v0  }
 0x36a   : > { %3088 = shalt.err (!%p3085_p8)
}
 0x36b   : > { %s3089_s15 = scalar_lea.hbm %s3916_s11, 128  ;;  %s3093_s25 = scalar_lea.hbm %s3970_s6, 256 }
 0x36c   : > { %p3090_p6 = scmp.ne.s32.totalorder %s3916_s11, %s3089_s15  ;;  %p3094_p3 = scmp.lt.u32.totalorder %s3916_s11, %s3970_s6 }
 0x36d   : > { %p3095_p5 = scmp.lt.u32.totalorder %s3093_s25, %s3089_s15  ;;  %p3097_p7 = scmp.lt.u32.totalorder %s3089_s15, %s3916_s11 }
 0x36e   : > { %p3091_p10 = pnand %p3090_p6, %p4002_p4 }
 0x36f   : > { %p3096_p9 = por %p3095_p5, %p3094_p3 }
 0x370   : > { %p3092_p11 = pneg %p3091_p10 }
 0x371   : > { %p3098_p12 = por %p3097_p7, %p3096_p9 }
 0x373   : > { %p3099_p1 = pnand %p3098_p12, %p3092_p11 }
 0x375   : > { %3102 = shalt.err (!%p3099_p1)
}
 0x376   : > { %s3170_s8 = smov 4  }
 0x377   : > { %2680 = dma.vmem_to_hbm [thread:$0]  (%p4002_p4), %s3918_s9, 128, %s3916_s11, %s2175_s12, %s3167_s19, %s3167_s19, %s3170_s8  }
 0x378 PF: > { %s2203_s30 = sand.u32 1, %s3141_s21   ;;  %p4003_p13 = scmp.ne.s32.totalorder %s3982_s10, 0 }
 0x379   : > { %p4004_p0 = scmp.ge.s32.totalorder %s3153_s24, 2  ;;  %s2204_s27 = scalar_lea.sflag [#allocation5], %s2203_s30 }
 0x37b   : > { %p2703_p2 = pnand %p4004_p0, %p4003_p13 }
 0x37d   : > { %3136 = dma.done.wait (!%p2703_p2), %s2204_s27, 128  }
 0x37e   : > { %3138 = vsyncadd (!%p2703_p2), %s2204_s27, 4294967168  ;;  %p22_p8 = scmp.ge.s32.totalorder %s3374_s7, 4   ;;  %s4005_s21 = smov %s3145_s22 }
 0x37f   : > { %s4006_s22 = smov %s3149_s23  ;;  %s4007_s23 = smov %s3386_s17 }
 0x380   : > { %s4008_s24 = smov %s3374_s7  ;;  %24 = sbr.rel (!%p22_p8) target bundleno = 8 (0x8), region = 109 }
 0x387   :  { %2209 = vsyncpa [#allocation4], 1 }
 0x388   :  { %2211 = vsyncpa [#allocation4 + $0x1], 1 }
 0x389   :  { %2212 = vsyncpa [#allocation7], 1 }
 0x38a   :  { %2213 = vsyncpa [#allocation10], 1 }
 0x38b   :  { %2214 = vsyncpa [#allocation13], 1 }
 0x38c   :  { %2215 = vsyncpa [#allocation5], 1 }
 0x38d   :  { %2217 = vsyncpa [#allocation5 + $0x1], 1 }

</bundles_post_ra>
